<compile_context>
chip_gen: v7x
topology: tpu7x:2x2x1
jax: 0.10.0
libtpu: 0.0.40
codegen_flags: <defaults>
</compile_context>

<pallas_src>
import math
from functools import partial

import jax
import jax.numpy as jnp
from jax.experimental import pallas as pl
from jax.experimental.pallas import tpu as pltpu


def _attn_pool_kernel(x_ref, pos0_ref, posr_ref,
                      wq_ref, bq_ref, wk_ref, bk_ref, wv_ref, bv_ref,
                      wout_ref, bout_ref, o_ref, *, n_heads, n_tokens):
    """One batch tile: (bt, Np, C) token-major inputs -> (bt, Dout) pooled output."""
    f32 = jnp.float32
    bt, Np, C = x_ref.shape
    H = n_heads
    ch = C // H
    BN = bt * Np
    cdt = x_ref.dtype                      # MXU matmul input dtype (f32 or bf16)

    x = x_ref[...]                         # (bt, Np, C) cdt, token-major
    posr = posr_ref[...]                   # (Np, C) cdt
    pos0 = pos0_ref[...]                   # (1, C)  f32
    wq, wk, wv = wq_ref[...], wk_ref[...], wv_ref[...]       # (C, C) cdt (wq pre-scaled)
    wout = wout_ref[...]                   # (C, Dout) cdt
    bq, bk, bv = bq_ref[...], bk_ref[...], bv_ref[...]       # (1, C) f32 (bq pre-scaled)
    bout = bout_ref[...]                   # (1, Dout) f32

    # --- tiny constant helper matrices (VPU iota; built once per grid step) --
    # head selector: sel[c, h] = 1 iff channel c belongs to head h
    c_col = jax.lax.broadcasted_iota(jnp.int32, (C, H), 0)
    h_col = jax.lax.broadcasted_iota(jnp.int32, (C, H), 1)
    sel = ((c_col >= h_col * ch) & (c_col < (h_col + 1) * ch)).astype(f32)    # (C, H)
    c_row = jax.lax.broadcasted_iota(jnp.int32, (H, C), 1)
    h_row = jax.lax.broadcasted_iota(jnp.int32, (H, C), 0)
    sel_t = ((c_row >= h_row * ch) & (c_row < (h_row + 1) * ch)).astype(f32)  # (H, C)
    # block-diagonal ones: blk[b, b*Np + j] = 1.  Turns every per-batch
    # token-axis reduction into one deep MXU contraction (keeps the XLU out of
    # the vector-extended slots that vmatmul needs).
    b_row = jax.lax.broadcasted_iota(jnp.int32, (bt, BN), 0)
    t_col = jax.lax.broadcasted_iota(jnp.int32, (bt, BN), 1)
    blk = ((t_col >= b_row * Np) & (t_col < (b_row + 1) * Np)).astype(f32)    # (bt, BN)

    # --- mean token (token 0 of the CLIP sequence), batched over the tile ----
    x_raw = x.reshape(BN, C)                                  # free view (Np sublane-aligned)
    x0 = (jnp.dot(blk.astype(cdt), x_raw, preferred_element_type=f32)
          * (1.0 / n_tokens) + pos0)                          # (bt, C) f32

    # --- spatial tokens + positional embedding (single add in compute dtype) -
    x_rows = (x + posr[None, :, :]).reshape(BN, C)            # (BN, C) cdt

    # --- projections: big MXU matmuls, weights resident over the tile --------
    k_all = jnp.dot(x_rows, wk, preferred_element_type=f32) + bk      # (BN, C) f32
    v_all = jnp.dot(x_rows, wv, preferred_element_type=f32) + bv      # (BN, C) f32
    x0c = x0.astype(cdt)                                              # (bt, C)
    q0 = jnp.dot(x0c, wq, preferred_element_type=f32) + bq            # (bt, C) f32
    k0 = jnp.dot(x0c, wk, preferred_element_type=f32) + bk            # (bt, C)
    v0 = jnp.dot(x0c, wv, preferred_element_type=f32) + bv            # (bt, C)

    # --- attention scores (only query token 0 survives the PyTorch forward) --
    kq = (k_all.reshape(bt, Np, C) * q0[:, None, :]).reshape(BN, C)   # f32, VPU
    s_r = jnp.dot(kq, sel, preferred_element_type=f32)                # (BN, H)
    s_0 = jnp.dot(k0 * q0, sel, preferred_element_type=f32)           # (bt, H)

    s_3d = s_r.reshape(bt, Np, H)
    if n_tokens != Np:                      # mask zero-padded key tokens
        tok = jax.lax.broadcasted_iota(jnp.int32, (bt, Np, H), 1)
        s_3d = jnp.where(tok < n_tokens, s_3d, jnp.float32(-1e30))

    # --- numerically stable softmax over the T = N + 1 keys (f32) ------------
    m = jnp.maximum(jnp.max(s_3d, axis=1), s_0)               # (bt, H)
    e_0 = jnp.exp(s_0 - m)                                    # (bt, H)
    e_r = jnp.exp(s_3d - m[:, None, :]).reshape(BN, H)        # (BN, H)
    denom = e_0 + jnp.dot(blk, e_r, preferred_element_type=f32)       # (bt, H)
    inv = pl.reciprocal(denom, approx=False)                  # exact (review note)

    # --- weighted value sum; normalisation deferred to the (bt, C) block -----
    w_r = jnp.dot(e_r, sel_t, preferred_element_type=f32)     # (BN, C) per-channel weights
    acc = (jnp.dot(blk, w_r * v_all, preferred_element_type=f32)
           + jnp.dot(e_0, sel_t, preferred_element_type=f32) * v0)    # (bt, C)
    a0 = acc * jnp.dot(inv, sel_t, preferred_element_type=f32)        # (bt, C)

    # --- output projection + one dense (bt, Dout) store ----------------------
    out = jnp.dot(a0.astype(cdt), wout, preferred_element_type=f32) + bout
    o_ref[...] = out.astype(o_ref.dtype)


def attention_pool_2d(x, pos, wqkv, bqkv, wout, bout, n_heads, *,
                      batch_tile=None, compute_dtype=None,
                      single_buffer_invariants=True):
    """AttentionPool2d forward.

    x: (B, C, H, W); pos: (C, H*W + 1); wqkv: (3C, C); bqkv: (3C, 1);
    wout: (Dout, C); bout: (Dout, 1).  Returns (B, Dout) (== PyTorch output).

    batch_tile: batch elements per grid step (multiple of 8, or == B).  On
      v5e/v6e grow it (16-32) to amortise serial grid-step overhead; on v7x
      keep the grid length >= 2 (and even) so both TensorCores get work.
    compute_dtype: dtype of the MXU matmul inputs (e.g. jnp.bfloat16 on
      v6e/v7x).  Mean / softmax / all accumulation stay f32.
    """
    B, C, Hs, Ws = x.shape
    N = Hs * Ws
    Dout = wout.shape[0]
    assert C % n_heads == 0
    ch = C // n_heads
    f32 = jnp.float32
    cdt = jnp.dtype(compute_dtype) if compute_dtype is not None else jnp.dtype(x.dtype)
    csz = cdt.itemsize

    if batch_tile is None:
        batch_tile = 8 if B % 8 == 0 else B
    bt = batch_tile
    assert B % bt == 0, "batch_tile must divide the batch size"
    assert bt == B or bt % 8 == 0, "batch_tile must be a multiple of 8 (or == B)"

    # Pad the token axis so the in-kernel (bt*Np, C) views stay sublane-aligned
    # for the compute dtype; padded tokens are zero in x and masked before
    # softmax in the kernel.
    mult = max(8, 32 // csz)
    Np = ((N + mult - 1) // mult) * mult

    # ---- one-time parameter prep (weights only; no extra pass over x) -------
    scale2 = 1.0 / math.sqrt(ch)             # two-sided 1/ch**0.25 folded into Q
    wq_t = (wqkv[0 * C:1 * C] * scale2).T.astype(cdt)        # (C, C)
    wk_t = wqkv[1 * C:2 * C].T.astype(cdt)
    wv_t = wqkv[2 * C:3 * C].T.astype(cdt)
    wout_t = wout.T.astype(cdt)                              # (C, Dout)
    bq = (bqkv[0 * C:1 * C] * scale2).reshape(1, C).astype(f32)
    bk = bqkv[1 * C:2 * C].reshape(1, C).astype(f32)
    bv = bqkv[2 * C:3 * C].reshape(1, C).astype(f32)
    bo = bout.reshape(1, Dout).astype(f32)
    pos0 = pos[:, 0:1].T.astype(f32)                         # (1, C)
    posr = pos[:, 1:].T                                      # (N, C)
    if Np != N:
        posr = jnp.pad(posr, ((0, Np - N), (0, 0)))
    posr = posr.astype(cdt)

    # ---- x: token-major (B, Np, C) in the compute dtype ---------------------
    # The transpose happens once here (fused by XLA into the producer); the
    # kernel never transposes or concatenates.
    xf = jnp.transpose(x.reshape(B, C, N), (0, 2, 1))
    if Np != N:
        xf = jnp.pad(xf, ((0, 0), (0, Np - N), (0, 0)))
    xf = xf.astype(cdt)

    # ---- explicit VMEM budget (review: the NOTE alone does nothing) ---------
    inv_bytes = ((3 * C * C + C * Dout) * csz      # wq / wk / wv / wout
                 + (3 * C + Dout) * 4              # biases (f32)
                 + Np * C * csz + C * 4)           # posr, pos0
    est = (2 * inv_bytes                           # conservative: double buffered
           + 2 * bt * Np * C * csz                 # x tile (double buffered)
           + 2 * bt * Dout * 4                     # output tile
           + 6 * bt * Np * C * 4                   # f32 intermediates (k/v/kq/w/...)
           + (8 << 20))                            # scratch / spill headroom
    try:
        cap = pltpu.get_tpu_info().vmem_capacity_bytes
    except Exception:
        cap = 64 << 20                             # v7x per-core capacity (safe floor)
    vmem_limit = int(min(max(est, 32 << 20), cap - (4 << 20), 100 << 20))

    kernel = partial(_attn_pool_kernel, n_heads=n_heads, n_tokens=N)
    args = (xf, pos0, posr, wq_t, bq, wk_t, bk, wv_t, bv, wout_t, bo)

    def build(single_buffer):
        def inv_spec(shape):
            zeros = (0,) * len(shape)
            index_map = lambda g: zeros
            if single_buffer:
                # Grid-invariant operand: a single resident copy instead of the
                # default double buffer (halves resident-weight VMEM on v7x).
                return pl.BlockSpec(shape, index_map, pipeline_mode=pl.Buffered(1))
            return pl.BlockSpec(shape, index_map)

        return pl.pallas_call(
            kernel,
            out_shape=jax.ShapeDtypeStruct((B, Dout), x.dtype),
            grid_spec=pltpu.PrefetchScalarGridSpec(
                num_scalar_prefetch=0,
                grid=(B // bt,),
                in_specs=[
                    pl.BlockSpec((bt, Np, C), lambda g: (g, 0, 0)),   # x batch tile
                    inv_spec((1, C)),                                  # pos, mean token
                    inv_spec((Np, C)),                                 # pos, spatial tokens
                    inv_spec((C, C)), inv_spec((1, C)),                # Wq^T, bq (scaled)
                    inv_spec((C, C)), inv_spec((1, C)),                # Wk^T, bk
                    inv_spec((C, C)), inv_spec((1, C)),                # Wv^T, bv
                    inv_spec((C, Dout)), inv_spec((1, Dout)),          # Wout^T, bout
                ],
                out_specs=pl.BlockSpec((bt, Dout), lambda g: (g, 0)),
            ),
            compiler_params=pltpu.CompilerParams(
                dimension_semantics=("parallel",),
                vmem_limit_bytes=vmem_limit),
        )

    if single_buffer_invariants:
        try:
            return build(True)(*args)
        except Exception:
            # pipeline_mode=pl.Buffered(1) unsupported by this JAX/Mosaic build:
            # fall back to default (double-buffered) invariant operands.
            pass
    return build(False)(*args)


def _reference(x, pos, wqkv, bqkv, wout, bout, n_heads):
    """Pure-JAX mirror of the PyTorch forward for verification."""
    b, c, Hs, Ws = x.shape
    xf = x.reshape(b, c, -1)
    xt = jnp.concatenate([xf.mean(-1, keepdims=True), xf], axis=-1) + pos[None]
    qkv = jnp.einsum('oc,bct->bot', wqkv, xt) + bqkv[None]
    q, k, v = jnp.split(qkv, 3, axis=1)
    ch = c // n_heads
    r = lambda t: t.reshape(b * n_heads, ch, -1)
    scale = 1.0 / math.sqrt(math.sqrt(ch))
    w = jnp.einsum('bct,bcs->bts', r(q) * scale, r(k) * scale)
    w = jax.nn.softmax(w, axis=-1)
    a = jnp.einsum('bts,bcs->bct', w, r(v)).reshape(b, c, -1)
    out = jnp.einsum('oc,bct->bot', wout, a) + bout[None]
    return out[:, :, 0]


if __name__ == "__main__":
    # Module config: spacial_dim=8, embed_dim=32, num_heads_channels=8, output_dim=16
    B, C, Hs, Ws = 16, 32, 8, 8
    num_heads_channels = 8
    n_heads = C // num_heads_channels          # 4
    Dout = 16
    T = Hs * Ws + 1

    key = jax.random.PRNGKey(0)
    ks = jax.random.split(key, 6)
    x = jax.random.normal(ks[0], (B, C, Hs, Ws), jnp.float32)
    # positional_embedding = randn(embed_dim, spacial_dim**2 + 1) / embed_dim**0.5
    pos = jax.random.normal(ks[1], (C, T), jnp.float32) / (C ** 0.5)
    # conv_nd(1, C, 3C, 1): weight (3C, C, 1) stored as (3C, C); bias (3C,) as (3C, 1)
    wqkv = jax.random.normal(ks[2], (3 * C, C), jnp.float32) * (1.0 / math.sqrt(C))
    bqkv = jax.random.normal(ks[3], (3 * C, 1), jnp.float32) * 0.01
    wout = jax.random.normal(ks[4], (Dout, C), jnp.float32) * (1.0 / math.sqrt(C))
    bout = jax.random.normal(ks[5], (Dout, 1), jnp.float32) * 0.01

    ref = _reference(x, pos, wqkv, bqkv, wout, bout, n_heads)

    # f32 path; batch_tile=8 -> grid of 2 parallel steps (fills both v7x TCs).
    out_f32 = jax.block_until_ready(
        attention_pool_2d(x, pos, wqkv, bqkv, wout, bout, n_heads, batch_tile=8))
    assert out_f32.shape == (B, Dout), out_f32.shape
    err32 = float(jnp.max(jnp.abs(out_f32 - ref)))
    assert jnp.allclose(out_f32, ref, atol=5e-3, rtol=5e-3), f"f32 max_err={err32}"

    # bf16 matmul-input path (v6e/v7x); mean/softmax/accumulation stay f32.
    out_bf16 = jax.block_until_ready(
        attention_pool_2d(x, pos, wqkv, bqkv, wout, bout, n_heads,
                          batch_tile=8, compute_dtype=jnp.bfloat16))
    errbf = float(jnp.max(jnp.abs(out_bf16 - ref)))
    assert jnp.allclose(out_bf16, ref, atol=1e-1, rtol=1e-1), f"bf16 max_err={errbf}"

    # Non-multiple-of-8 token count (7x7 spatial) exercises the pad + mask path.
    B2, Hs2, Ws2 = 8, 7, 7
    T2 = Hs2 * Ws2 + 1
    ks2 = jax.random.split(jax.random.PRNGKey(1), 2)
    x2 = jax.random.normal(ks2[0], (B2, C, Hs2, Ws2), jnp.float32)
    pos2 = jax.random.normal(ks2[1], (C, T2), jnp.float32) / (C ** 0.5)
    ref2 = _reference(x2, pos2, wqkv, bqkv, wout, bout, n_heads)
    out2 = jax.block_until_ready(
        attention_pool_2d(x2, pos2, wqkv, bqkv, wout, bout, n_heads))
    err2 = float(jnp.max(jnp.abs(out2 - ref2)))
    assert jnp.allclose(out2, ref2, atol=5e-3, rtol=5e-3), f"padded max_err={err2}"

    print("KERNEL_OK")
</pallas_src>

<mosaic_0001>
module attributes {stable_mosaic.version = 11 : i64} {
  func.func @_attn_pool_kernel(%arg0: i32, %arg1: memref<8x64x32xf32, #tpu.memory_space<vmem>>, %arg2: memref<1x32xf32, #tpu.memory_space<vmem>>, %arg3: memref<64x32xf32, #tpu.memory_space<vmem>>, %arg4: memref<32x32xf32, #tpu.memory_space<vmem>>, %arg5: memref<1x32xf32, #tpu.memory_space<vmem>>, %arg6: memref<32x32xf32, #tpu.memory_space<vmem>>, %arg7: memref<1x32xf32, #tpu.memory_space<vmem>>, %arg8: memref<32x32xf32, #tpu.memory_space<vmem>>, %arg9: memref<1x32xf32, #tpu.memory_space<vmem>>, %arg10: memref<32x16xf32, #tpu.memory_space<vmem>>, %arg11: memref<1x16xf32, #tpu.memory_space<vmem>>, %arg12: memref<8x16xf32, #tpu.memory_space<vmem>>) attributes {dimension_semantics = [#tpu.dimension_semantics<parallel>], iteration_bounds = array<i64: 2>, scalar_prefetch = 0 : i64, scratch_operands = 0 : i64, tpu.core_type = #tpu.core_type<tc>, window_params = [{transform_indices = @transform_0, window_bounds = array<i64: 8, 64, 32>}, {pipeline_mode = #tpu.pipeline_mode<synchronous>, transform_indices = @transform_1, window_bounds = array<i64: 1, 32>}, {pipeline_mode = #tpu.pipeline_mode<synchronous>, transform_indices = @transform_2, window_bounds = array<i64: 64, 32>}, {pipeline_mode = #tpu.pipeline_mode<synchronous>, transform_indices = @transform_3, window_bounds = array<i64: 32, 32>}, {pipeline_mode = #tpu.pipeline_mode<synchronous>, transform_indices = @transform_4, window_bounds = array<i64: 1, 32>}, {pipeline_mode = #tpu.pipeline_mode<synchronous>, transform_indices = @transform_5, window_bounds = array<i64: 32, 32>}, {pipeline_mode = #tpu.pipeline_mode<synchronous>, transform_indices = @transform_6, window_bounds = array<i64: 1, 32>}, {pipeline_mode = #tpu.pipeline_mode<synchronous>, transform_indices = @transform_7, window_bounds = array<i64: 32, 32>}, {pipeline_mode = #tpu.pipeline_mode<synchronous>, transform_indices = @transform_8, window_bounds = array<i64: 1, 32>}, {pipeline_mode = #tpu.pipeline_mode<synchronous>, transform_indices = @transform_9, window_bounds = array<i64: 32, 16>}, {pipeline_mode = #tpu.pipeline_mode<synchronous>, transform_indices = @transform_10, window_bounds = array<i64: 1, 16>}, {transform_indices = @transform_11, window_bounds = array<i64: 8, 16>}]} {
    %c0 = arith.constant 0 : index
    %c0_0 = arith.constant 0 : index
    %c0_1 = arith.constant 0 : index
    %0 = vector.load %arg1[%c0, %c0_0, %c0_1] : memref<8x64x32xf32, #tpu.memory_space<vmem>>, vector<8x64x32xf32>
    %c0_2 = arith.constant 0 : index
    %c0_3 = arith.constant 0 : index
    %1 = vector.load %arg3[%c0_2, %c0_3] : memref<64x32xf32, #tpu.memory_space<vmem>>, vector<64x32xf32>
    %c0_4 = arith.constant 0 : index
    %c0_5 = arith.constant 0 : index
    %2 = vector.load %arg2[%c0_4, %c0_5] : memref<1x32xf32, #tpu.memory_space<vmem>>, vector<1x32xf32>
    %c0_6 = arith.constant 0 : index
    %c0_7 = arith.constant 0 : index
    %3 = vector.load %arg4[%c0_6, %c0_7] : memref<32x32xf32, #tpu.memory_space<vmem>>, vector<32x32xf32>
    %c0_8 = arith.constant 0 : index
    %c0_9 = arith.constant 0 : index
    %4 = vector.load %arg6[%c0_8, %c0_9] : memref<32x32xf32, #tpu.memory_space<vmem>>, vector<32x32xf32>
    %c0_10 = arith.constant 0 : index
    %c0_11 = arith.constant 0 : index
    %5 = vector.load %arg8[%c0_10, %c0_11] : memref<32x32xf32, #tpu.memory_space<vmem>>, vector<32x32xf32>
    %c0_12 = arith.constant 0 : index
    %c0_13 = arith.constant 0 : index
    %6 = vector.load %arg10[%c0_12, %c0_13] : memref<32x16xf32, #tpu.memory_space<vmem>>, vector<32x16xf32>
    %c0_14 = arith.constant 0 : index
    %c0_15 = arith.constant 0 : index
    %7 = vector.load %arg5[%c0_14, %c0_15] : memref<1x32xf32, #tpu.memory_space<vmem>>, vector<1x32xf32>
    %c0_16 = arith.constant 0 : index
    %c0_17 = arith.constant 0 : index
    %8 = vector.load %arg7[%c0_16, %c0_17] : memref<1x32xf32, #tpu.memory_space<vmem>>, vector<1x32xf32>
    %c0_18 = arith.constant 0 : index
    %c0_19 = arith.constant 0 : index
    %9 = vector.load %arg9[%c0_18, %c0_19] : memref<1x32xf32, #tpu.memory_space<vmem>>, vector<1x32xf32>
    %c0_20 = arith.constant 0 : index
    %c0_21 = arith.constant 0 : index
    %10 = vector.load %arg11[%c0_20, %c0_21] : memref<1x16xf32, #tpu.memory_space<vmem>>, vector<1x16xf32>
    %11 = tpu.iota {dimensions = array<i32: 0>} : vector<32x4xi32>
    %12 = tpu.iota {dimensions = array<i32: 1>} : vector<32x4xi32>
    %c8_i32 = arith.constant 8 : i32
    %13 = vector.broadcast %c8_i32 : i32 to vector<32x4xi32>
    %14 = arith.muli %12, %13 : vector<32x4xi32>
    %15 = arith.cmpi sge, %11, %14 : vector<32x4xi32>
    %c1_i32 = arith.constant 1 : i32
    %16 = vector.broadcast %c1_i32 : i32 to vector<32x4xi32>
    %17 = arith.addi %12, %16 : vector<32x4xi32>
    %c8_i32_22 = arith.constant 8 : i32
    %18 = vector.broadcast %c8_i32_22 : i32 to vector<32x4xi32>
    %19 = arith.muli %17, %18 : vector<32x4xi32>
    %20 = arith.cmpi slt, %11, %19 : vector<32x4xi32>
    %21 = arith.andi %15, %20 : vector<32x4xi1>
    %22 = arith.extui %21 : vector<32x4xi1> to vector<32x4xi32>
    %23 = arith.sitofp %22 : vector<32x4xi32> to vector<32x4xf32>
    %24 = tpu.iota {dimensions = array<i32: 1>} : vector<4x32xi32>
    %25 = tpu.iota {dimensions = array<i32: 0>} : vector<4x32xi32>
    %c8_i32_23 = arith.constant 8 : i32
    %26 = vector.broadcast %c8_i32_23 : i32 to vector<4x32xi32>
    %27 = arith.muli %25, %26 : vector<4x32xi32>
    %28 = arith.cmpi sge, %24, %27 : vector<4x32xi32>
    %c1_i32_24 = arith.constant 1 : i32
    %29 = vector.broadcast %c1_i32_24 : i32 to vector<4x32xi32>
    %30 = arith.addi %25, %29 : vector<4x32xi32>
    %c8_i32_25 = arith.constant 8 : i32
    %31 = vector.broadcast %c8_i32_25 : i32 to vector<4x32xi32>
    %32 = arith.muli %30, %31 : vector<4x32xi32>
    %33 = arith.cmpi slt, %24, %32 : vector<4x32xi32>
    %34 = arith.andi %28, %33 : vector<4x32xi1>
    %35 = arith.extui %34 : vector<4x32xi1> to vector<4x32xi32>
    %36 = arith.sitofp %35 : vector<4x32xi32> to vector<4x32xf32>
    %37 = tpu.iota {dimensions = array<i32: 0>} : vector<8x512xi32>
    %38 = tpu.iota {dimensions = array<i32: 1>} : vector<8x512xi32>
    %c64_i32 = arith.constant 64 : i32
    %39 = vector.broadcast %c64_i32 : i32 to vector<8x512xi32>
    %40 = arith.muli %37, %39 : vector<8x512xi32>
    %41 = arith.cmpi sge, %38, %40 : vector<8x512xi32>
    %c1_i32_26 = arith.constant 1 : i32
    %42 = vector.broadcast %c1_i32_26 : i32 to vector<8x512xi32>
    %43 = arith.addi %37, %42 : vector<8x512xi32>
    %c64_i32_27 = arith.constant 64 : i32
    %44 = vector.broadcast %c64_i32_27 : i32 to vector<8x512xi32>
    %45 = arith.muli %43, %44 : vector<8x512xi32>
    %46 = arith.cmpi slt, %38, %45 : vector<8x512xi32>
    %47 = arith.andi %41, %46 : vector<8x512xi1>
    %48 = arith.extui %47 : vector<8x512xi1> to vector<8x512xi32>
    %49 = arith.sitofp %48 : vector<8x512xi32> to vector<8x512xf32>
    %50 = vector.shape_cast %0 : vector<8x64x32xf32> to vector<512x32xf32>
    %cst = arith.constant dense<0.000000e+00> : vector<8x32xf32>
    %51 = tpu.matmul %49, %50, %cst {dimension_numbers = #tpu.dot_dimension_numbers<[1], [0], [0], [1], [0, 0, 1, 1], [], []>} : vector<8x512xf32>, vector<512x32xf32>, vector<8x32xf32> -> vector<8x32xf32>
    %cst_28 = arith.constant 1.562500e-02 : f32
    %52 = vector.broadcast %cst_28 : f32 to vector<8x32xf32>
    %53 = arith.mulf %51, %52 : vector<8x32xf32>
    %54 = vector.broadcast %2 : vector<1x32xf32> to vector<8x32xf32>
    %55 = arith.addf %53, %54 : vector<8x32xf32>
    %56 = vector.shape_cast %1 : vector<64x32xf32> to vector<1x64x32xf32>
    %57 = vector.broadcast %56 : vector<1x64x32xf32> to vector<8x64x32xf32>
    %58 = arith.addf %0, %57 : vector<8x64x32xf32>
    %59 = vector.shape_cast %58 : vector<8x64x32xf32> to vector<512x32xf32>
    %cst_29 = arith.constant dense<0.000000e+00> : vector<512x32xf32>
    %60 = tpu.matmul %59, %4, %cst_29 {dimension_numbers = #tpu.dot_dimension_numbers<[1], [0], [0], [1], [0, 0, 1, 1], [], []>} : vector<512x32xf32>, vector<32x32xf32>, vector<512x32xf32> -> vector<512x32xf32>
    %61 = vector.broadcast %8 : vector<1x32xf32> to vector<512x32xf32>
    %62 = arith.addf %60, %61 : vector<512x32xf32>
    %cst_30 = arith.constant dense<0.000000e+00> : vector<512x32xf32>
    %63 = tpu.matmul %59, %5, %cst_30 {dimension_numbers = #tpu.dot_dimension_numbers<[1], [0], [0], [1], [0, 0, 1, 1], [], []>} : vector<512x32xf32>, vector<32x32xf32>, vector<512x32xf32> -> vector<512x32xf32>
    %64 = vector.broadcast %9 : vector<1x32xf32> to vector<512x32xf32>
    %65 = arith.addf %63, %64 : vector<512x32xf32>
    %cst_31 = arith.constant dense<0.000000e+00> : vector<8x32xf32>
    %66 = tpu.matmul %55, %3, %cst_31 {dimension_numbers = #tpu.dot_dimension_numbers<[1], [0], [0], [1], [0, 0, 1, 1], [], []>} : vector<8x32xf32>, vector<32x32xf32>, vector<8x32xf32> -> vector<8x32xf32>
    %67 = vector.broadcast %7 : vector<1x32xf32> to vector<8x32xf32>
    %68 = arith.addf %66, %67 : vector<8x32xf32>
    %cst_32 = arith.constant dense<0.000000e+00> : vector<8x32xf32>
    %69 = tpu.matmul %55, %4, %cst_32 {dimension_numbers = #tpu.dot_dimension_numbers<[1], [0], [0], [1], [0, 0, 1, 1], [], []>} : vector<8x32xf32>, vector<32x32xf32>, vector<8x32xf32> -> vector<8x32xf32>
    %70 = vector.broadcast %8 : vector<1x32xf32> to vector<8x32xf32>
    %71 = arith.addf %69, %70 : vector<8x32xf32>
    %cst_33 = arith.constant dense<0.000000e+00> : vector<8x32xf32>
    %72 = tpu.matmul %55, %5, %cst_33 {dimension_numbers = #tpu.dot_dimension_numbers<[1], [0], [0], [1], [0, 0, 1, 1], [], []>} : vector<8x32xf32>, vector<32x32xf32>, vector<8x32xf32> -> vector<8x32xf32>
    %73 = vector.broadcast %9 : vector<1x32xf32> to vector<8x32xf32>
    %74 = arith.addf %72, %73 : vector<8x32xf32>
    %75 = vector.shape_cast %62 : vector<512x32xf32> to vector<8x64x32xf32>
    %76 = vector.shape_cast %68 : vector<8x32xf32> to vector<8x1x32xf32>
    %77 = vector.broadcast %76 : vector<8x1x32xf32> to vector<8x64x32xf32>
    %78 = arith.mulf %75, %77 : vector<8x64x32xf32>
    %79 = vector.shape_cast %78 : vector<8x64x32xf32> to vector<512x32xf32>
    %cst_34 = arith.constant dense<0.000000e+00> : vector<512x4xf32>
    %80 = tpu.matmul %79, %23, %cst_34 {dimension_numbers = #tpu.dot_dimension_numbers<[1], [0], [0], [1], [0, 0, 1, 1], [], []>} : vector<512x32xf32>, vector<32x4xf32>, vector<512x4xf32> -> vector<512x4xf32>
    %81 = arith.mulf %71, %68 : vector<8x32xf32>
    %cst_35 = arith.constant dense<0.000000e+00> : vector<8x4xf32>
    %82 = tpu.matmul %81, %23, %cst_35 {dimension_numbers = #tpu.dot_dimension_numbers<[1], [0], [0], [1], [0, 0, 1, 1], [], []>} : vector<8x32xf32>, vector<32x4xf32>, vector<8x4xf32> -> vector<8x4xf32>
    %83 = vector.shape_cast %80 : vector<512x4xf32> to vector<8x64x4xf32>
    %cst_36 = arith.constant dense<0xFF800000> : vector<8x4xf32>
    %84 = vector.multi_reduction <maximumf>, %83, %cst_36 [1] : vector<8x64x4xf32> to vector<8x4xf32>
    %85 = arith.maximumf %84, %82 : vector<8x4xf32>
    %86 = arith.subf %82, %85 : vector<8x4xf32>
    %87 = math.exp %86 : vector<8x4xf32>
    %88 = vector.shape_cast %85 : vector<8x4xf32> to vector<8x1x4xf32>
    %89 = vector.broadcast %88 : vector<8x1x4xf32> to vector<8x64x4xf32>
    %90 = arith.subf %83, %89 : vector<8x64x4xf32>
    %91 = math.exp %90 : vector<8x64x4xf32>
    %92 = vector.shape_cast %91 : vector<8x64x4xf32> to vector<512x4xf32>
    %cst_37 = arith.constant dense<0.000000e+00> : vector<8x4xf32>
    %93 = tpu.matmul %49, %92, %cst_37 {dimension_numbers = #tpu.dot_dimension_numbers<[1], [0], [0], [1], [0, 0, 1, 1], [], []>} : vector<8x512xf32>, vector<512x4xf32>, vector<8x4xf32> -> vector<8x4xf32>
    %94 = arith.addf %87, %93 : vector<8x4xf32>
    %95 = tpu.reciprocal %94 : vector<8x4xf32> -> vector<8x4xf32>
    %cst_38 = arith.constant dense<0.000000e+00> : vector<512x32xf32>
    %96 = tpu.matmul %92, %36, %cst_38 {dimension_numbers = #tpu.dot_dimension_numbers<[1], [0], [0], [1], [0, 0, 1, 1], [], []>} : vector<512x4xf32>, vector<4x32xf32>, vector<512x32xf32> -> vector<512x32xf32>
    %97 = arith.mulf %96, %65 : vector<512x32xf32>
    %cst_39 = arith.constant dense<0.000000e+00> : vector<8x32xf32>
    %98 = tpu.matmul %49, %97, %cst_39 {dimension_numbers = #tpu.dot_dimension_numbers<[1], [0], [0], [1], [0, 0, 1, 1], [], []>} : vector<8x512xf32>, vector<512x32xf32>, vector<8x32xf32> -> vector<8x32xf32>
    %cst_40 = arith.constant dense<0.000000e+00> : vector<8x32xf32>
    %99 = tpu.matmul %87, %36, %cst_40 {dimension_numbers = #tpu.dot_dimension_numbers<[1], [0], [0], [1], [0, 0, 1, 1], [], []>} : vector<8x4xf32>, vector<4x32xf32>, vector<8x32xf32> -> vector<8x32xf32>
    %100 = arith.mulf %99, %74 : vector<8x32xf32>
    %101 = arith.addf %98, %100 : vector<8x32xf32>
    %cst_41 = arith.constant dense<0.000000e+00> : vector<8x32xf32>
    %102 = tpu.matmul %95, %36, %cst_41 {dimension_numbers = #tpu.dot_dimension_numbers<[1], [0], [0], [1], [0, 0, 1, 1], [], []>} : vector<8x4xf32>, vector<4x32xf32>, vector<8x32xf32> -> vector<8x32xf32>
    %103 = arith.mulf %101, %102 : vector<8x32xf32>
    %cst_42 = arith.constant dense<0.000000e+00> : vector<8x16xf32>
    %104 = tpu.matmul %103, %6, %cst_42 {dimension_numbers = #tpu.dot_dimension_numbers<[1], [0], [0], [1], [0, 0, 1, 1], [], []>} : vector<8x32xf32>, vector<32x16xf32>, vector<8x16xf32> -> vector<8x16xf32>
    %105 = vector.broadcast %10 : vector<1x16xf32> to vector<8x16xf32>
    %106 = arith.addf %104, %105 : vector<8x16xf32>
    %c0_43 = arith.constant 0 : index
    %c0_44 = arith.constant 0 : index
    %107 = vector.load %arg12[%c0_43, %c0_44] : memref<8x16xf32, #tpu.memory_space<vmem>>, vector<8x16xf32>
    tpu.vector_store %arg12[%c0_43, %c0_44], %106 {strides = array<i32>} : memref<8x16xf32, #tpu.memory_space<vmem>>, vector<8x16xf32>,
    return
  }
  func.func @transform_0(%arg0: i32) -> (i32, i32, i32) {
    %c0_i32 = arith.constant 0 : i32
    %c0_i32_0 = arith.constant 0 : i32
    %c0_i32_1 = arith.constant 0 : i32
    return %arg0, %c0_i32, %c0_i32_0 : i32, i32, i32
  }
  func.func @transform_1(%arg0: i32) -> (i32, i32) {
    %c0_i32 = arith.constant 0 : i32
    %c0_i32_0 = arith.constant 0 : i32
    %c0_i32_1 = arith.constant 0 : i32
    return %c0_i32, %c0_i32_0 : i32, i32
  }
  func.func @transform_2(%arg0: i32) -> (i32, i32) {
    %c0_i32 = arith.constant 0 : i32
    %c0_i32_0 = arith.constant 0 : i32
    %c0_i32_1 = arith.constant 0 : i32
    return %c0_i32, %c0_i32_0 : i32, i32
  }
  func.func @transform_3(%arg0: i32) -> (i32, i32) {
    %c0_i32 = arith.constant 0 : i32
    %c0_i32_0 = arith.constant 0 : i32
    %c0_i32_1 = arith.constant 0 : i32
    return %c0_i32, %c0_i32_0 : i32, i32
  }
  func.func @transform_4(%arg0: i32) -> (i32, i32) {
    %c0_i32 = arith.constant 0 : i32
    %c0_i32_0 = arith.constant 0 : i32
    %c0_i32_1 = arith.constant 0 : i32
    return %c0_i32, %c0_i32_0 : i32, i32
  }
  func.func @transform_5(%arg0: i32) -> (i32, i32) {
    %c0_i32 = arith.constant 0 : i32
    %c0_i32_0 = arith.constant 0 : i32
    %c0_i32_1 = arith.constant 0 : i32
    return %c0_i32, %c0_i32_0 : i32, i32
  }
  func.func @transform_6(%arg0: i32) -> (i32, i32) {
    %c0_i32 = arith.constant 0 : i32
    %c0_i32_0 = arith.constant 0 : i32
    %c0_i32_1 = arith.constant 0 : i32
    return %c0_i32, %c0_i32_0 : i32, i32
  }
  func.func @transform_7(%arg0: i32) -> (i32, i32) {
    %c0_i32 = arith.constant 0 : i32
    %c0_i32_0 = arith.constant 0 : i32
    %c0_i32_1 = arith.constant 0 : i32
    return %c0_i32, %c0_i32_0 : i32, i32
  }
  func.func @transform_8(%arg0: i32) -> (i32, i32) {
    %c0_i32 = arith.constant 0 : i32
    %c0_i32_0 = arith.constant 0 : i32
    %c0_i32_1 = arith.constant 0 : i32
    return %c0_i32, %c0_i32_0 : i32, i32
  }
  func.func @transform_9(%arg0: i32) -> (i32, i32) {
    %c0_i32 = arith.constant 0 : i32
    %c0_i32_0 = arith.constant 0 : i32
    %c0_i32_1 = arith.constant 0 : i32
    return %c0_i32, %c0_i32_0 : i32, i32
  }
  func.func @transform_10(%arg0: i32) -> (i32, i32) {
    %c0_i32 = arith.constant 0 : i32
    %c0_i32_0 = arith.constant 0 : i32
    %c0_i32_1 = arith.constant 0 : i32
    return %c0_i32, %c0_i32_0 : i32, i32
  }
  func.func @transform_11(%arg0: i32) -> (i32, i32) {
    %c0_i32 = arith.constant 0 : i32
    %c0_i32_0 = arith.constant 0 : i32
    return %arg0, %c0_i32 : i32, i32
  }
}

module attributes {stable_mosaic.version = 11 : i64} {
  func.func @_attn_pool_kernel(%arg0: i32, %arg1: memref<8x64x32xf32, #tpu.memory_space<vmem>>, %arg2: memref<1x32xf32, #tpu.memory_space<vmem>>, %arg3: memref<64x32xf32, #tpu.memory_space<vmem>>, %arg4: memref<32x32xf32, #tpu.memory_space<vmem>>, %arg5: memref<1x32xf32, #tpu.memory_space<vmem>>, %arg6: memref<32x32xf32, #tpu.memory_space<vmem>>, %arg7: memref<1x32xf32, #tpu.memory_space<vmem>>, %arg8: memref<32x32xf32, #tpu.memory_space<vmem>>, %arg9: memref<1x32xf32, #tpu.memory_space<vmem>>, %arg10: memref<32x16xf32, #tpu.memory_space<vmem>>, %arg11: memref<1x16xf32, #tpu.memory_space<vmem>>, %arg12: memref<8x16xf32, #tpu.memory_space<vmem>>) attributes {dimension_semantics = [#tpu.dimension_semantics<parallel>], iteration_bounds = array<i64: 2>, scalar_prefetch = 0 : i64, scratch_operands = 0 : i64, tpu.core_type = #tpu.core_type<tc>, window_params = [{transform_indices = @transform_0, window_bounds = array<i64: 8, 64, 32>}, {pipeline_mode = #tpu.pipeline_mode<synchronous>, transform_indices = @transform_1, window_bounds = array<i64: 1, 32>}, {pipeline_mode = #tpu.pipeline_mode<synchronous>, transform_indices = @transform_2, window_bounds = array<i64: 64, 32>}, {pipeline_mode = #tpu.pipeline_mode<synchronous>, transform_indices = @transform_3, window_bounds = array<i64: 32, 32>}, {pipeline_mode = #tpu.pipeline_mode<synchronous>, transform_indices = @transform_4, window_bounds = array<i64: 1, 32>}, {pipeline_mode = #tpu.pipeline_mode<synchronous>, transform_indices = @transform_5, window_bounds = array<i64: 32, 32>}, {pipeline_mode = #tpu.pipeline_mode<synchronous>, transform_indices = @transform_6, window_bounds = array<i64: 1, 32>}, {pipeline_mode = #tpu.pipeline_mode<synchronous>, transform_indices = @transform_7, window_bounds = array<i64: 32, 32>}, {pipeline_mode = #tpu.pipeline_mode<synchronous>, transform_indices = @transform_8, window_bounds = array<i64: 1, 32>}, {pipeline_mode = #tpu.pipeline_mode<synchronous>, transform_indices = @transform_9, window_bounds = array<i64: 32, 16>}, {pipeline_mode = #tpu.pipeline_mode<synchronous>, transform_indices = @transform_10, window_bounds = array<i64: 1, 16>}, {transform_indices = @transform_11, window_bounds = array<i64: 8, 16>}]} {
    %c0 = arith.constant 0 : index
    %c0_0 = arith.constant 0 : index
    %c0_1 = arith.constant 0 : index
    %0 = vector.load %arg1[%c0, %c0_0, %c0_1] : memref<8x64x32xf32, #tpu.memory_space<vmem>>, vector<8x64x32xf32>
    %c0_2 = arith.constant 0 : index
    %c0_3 = arith.constant 0 : index
    %1 = vector.load %arg3[%c0_2, %c0_3] : memref<64x32xf32, #tpu.memory_space<vmem>>, vector<64x32xf32>
    %c0_4 = arith.constant 0 : index
    %c0_5 = arith.constant 0 : index
    %2 = vector.load %arg2[%c0_4, %c0_5] : memref<1x32xf32, #tpu.memory_space<vmem>>, vector<1x32xf32>
    %c0_6 = arith.constant 0 : index
    %c0_7 = arith.constant 0 : index
    %3 = vector.load %arg4[%c0_6, %c0_7] : memref<32x32xf32, #tpu.memory_space<vmem>>, vector<32x32xf32>
    %c0_8 = arith.constant 0 : index
    %c0_9 = arith.constant 0 : index
    %4 = vector.load %arg6[%c0_8, %c0_9] : memref<32x32xf32, #tpu.memory_space<vmem>>, vector<32x32xf32>
    %c0_10 = arith.constant 0 : index
    %c0_11 = arith.constant 0 : index
    %5 = vector.load %arg8[%c0_10, %c0_11] : memref<32x32xf32, #tpu.memory_space<vmem>>, vector<32x32xf32>
    %c0_12 = arith.constant 0 : index
    %c0_13 = arith.constant 0 : index
    %6 = vector.load %arg10[%c0_12, %c0_13] : memref<32x16xf32, #tpu.memory_space<vmem>>, vector<32x16xf32>
    %c0_14 = arith.constant 0 : index
    %c0_15 = arith.constant 0 : index
    %7 = vector.load %arg5[%c0_14, %c0_15] : memref<1x32xf32, #tpu.memory_space<vmem>>, vector<1x32xf32>
    %c0_16 = arith.constant 0 : index
    %c0_17 = arith.constant 0 : index
    %8 = vector.load %arg7[%c0_16, %c0_17] : memref<1x32xf32, #tpu.memory_space<vmem>>, vector<1x32xf32>
    %c0_18 = arith.constant 0 : index
    %c0_19 = arith.constant 0 : index
    %9 = vector.load %arg9[%c0_18, %c0_19] : memref<1x32xf32, #tpu.memory_space<vmem>>, vector<1x32xf32>
    %c0_20 = arith.constant 0 : index
    %c0_21 = arith.constant 0 : index
    %10 = vector.load %arg11[%c0_20, %c0_21] : memref<1x16xf32, #tpu.memory_space<vmem>>, vector<1x16xf32>
    %11 = tpu.iota {dimensions = array<i32: 0>} : vector<32x4xi32>
    %12 = tpu.iota {dimensions = array<i32: 1>} : vector<32x4xi32>
    %c8_i32 = arith.constant 8 : i32
    %13 = vector.broadcast %c8_i32 : i32 to vector<32x4xi32>
    %14 = arith.muli %12, %13 : vector<32x4xi32>
    %15 = arith.cmpi sge, %11, %14 : vector<32x4xi32>
    %c1_i32 = arith.constant 1 : i32
    %16 = vector.broadcast %c1_i32 : i32 to vector<32x4xi32>
    %17 = arith.addi %12, %16 : vector<32x4xi32>
    %c8_i32_22 = arith.constant 8 : i32
    %18 = vector.broadcast %c8_i32_22 : i32 to vector<32x4xi32>
    %19 = arith.muli %17, %18 : vector<32x4xi32>
    %20 = arith.cmpi slt, %11, %19 : vector<32x4xi32>
    %21 = arith.andi %15, %20 : vector<32x4xi1>
    %22 = arith.extui %21 : vector<32x4xi1> to vector<32x4xi32>
    %23 = arith.sitofp %22 : vector<32x4xi32> to vector<32x4xf32>
    %24 = tpu.iota {dimensions = array<i32: 1>} : vector<4x32xi32>
    %25 = tpu.iota {dimensions = array<i32: 0>} : vector<4x32xi32>
    %c8_i32_23 = arith.constant 8 : i32
    %26 = vector.broadcast %c8_i32_23 : i32 to vector<4x32xi32>
    %27 = arith.muli %25, %26 : vector<4x32xi32>
    %28 = arith.cmpi sge, %24, %27 : vector<4x32xi32>
    %c1_i32_24 = arith.constant 1 : i32
    %29 = vector.broadcast %c1_i32_24 : i32 to vector<4x32xi32>
    %30 = arith.addi %25, %29 : vector<4x32xi32>
    %c8_i32_25 = arith.constant 8 : i32
    %31 = vector.broadcast %c8_i32_25 : i32 to vector<4x32xi32>
    %32 = arith.muli %30, %31 : vector<4x32xi32>
    %33 = arith.cmpi slt, %24, %32 : vector<4x32xi32>
    %34 = arith.andi %28, %33 : vector<4x32xi1>
    %35 = arith.extui %34 : vector<4x32xi1> to vector<4x32xi32>
    %36 = arith.sitofp %35 : vector<4x32xi32> to vector<4x32xf32>
    %37 = tpu.iota {dimensions = array<i32: 0>} : vector<8x512xi32>
    %38 = tpu.iota {dimensions = array<i32: 1>} : vector<8x512xi32>
    %c64_i32 = arith.constant 64 : i32
    %39 = vector.broadcast %c64_i32 : i32 to vector<8x512xi32>
    %40 = arith.muli %37, %39 : vector<8x512xi32>
    %41 = arith.cmpi sge, %38, %40 : vector<8x512xi32>
    %c1_i32_26 = arith.constant 1 : i32
    %42 = vector.broadcast %c1_i32_26 : i32 to vector<8x512xi32>
    %43 = arith.addi %37, %42 : vector<8x512xi32>
    %c64_i32_27 = arith.constant 64 : i32
    %44 = vector.broadcast %c64_i32_27 : i32 to vector<8x512xi32>
    %45 = arith.muli %43, %44 : vector<8x512xi32>
    %46 = arith.cmpi slt, %38, %45 : vector<8x512xi32>
    %47 = arith.andi %41, %46 : vector<8x512xi1>
    %48 = arith.extui %47 : vector<8x512xi1> to vector<8x512xi32>
    %49 = arith.sitofp %48 : vector<8x512xi32> to vector<8x512xf32>
    %50 = vector.shape_cast %0 : vector<8x64x32xf32> to vector<512x32xf32>
    %cst = arith.constant dense<0.000000e+00> : vector<8x32xf32>
    %51 = tpu.matmul %49, %50, %cst {dimension_numbers = #tpu.dot_dimension_numbers<[1], [0], [0], [1], [0, 0, 1, 1], [], []>} : vector<8x512xf32>, vector<512x32xf32>, vector<8x32xf32> -> vector<8x32xf32>
    %cst_28 = arith.constant 1.562500e-02 : f32
    %52 = vector.broadcast %cst_28 : f32 to vector<8x32xf32>
    %53 = arith.mulf %51, %52 : vector<8x32xf32>
    %54 = vector.broadcast %2 : vector<1x32xf32> to vector<8x32xf32>
    %55 = arith.addf %53, %54 : vector<8x32xf32>
    %56 = vector.shape_cast %1 : vector<64x32xf32> to vector<1x64x32xf32>
    %57 = vector.broadcast %56 : vector<1x64x32xf32> to vector<8x64x32xf32>
    %58 = arith.addf %0, %57 : vector<8x64x32xf32>
    %59 = vector.shape_cast %58 : vector<8x64x32xf32> to vector<512x32xf32>
    %cst_29 = arith.constant dense<0.000000e+00> : vector<512x32xf32>
    %60 = tpu.matmul %59, %4, %cst_29 {dimension_numbers = #tpu.dot_dimension_numbers<[1], [0], [0], [1], [0, 0, 1, 1], [], []>} : vector<512x32xf32>, vector<32x32xf32>, vector<512x32xf32> -> vector<512x32xf32>
    %61 = vector.broadcast %8 : vector<1x32xf32> to vector<512x32xf32>
    %62 = arith.addf %60, %61 : vector<512x32xf32>
    %cst_30 = arith.constant dense<0.000000e+00> : vector<512x32xf32>
    %63 = tpu.matmul %59, %5, %cst_30 {dimension_numbers = #tpu.dot_dimension_numbers<[1], [0], [0], [1], [0, 0, 1, 1], [], []>} : vector<512x32xf32>, vector<32x32xf32>, vector<512x32xf32> -> vector<512x32xf32>
    %64 = vector.broadcast %9 : vector<1x32xf32> to vector<512x32xf32>
    %65 = arith.addf %63, %64 : vector<512x32xf32>
    %cst_31 = arith.constant dense<0.000000e+00> : vector<8x32xf32>
    %66 = tpu.matmul %55, %3, %cst_31 {dimension_numbers = #tpu.dot_dimension_numbers<[1], [0], [0], [1], [0, 0, 1, 1], [], []>} : vector<8x32xf32>, vector<32x32xf32>, vector<8x32xf32> -> vector<8x32xf32>
    %67 = vector.broadcast %7 : vector<1x32xf32> to vector<8x32xf32>
    %68 = arith.addf %66, %67 : vector<8x32xf32>
    %cst_32 = arith.constant dense<0.000000e+00> : vector<8x32xf32>
    %69 = tpu.matmul %55, %4, %cst_32 {dimension_numbers = #tpu.dot_dimension_numbers<[1], [0], [0], [1], [0, 0, 1, 1], [], []>} : vector<8x32xf32>, vector<32x32xf32>, vector<8x32xf32> -> vector<8x32xf32>
    %70 = vector.broadcast %8 : vector<1x32xf32> to vector<8x32xf32>
    %71 = arith.addf %69, %70 : vector<8x32xf32>
    %cst_33 = arith.constant dense<0.000000e+00> : vector<8x32xf32>
    %72 = tpu.matmul %55, %5, %cst_33 {dimension_numbers = #tpu.dot_dimension_numbers<[1], [0], [0], [1], [0, 0, 1, 1], [], []>} : vector<8x32xf32>, vector<32x32xf32>, vector<8x32xf32> -> vector<8x32xf32>
    %73 = vector.broadcast %9 : vector<1x32xf32> to vector<8x32xf32>
    %74 = arith.addf %72, %73 : vector<8x32xf32>
    %75 = vector.shape_cast %62 : vector<512x32xf32> to vector<8x64x32xf32>
    %76 = vector.shape_cast %68 : vector<8x32xf32> to vector<8x1x32xf32>
    %77 = vector.broadcast %76 : vector<8x1x32xf32> to vector<8x64x32xf32>
    %78 = arith.mulf %75, %77 : vector<8x64x32xf32>
    %79 = vector.shape_cast %78 : vector<8x64x32xf32> to vector<512x32xf32>
    %cst_34 = arith.constant dense<0.000000e+00> : vector<512x4xf32>
    %80 = tpu.matmul %79, %23, %cst_34 {dimension_numbers = #tpu.dot_dimension_numbers<[1], [0], [0], [1], [0, 0, 1, 1], [], []>} : vector<512x32xf32>, vector<32x4xf32>, vector<512x4xf32> -> vector<512x4xf32>
    %81 = arith.mulf %71, %68 : vector<8x32xf32>
    %cst_35 = arith.constant dense<0.000000e+00> : vector<8x4xf32>
    %82 = tpu.matmul %81, %23, %cst_35 {dimension_numbers = #tpu.dot_dimension_numbers<[1], [0], [0], [1], [0, 0, 1, 1], [], []>} : vector<8x32xf32>, vector<32x4xf32>, vector<8x4xf32> -> vector<8x4xf32>
    %83 = vector.shape_cast %80 : vector<512x4xf32> to vector<8x64x4xf32>
    %cst_36 = arith.constant dense<0xFF800000> : vector<8x4xf32>
    %84 = vector.multi_reduction <maximumf>, %83, %cst_36 [1] : vector<8x64x4xf32> to vector<8x4xf32>
    %85 = arith.maximumf %84, %82 : vector<8x4xf32>
    %86 = arith.subf %82, %85 : vector<8x4xf32>
    %87 = math.exp %86 : vector<8x4xf32>
    %88 = vector.shape_cast %85 : vector<8x4xf32> to vector<8x1x4xf32>
    %89 = vector.broadcast %88 : vector<8x1x4xf32> to vector<8x64x4xf32>
    %90 = arith.subf %83, %89 : vector<8x64x4xf32>
    %91 = math.exp %90 : vector<8x64x4xf32>
    %92 = vector.shape_cast %91 : vector<8x64x4xf32> to vector<512x4xf32>
    %cst_37 = arith.constant dense<0.000000e+00> : vector<8x4xf32>
    %93 = tpu.matmul %49, %92, %cst_37 {dimension_numbers = #tpu.dot_dimension_numbers<[1], [0], [0], [1], [0, 0, 1, 1], [], []>} : vector<8x512xf32>, vector<512x4xf32>, vector<8x4xf32> -> vector<8x4xf32>
    %94 = arith.addf %87, %93 : vector<8x4xf32>
    %95 = tpu.reciprocal %94 : vector<8x4xf32> -> vector<8x4xf32>
    %cst_38 = arith.constant dense<0.000000e+00> : vector<512x32xf32>
    %96 = tpu.matmul %92, %36, %cst_38 {dimension_numbers = #tpu.dot_dimension_numbers<[1], [0], [0], [1], [0, 0, 1, 1], [], []>} : vector<512x4xf32>, vector<4x32xf32>, vector<512x32xf32> -> vector<512x32xf32>
    %97 = arith.mulf %96, %65 : vector<512x32xf32>
    %cst_39 = arith.constant dense<0.000000e+00> : vector<8x32xf32>
    %98 = tpu.matmul %49, %97, %cst_39 {dimension_numbers = #tpu.dot_dimension_numbers<[1], [0], [0], [1], [0, 0, 1, 1], [], []>} : vector<8x512xf32>, vector<512x32xf32>, vector<8x32xf32> -> vector<8x32xf32>
    %cst_40 = arith.constant dense<0.000000e+00> : vector<8x32xf32>
    %99 = tpu.matmul %87, %36, %cst_40 {dimension_numbers = #tpu.dot_dimension_numbers<[1], [0], [0], [1], [0, 0, 1, 1], [], []>} : vector<8x4xf32>, vector<4x32xf32>, vector<8x32xf32> -> vector<8x32xf32>
    %100 = arith.mulf %99, %74 : vector<8x32xf32>
    %101 = arith.addf %98, %100 : vector<8x32xf32>
    %cst_41 = arith.constant dense<0.000000e+00> : vector<8x32xf32>
    %102 = tpu.matmul %95, %36, %cst_41 {dimension_numbers = #tpu.dot_dimension_numbers<[1], [0], [0], [1], [0, 0, 1, 1], [], []>} : vector<8x4xf32>, vector<4x32xf32>, vector<8x32xf32> -> vector<8x32xf32>
    %103 = arith.mulf %101, %102 : vector<8x32xf32>
    %cst_42 = arith.constant dense<0.000000e+00> : vector<8x16xf32>
    %104 = tpu.matmul %103, %6, %cst_42 {dimension_numbers = #tpu.dot_dimension_numbers<[1], [0], [0], [1], [0, 0, 1, 1], [], []>} : vector<8x32xf32>, vector<32x16xf32>, vector<8x16xf32> -> vector<8x16xf32>
    %105 = vector.broadcast %10 : vector<1x16xf32> to vector<8x16xf32>
    %106 = arith.addf %104, %105 : vector<8x16xf32>
    %c0_43 = arith.constant 0 : index
    %c0_44 = arith.constant 0 : index
    %107 = vector.load %arg12[%c0_43, %c0_44] : memref<8x16xf32, #tpu.memory_space<vmem>>, vector<8x16xf32>
    tpu.vector_store %arg12[%c0_43, %c0_44], %106 {strides = array<i32>} : memref<8x16xf32, #tpu.memory_space<vmem>>, vector<8x16xf32>,
    return
  }
  func.func @transform_0(%arg0: i32) -> (i32, i32, i32) {
    %c0_i32 = arith.constant 0 : i32
    %c0_i32_0 = arith.constant 0 : i32
    %c0_i32_1 = arith.constant 0 : i32
    return %arg0, %c0_i32, %c0_i32_0 : i32, i32, i32
  }
  func.func @transform_1(%arg0: i32) -> (i32, i32) {
    %c0_i32 = arith.constant 0 : i32
    %c0_i32_0 = arith.constant 0 : i32
    %c0_i32_1 = arith.constant 0 : i32
    return %c0_i32, %c0_i32_0 : i32, i32
  }
  func.func @transform_2(%arg0: i32) -> (i32, i32) {
    %c0_i32 = arith.constant 0 : i32
    %c0_i32_0 = arith.constant 0 : i32
    %c0_i32_1 = arith.constant 0 : i32
    return %c0_i32, %c0_i32_0 : i32, i32
  }
  func.func @transform_3(%arg0: i32) -> (i32, i32) {
    %c0_i32 = arith.constant 0 : i32
    %c0_i32_0 = arith.constant 0 : i32
    %c0_i32_1 = arith.constant 0 : i32
    return %c0_i32, %c0_i32_0 : i32, i32
  }
  func.func @transform_4(%arg0: i32) -> (i32, i32) {
    %c0_i32 = arith.constant 0 : i32
    %c0_i32_0 = arith.constant 0 : i32
    %c0_i32_1 = arith.constant 0 : i32
    return %c0_i32, %c0_i32_0 : i32, i32
  }
  func.func @transform_5(%arg0: i32) -> (i32, i32) {
    %c0_i32 = arith.constant 0 : i32
    %c0_i32_0 = arith.constant 0 : i32
    %c0_i32_1 = arith.constant 0 : i32
    return %c0_i32, %c0_i32_0 : i32, i32
  }
  func.func @transform_6(%arg0: i32) -> (i32, i32) {
    %c0_i32 = arith.constant 0 : i32
    %c0_i32_0 = arith.constant 0 : i32
    %c0_i32_1 = arith.constant 0 : i32
    return %c0_i32, %c0_i32_0 : i32, i32
  }
  func.func @transform_7(%arg0: i32) -> (i32, i32) {
    %c0_i32 = arith.constant 0 : i32
    %c0_i32_0 = arith.constant 0 : i32
    %c0_i32_1 = arith.constant 0 : i32
    return %c0_i32, %c0_i32_0 : i32, i32
  }
  func.func @transform_8(%arg0: i32) -> (i32, i32) {
    %c0_i32 = arith.constant 0 : i32
    %c0_i32_0 = arith.constant 0 : i32
    %c0_i32_1 = arith.constant 0 : i32
    return %c0_i32, %c0_i32_0 : i32, i32
  }
  func.func @transform_9(%arg0: i32) -> (i32, i32) {
    %c0_i32 = arith.constant 0 : i32
    %c0_i32_0 = arith.constant 0 : i32
    %c0_i32_1 = arith.constant 0 : i32
    return %c0_i32, %c0_i32_0 : i32, i32
  }
  func.func @transform_10(%arg0: i32) -> (i32, i32) {
    %c0_i32 = arith.constant 0 : i32
    %c0_i32_0 = arith.constant 0 : i32
    %c0_i32_1 = arith.constant 0 : i32
    return %c0_i32, %c0_i32_0 : i32, i32
  }
  func.func @transform_11(%arg0: i32) -> (i32, i32) {
    %c0_i32 = arith.constant 0 : i32
    %c0_i32_0 = arith.constant 0 : i32
    return %arg0, %c0_i32 : i32, i32
  }
}

</mosaic_0001>

<bundles_post_ra>
// kernel: tpu_custom_call.1
= control target key start
LH: loop header
LB: loop body
LE: loop exit
PB: predicated region body
PF: predicated region fallthrough
CT: control target
= control target key end

     0   :  { %s8936_s0 = inlined_call_operand.vmem [shape: f32[16,64,32], index: 0, kind: input, shape index: {}]   ;;  %s8937_s1 = inlined_call_operand.vmem [shape: f32[1,32], index: 1, kind: input, shape index: {}]   ;;  %s8938_s2 = inlined_call_operand.vmem [shape: f32[64,32], index: 2, kind: input, shape index: {}]   ;;  %s8939_s3 = inlined_call_operand.vmem [shape: f32[32,32], index: 3, kind: input, shape index: {}]   ;;  %s8940_s4 = inlined_call_operand.vmem [shape: f32[1,32], index: 4, kind: input, shape index: {}]   ;;  %s8941_s5 = inlined_call_operand.vmem [shape: f32[32,32], index: 5, kind: input, shape index: {}]   ;;  %s8942_s6 = inlined_call_operand.vmem [shape: f32[1,32], index: 6, kind: input, shape index: {}]   ;;  %s8943_s7 = inlined_call_operand.vmem [shape: f32[32,32], index: 7, kind: input, shape index: {}]   ;;  %s8944_s8 = inlined_call_operand.vmem [shape: f32[1,32], index: 8, kind: input, shape index: {}]   ;;  %s8945_s9 = inlined_call_operand.vmem [shape: f32[32,16], index: 9, kind: input, shape index: {}]   ;;  %s8946_s10 = inlined_call_operand.vmem [shape: f32[1,16], index: 10, kind: input, shape index: {}]   ;;  %s8947_s11 = inlined_call_operand.hbm [shape: f32[16,16], index: 11, kind: output, shape index: {}]  }
   0x1   :  { %9044 = sst [smem:[#allocation106_spill]] %s8936_s0 }
   0x2   :  { %16 = vsyncpa [#allocation3], 0 }
   0x3   :  { %18 = vsyncpa [#allocation3 + $0x1], 0  ;;  %s6286_s17 = smov 0   ;;  %s6288_s18 = smov 0  }
   0x4   :  { %s6290_s19 = smov 0   ;;  %s6292_s20 = smov 0  }
   0x5 LB: > { %s6307_s21 = sadd.s32 4294967295, %s6217_s20   ;;  %s4436_s22 = sadd.s32 4294967294, %s6217_s20   ;;  %s6217_s20 = sphi %s6292_s20, %s9418_s20   ;;  %s6213_s19 = sphi %s6290_s19, %s9417_s19   ;;  %s6209_s18 = sphi %s6288_s18, %s9416_s18   ;;  %s6205_s17 = sphi %s6286_s17, %s9415_s17  }
   0x6   : > { %s6311_s23 = sadd.s32 1, %s6217_s20   ;;  %s267_s24 = sadd.s32 1, %s6213_s19 }
   0x7   : > { %s264_s25 = ssub.s32 %s6217_s20, %s6311_s23  ;;  %p277_p0 = scmp.ne.s32.totalorder %s6213_s19, %s6209_s18 }
   0x8   : > { %p265_p1 = scmp.eq.s32.totalorder %s264_s25, 0  ;;  %p278_p2 = scmp.eq.s32.totalorder %s6307_s21, 1 }
   0x9   : > { %p283_p3 = scmp.ne.s32.totalorder %s6209_s18, %s6205_s17  ;;  %p284_p4 = scmp.eq.s32.totalorder %s4436_s22, 1 }
   0xa   : > { %s6322_s26 = scalar_select %p265_p1, %s6213_s19, %s267_s24  }
   0xb   : > { %p6324_p5 = por %p278_p2, %p277_p0  ;;  %p6328_p6 = por %p284_p4, %p283_p3 }
   0xc   : > { %p4439_p7 = scmp.ge.s32.totalorder %s6217_s20, 1  ;;  %p342_p8 = scmp.lt.s32.totalorder %s6217_s20, 3 }
   0xe   : > { %p343_p9 = pnand %p4439_p7, %p342_p8 }
  0x10   : > { %346 = sbr.rel (%p343_p9) target bundleno = 1741 (0x6cd), region = 64 }
  0x17   : > { %s4441_s29 = sshll.u32 %s6307_s21, 3  ;;  %s9047_s0 = sld [smem:[#allocation106_spill]]  ;;  %v6343_v0 = vld [vmem:[%s8938_s2] sm:$0xff]  ;;  %v6348_v1 = vld [vmem:[%s8938_s2 + $0x8] sm:$0xff]  ;;  %v6382_v16 = vld [vmem:[%s8938_s2 + $0x10] sm:$0xff]  ;;  %vm764_vm12 = vcmask 261120  }
  0x18   : > { %p384_p10 = scmp.lt.s32.totalorder %s4441_s29, 15  ;;  %v6387_v17 = vld [vmem:[%s8938_s2 + $0x18] sm:$0xff]  ;;  %v6429_v35 = vld [vmem:[%s8938_s2 + $0x20] sm:$0xff]  ;;  %v6434_v36 = vld [vmem:[%s8938_s2 + $0x28] sm:$0xff]  ;;  %vm6221_vm13 = vmmov 0   ;;  %s380_s12 = sand.u32 1, %s6209_s18  }
  0x19   : > { %v6469_v52 = vld [vmem:[%s8938_s2 + $0x30] sm:$0xff]  ;;  %v6474_v53 = vld [vmem:[%s8938_s2 + $0x38] sm:$0xff]  ;;  %s4440_s13 = sshll.u32 %s380_s12, 3  ;;  %s4745_s22 = sshll.u32 %s6307_s21, 7 }
  0x1a   : > { %s9420_s29 = smov (!%p384_p10, %s4441_s29), 15  ;;  %s382_s24 = scalar_lea.vmem [#allocation2], %s4440_s13 }
  0x1b   : > { %s4748_s30 = sshll.u32 %s9420_s29, 6  ;;  %s4364_s15 = scalar_lea.sflag [#allocation3], %s380_s12 }
  0x1c   : > { %s6225_s21 = smov [#allocation2]  }
  0x1d   : > { %s6338_s14 = scalar_lea.vmem %s9047_s0, %s4748_s30  ;;  %s8894_s30 = scalar_lea.hbm %s8947_s11, %s4745_s22 }
  0x1e   : > { %v6351_v2 = vld [vmem:[%s6338_s14 + $0x80] sm:$0xff]  ;;  %v6354_v3 = vld [vmem:[%s6338_s14 + $0x88] sm:$0xff]  ;;  %v6377_v15 = vld [vmem:[%s6338_s14 + $0x90] sm:$0xff]  ;;  %s6159_s13 = sshll.u32 %s6225_s21, 4  ;;  %s6160_s13 = int_to_ptr.vmem [resolvable:$false] %s6159_s13 }
  0x1f   : > { %v438_v4 = vld [vmem:[%s6338_s14 + $0x180] sm:$0xff]  ;;  %v5732_v5 = vpack.c.bf16 %v6354_v3, %v6351_v2  ;;  %v439_v6 = vld [vmem:[%s6338_s14 + $0x188] sm:$0xff]  ;;  %v6396_v21 = vld [vmem:[%s6338_s14 + $0x98] sm:$0xff]  ;;  %s6161_s0 = scalar_lea.vmem %s6160_s13, 256 }
  0x20   : > { %v6361_v7 = vadd.f32 %v6343_v0, %v438_v4  ;;  %v6364_v8 = vld [vmem:[%s6338_s14] sm:$0xff]  ;;  %v6367_v9 = vld [vmem:[%s6338_s14 + $0x8] sm:$0xff]  ;;  %v5764_v10 = vpack.c.bf16 %v439_v6, %v438_v4  ;;  %v6370_v11 = vadd.f32 %v6348_v1, %v439_v6  ;;  %v440_v22 = vld [vmem:[%s6338_s14 + $0x190] sm:$0xff]  ;;  %v5736_v24 = vpack.c.bf16 %v6396_v21, %v6377_v15 }
  0x21   : > { %v5734_v12 = vpack.c.bf16 %v6367_v9, %v6364_v8  ;;  %v422_v13 = vld [vmem:[%s6338_s14 + $0x100] sm:$0xff]  ;;  %v423_v14 = vld [vmem:[%s6338_s14 + $0x108] sm:$0xff]  ;;  %5733 = vmatprep.subr.bf16.mxu0 %v5732_v5  ;;  %v441_v23 = vld [vmem:[%s6338_s14 + $0x198] sm:$0xff]  ;;  %v6412_v29 = vadd.f32 %v6382_v16, %v440_v22  ;;  %v483_v5 = vlaneseq }
  0x22   : > { %9048 = vst [vmem:[#allocation5_spill] sm:$0xff] %v6361_v7  ;;  %9049 = vst [vmem:[#allocation6_spill] sm:$0xff] %v6370_v11  ;;  %v5766_v18 = vpack.c.bf16 %v423_v14, %v422_v13  ;;  %v6390_v19 = vadd.f32 %v6343_v0, %v422_v13  ;;  %v6393_v20 = vadd.f32 %v6348_v1, %v423_v14  ;;  %5765 = vmatprep.subr.bf16.mxu1 %v5764_v10  ;;  %v6403_v25 = vld [vmem:[%s6338_s14 + $0x10] sm:$0xff]  ;;  %v6406_v26 = vld [vmem:[%s6338_s14 + $0x18] sm:$0xff] }
  0x23   : > { %5735 = vmatpush3.bf16.msra.mxu0 %v5734_v12  ;;  %v6409_v27 = vld [vmem:[%s6338_s14 + $0x110] sm:$0xff]  ;;  %v5768_v28 = vpack.c.bf16 %v441_v23, %v440_v22  ;;  %9052 = vst [vmem:[#allocation9_spill] sm:$0xff] %v6412_v29  ;;  %v6415_v30 = vadd.f32 %v6387_v17, %v441_v23  ;;  %v5738_v31 = vpack.c.bf16 %v6406_v26, %v6403_v25  ;;  %v425_v32 = vld [vmem:[%s6338_s14 + $0x118] sm:$0xff]  ;;  %v6421_v33 = vld [vmem:[%s6338_s14 + $0xa0] sm:$0xff] }
  0x24   : > { %9050 = vst [vmem:[#allocation7_spill] sm:$0xff] %v6390_v19  ;;  %9051 = vst [vmem:[#allocation8_spill] sm:$0xff] %v6393_v20  ;;  %5767 = vmatpush3.bf16.msra.mxu1 %v5766_v18  ;;  %v6424_v34 = vld [vmem:[%s6338_s14 + $0xa8] sm:$0xff]  ;;  %5737 = vmatprep.subr.bf16.mxu0 %v5736_v24  ;;  %v5770_v37 = vpack.c.bf16 %v425_v32, %v6409_v27  ;;  %v442_v38 = vld [vmem:[%s6338_s14 + $0x1a0] sm:$0xff]  ;;  %v6443_v41 = vadd.f32 %v6387_v17, %v425_v32 }
  0x25   : > { %9053 = vst [vmem:[#allocation10_spill] sm:$0xff] %v6415_v30  ;;  %v443_v39 = vld [vmem:[%s6338_s14 + $0x1a8] sm:$0xff]  ;;  %v6440_v40 = vld [vmem:[%s6338_s14 + $0x20] sm:$0xff]  ;;  %5769 = vmatprep.subr.bf16.mxu1 %v5768_v28  ;;  %v5740_v42 = vpack.c.bf16 %v6424_v34, %v6421_v33  ;;  %v6453_v47 = vadd.f32 %v6429_v35, %v442_v38  ;;  %v6461_v50 = vld [vmem:[%s6338_s14 + $0xb0] sm:$0xff] }
  0x26   : > { %9054 = vst [vmem:[#allocation11_spill] sm:$0xff] %v6443_v41  ;;  %v6448_v43 = vld [vmem:[%s6338_s14 + $0x28] sm:$0xff]  ;;  %v426_v44 = vld [vmem:[%s6338_s14 + $0x120] sm:$0xff]  ;;  %v5772_v46 = vpack.c.bf16 %v443_v39, %v442_v38  ;;  %v6456_v48 = vadd.f32 %v6434_v36, %v443_v39  ;;  %v6464_v51 = vld [vmem:[%s6338_s14 + $0xb8] sm:$0xff] }
  0x27   : > { %v427_v45 = vld [vmem:[%s6338_s14 + $0x128] sm:$0xff]  ;;  %5739 = vmatpush3.bf16.msra.mxu0 %v5738_v31  ;;  %9055 = vst [vmem:[#allocation12_spill] sm:$0xff] %v6453_v47  ;;  %v5742_v49 = vpack.c.bf16 %v6448_v43, %v6440_v40  ;;  %v444_v54 = vld [vmem:[%s6338_s14 + $0x1b0] sm:$0xff]  ;;  %v445_v56 = vld [vmem:[%s6338_s14 + $0x1b8] sm:$0xff]  ;;  %v6485_v59 = vadd.f32 %v6429_v35, %v426_v44  ;;  %v5744_v61 = vpack.c.bf16 %v6464_v51, %v6461_v50 }
  0x28   : > { %9056 = vst [vmem:[#allocation13_spill] sm:$0xff] %v6456_v48  ;;  %5771 = vmatpush3.bf16.msra.mxu1 %v5770_v37  ;;  %5741 = vmatprep.subr.bf16.mxu0 %v5740_v42  ;;  %v5774_v55 = vpack.c.bf16 %v427_v45, %v426_v44  ;;  %v6479_v57 = vld [vmem:[%s6338_s14 + $0x30] sm:$0xff]  ;;  %v6482_v58 = vld [vmem:[%s6338_s14 + $0x38] sm:$0xff]  ;;  %v6488_v60 = vadd.f32 %v6434_v36, %v427_v45  ;;  %v6495_v4 = vld [vmem:[%s6338_s14 + $0xc0] sm:$0xff] }
  0x29   : > { %5773 = vmatprep.subr.bf16.mxu1 %v5772_v46  ;;  %9057 = vst [vmem:[#allocation14_spill] sm:$0xff] %v6485_v59  ;;  %v428_v62 = vld [vmem:[%s6338_s14 + $0x130] sm:$0xff]  ;;  %v429_v63 = vld [vmem:[%s6338_s14 + $0x138] sm:$0xff]  ;;  %v5776_v6 = vpack.c.bf16 %v445_v56, %v444_v54  ;;  %v6498_v10 = vadd.f32 %v6469_v52, %v444_v54  ;;  %v6501_v12 = vadd.f32 %v6474_v53, %v445_v56  ;;  %v6504_v13 = vld [vmem:[%s6338_s14 + $0xc8] sm:$0xff] }
  0x2a   : > { %9058 = vst [vmem:[#allocation15_spill] sm:$0xff] %v6488_v60  ;;  %v446_v14 = vld [vmem:[%s6338_s14 + $0x1c0] sm:$0xff]  ;;  %v447_v18 = vld [vmem:[%s6338_s14 + $0x1c8] sm:$0xff]  ;;  %v5746_v22 = vpack.c.bf16 %v6482_v58, %v6479_v57  ;;  %v5778_v23 = vpack.c.bf16 %v429_v63, %v428_v62  ;;  %v6511_v24 = vadd.f32 %v6469_v52, %v428_v62  ;;  %v6514_v28 = vadd.f32 %v6474_v53, %v429_v63  ;;  %v6530_v45 = vld [vmem:[%s6338_s14 + $0xd0] sm:$0xff] }
  0x2b   : > { %9059 = vst [vmem:[#allocation16_spill] sm:$0xff] %v6498_v10  ;;  %9060 = vst [vmem:[#allocation17_spill] sm:$0xff] %v6501_v12  ;;  %5743 = vmatpush3.bf16.msra.mxu0 %v5742_v49  ;;  %v5748_v31 = vpack.c.bf16 %v6504_v13, %v6495_v4  ;;  %v6519_v32 = vld [vmem:[%s6338_s14 + $0x40] sm:$0xff]  ;;  %v6522_v37 = vld [vmem:[%s6338_s14 + $0x48] sm:$0xff]  ;;  %v5780_v39 = vpack.c.bf16 %v447_v18, %v446_v14  ;;  %v6526_v42 = vadd.f32 %v6343_v0, %v446_v14 }
  0x2c   : > { %5775 = vmatpush3.bf16.msra.mxu1 %v5774_v55  ;;  %5745 = vmatprep.subr.bf16.mxu0 %v5744_v61  ;;  %9061 = vst [vmem:[#allocation18_spill] sm:$0xff] %v6511_v24  ;;  %9062 = vst [vmem:[#allocation19_spill] sm:$0xff] %v6514_v28  ;;  %v430_v38 = vld [vmem:[%s6338_s14 + $0x140] sm:$0xff]  ;;  %v431_v44 = vld [vmem:[%s6338_s14 + $0x148] sm:$0xff]  ;;  %v6535_v49 = vshrl.u32 %v483_v5, 7  ;;  %v6538_v54 = vadd.f32 %v6348_v1, %v447_v18  ;;  %v6542_v61 = vand.u32 127, %v483_v5 }
  0x2d   : > { %5777 = vmatprep.subr.bf16.mxu1 %v5776_v6  ;;  %9063 = vst [vmem:[#allocation20_spill] sm:$0xff] %v6526_v42  ;;  %v6533_v46 = vld [vmem:[%s6338_s14 + $0xd8] sm:$0xff]  ;;  %v448_v55 = vld [vmem:[%s6338_s14 + $0x1d0] sm:$0xff]  ;;  %v5750_v62 = vpack.c.bf16 %v6522_v37, %v6519_v32  ;;  %v6547_v63 = vadd.f32 %v6343_v0, %v430_v38  ;;  %v6550_v6 = vadd.f32 %v6348_v1, %v431_v44  ;;  %v450_v47 = vld [vmem:[%s6338_s14 + $0x1e0] sm:$0xff] }
  0x2e   : > { %9064 = vst [vmem:[#allocation21_spill] sm:$0xff] %v6535_v49  ;;  %9065 = vst [vmem:[#allocation22_spill] sm:$0xff] %v6538_v54  ;;  %v449_v56 = vld [vmem:[%s6338_s14 + $0x1d8] sm:$0xff]  ;;  %v6553_v14 = vld [vmem:[%s6338_s14 + $0x50] sm:$0xff]  ;;  %v5782_v5 = vpack.c.bf16 %v431_v44, %v430_v38  ;;  %v5752_v18 = vpack.c.bf16 %v6533_v46, %v6530_v45  ;;  %v6563_v10 = vadd.f32 %v6382_v16, %v448_v55  ;;  %v6575_v44 = vadd.s32 1, %v6535_v49 }
  0x2f   : > { %9066 = vst [vmem:[#allocation23_spill] sm:$0xff] %v6542_v61  ;;  %5747 = vmatpush3.bf16.msra.mxu0 %v5746_v22  ;;  %9067 = vst [vmem:[#allocation24_spill] sm:$0xff] %v6547_v63  ;;  %v6558_v22 = vld [vmem:[%s6338_s14 + $0x58] sm:$0xff]  ;;  %v432_v54 = vld [vmem:[%s6338_s14 + $0x150] sm:$0xff]  ;;  %v5784_v12 = vpack.c.bf16 %v449_v56, %v448_v55  ;;  %v523_v7 = vadd.s32 384, %v6542_v61  ;;  %v522_v41 = vadd.s32 256, %v6542_v61 }
  0x30   : > { %9068 = vst [vmem:[#allocation25_spill] sm:$0xff] %v6550_v6  ;;  %5779 = vmatpush3.bf16.msra.mxu1 %v5778_v23  ;;  %5749 = vmatprep.subr.bf16.mxu0 %v5748_v31  ;;  %v433_v42 = vld [vmem:[%s6338_s14 + $0x158] sm:$0xff]  ;;  %9069 = vst [vmem:[#allocation26_spill] sm:$0xff] %v6563_v10  ;;  %v6566_v23 = vadd.f32 %v6387_v17, %v449_v56  ;;  %v6569_v31 = vld [vmem:[%s6338_s14 + $0xe0] sm:$0xff]  ;;  %v6578_v48 = vadd.f32 %v6382_v16, %v432_v54  ;;  %v521_v56 = vadd.s32 128, %v6542_v61 }
  0x31   : > { %5781 = vmatprep.subr.bf16.mxu1 %v5780_v39  ;;  %v6572_v38 = vld [vmem:[%s6338_s14 + $0xe8] sm:$0xff]  ;;  %9071 = vst [vmem:[#allocation28_spill] sm:$0xff] %v6575_v44  ;;  %v6581_v39 = vadd.f32 %v6387_v17, %v433_v42  ;;  %v5754_v10 = vpack.c.bf16 %v6558_v22, %v6553_v14  ;;  %v5786_v30 = vpack.c.bf16 %v433_v42, %v432_v54  ;;  %v6592_v29 = vld [vmem:[%s6338_s14 + $0x60] sm:$0xff]  ;;  %v453_v28 = vld [vmem:[%s6338_s14 + $0x1f8] sm:$0xff]  ;;  %v529_v24 = vmul.u32 64, %v6575_v44 }
  0x32   : > { %9070 = vst [vmem:[#allocation27_spill] sm:$0xff] %v6566_v23  ;;  %9072 = vst [vmem:[#allocation29_spill] sm:$0xff] %v6578_v48  ;;  %v451_v55 = vld [vmem:[%s6338_s14 + $0x1e8] sm:$0xff]  ;;  %v6587_v23 = vmul.u32 64, %v6535_v49  ;;  %v5756_v49 = vpack.c.bf16 %v6572_v38, %v6569_v31  ;;  %v434_v42 = vld [vmem:[%s6338_s14 + $0x160] sm:$0xff] }
  0x33   : > { %9073 = vst [vmem:[#allocation30_spill] sm:$0xff] %v6581_v39  ;;  %5751 = vmatpush3.bf16.msra.mxu0 %v5750_v62  ;;  %v6595_v11 = vld [vmem:[%s6338_s14 + $0x68] sm:$0xff]  ;;  %v6601_v62 = vadd.f32 %v6429_v35, %v450_v47  ;;  %v6604_v39 = vadd.f32 %v6434_v36, %v451_v55  ;;  %v6609_v48 = vld [vmem:[%s6338_s14 + $0xf0] sm:$0xff]  ;;  %v5788_v6 = vpack.c.bf16 %v451_v55, %v450_v47  ;;  %v467_v44 = vld [vmem:[%s8941_s5] sm:$0xff] }
  0x34   : > { %5783 = vmatpush3.bf16.msra.mxu1 %v5782_v5  ;;  %5753 = vmatprep.subr.bf16.mxu0 %v5752_v18  ;;  %v435_v54 = vld [vmem:[%s6338_s14 + $0x168] sm:$0xff]  ;;  %v6612_v63 = vadd.f32 %v6429_v35, %v434_v42  ;;  %v6615_v5 = vld [vmem:[%s6338_s14 + $0xf8] sm:$0xff]  ;;  %v452_v18 = vld [vmem:[%s6338_s14 + $0x1f0] sm:$0xff]  ;;  %vm526_vm0 = vcmp.ge.s32.totalorder %v521_v56, %v6587_v23  ;;  %v5758_v47 = vpack.c.bf16 %v6595_v11, %v6592_v29 }
  0x35   : > { %9074 = vst [vmem:[#allocation31_spill] sm:$0xff] %v6601_v62  ;;  %9075 = vst [vmem:[#allocation32_spill] sm:$0xff] %v6604_v39  ;;  %5785 = vmatprep.subr.bf16.mxu1 %v5784_v12  ;;  %v6621_v62 = vadd.f32 %v6434_v36, %v435_v54  ;;  %v6627_v12 = vadd.f32 %v6469_v52, %v452_v18  ;;  %v6630_v55 = vadd.f32 %v6474_v53, %v453_v28  ;;  %v6633_v39 = vld [vmem:[%s6338_s14 + $0x70] sm:$0xff]  ;;  %v437_v59 = vld [vmem:[%s6338_s14 + $0x178] sm:$0xff] }
  0x36   : > { %9076 = vst [vmem:[#allocation33_spill] sm:$0xff] %v6612_v63  ;;  %vm528_vm1 = vcmp.ge.s32.totalorder %v523_v7, %v6587_v23  ;;  %v5792_v63 = vpack.c.bf16 %v453_v28, %v452_v18  ;;  %v436_v60 = vld [vmem:[%s6338_s14 + $0x170] sm:$0xff]  ;;  %v6654_v19 = vadd.f32 %v6474_v53, %v437_v59  ;;  %vm531_vm2 = vcmp.lt.s32.totalorder %v521_v56, %v529_v24  ;;  %v471_v28 = vld [vmem:[%s8943_s7] sm:$0xff] }
  0x37   : > { %9077 = vst [vmem:[#allocation34_spill] sm:$0xff] %v6621_v62  ;;  %5755 = vmatpush3.bf16.msra.mxu0 %v5754_v10  ;;  %9078 = vst [vmem:[#allocation35_spill] sm:$0xff] %v6627_v12  ;;  %v468_v10 = vld [vmem:[%s8941_s5 + $0x8] sm:$0xff]  ;;  %v5790_v62 = vpack.c.bf16 %v435_v54, %v434_v42  ;;  %v5760_v12 = vpack.c.bf16 %v6615_v5, %v6609_v48  ;;  %v6651_v20 = vadd.f32 %v6469_v52, %v436_v60  ;;  %v8980_v42 = vmov 1.0  }
  0x38   : > { %9079 = vst [vmem:[#allocation36_spill] sm:$0xff] %v6630_v55  ;;  %5787 = vmatpush3.bf16.msra.mxu1 %v5786_v30  ;;  %5757 = vmatprep.subr.bf16.mxu0 %v5756_v49  ;;  %v6645_v55 = vld [vmem:[%s6338_s14 + $0x78] sm:$0xff]  ;;  %vm533_vm3 = vcmp.lt.s32.totalorder %v523_v7, %v529_v24  ;;  %vm6658_vm4 = vmand %vm526_vm0, %vm531_vm2  ;;  %v9080_v30 = vmov 0  ;;  %v472_v49 = vld [vmem:[%s8943_s7 + $0x8] sm:$0xff]  ;;  %v9083_v56 = vmov 0  ;;  %v5796_v54 = vpack.c.bf16 %v468_v10, %v467_v44  ;;  %s4377_s14 = sshll.u32 %s382_s24, 4  ;;  %s8896_s14 = int_to_ptr.vmem [resolvable:$true] %s4377_s14 }
  0x39   : > { %5789 = vmatprep.subr.bf16.mxu1 %v5788_v6  ;;  %v9081_v30 = vsel %vm6658_vm4, 4294967295, %v9080_v30  ;;  %v5762_v6 = vpack.c.bf16 %v6645_v55, %v6633_v39  ;;  %4453 = vmatprep.mubr.msk.f32.mxu0 %vm6658_vm4, %v8980_v42  ;;  %vm6675_vm5 = vmand %vm528_vm1, %vm533_vm3  ;;  %v5794_v18 = vpack.c.bf16 %v437_v59, %v436_v60  ;;  %vm525_vm6 = vcmp.ge.s32.totalorder %v6542_v61, %v6587_v23  ;;  %v469_v44 = vld [vmem:[%s8941_s5 + $0x10] sm:$0xff]  ;;  %v470_v59 = vld [vmem:[%s8941_s5 + $0x18] sm:$0xff]  ;;  %s6155_s16 = scalar_lea.vmem %s8896_s14, 128  ;;  %p6162_p0 = scmp.lt.s32.totalorder %s8896_s14, %s6160_s13 }
  0x3a   : > { %9082 = vst [vmem:[#allocation37_spill] sm:$0xff] %v9081_v30  ;;  %v9084_v56 = vsel %vm6675_vm5, 4294967295, %v9083_v56  ;;  %vm530_vm7 = vcmp.lt.s32.totalorder %v6542_v61, %v529_v24  ;;  %4455 = vmatprep.mubr.msk.f32.mxu1 %vm6675_vm5, %v8980_v42  ;;  %vm527_vm8 = vcmp.ge.s32.totalorder %v522_v41, %v6587_v23  ;;  %vm532_vm9 = vcmp.lt.s32.totalorder %v522_v41, %v529_v24  ;;  %v473_v60 = vld [vmem:[%s8943_s7 + $0x10] sm:$0xff]  ;;  %p6156_p11 = scmp.ne.s32.totalorder %s8896_s14, %s6155_s16  ;;  %p6163_p1 = scmp.lt.s32.totalorder %s6161_s0, %s6155_s16 }
  0x3b   : > { %5759 = vmatpush3.bf16.msra.mxu0 %v5758_v47  ;;  %9085 = vst [vmem:[#allocation38_spill] sm:$0xff] %v9084_v56  ;;  %v6686_v7 = vpack.c.bf16 %v472_v49, %v471_v28  ;;  %vm6700_vm10 = vmand %vm525_vm6, %vm530_vm7  ;;  %v9086_v41 = vmov 0  ;;  %v9089_v24 = vmov 0  ;;  %v5800_v23 = vpack.c.bf16 %v470_v59, %v469_v44 }
  0x3c   : > { %5791 = vmatpush3.bf16.msra.mxu1 %v5790_v62  ;;  %5761 = vmatprep.subr.bf16.mxu0 %v5760_v12  ;;  %v9087_v41 = vsel %vm6700_vm10, 4294967295, %v9086_v41  ;;  %vm6704_vm11 = vmand %vm527_vm8, %vm532_vm9  ;;  %v694_v62 = vadd.f32 %v6343_v0, %v6364_v8  ;;  %v463_v8 = vld [vmem:[%s8939_s3] sm:$0xff]  ;;  %v464_v12 = vld [vmem:[%s8939_s3 + $0x8] sm:$0xff]  ;;  %v695_v10 = vadd.f32 %v6348_v1, %v6367_v9  ;;  %v696_v49 = vadd.f32 %v6382_v16, %v6403_v25  ;;  %p6157_p12 = pnand %p6156_p11, %p6324_p5  ;;  %p6164_p2 = por %p6163_p1, %p6162_p0 }
  0x3d   : > { %5793 = vmatprep.subr.bf16.mxu1 %v5792_v63  ;;  %v474_v63 = vld [vmem:[%s8943_s7 + $0x18] sm:$0xff]  ;;  %9088 = vst [vmem:[#allocation39_spill] sm:$0xff] %v9087_v41  ;;  %v9090_v24 = vsel %vm6704_vm11, 4294967295, %v9089_v24  ;;  %v5813_v28 = vpack.c.bf16 %v464_v12, %v463_v8  ;;  %v697_v44 = vadd.f32 %v6387_v17, %v6406_v26  ;;  %v698_v25 = vadd.f32 %v6429_v35, %v6440_v40  ;;  %v9107_v8 = vld [vmem:[#allocation9_spill] sm:$0xff] }
  0x3e   : > { %9091 = vst [vmem:[#allocation40_spill] sm:$0xff] %v9090_v24  ;;  %v6711_v47 = vpack.c.bf16 %v474_v63, %v473_v60  ;;  %v466_v9 = vld [vmem:[%s8939_s3 + $0x18] sm:$0xff]  ;;  %v699_v60 = vadd.f32 %v6434_v36, %v6448_v43  ;;  %v700_v26 = vadd.f32 %v6469_v52, %v6479_v57  ;;  %v701_v40 = vadd.f32 %v6474_v53, %v6482_v58  ;;  %v9110_v12 = vld [vmem:[#allocation13_spill] sm:$0xff]  ;;  %p6158_p13 = pneg %p6157_p12 }
  0x3f   : > { %5763 = vmatpush3.bf16.msra.mxu0 %v5762_v6  ;;  %v8984_v6 = vmov 0.0|0.0   ;;  %v702_v43 = vadd.f32 %v6343_v0, %v6519_v32  ;;  %v703_v57 = vadd.f32 %v6348_v1, %v6522_v37  ;;  %v705_v58 = vadd.f32 %v6387_v17, %v6558_v22  ;;  %v9104_v63 = vld [vmem:[#allocation34_spill] sm:$0xff] }
  0x40   : > { %5795 = vmatpush3.bf16.msra.mxu1 %v5794_v18  ;;  %5797 = vmatprep.subr.bf16.mxu0 %v5796_v54  ;;  %v465_v18 = vld [vmem:[%s8939_s3 + $0x10] sm:$0xff]  ;;  %v706_v32 = vadd.f32 %v6429_v35, %v6592_v29  ;;  %v707_v37 = vadd.f32 %v6434_v36, %v6595_v11  ;;  %v709_v29 = vadd.f32 %v6474_v53, %v6645_v55  ;;  %p6165_p3 = pnand %p6164_p2, %p6158_p13 }
  0x41   : > { %5805 = vmatprep.subr.bf16.mxu1 %v6686_v7  ;;  %v5816_v59 = vpack.c.bf16 %v466_v9, %v465_v18  ;;  %v710_v22 = vadd.f32 %v6343_v0, %v6351_v2  ;;  %v711_v11 = vadd.f32 %v6348_v1, %v6354_v3  ;;  %v713_v2 = vadd.f32 %v6387_v17, %v6396_v21  ;;  %v9114_v18 = vld [vmem:[#allocation22_spill] sm:$0xff] }
  0x42   : > { %4454 = vmatmul.mubr.msk.f32.vlgmr.msra.gmra.mrb[0].mxu0 %vm6700_vm10, %v8980_v42  ;;  %v714_v55 = vadd.f32 %v6429_v35, %v6421_v33  ;;  %v715_v3 = vadd.f32 %v6434_v36, %v6424_v34  ;;  %v717_v21 = vadd.f32 %v6474_v53, %v6464_v51  ;;  %v718_v33 = vadd.f32 %v6343_v0, %v6495_v4  ;;  %v9115_v9 = vld [vmem:[#allocation26_spill] sm:$0xff] }
  0x43   : > { %4456 = vmatmul.mubr.msk.f32.vlgmr.msra.gmra.mrb[0].mxu1 %vm6704_vm11, %v8980_v42  ;;  %5799 = vmatpush3.bf16.msra.mxu0 %v5796_v54  ;;  %v719_v34 = vadd.f32 %v6348_v1, %v6504_v13  ;;  %v721_v0 = vadd.f32 %v6387_v17, %v6533_v46  ;;  %v722_v51 = vadd.f32 %v6429_v35, %v6569_v31  ;;  %v9098_v13 = vld [vmem:[#allocation19_spill] sm:$0xff]  ;;  %v9100_v46 = vld [vmem:[#allocation25_spill] sm:$0xff] }
  0x44   : > { %5807 = vmatpush3.bf16.msra.mxu1 %v6686_v7  ;;  %5801 = vmatprep.subr.bf16.mxu0 %v5800_v23  ;;  %v723_v1 = vadd.f32 %v6434_v36, %v6572_v38  ;;  %v724_v4 = vadd.f32 %v6469_v52, %v6609_v48  ;;  %v725_v17 = vadd.f32 %v6474_v53, %v6615_v5  ;;  %v9092_v36 = vld [vmem:[#allocation7_spill] sm:$0xff]  ;;  %v9093_v48 = vld [vmem:[#allocation8_spill] sm:$0xff]  ;;  %v9097_v53 = vld [vmem:[#allocation18_spill] sm:$0xff] }
  0x45   : > { %5809 = vmatprep.subr.bf16.mxu1 %v6711_v47  ;;  %5265 = vmatprep.mubr.msk.f32.mxu0 %vm764_vm12, %v694_v62  ;;  %v728_v35 = vadd.f32 %v6382_v16, %v6409_v27  ;;  %v9096_v27 = vld [vmem:[#allocation15_spill] sm:$0xff]  ;;  %v9101_v31 = vld [vmem:[#allocation29_spill] sm:$0xff]  ;;  %v9102_v38 = vld [vmem:[#allocation30_spill] sm:$0xff] }
  0x46   : > { %5369 = vmatprep.mubr.msk.f32.mxu1 %vm764_vm12, %v694_v62  ;;  %v9103_v5 = vld [vmem:[#allocation33_spill] sm:$0xff]  ;;  %v9106_v62 = vld [vmem:[#allocation6_spill] sm:$0xff] }
  0x47   : > { %5803 = vmatpush3.bf16.msra.mxu0 %v5800_v23 }
  0x48   : > { %5811 = vmatpush3.bf16.msra.mxu1 %v6711_v47  ;;  %5812 = vmatprep.subr.bf16.mxu0 %v8984_v6 }
  0x49   : > { %5818 = vmatprep.subr.bf16.mxu1 %v8984_v6 }
  0x4a   : > { %5266 = vmatmul.mubr.msk.f32.vlgmr.msra.gmra.mrb[2].mxu0 %vm764_vm12, %v695_v10 }
  0x4b   : > { %5370 = vmatmul.mubr.msk.f32.vlgmr.msra.gmra.mrb[2].mxu1 %vm764_vm12, %v695_v10  ;;  %5814 = vmatpush3.bf16.msra.mxu0 %v5813_v28  ;;  %v9111_v10 = vld [vmem:[#allocation16_spill] sm:$0xff]  ;;  %v9112_v28 = vld [vmem:[#allocation17_spill] sm:$0xff] }
  0x4c   : > { %5268 = vmatprep.mubr.msk.f32.mxu0 %vm764_vm12, %v696_v49  ;;  %5372 = vmatprep.mubr.msk.f32.mxu1 %vm764_vm12, %v696_v49  ;;  %v9113_v49 = vld [vmem:[#allocation20_spill] sm:$0xff] }
  0x4d   : > { %5815 = vmatprep.subr.bf16.mxu0 %v8984_v6  ;;  %5820 = vmatpush3.bf16.msra.mxu1 %v5796_v54  ;;  %v704_v54 = vadd.f32 %v6382_v16, %v6553_v14  ;;  %v708_v14 = vadd.f32 %v6469_v52, %v6633_v39  ;;  %v712_v39 = vadd.f32 %v6382_v16, %v6377_v15 }
  0x4e   : > { %5269 = vmatmul.mubr.msk.f32.gmra.mrb[4].mxu0 %vm764_vm12, %v697_v44  ;;  %5821 = vmatprep.subr.bf16.mxu1 %v8984_v6  ;;  %v716_v15 = vadd.f32 %v6469_v52, %v6461_v50  ;;  %v720_v50 = vadd.f32 %v6382_v16, %v6530_v45  ;;  %v9094_v52 = vld [vmem:[#allocation11_spill] sm:$0xff]  ;;  %v9095_v16 = vld [vmem:[#allocation14_spill] sm:$0xff]  ;;  %v9099_v45 = vld [vmem:[#allocation24_spill] sm:$0xff] }
  0x4f   : > { %5373 = vmatmul.mubr.msk.f32.gmra.mrb[4].mxu1 %vm764_vm12, %v697_v44  ;;  %5271 = vmatprep.mubr.msk.f32.mxu0 %vm764_vm12, %v698_v25  ;;  %v9116_v44 = vld [vmem:[#allocation27_spill] sm:$0xff] }
  0x50   : > { %5375 = vmatprep.mubr.msk.f32.mxu1 %vm764_vm12, %v698_v25  ;;  %5817 = vmatpush3.bf16.msra.mxu0 %v5816_v59  ;;  %v9117_v25 = vld [vmem:[#allocation31_spill] sm:$0xff]  ;;  %v9118_v59 = vld [vmem:[#allocation32_spill] sm:$0xff] }
  0x51   : > { %5823 = vmatpush3.bf16.msra.mxu1 %v5800_v23  ;;  %5824 = vmatprep.subr.bf16.mxu0 %v8984_v6  ;;  %v9105_v23 = vld [vmem:[#allocation5_spill] sm:$0xff] }
  0x52   : > { %5272 = vmatmul.mubr.msk.f32.gmra.mrb[6].mxu0 %vm764_vm12, %v699_v60 }
  0x53   : > { %5376 = vmatmul.mubr.msk.f32.gmra.mrb[6].mxu1 %vm764_vm12, %v699_v60  ;;  %5274 = vmatprep.mubr.msk.f32.mxu0 %vm764_vm12, %v700_v26  ;;  %v9119_v60 = vld [vmem:[#allocation35_spill] sm:$0xff] }
  0x54   : > { %5378 = vmatprep.mubr.msk.f32.mxu1 %vm764_vm12, %v700_v26  ;;  %v9120_v26 = vld [vmem:[#allocation36_spill] sm:$0xff] }
  0x56   : > { %5275 = vmatmul.mubr.msk.f32.gmra.mrb[8].mxu0 %vm764_vm12, %v701_v40 }
  0x57   : > { %5379 = vmatmul.mubr.msk.f32.gmra.mrb[8].mxu1 %vm764_vm12, %v701_v40  ;;  %5277 = vmatprep.mubr.msk.f32.mxu0 %vm764_vm12, %v702_v43  ;;  %v8982_v40 = vmov 0.0  }
  0x58   : > { %5381 = vmatprep.mubr.msk.f32.mxu1 %vm764_vm12, %v702_v43 }
  0x5a   : > { %5278 = vmatmul.mubr.msk.f32.gmra.mrb[10].mxu0 %vm764_vm12, %v703_v57 }
  0x5b   : > { %5382 = vmatmul.mubr.msk.f32.gmra.mrb[10].mxu1 %vm764_vm12, %v703_v57  ;;  %5280 = vmatprep.mubr.msk.f32.mxu0 %vm764_vm12, %v704_v54 }
  0x5c   : > { %5384 = vmatprep.mubr.msk.f32.mxu1 %vm764_vm12, %v704_v54 }
  0x5e   : > { %5281 = vmatmul.mubr.msk.f32.gmra.mrb[12].mxu0 %vm764_vm12, %v705_v58 }
  0x5f   : > { %5385 = vmatmul.mubr.msk.f32.gmra.mrb[12].mxu1 %vm764_vm12, %v705_v58  ;;  %5283 = vmatprep.mubr.msk.f32.mxu0 %vm764_vm12, %v706_v32 }
  0x60   : > { %5387 = vmatprep.mubr.msk.f32.mxu1 %vm764_vm12, %v706_v32 }
  0x62   : > { %5284 = vmatmul.mubr.msk.f32.gmra.mrb[14].mxu0 %vm764_vm12, %v707_v37 }
  0x63   : > { %5388 = vmatmul.mubr.msk.f32.gmra.mrb[14].mxu1 %vm764_vm12, %v707_v37  ;;  %5286 = vmatprep.mubr.msk.f32.mxu0 %vm764_vm12, %v708_v14 }
  0x64   : > { %5390 = vmatprep.mubr.msk.f32.mxu1 %vm764_vm12, %v708_v14 }
  0x66   : > { %5287 = vmatmul.mubr.msk.f32.gmra.mrb[16].mxu0 %vm764_vm12, %v709_v29 }
  0x67   : > { %5391 = vmatmul.mubr.msk.f32.gmra.mrb[16].mxu1 %vm764_vm12, %v709_v29  ;;  %5289 = vmatprep.mubr.msk.f32.mxu0 %vm764_vm12, %v710_v22  ;;  %v4457_v29 = vld [vmem:[%s8937_s1] ss:$0 sm:$0xff] }
  0x68   : > { %5393 = vmatprep.mubr.msk.f32.mxu1 %vm764_vm12, %v710_v22 }
  0x6a   : > { %5290 = vmatmul.mubr.msk.f32.gmra.mrb[18].mxu0 %vm764_vm12, %v711_v11 }
  0x6b   : > { %5394 = vmatmul.mubr.msk.f32.gmra.mrb[18].mxu1 %vm764_vm12, %v711_v11  ;;  %5292 = vmatprep.mubr.msk.f32.mxu0 %vm764_vm12, %v712_v39 }
  0x6c   : > { %5396 = vmatprep.mubr.msk.f32.mxu1 %vm764_vm12, %v712_v39 }
  0x6e   : > { %5293 = vmatmul.mubr.msk.f32.gmra.mrb[20].mxu0 %vm764_vm12, %v713_v2 }
  0x6f   : > { %5397 = vmatmul.mubr.msk.f32.gmra.mrb[20].mxu1 %vm764_vm12, %v713_v2  ;;  %5295 = vmatprep.mubr.msk.f32.mxu0 %vm764_vm12, %v714_v55 }
  0x70   : > { %5399 = vmatprep.mubr.msk.f32.mxu1 %vm764_vm12, %v714_v55 }
  0x72   : > { %5296 = vmatmul.mubr.msk.f32.gmra.mrb[22].mxu0 %vm764_vm12, %v715_v3 }
  0x73   : > { %5400 = vmatmul.mubr.msk.f32.gmra.mrb[22].mxu1 %vm764_vm12, %v715_v3  ;;  %5298 = vmatprep.mubr.msk.f32.mxu0 %vm764_vm12, %v716_v15 }
  0x74   : > { %5402 = vmatprep.mubr.msk.f32.mxu1 %vm764_vm12, %v716_v15 }
  0x76   : > { %5299 = vmatmul.mubr.msk.f32.gmra.mrb[24].mxu0 %vm764_vm12, %v717_v21 }
  0x77   : > { %5403 = vmatmul.mubr.msk.f32.gmra.mrb[24].mxu1 %vm764_vm12, %v717_v21  ;;  %5301 = vmatprep.mubr.msk.f32.mxu0 %vm764_vm12, %v718_v33 }
  0x78   : > { %5405 = vmatprep.mubr.msk.f32.mxu1 %vm764_vm12, %v718_v33 }
  0x7a   : > { %5302 = vmatmul.mubr.msk.f32.gmra.mrb[26].mxu0 %vm764_vm12, %v719_v34 }
  0x7b   : > { %5406 = vmatmul.mubr.msk.f32.gmra.mrb[26].mxu1 %vm764_vm12, %v719_v34  ;;  %5304 = vmatprep.mubr.msk.f32.mxu0 %vm764_vm12, %v720_v50 }
  0x7c   : > { %5408 = vmatprep.mubr.msk.f32.mxu1 %vm764_vm12, %v720_v50 }
  0x7e   : > { %5305 = vmatmul.mubr.msk.f32.gmra.mrb[28].mxu0 %vm764_vm12, %v721_v0 }
  0x7f   : > { %5409 = vmatmul.mubr.msk.f32.gmra.mrb[28].mxu1 %vm764_vm12, %v721_v0  ;;  %5307 = vmatprep.mubr.msk.f32.mxu0 %vm764_vm12, %v722_v51 }
  0x80   : > { %5411 = vmatprep.mubr.msk.f32.mxu1 %vm764_vm12, %v722_v51 }
  0x82   : > { %5308 = vmatmul.mubr.msk.f32.gmra.mrb[30].mxu0 %vm764_vm12, %v723_v1 }
  0x83   : > { %5412 = vmatmul.mubr.msk.f32.gmra.mrb[30].mxu1 %vm764_vm12, %v723_v1  ;;  %5310 = vmatprep.mubr.msk.f32.mxu0 %vm764_vm12, %v724_v4 }
  0x84   : > { %5414 = vmatprep.mubr.msk.f32.mxu1 %vm764_vm12, %v724_v4 }
  0x86   : > { %5311 = vmatmul.mubr.msk.f32.gmra.mrb[32].mxu0 %vm764_vm12, %v725_v17 }
  0x87   : > { %5415 = vmatmul.mubr.msk.f32.gmra.mrb[32].mxu1 %vm764_vm12, %v725_v17  ;;  %5313 = vmatprep.mubr.msk.f32.mxu0 %vm764_vm12, %v9092_v36 }
  0x88   : > { %5417 = vmatprep.mubr.msk.f32.mxu1 %vm764_vm12, %v9092_v36 }
  0x8a   : > { %5314 = vmatmul.mubr.msk.f32.gmra.mrb[34].mxu0 %vm764_vm12, %v9093_v48 }
  0x8b   : > { %5418 = vmatmul.mubr.msk.f32.gmra.mrb[34].mxu1 %vm764_vm12, %v9093_v48  ;;  %5316 = vmatprep.mubr.msk.f32.mxu0 %vm764_vm12, %v728_v35 }
  0x8c   : > { %5420 = vmatprep.mubr.msk.f32.mxu1 %vm764_vm12, %v728_v35 }
  0x8e   : > { %5317 = vmatmul.mubr.msk.f32.gmra.mrb[36].mxu0 %vm764_vm12, %v9094_v52 }
  0x8f   : > { %5421 = vmatmul.mubr.msk.f32.gmra.mrb[36].mxu1 %vm764_vm12, %v9094_v52  ;;  %5319 = vmatprep.mubr.msk.f32.mxu0 %vm764_vm12, %v9095_v16 }
  0x90   : > { %5423 = vmatprep.mubr.msk.f32.mxu1 %vm764_vm12, %v9095_v16 }
  0x92   : > { %5320 = vmatmul.mubr.msk.f32.gmra.mrb[38].mxu0 %vm764_vm12, %v9096_v27 }
  0x93   : > { %5424 = vmatmul.mubr.msk.f32.gmra.mrb[38].mxu1 %vm764_vm12, %v9096_v27  ;;  %5322 = vmatprep.mubr.msk.f32.mxu0 %vm764_vm12, %v9097_v53 }
  0x94   : > { %5426 = vmatprep.mubr.msk.f32.mxu1 %vm764_vm12, %v9097_v53 }
  0x96   : > { %5323 = vmatmul.mubr.msk.f32.gmra.mrb[40].mxu0 %vm764_vm12, %v9098_v13 }
  0x97   : > { %5427 = vmatmul.mubr.msk.f32.gmra.mrb[40].mxu1 %vm764_vm12, %v9098_v13  ;;  %5325 = vmatprep.mubr.msk.f32.mxu0 %vm764_vm12, %v9099_v45 }
  0x98   : > { %5429 = vmatprep.mubr.msk.f32.mxu1 %vm764_vm12, %v9099_v45 }
  0x9a   : > { %5326 = vmatmul.mubr.msk.f32.gmra.mrb[42].mxu0 %vm764_vm12, %v9100_v46 }
  0x9b   : > { %5430 = vmatmul.mubr.msk.f32.gmra.mrb[42].mxu1 %vm764_vm12, %v9100_v46  ;;  %5328 = vmatprep.mubr.msk.f32.mxu0 %vm764_vm12, %v9101_v31 }
  0x9c   : > { %5432 = vmatprep.mubr.msk.f32.mxu1 %vm764_vm12, %v9101_v31 }
  0x9e   : > { %5329 = vmatmul.mubr.msk.f32.gmra.mrb[44].mxu0 %vm764_vm12, %v9102_v38 }
  0x9f   : > { %5433 = vmatmul.mubr.msk.f32.gmra.mrb[44].mxu1 %vm764_vm12, %v9102_v38  ;;  %5331 = vmatprep.mubr.msk.f32.mxu0 %vm764_vm12, %v9103_v5 }
  0xa0   : > { %5435 = vmatprep.mubr.msk.f32.mxu1 %vm764_vm12, %v9103_v5 }
  0xa2   : > { %5332 = vmatmul.mubr.msk.f32.gmra.mrb[46].mxu0 %vm764_vm12, %v9104_v63 }
  0xa3   : > { %5436 = vmatmul.mubr.msk.f32.gmra.mrb[46].mxu1 %vm764_vm12, %v9104_v63  ;;  %5334 = vmatprep.mubr.msk.f32.mxu0 %vm764_vm12, %v6651_v20 }
  0xa4   : > { %5438 = vmatprep.mubr.msk.f32.mxu1 %vm764_vm12, %v6651_v20  ;;  %v9108_v20 = vld [vmem:[#allocation10_spill] sm:$0xff] }
  0xa6   : > { %5335 = vmatmul.mubr.msk.f32.gmra.mrb[48].mxu0 %vm764_vm12, %v6654_v19 }
  0xa7   : > { %5439 = vmatmul.mubr.msk.f32.gmra.mrb[48].mxu1 %vm764_vm12, %v6654_v19  ;;  %5337 = vmatprep.mubr.msk.f32.mxu0 %vm764_vm12, %v9105_v23  ;;  %v9109_v19 = vld [vmem:[#allocation12_spill] sm:$0xff] }
  0xa8   : > { %5441 = vmatprep.mubr.msk.f32.mxu1 %vm764_vm12, %v9105_v23 }
  0xaa   : > { %5338 = vmatmul.mubr.msk.f32.gmra.mrb[50].mxu0 %vm764_vm12, %v9106_v62 }
  0xab   : > { %5442 = vmatmul.mubr.msk.f32.gmra.mrb[50].mxu1 %vm764_vm12, %v9106_v62  ;;  %5340 = vmatprep.mubr.msk.f32.mxu0 %vm764_vm12, %v9107_v8 }
  0xac   : > { %5444 = vmatprep.mubr.msk.f32.mxu1 %vm764_vm12, %v9107_v8 }
  0xae   : > { %5341 = vmatmul.mubr.msk.f32.gmra.mrb[52].mxu0 %vm764_vm12, %v9108_v20 }
  0xaf   : > { %5445 = vmatmul.mubr.msk.f32.gmra.mrb[52].mxu1 %vm764_vm12, %v9108_v20  ;;  %5343 = vmatprep.mubr.msk.f32.mxu0 %vm764_vm12, %v9109_v19 }
  0xb0   : > { %5447 = vmatprep.mubr.msk.f32.mxu1 %vm764_vm12, %v9109_v19 }
  0xb2   : > { %5344 = vmatmul.mubr.msk.f32.gmra.mrb[54].mxu0 %vm764_vm12, %v9110_v12 }
  0xb3   : > { %5448 = vmatmul.mubr.msk.f32.gmra.mrb[54].mxu1 %vm764_vm12, %v9110_v12  ;;  %5346 = vmatprep.mubr.msk.f32.mxu0 %vm764_vm12, %v9111_v10 }
  0xb4   : > { %5450 = vmatprep.mubr.msk.f32.mxu1 %vm764_vm12, %v9111_v10 }
  0xb6   : > { %5347 = vmatmul.mubr.msk.f32.gmra.mrb[56].mxu0 %vm764_vm12, %v9112_v28 }
  0xb7   : > { %5451 = vmatmul.mubr.msk.f32.gmra.mrb[56].mxu1 %vm764_vm12, %v9112_v28  ;;  %5349 = vmatprep.mubr.msk.f32.mxu0 %vm764_vm12, %v9113_v49 }
  0xb8   : > { %5453 = vmatprep.mubr.msk.f32.mxu1 %vm764_vm12, %v9113_v49 }
  0xba   : > { %5350 = vmatmul.mubr.msk.f32.gmra.mrb[58].mxu0 %vm764_vm12, %v9114_v18 }
  0xbb   : > { %5454 = vmatmul.mubr.msk.f32.gmra.mrb[58].mxu1 %vm764_vm12, %v9114_v18  ;;  %5352 = vmatprep.mubr.msk.f32.mxu0 %vm764_vm12, %v9115_v9 }
  0xbc   : > { %5456 = vmatprep.mubr.msk.f32.mxu1 %vm764_vm12, %v9115_v9 }
  0xbe   : > { %5353 = vmatmul.mubr.msk.f32.gmra.mrb[60].mxu0 %vm764_vm12, %v9116_v44 }
  0xbf   : > { %5457 = vmatmul.mubr.msk.f32.gmra.mrb[60].mxu1 %vm764_vm12, %v9116_v44  ;;  %5355 = vmatprep.mubr.msk.f32.mxu0 %vm764_vm12, %v9117_v25 }
  0xc0   : > { %5459 = vmatprep.mubr.msk.f32.mxu1 %vm764_vm12, %v9117_v25 }
  0xc2   : > { %5356 = vmatmul.mubr.msk.f32.gmra.mrb[62].mxu0 %vm764_vm12, %v9118_v59 }
  0xc3   : > { %5460 = vmatmul.mubr.msk.f32.gmra.mrb[62].mxu1 %vm764_vm12, %v9118_v59  ;;  %5358 = vmatprep.mubr.msk.f32.mxu0 %vm764_vm12, %v9119_v60 }
  0xc4   : > { %5462 = vmatprep.mubr.msk.f32.mxu1 %vm764_vm12, %v9119_v60 }
  0xc6   : > { %5359 = vmatmul.mubr.msk.f32.gmra.mrb[64].mxu0 %vm764_vm12, %v9120_v26 }
  0xc7   : > { %5463 = vmatmul.mubr.msk.f32.gmra.mrb[64].mxu1 %vm764_vm12, %v9120_v26  ;;  %5473 = vmatprep.mubr.msk.f32.mxu0 %vm6221_vm13, %v8982_v40 }
  0xc8   : > { %5484 = vmatprep.mubr.msk.f32.mxu1 %vm6221_vm13, %v8982_v40 }
 0x115   : > { %v4781_v43 = vpop.f32.mrb[0].mxu0 }
 0x116   : > { %v4816_v57 = vpop.f32.mrb[0].mxu1  ;;  %v4782_v54 = vpop.f32.mrb[1].mxu0 }
 0x117   : > { %v4783_v58 = vadd.f32 %v4782_v54, %v4781_v43  ;;  %v4817_v32 = vpop.f32.mrb[1].mxu1 }
 0x118   : > { %v4818_v37 = vadd.f32 %v4817_v32, %v4816_v57 }
 0x11a   : > { %v683_v14 = vadd.f32 %v4818_v37, %v4783_v58 }
 0x11c   : > { %v686_v22 = vmul.f32 0.015625, %v683_v14 }
 0x11d   : > { %v7000_v11 = vpop.f32.mrb[2].mxu0 }
 0x11e   : > { %v693_v39 = vadd.f32 %v4457_v29, %v686_v22  ;;  %v7002_v2 = vpop.f32.mrb[3].mxu0  ;;  %v7004_v55 = vpop.f32.mrb[2].mxu1 }
 0x11f   : > { %9121 = vst [vmem:[#allocation7_spill] sm:$0xff] %v7004_v55  ;;  %v7006_v3 = vpop.f32.mrb[3].mxu1 }
 0x120   : > { %9122 = vst [vmem:[#allocation8_spill] sm:$0xff] %v7006_v3  ;;  %5474 = vmatmul.mubr.msk.f32.vlgmr.msra.gmra.mrb[66].mxu0 %vm764_vm12, %v693_v39  ;;  %5485 = vmatmul.mubr.msk.f32.vlgmr.msra.gmra.mrb[66].mxu1 %vm764_vm12, %v693_v39  ;;  %v8995_v3 = vmov 1.0|1.0  }
 0x121   : > { %5826 = vmatpush3.bf16.msra.mxu0 %v6686_v7  ;;  %5495 = vmatprep.mubr.msk.f32.mxu0 %vm6221_vm13, %v8982_v40  ;;  %v7013_v15 = vpop.f32.mrb[4].mxu0 }
 0x122   : > { %5827 = vmatprep.subr.bf16.mxu0 %v8984_v6  ;;  %v7016_v21 = vpop.f32.mrb[5].mxu0  ;;  %v7018_v33 = vpop.f32.mrb[4].mxu1 }
 0x123   : > { %9123 = vst [vmem:[#allocation11_spill] sm:$0xff] %v7018_v33  ;;  %v7020_v34 = vpop.f32.mrb[5].mxu1 }
 0x124   : > { %9124 = vst [vmem:[#allocation14_spill] sm:$0xff] %v7020_v34  ;;  %v9168_v34 = vmov 0 }
 0x125   : > { %5829 = vmatpush3.bf16.msra.mxu0 %v6711_v47  ;;  %v7023_v50 = vpop.f32.mrb[6].mxu0 }
 0x126   : > { %v7025_v0 = vpop.f32.mrb[7].mxu0  ;;  %v7027_v7 = vpop.f32.mrb[6].mxu1 }
 0x127   : > { %9125 = vst [vmem:[#allocation15_spill] sm:$0xff] %v7027_v7  ;;  %v7029_v51 = vpop.f32.mrb[7].mxu1 }
 0x128   : > { %9126 = vst [vmem:[#allocation18_spill] sm:$0xff] %v7029_v51  ;;  %5496 = vmatmul.mubr.msk.f32.vlgmr.msra.gmra.mrb[68].mxu0 %vm764_vm12, %v693_v39 }
 0x129   : > { %v7032_v1 = vpop.f32.mrb[8].mxu0  ;;  %4665 = vmatprep.mubr.msk.f32.mxu0 %vm6658_vm4, %v8980_v42 }
 0x12a   : > { %v7037_v4 = vpop.f32.mrb[9].mxu0  ;;  %v7039_v17 = vpop.f32.mrb[8].mxu1 }
 0x12b   : > { %9127 = vst [vmem:[#allocation19_spill] sm:$0xff] %v7039_v17  ;;  %v7041_v47 = vpop.f32.mrb[9].mxu1 }
 0x12c   : > { %9128 = vst [vmem:[#allocation24_spill] sm:$0xff] %v7041_v47  ;;  %v490_v47 = vmul.u32 8, %v6542_v61 }
 0x12d   : > { %v7043_v35 = vpop.f32.mrb[10].mxu0 }
 0x12e   : > { %v7045_v36 = vpop.f32.mrb[11].mxu0  ;;  %v7047_v48 = vpop.f32.mrb[10].mxu1 }
 0x12f   : > { %9129 = vst [vmem:[#allocation25_spill] sm:$0xff] %v7047_v48  ;;  %v7049_v52 = vpop.f32.mrb[11].mxu1 }
 0x130   : > { %9130 = vst [vmem:[#allocation29_spill] sm:$0xff] %v7049_v52 }
 0x131   : > { %v7051_v16 = vpop.f32.mrb[12].mxu0 }
 0x132   : > { %v7053_v27 = vpop.f32.mrb[13].mxu0  ;;  %v7055_v53 = vpop.f32.mrb[12].mxu1 }
 0x133   : > { %9131 = vst [vmem:[#allocation30_spill] sm:$0xff] %v7055_v53  ;;  %v7057_v13 = vpop.f32.mrb[13].mxu1 }
 0x134   : > { %9132 = vst [vmem:[#allocation33_spill] sm:$0xff] %v7057_v13 }
 0x135   : > { %v7059_v45 = vpop.f32.mrb[14].mxu0 }
 0x136   : > { %v7061_v46 = vpop.f32.mrb[15].mxu0  ;;  %v7063_v31 = vpop.f32.mrb[14].mxu1 }
 0x137   : > { %9133 = vst [vmem:[#allocation34_spill] sm:$0xff] %v7063_v31  ;;  %v7065_v38 = vpop.f32.mrb[15].mxu1 }
 0x138   : > { %9134 = vst [vmem:[#allocation5_spill] sm:$0xff] %v7065_v38 }
 0x139   : > { %v7067_v5 = vpop.f32.mrb[16].mxu0 }
 0x13a   : > { %v7069_v63 = vpop.f32.mrb[17].mxu0  ;;  %v7071_v23 = vpop.f32.mrb[16].mxu1 }
 0x13b   : > { %9135 = vst [vmem:[#allocation6_spill] sm:$0xff] %v7071_v23  ;;  %v7073_v62 = vpop.f32.mrb[17].mxu1 }
 0x13c   : > { %9136 = vst [vmem:[#allocation9_spill] sm:$0xff] %v7073_v62 }
 0x13d   : > { %v7075_v8 = vpop.f32.mrb[18].mxu0 }
 0x13e   : > { %v7077_v20 = vpop.f32.mrb[19].mxu0  ;;  %v7079_v19 = vpop.f32.mrb[18].mxu1 }
 0x13f   : > { %9137 = vst [vmem:[#allocation10_spill] sm:$0xff] %v7079_v19  ;;  %v7081_v12 = vpop.f32.mrb[19].mxu1 }
 0x140   : > { %9138 = vst [vmem:[#allocation12_spill] sm:$0xff] %v7081_v12 }
 0x141   : > { %v7083_v10 = vpop.f32.mrb[20].mxu0 }
 0x142   : > { %v7085_v28 = vpop.f32.mrb[21].mxu0  ;;  %v7087_v49 = vpop.f32.mrb[20].mxu1 }
 0x143   : > { %9139 = vst [vmem:[#allocation13_spill] sm:$0xff] %v7087_v49  ;;  %v7089_v18 = vpop.f32.mrb[21].mxu1 }
 0x144   : > { %9140 = vst [vmem:[#allocation16_spill] sm:$0xff] %v7089_v18 }
 0x145   : > { %v7091_v9 = vpop.f32.mrb[22].mxu0 }
 0x146   : > { %v7093_v44 = vpop.f32.mrb[23].mxu0  ;;  %v7095_v25 = vpop.f32.mrb[22].mxu1 }
 0x147   : > { %9141 = vst [vmem:[#allocation17_spill] sm:$0xff] %v7095_v25  ;;  %v7097_v59 = vpop.f32.mrb[23].mxu1 }
 0x148   : > { %9142 = vst [vmem:[#allocation20_spill] sm:$0xff] %v7097_v59 }
 0x149   : > { %v7099_v60 = vpop.f32.mrb[24].mxu0 }
 0x14a   : > { %v7101_v26 = vpop.f32.mrb[25].mxu0  ;;  %v7103_v43 = vpop.f32.mrb[24].mxu1 }
 0x14b   : > { %9143 = vst [vmem:[#allocation22_spill] sm:$0xff] %v7103_v43  ;;  %v7105_v57 = vpop.f32.mrb[25].mxu1 }
 0x14c   : > { %9144 = vst [vmem:[#allocation26_spill] sm:$0xff] %v7105_v57 }
 0x14d   : > { %v7107_v54 = vpop.f32.mrb[26].mxu0 }
 0x14e   : > { %v7109_v58 = vpop.f32.mrb[27].mxu0  ;;  %v7111_v32 = vpop.f32.mrb[26].mxu1 }
 0x14f   : > { %9145 = vst [vmem:[#allocation27_spill] sm:$0xff] %v7111_v32  ;;  %v7113_v37 = vpop.f32.mrb[27].mxu1 }
 0x150   : > { %9146 = vst [vmem:[#allocation31_spill] sm:$0xff] %v7113_v37 }
 0x151   : > { %v7115_v14 = vpop.f32.mrb[28].mxu0 }
 0x152   : > { %v7117_v29 = vpop.f32.mrb[29].mxu0  ;;  %v7119_v22 = vpop.f32.mrb[28].mxu1 }
 0x153   : > { %9147 = vst [vmem:[#allocation32_spill] sm:$0xff] %v7119_v22  ;;  %v7121_v39 = vpop.f32.mrb[29].mxu1 }
 0x154   : > { %9148 = vst [vmem:[#allocation35_spill] sm:$0xff] %v7121_v39 }
 0x155   : > { %v7123_v42 = vpop.f32.mrb[30].mxu0 }
 0x156   : > { %v7125_v40 = vpop.f32.mrb[31].mxu0  ;;  %v7127_v6 = vpop.f32.mrb[30].mxu1 }
 0x157   : > { %9149 = vst [vmem:[#allocation36_spill] sm:$0xff] %v7127_v6  ;;  %v7129_v57 = vpop.f32.mrb[31].mxu1 }
 0x158   : > { %9150 = vst [vmem:[#allocation41_spill] sm:$0xff] %v7129_v57 }
 0x159   : > { %v7131_v43 = vpop.f32.mrb[32].mxu0 }
 0x15a   : > { %v7133_v32 = vpop.f32.mrb[33].mxu0  ;;  %v7135_v37 = vpop.f32.mrb[32].mxu1 }
 0x15b   : > { %9151 = vst [vmem:[#allocation42_spill] sm:$0xff] %v7135_v37  ;;  %v7137_v59 = vpop.f32.mrb[33].mxu1 }
 0x15c   : > { %9152 = vst [vmem:[#allocation43_spill] sm:$0xff] %v7137_v59 }
 0x15d   : > { %v7139_v25 = vpop.f32.mrb[34].mxu0 }
 0x15e   : > { %v7141_v22 = vpop.f32.mrb[35].mxu0  ;;  %v7143_v39 = vpop.f32.mrb[34].mxu1 }
 0x15f   : > { %9153 = vst [vmem:[#allocation44_spill] sm:$0xff] %v7143_v39  ;;  %v7145_v18 = vpop.f32.mrb[35].mxu1 }
 0x160   : > { %9154 = vst [vmem:[#allocation45_spill] sm:$0xff] %v7145_v18 }
 0x161   : > { %v7147_v49 = vpop.f32.mrb[36].mxu0 }
 0x162   : > { %v7149_v6 = vpop.f32.mrb[37].mxu0  ;;  %v7151_v57 = vpop.f32.mrb[36].mxu1 }
 0x163   : > { %9155 = vst [vmem:[#allocation46_spill] sm:$0xff] %v7151_v57  ;;  %v7153_v12 = vpop.f32.mrb[37].mxu1 }
 0x164   : > { %9156 = vst [vmem:[#allocation47_spill] sm:$0xff] %v7153_v12 }
 0x165   : > { %v7155_v19 = vpop.f32.mrb[38].mxu0 }
 0x166   : > { %v7157_v37 = vpop.f32.mrb[39].mxu0  ;;  %v7159_v59 = vpop.f32.mrb[38].mxu1 }
 0x167   : > { %9157 = vst [vmem:[#allocation48_spill] sm:$0xff] %v7159_v59  ;;  %v7161_v62 = vpop.f32.mrb[39].mxu1 }
 0x168   : > { %9158 = vst [vmem:[#allocation49_spill] sm:$0xff] %v7161_v62  ;;  %v495_v62 = vadd.s32 1, %v6542_v61 }
 0x169   : > { %v7163_v23 = vpop.f32.mrb[40].mxu0 }
 0x16a   : > { %v7165_v39 = vpop.f32.mrb[41].mxu0  ;;  %v7167_v18 = vpop.f32.mrb[40].mxu1  ;;  %v496_v17 = vmul.u32 8, %v495_v62 }
 0x16b   : > { %9159 = vst [vmem:[#allocation50_spill] sm:$0xff] %v7167_v18  ;;  %v7169_v38 = vpop.f32.mrb[41].mxu1  ;;  %v9165_v18 = vld [vmem:[#allocation21_spill] sm:$0xff] }
 0x16c   : > { %9160 = vst [vmem:[#allocation51_spill] sm:$0xff] %v7169_v38  ;;  %v485_v38 = vadd.s32 8, %v9165_v18  ;;  %vm491_vm14 = vcmp.ge.s32.totalorder %v9165_v18, %v490_v47  ;;  %vm497_vm0 = vcmp.lt.s32.totalorder %v9165_v18, %v496_v17  ;;  %v487_v62 = vadd.s32 24, %v9165_v18 }
 0x16d   : > { %v7171_v31 = vpop.f32.mrb[42].mxu0  ;;  %vm501_vm2 = vmand %vm491_vm14, %vm497_vm0 }
 0x16e   : > { %v7173_v57 = vpop.f32.mrb[43].mxu0  ;;  %v7175_v12 = vpop.f32.mrb[42].mxu1  ;;  %vm492_vm15 = vcmp.ge.s32.totalorder %v485_v38, %v490_v47  ;;  %vm498_vm1 = vcmp.lt.s32.totalorder %v485_v38, %v496_v17  ;;  %vm494_vm8 = vcmp.ge.s32.totalorder %v487_v62, %v490_v47  ;;  %vm500_vm14 = vcmp.lt.s32.totalorder %v487_v62, %v496_v17 }
 0x16f   : > { %9161 = vst [vmem:[#allocation52_spill] sm:$0xff] %v7175_v12  ;;  %v7177_v13 = vpop.f32.mrb[43].mxu1  ;;  %vm502_vm3 = vmand %vm492_vm15, %vm498_vm1 }
 0x170   : > { %9162 = vst [vmem:[#allocation53_spill] sm:$0xff] %v7177_v13  ;;  %vm7204_vm6 = vmpackc.low %vm502_vm3, %vm501_vm2  ;;  %vm2757_vm2 = vcmask 31744  }
 0x171   : > { %v7179_v53 = vpop.f32.mrb[44].mxu0  ;;  %v9169_v34 = vsel %vm7204_vm6, 4294967295, %v9168_v34  ;;  %5831 = vmatprep.subr.msk.bf16.mxu1 %vm7204_vm6, %v8995_v3  ;;  %vm504_vm0 = vmand %vm494_vm8, %vm500_vm14  ;;  %vm2962_vm14 = vcmask 1042434  }
 0x172   : > { %v7182_v59 = vpop.f32.mrb[45].mxu0  ;;  %v7184_v52 = vpop.f32.mrb[44].mxu1  ;;  %9170 = vst [vmem:[#allocation58_spill] sm:$0xff] %v9169_v34  ;;  %5833 = vmatpush3.bf16.msk.msra.mxu1 %vm7204_vm6, %v8995_v3 }
 0x173   : > { %9163 = vst [vmem:[#allocation54_spill] sm:$0xff] %v7184_v52  ;;  %v7186_v48 = vpop.f32.mrb[45].mxu1 }
 0x174   : > { %9164 = vst [vmem:[#allocation55_spill] sm:$0xff] %v7186_v48  ;;  %v486_v48 = vadd.s32 16, %v9165_v18 }
 0x175   : > { %v7190_v51 = vpop.f32.mrb[46].mxu0 }
 0x176   : > { %v7192_v12 = vpop.f32.mrb[47].mxu0  ;;  %v7194_v13 = vpop.f32.mrb[46].mxu1  ;;  %vm493_vm7 = vcmp.ge.s32.totalorder %v486_v48, %v490_v47  ;;  %vm499_vm9 = vcmp.lt.s32.totalorder %v486_v48, %v496_v17  ;;  %v9178_v17 = vmov 0.0|0.0  }
 0x177   : > { %9166 = vst [vmem:[#allocation56_spill] sm:$0xff] %v7194_v13  ;;  %v7198_v7 = vpop.f32.mrb[47].mxu1  ;;  %vm503_vm15 = vmand %vm493_vm7, %vm499_vm9  ;;  %vm3541_vm7 = vcmask 1043456   ;;  %vm2959_vm9 = vcmask 1041409  }
 0x178   : > { %9167 = vst [vmem:[#allocation57_spill] sm:$0xff] %v7198_v7  ;;  %vm7222_vm1 = vmpackc.low %vm504_vm0, %vm503_vm15  ;;  %vm2965_vm15 = vcmask 1043459   ;;  %vm2968_vm0 = vcmask 1044484  }
 0x179   : > { %v7202_v52 = vpop.f32.mrb[48].mxu0  ;;  %5835 = vmatprep.subr.msk.bf16.mxu1 %vm7222_vm1, %v8995_v3 }
 0x17a   : > { %v7208_v13 = vpop.f32.mrb[49].mxu0  ;;  %v7210_v33 = vpop.f32.mrb[48].mxu1  ;;  %5837 = vmatpush3.bf16.msk.msra.mxu1 %vm7222_vm1, %v8995_v3 }
 0x17b   : > { %9171 = vst [vmem:[#allocation59_spill] sm:$0xff] %v7210_v33  ;;  %v7215_v38 = vpop.f32.mrb[49].mxu1  ;;  %v9173_v33 = vmov 0  ;;  %5838 = vmatprep.subr.bf16.mxu1 %v9178_v17 }
 0x17c   : > { %9172 = vst [vmem:[#allocation60_spill] sm:$0xff] %v7215_v38  ;;  %v9174_v33 = vsel %vm7222_vm1, 4294967295, %v9173_v33 }
 0x17d   : > { %v7220_v7 = vpop.f32.mrb[50].mxu0  ;;  %9175 = vst [vmem:[#allocation61_spill] sm:$0xff] %v9174_v33 }
 0x17e   : > { %v7226_v55 = vpop.f32.mrb[51].mxu0  ;;  %v7228_v24 = vpop.f32.mrb[50].mxu1 }
 0x17f   : > { %9176 = vst [vmem:[#allocation62_spill] sm:$0xff] %v7228_v24  ;;  %v7233_v47 = vpop.f32.mrb[51].mxu1 }
 0x180   : > { %9177 = vst [vmem:[#allocation63_spill] sm:$0xff] %v7233_v47 }
 0x181   : > { %v7239_v48 = vpop.f32.mrb[52].mxu0 }
 0x182   : > { %v7241_v62 = vpop.f32.mrb[53].mxu0  ;;  %v7243_v38 = vpop.f32.mrb[52].mxu1 }
 0x183   : > { %9179 = vst [vmem:[#allocation64_spill] sm:$0xff] %v7243_v38  ;;  %v7245_v56 = vpop.f32.mrb[53].mxu1 }
 0x184   : > { %9180 = vst [vmem:[#allocation65_spill] sm:$0xff] %v7245_v56 }
 0x185   : > { %v7247_v24 = vpop.f32.mrb[54].mxu0 }
 0x186   : > { %9181 = vst [vmem:[#allocation66_spill] sm:$0xff] %v7247_v24  ;;  %v7249_v41 = vpop.f32.mrb[55].mxu0  ;;  %v7251_v30 = vpop.f32.mrb[54].mxu1 }
 0x187   : > { %9182 = vst [vmem:[#allocation67_spill] sm:$0xff] %v7249_v41  ;;  %9183 = vst [vmem:[#allocation68_spill] sm:$0xff] %v7251_v30  ;;  %v7253_v47 = vpop.f32.mrb[55].mxu1 }
 0x188   : > { %9184 = vst [vmem:[#allocation69_spill] sm:$0xff] %v7253_v47 }
 0x189   : > { %v7255_v61 = vpop.f32.mrb[56].mxu0 }
 0x18a   : > { %9185 = vst [vmem:[#allocation70_spill] sm:$0xff] %v7255_v61  ;;  %v7257_v3 = vpop.f32.mrb[57].mxu0  ;;  %v7259_v33 = vpop.f32.mrb[56].mxu1 }
 0x18b   : > { %9186 = vst [vmem:[#allocation71_spill] sm:$0xff] %v7257_v3  ;;  %9187 = vst [vmem:[#allocation72_spill] sm:$0xff] %v7259_v33  ;;  %v7261_v17 = vpop.f32.mrb[57].mxu1 }
 0x18c   : > { %9188 = vst [vmem:[#allocation73_spill] sm:$0xff] %v7261_v17 }
 0x18d   : > { %v7263_v34 = vpop.f32.mrb[58].mxu0 }
 0x18e   : > { %9189 = vst [vmem:[#allocation74_spill] sm:$0xff] %v7263_v34  ;;  %v7265_v38 = vpop.f32.mrb[59].mxu0  ;;  %v7267_v56 = vpop.f32.mrb[58].mxu1 }
 0x18f   : > { %9190 = vst [vmem:[#allocation75_spill] sm:$0xff] %v7265_v38  ;;  %9191 = vst [vmem:[#allocation76_spill] sm:$0xff] %v7267_v56  ;;  %v7269_v24 = vpop.f32.mrb[59].mxu1 }
 0x190   : > { %9192 = vst [vmem:[#allocation77_spill] sm:$0xff] %v7269_v24 }
 0x191   : > { %v7271_v41 = vpop.f32.mrb[60].mxu0 }
 0x192   : > { %9193 = vst [vmem:[#allocation78_spill] sm:$0xff] %v7271_v41  ;;  %v7273_v30 = vpop.f32.mrb[61].mxu0  ;;  %v7275_v47 = vpop.f32.mrb[60].mxu1 }
 0x193   : > { %9194 = vst [vmem:[#allocation79_spill] sm:$0xff] %v7275_v47  ;;  %v7277_v61 = vpop.f32.mrb[61].mxu1  ;;  %v7301_v47 = vsub.s32 0, %v9165_v18 }
 0x194   : > { %9195 = vst [vmem:[#allocation80_spill] sm:$0xff] %v7277_v61  ;;  %v7298_v61 = vld [vmem:[%s8942_s6] ss:$0 sm:$0xff] }
 0x195   : > { %v7279_v3 = vpop.f32.mrb[62].mxu0  ;;  %9201 = vst [vmem:[#allocation86_spill] sm:$0xff] %v7301_v47 }
 0x196   : > { %v7281_v33 = vpop.f32.mrb[63].mxu0  ;;  %v7283_v17 = vpop.f32.mrb[62].mxu1 }
 0x197   : > { %9196 = vst [vmem:[#allocation81_spill] sm:$0xff] %v7283_v17  ;;  %v7285_v34 = vpop.f32.mrb[63].mxu1  ;;  %v7305_v17 = vadd.f32 %v7000_v11, %v7298_v61  ;;  %v7325_v11 = vadd.f32 %v7298_v61, %v7025_v0  ;;  %v7345_v0 = vadd.f32 %v7051_v16, %v7298_v61  ;;  %v7369_v16 = vadd.f32 %v7075_v8, %v7298_v61 }
 0x198   : > { %9197 = vst [vmem:[#allocation82_spill] sm:$0xff] %v7285_v34  ;;  %v7309_v34 = vadd.f32 %v7298_v61, %v7002_v2  ;;  %v7329_v2 = vadd.f32 %v7032_v1, %v7298_v61  ;;  %v7349_v1 = vadd.f32 %v7298_v61, %v7053_v27  ;;  %v7373_v27 = vadd.f32 %v7298_v61, %v7077_v20 }
 0x199   : > { %v7287_v38 = vpop.f32.mrb[64].mxu0  ;;  %v7393_v8 = vadd.f32 %v7099_v60, %v7298_v61  ;;  %v7397_v20 = vadd.f32 %v7298_v61, %v7101_v26  ;;  %v7413_v60 = vadd.f32 %v7298_v61, %v7117_v29  ;;  %v7417_v26 = vadd.f32 %v7123_v42, %v7298_v61 }
 0x19a   : > { %v7289_v56 = vpop.f32.mrb[65].mxu0  ;;  %v7291_v24 = vpop.f32.mrb[64].mxu1  ;;  %v7437_v42 = vadd.f32 %v7298_v61, %v7141_v22  ;;  %v7456_v29 = vadd.f32 %v7298_v61, %v7157_v37  ;;  %v7477_v37 = vadd.f32 %v7179_v53, %v7298_v61 }
 0x19b   : > { %9198 = vst [vmem:[#allocation83_spill] sm:$0xff] %v7289_v56  ;;  %9199 = vst [vmem:[#allocation84_spill] sm:$0xff] %v7291_v24  ;;  %v7293_v41 = vpop.f32.mrb[65].mxu1  ;;  %v7313_v24 = vadd.f32 %v7013_v15, %v7298_v61  ;;  %v7321_v56 = vadd.f32 %v7023_v50, %v7298_v61  ;;  %v7333_v15 = vadd.f32 %v7298_v61, %v7037_v4 }
 0x19c   : > { %9200 = vst [vmem:[#allocation85_spill] sm:$0xff] %v7293_v41  ;;  %v7317_v41 = vadd.f32 %v7298_v61, %v7016_v21  ;;  %v7337_v21 = vadd.f32 %v7043_v35, %v7298_v61  ;;  %v7341_v50 = vadd.f32 %v7298_v61, %v7045_v36  ;;  %v7353_v4 = vadd.f32 %v7059_v45, %v7298_v61 }
 0x19d   : > { %9202 = vst [vmem:[#allocation87_spill] sm:$0xff] %v7313_v24  ;;  %9203 = vst [vmem:[#allocation88_spill] sm:$0xff] %v7321_v56  ;;  %v6224_v56 = vmov 1966171168   ;;  %v7357_v35 = vadd.f32 %v7298_v61, %v7061_v46  ;;  %v7361_v36 = vadd.f32 %v7067_v5, %v7298_v61  ;;  %v7377_v45 = vadd.f32 %v7083_v10, %v7298_v61 }
 0x19e   : > { %v1955_v24 = vunpack.c.l.s4 %v6224_v56  ;;  %v7365_v56 = vadd.f32 %v7298_v61, %v7069_v63  ;;  %v7381_v46 = vadd.f32 %v7298_v61, %v7085_v28  ;;  %v7385_v5 = vadd.f32 %v7091_v9, %v7298_v61  ;;  %9207 = vst [vmem:[#allocation92_spill] sm:$0xff] %v7477_v37 }
 0x19f   : > { %v7389_v63 = vadd.f32 %v7298_v61, %v7093_v44  ;;  %v7401_v10 = vadd.f32 %v7107_v54, %v7298_v61  ;;  %v7405_v9 = vadd.f32 %v7298_v61, %v7109_v58  ;;  %v7409_v44 = vadd.f32 %v7115_v14, %v7298_v61 }
 0x1a0   : > { %v1956_v28 = vunpack.c.0.s8 %v1955_v24  ;;  %v7421_v54 = vadd.f32 %v7298_v61, %v7125_v40  ;;  %v7425_v24 = vadd.f32 %v7131_v43, %v7298_v61  ;;  %v7429_v58 = vadd.f32 %v7298_v61, %v7133_v32 }
 0x1a1   : > { %v7433_v14 = vadd.f32 %v7139_v25, %v7298_v61  ;;  %v7441_v40 = vadd.f32 %v7147_v49, %v7298_v61  ;;  %v7445_v43 = vadd.f32 %v7298_v61, %v7149_v6  ;;  %v7449_v32 = vadd.f32 %v7155_v19, %v7298_v61  ;;  %v4588_v25 = vld [vmem:[%s8940_s4] ss:$0 sm:$0xff] }
 0x1a2   : > { %v7460_v49 = vadd.f32 %v7163_v23, %v7298_v61  ;;  %v7464_v6 = vadd.f32 %v7298_v61, %v7165_v39  ;;  %v1959_v22 = vsub.s32 %v1956_v28, %v9165_v18  ;;  %v7469_v19 = vadd.f32 %v7171_v31, %v7298_v61 }
 0x1a3   : > { %9204 = vst [vmem:[#allocation89_spill] sm:$0xff] %v7449_v32  ;;  %v7473_v32 = vadd.f32 %v7298_v61, %v7173_v57  ;;  %v7481_v23 = vadd.f32 %v7298_v61, %v7182_v59  ;;  %v7485_v28 = vadd.f32 %v7190_v51, %v7298_v61  ;;  %v7489_v31 = vadd.f32 %v7298_v61, %v7192_v12 }
 0x1a4   : > { %9205 = vst [vmem:[#allocation90_spill] sm:$0xff] %v7460_v49  ;;  %9206 = vst [vmem:[#allocation91_spill] sm:$0xff] %v7469_v19  ;;  %v7494_v37 = vadd.f32 %v7202_v52, %v7298_v61  ;;  %v7498_v59 = vadd.f32 %v7298_v61, %v7208_v13  ;;  %v7502_v51 = vadd.f32 %v7220_v7, %v7298_v61 }
 0x1a5   : > { %v7506_v12 = vadd.f32 %v7298_v61, %v7226_v55  ;;  %v7516_v13 = vadd.f32 %v7298_v61, %v7241_v62 }
 0x1a6   : > { %9208 = vst [vmem:[#allocation93_spill] sm:$0xff] %v7502_v51  ;;  %v9217_v51 = vld [vmem:[#allocation70_spill] sm:$0xff] }
 0x1a7   : > { %9209 = vst [vmem:[#allocation94_spill] sm:$0xff] %v7506_v12  ;;  %9212 = vst [vmem:[#allocation97_spill] sm:$0xff] %v7516_v13  ;;  %v9220_v13 = vld [vmem:[#allocation74_spill] sm:$0xff] }
 0x1a8   : > { %v7536_v12 = vadd.f32 %v9220_v13, %v7298_v61  ;;  %v7552_v13 = vadd.f32 %v7279_v3, %v7298_v61 }
 0x1aa   : > { %9227 = vst [vmem:[#allocation98_spill] sm:$0xff] %v7552_v13 }
 0x1f3   : > { %v1808_v39 = vpop.f32.mrb[66].mxu0  ;;  %v1878_v49 = vpop.f32.mrb[66].mxu1 }
 0x1f4   : > { %v1809_v57 = vadd.f32 %v4588_v25, %v1808_v39  ;;  %v1879_v18 = vadd.f32 %v7298_v61, %v1878_v49  ;;  %v5475_v19 = vpop.f32.mrb[67].mxu0  ;;  %v5486_v53 = vpop.f32.mrb[67].mxu1  ;;  %v7510_v25 = vadd.f32 %v7239_v48, %v7298_v61  ;;  %v9213_v39 = vld [vmem:[#allocation66_spill] sm:$0xff]  ;;  %v7528_v48 = vadd.f32 %v9217_v51, %v7298_v61 }
 0x1f5   : > { %v7520_v7 = vadd.f32 %v9213_v39, %v7298_v61  ;;  %v9215_v53 = vld [vmem:[#allocation67_spill] sm:$0xff]  ;;  %v7548_v51 = vadd.f32 %v7298_v61, %v7273_v30 }
 0x1f6   : > { %9210 = vst [vmem:[#allocation95_spill] sm:$0xff] %v7510_v25  ;;  %v1953_v49 = vcombine.high %v1809_v57, %v1809_v57  ;;  %v1960_v19 = vrot.slane %v1809_v57, %v1959_v22  ;;  %v7512_v52 = vmul.f32 %v1879_v18, %v1809_v57  ;;  %v7524_v55 = vadd.f32 %v7298_v61, %v9215_v53  ;;  %v9219_v25 = vld [vmem:[#allocation71_spill] sm:$0xff]  ;;  %v9224_v53 = vld [vmem:[#allocation78_spill] sm:$0xff] }
 0x1f7   : > { %9214 = vst [vmem:[#allocation66_spill] sm:$0xff] %v7520_v7  ;;  %9218 = vst [vmem:[#allocation70_spill] sm:$0xff] %v7528_v48  ;;  %v7532_v18 = vadd.f32 %v7298_v61, %v9219_v25  ;;  %v9222_v39 = vld [vmem:[#allocation75_spill] sm:$0xff] }
 0x1f8   : > { %9211 = vst [vmem:[#allocation96_spill] sm:$0xff] %v7512_v52  ;;  %9216 = vst [vmem:[#allocation67_spill] sm:$0xff] %v7524_v55  ;;  %v1967_v57 = vrot.slane %v1953_v49, %v1959_v22  ;;  %v1968_v52 = vcombine.high %v1960_v19, %v1960_v19  ;;  %v1976_v62 = vrot.slane %v1960_v19, %v1959_v22 }
 0x1f9   : > { %9221 = vst [vmem:[#allocation71_spill] sm:$0xff] %v7536_v12  ;;  %v7540_v7 = vadd.f32 %v7298_v61, %v9222_v39  ;;  %v7544_v55 = vadd.f32 %v9224_v53, %v7298_v61  ;;  %9226 = vst [vmem:[#allocation78_spill] sm:$0xff] %v7548_v51  ;;  %v7556_v39 = vadd.f32 %v7298_v61, %v7281_v33  ;;  %v9231_v51 = vld [vmem:[#allocation83_spill] sm:$0xff] }
 0x1fa   : > { %v1969_v25 = vcombine.high %v1967_v57, %v1967_v57  ;;  %v1983_v49 = vrot.slane %v1967_v57, %v1959_v22  ;;  %v1990_v48 = vrot.slane %v1968_v52, %v1959_v22  ;;  %v1998_v19 = vcombine.high %v1976_v62, %v1976_v62 }
 0x1fb   : > { %9223 = vst [vmem:[#allocation74_spill] sm:$0xff] %v7540_v7  ;;  %9225 = vst [vmem:[#allocation75_spill] sm:$0xff] %v7544_v55  ;;  %v7560_v53 = vadd.f32 %v7287_v38, %v7298_v61  ;;  %v2005_v55 = vrot.slane %v1976_v62, %v7301_v47  ;;  %v7563_v30 = vpop.f32.mrb[68].mxu0  ;;  %v7567_v52 = vadd.f32 %v7298_v61, %v9231_v51  ;;  %v9232_v51 = vld [vmem:[#allocation87_spill] sm:$0xff] }
 0x1fc   : > { %9228 = vst [vmem:[#allocation99_spill] sm:$0xff] %v7556_v39  ;;  %9230 = vst [vmem:[#allocation101_spill] sm:$0xff] %v7563_v30  ;;  %v1997_v57 = vrot.slane %v1969_v25, %v1959_v22  ;;  %v1999_v12 = vcombine.high %v1983_v49, %v1983_v49  ;;  %v2000_v3 = vcombine.high %v1990_v48, %v1990_v48  ;;  %v5497_v13 = vpop.f32.mrb[69].mxu0 }
 0x1fd   : > { %9229 = vst [vmem:[#allocation100_spill] sm:$0xff] %v7560_v53  ;;  %v2009_v7 = vrot.slane %v1990_v48, %v7301_v47  ;;  %v2013_v33 = vrot.slane %v1998_v19, %v7301_v47  ;;  %v2021_v39 = vrot.slane %v1983_v49, %v7301_v47  ;;  %v2042_v38 = vmul.f32 %v2005_v55, %v7309_v34  ;;  %v9233_v19 = vld [vmem:[#allocation88_spill] sm:$0xff] }
 0x1fe   : > { %v2001_v53 = vcombine.high %v1997_v57, %v1997_v57  ;;  %v2017_v62 = vrot.slane %v2000_v3, %v7301_v47  ;;  %v2025_v30 = vrot.slane %v1997_v57, %v7301_v47  ;;  %v7576_v61 = vrot.slane %v1999_v12, %v7301_v47 }
 0x1ff   : > { %5506 = vmatprep.mubr.msk.f32.mxu1 %vm764_vm12, %v2042_v38  ;;  %v2043_v22 = vmul.f32 %v2005_v55, %v7305_v17  ;;  %v2044_v48 = vmul.f32 %v2005_v55, %v7317_v41  ;;  %v2045_v25 = vmul.f32 %v2005_v55, %v9232_v51  ;;  %v2046_v49 = vmul.f32 %v2005_v55, %v7325_v11 }
 0x200   : > { %v7584_v34 = vrot.slane %v2001_v53, %v7301_v47  ;;  %v2047_v13 = vmul.f32 %v2005_v55, %v9233_v19  ;;  %v2048_v57 = vmul.f32 %v2005_v55, %v7333_v15  ;;  %v2049_v12 = vmul.f32 %v2005_v55, %v7329_v2  ;;  %v9255_v47 = vld [vmem:[#allocation98_spill] sm:$0xff] }
 0x201   : > { %5507 = vmatmul.mubr.msk.f32.vlgmr.msra.gmra.mrb[68].mxu1 %vm764_vm12, %v2043_v22  ;;  %v2050_v3 = vmul.f32 %v2009_v7, %v7341_v50  ;;  %v7592_v17 = vmul.f32 %v2009_v7, %v7337_v21  ;;  %v7595_v41 = vmul.f32 %v2009_v7, %v7349_v1  ;;  %v7598_v11 = vmul.f32 %v2009_v7, %v7345_v0 }
 0x202   : > { %5509 = vmatprep.mubr.msk.f32.mxu1 %vm764_vm12, %v2044_v48  ;;  %v9234_v53 = vmov 1.0|1.0   ;;  %v7605_v2 = vmul.f32 %v2009_v7, %v7357_v35  ;;  %v7608_v15 = vmul.f32 %v2009_v7, %v7353_v4  ;;  %v7611_v21 = vmul.f32 %v2009_v7, %v7365_v56 }
 0x203   : > { %5840 = vmatpush3.bf16.msk.msra.mxu1 %vm7204_vm6, %v9234_v53  ;;  %v7614_v50 = vmul.f32 %v2009_v7, %v7361_v36  ;;  %v7617_v0 = vmul.f32 %v2013_v33, %v7373_v27  ;;  %v7620_v1 = vmul.f32 %v2013_v33, %v7369_v16  ;;  %v7623_v55 = vmul.f32 %v2013_v33, %v7381_v46 }
 0x204   : > { %v9236_v35 = vmov 0.0|0.0   ;;  %v7627_v4 = vmul.f32 %v2013_v33, %v7377_v45  ;;  %v7630_v56 = vmul.f32 %v2013_v33, %v7389_v63  ;;  %v7633_v36 = vmul.f32 %v2013_v33, %v7385_v5 }
 0x205   : > { %5841 = vmatprep.subr.bf16.mxu1 %v9236_v35  ;;  %v7636_v27 = vmul.f32 %v2013_v33, %v7397_v20  ;;  %5510 = vmatmul.mubr.msk.f32.gmra.mrb[70].mxu1 %vm764_vm12, %v2045_v25  ;;  %v2065_v16 = vmul.f32 %v2013_v33, %v7393_v8  ;;  %v2066_v46 = vmul.f32 %v2017_v62, %v7405_v9  ;;  %v9238_v33 = vld [vmem:[#allocation89_spill] sm:$0xff]  ;;  %v9239_v51 = vmov 0.0  }
 0x206   : > { %v2067_v7 = vmul.f32 %v2017_v62, %v7401_v10  ;;  %v2068_v45 = vmul.f32 %v2017_v62, %v7413_v60  ;;  %5512 = vmatprep.mubr.msk.f32.mxu1 %vm764_vm12, %v2046_v49  ;;  %v2069_v63 = vmul.f32 %v2017_v62, %v7409_v44  ;;  %v2070_v5 = vmul.f32 %v2017_v62, %v7421_v54  ;;  %v9245_v60 = vld [vmem:[#allocation97_spill] sm:$0xff] }
 0x207   : > { %v2071_v22 = vmul.f32 %v2017_v62, %v7417_v26  ;;  %v2072_v20 = vmul.f32 %v2017_v62, %v7429_v58  ;;  %v2073_v48 = vmul.f32 %v2017_v62, %v7425_v24  ;;  %v2074_v8 = vmul.f32 %v2021_v39, %v7437_v42  ;;  %5843 = vmatpush3.bf16.msk.msra.mxu1 %vm7222_vm1, %v9234_v53  ;;  %v9240_v24 = vld [vmem:[#allocation90_spill] sm:$0xff] }
 0x208   : > { %v2075_v9 = vmul.f32 %v2021_v39, %v7433_v14  ;;  %v2076_v10 = vmul.f32 %v2021_v39, %v7445_v43  ;;  %v2077_v44 = vmul.f32 %v2021_v39, %v7441_v40  ;;  %v2078_v54 = vmul.f32 %v2021_v39, %v7456_v29  ;;  %5711 = vmatprep.subr.mxu1 %v9239_v51  ;;  %v9241_v43 = vld [vmem:[#allocation91_spill] sm:$0xff]  ;;  %v9242_v40 = vld [vmem:[#allocation92_spill] sm:$0xff]  ;;  %v9243_v53 = vld [vmem:[#allocation94_spill] sm:$0xff] }
 0x209   : > { %v2079_v26 = vmul.f32 %v2021_v39, %v9238_v33  ;;  %v2080_v58 = vmul.f32 %v2021_v39, %v7464_v6  ;;  %5513 = vmatmul.mubr.msk.f32.gmra.mrb[72].mxu1 %vm764_vm12, %v2047_v13  ;;  %v2081_v14 = vmul.f32 %v2021_v39, %v9240_v24  ;;  %v2082_v42 = vmul.f32 %v2025_v30, %v7473_v32  ;;  %v9244_v32 = vld [vmem:[#allocation93_spill] sm:$0xff]  ;;  %v9247_v24 = vld [vmem:[#allocation67_spill] sm:$0xff] }
 0x20a   : > { %v2083_v62 = vmul.f32 %v2025_v30, %v9241_v43  ;;  %v2084_v25 = vmul.f32 %v2025_v30, %v7481_v23  ;;  %5515 = vmatprep.mubr.msk.f32.mxu1 %vm764_vm12, %v2048_v57  ;;  %v2085_v29 = vmul.f32 %v2025_v30, %v9242_v40  ;;  %v2086_v49 = vmul.f32 %v2025_v30, %v7489_v31  ;;  %v9246_v57 = vld [vmem:[#allocation95_spill] sm:$0xff]  ;;  %v9250_v40 = vld [vmem:[#allocation74_spill] sm:$0xff] }
 0x20b   : > { %v2087_v6 = vmul.f32 %v2025_v30, %v7485_v28  ;;  %v2088_v19 = vmul.f32 %v2025_v30, %v7498_v59  ;;  %v2089_v13 = vmul.f32 %v2025_v30, %v7494_v37  ;;  %v2090_v39 = vmul.f32 %v7576_v61, %v9243_v53  ;;  %v9248_v28 = vld [vmem:[#allocation66_spill] sm:$0xff] }
 0x20c   : > { %v2091_v38 = vmul.f32 %v7576_v61, %v9244_v32  ;;  %v2092_v23 = vmul.f32 %v7576_v61, %v9245_v60  ;;  %v2093_v33 = vmul.f32 %v7576_v61, %v9246_v57  ;;  %v2094_v31 = vmul.f32 %v7576_v61, %v9247_v24  ;;  %v9249_v30 = vld [vmem:[#allocation70_spill] sm:$0xff]  ;;  %v9251_v32 = vld [vmem:[#allocation71_spill] sm:$0xff] }
 0x20d   : > { %v2095_v59 = vmul.f32 %v7576_v61, %v9248_v28  ;;  %v2096_v37 = vmul.f32 %v7576_v61, %v7532_v18  ;;  %5516 = vmatmul.mubr.msk.f32.gmra.mrb[74].mxu1 %vm764_vm12, %v2049_v12  ;;  %v2097_v43 = vmul.f32 %v7576_v61, %v9249_v30  ;;  %v2098_v53 = vmul.f32 %v7584_v34, %v9250_v40  ;;  %v9252_v57 = vld [vmem:[#allocation78_spill] sm:$0xff]  ;;  %v9253_v28 = vld [vmem:[#allocation75_spill] sm:$0xff]  ;;  %v9256_v40 = vld [vmem:[#allocation100_spill] sm:$0xff] }
 0x20e   : > { %v2099_v60 = vmul.f32 %v7584_v34, %v9251_v32  ;;  %v2100_v24 = vmul.f32 %v7584_v34, %v9252_v57  ;;  %5518 = vmatprep.mubr.msk.f32.mxu1 %vm764_vm12, %v2050_v3  ;;  %v2101_v35 = vmul.f32 %v7584_v34, %v9253_v28  ;;  %v9254_v18 = vld [vmem:[#allocation99_spill] sm:$0xff]  ;;  %v2103_v61 = vmul.f32 %v7584_v34, %v9255_v47  ;;  %v9257_v47 = vld [vmem:[#allocation96_spill] sm:$0xff] }
 0x20f   : > { %v2102_v12 = vmul.f32 %v7584_v34, %v9254_v18  ;;  %v2104_v30 = vmul.f32 %v7584_v34, %v7567_v52  ;;  %v2105_v32 = vmul.f32 %v7584_v34, %v9256_v40  ;;  %vm2971_vm1 = vcmask 1045509  }
 0x211   : > { %5519 = vmatmul.mubr.msk.f32.gmra.mrb[76].mxu1 %vm764_vm12, %v7592_v17 }
 0x212   : > { %5521 = vmatprep.mubr.msk.f32.mxu1 %vm764_vm12, %v7595_v41 }
 0x215   : > { %5522 = vmatmul.mubr.msk.f32.gmra.mrb[78].mxu1 %vm764_vm12, %v7598_v11 }
 0x216   : > { %5524 = vmatprep.mubr.msk.f32.mxu1 %vm764_vm12, %v7605_v2 }
 0x219   : > { %5525 = vmatmul.mubr.msk.f32.gmra.mrb[80].mxu1 %vm764_vm12, %v7608_v15 }
 0x21a   : > { %5527 = vmatprep.mubr.msk.f32.mxu1 %vm764_vm12, %v7611_v21 }
 0x21d   : > { %5528 = vmatmul.mubr.msk.f32.gmra.mrb[82].mxu1 %vm764_vm12, %v7614_v50 }
 0x21e   : > { %5530 = vmatprep.mubr.msk.f32.mxu1 %vm764_vm12, %v7617_v0 }
 0x221   : > { %5531 = vmatmul.mubr.msk.f32.gmra.mrb[84].mxu1 %vm764_vm12, %v7620_v1 }
 0x222   : > { %5533 = vmatprep.mubr.msk.f32.mxu1 %vm764_vm12, %v7623_v55 }
 0x225   : > { %5534 = vmatmul.mubr.msk.f32.gmra.mrb[86].mxu1 %vm764_vm12, %v7627_v4 }
 0x226   : > { %5536 = vmatprep.mubr.msk.f32.mxu1 %vm764_vm12, %v7630_v56 }
 0x229   : > { %5537 = vmatmul.mubr.msk.f32.gmra.mrb[88].mxu1 %vm764_vm12, %v7633_v36 }
 0x22a   : > { %5539 = vmatprep.mubr.msk.f32.mxu1 %vm764_vm12, %v7636_v27 }
 0x22d   : > { %5540 = vmatmul.mubr.msk.f32.gmra.mrb[90].mxu1 %vm764_vm12, %v2065_v16 }
 0x22e   : > { %5542 = vmatprep.mubr.msk.f32.mxu1 %vm764_vm12, %v2066_v46 }
 0x231   : > { %5543 = vmatmul.mubr.msk.f32.gmra.mrb[92].mxu1 %vm764_vm12, %v2067_v7 }
 0x232   : > { %5545 = vmatprep.mubr.msk.f32.mxu1 %vm764_vm12, %v2068_v45 }
 0x235   : > { %5546 = vmatmul.mubr.msk.f32.gmra.mrb[94].mxu1 %vm764_vm12, %v2069_v63 }
 0x236   : > { %5548 = vmatprep.mubr.msk.f32.mxu1 %vm764_vm12, %v2070_v5 }
 0x239   : > { %5549 = vmatmul.mubr.msk.f32.gmra.mrb[96].mxu1 %vm764_vm12, %v2071_v22 }
 0x23a   : > { %5551 = vmatprep.mubr.msk.f32.mxu1 %vm764_vm12, %v2072_v20 }
 0x23d   : > { %5552 = vmatmul.mubr.msk.f32.gmra.mrb[98].mxu1 %vm764_vm12, %v2073_v48 }
 0x23e   : > { %5554 = vmatprep.mubr.msk.f32.mxu1 %vm764_vm12, %v2074_v8 }
 0x241   : > { %5555 = vmatmul.mubr.msk.f32.gmra.mrb[100].mxu1 %vm764_vm12, %v2075_v9 }
 0x242   : > { %5557 = vmatprep.mubr.msk.f32.mxu1 %vm764_vm12, %v2076_v10 }
 0x245   : > { %5558 = vmatmul.mubr.msk.f32.gmra.mrb[102].mxu1 %vm764_vm12, %v2077_v44 }
 0x246   : > { %5560 = vmatprep.mubr.msk.f32.mxu1 %vm764_vm12, %v2078_v54 }
 0x249   : > { %5561 = vmatmul.mubr.msk.f32.gmra.mrb[104].mxu1 %vm764_vm12, %v2079_v26 }
 0x24a   : > { %5563 = vmatprep.mubr.msk.f32.mxu1 %vm764_vm12, %v2080_v58 }
 0x24d   : > { %5564 = vmatmul.mubr.msk.f32.gmra.mrb[106].mxu1 %vm764_vm12, %v2081_v14 }
 0x24e   : > { %5566 = vmatprep.mubr.msk.f32.mxu1 %vm764_vm12, %v2082_v42 }
 0x251   : > { %5567 = vmatmul.mubr.msk.f32.gmra.mrb[108].mxu1 %vm764_vm12, %v2083_v62 }
 0x252   : > { %5569 = vmatprep.mubr.msk.f32.mxu1 %vm764_vm12, %v2084_v25 }
 0x255   : > { %5570 = vmatmul.mubr.msk.f32.gmra.mrb[110].mxu1 %vm764_vm12, %v2085_v29 }
 0x256   : > { %5572 = vmatprep.mubr.msk.f32.mxu1 %vm764_vm12, %v2086_v49 }
 0x259   : > { %5573 = vmatmul.mubr.msk.f32.gmra.mrb[112].mxu1 %vm764_vm12, %v2087_v6 }
 0x25a   : > { %5575 = vmatprep.mubr.msk.f32.mxu1 %vm764_vm12, %v2088_v19 }
 0x25d   : > { %5576 = vmatmul.mubr.msk.f32.gmra.mrb[114].mxu1 %vm764_vm12, %v2089_v13 }
 0x25e   : > { %5578 = vmatprep.mubr.msk.f32.mxu1 %vm764_vm12, %v2090_v39 }
 0x261   : > { %5579 = vmatmul.mubr.msk.f32.gmra.mrb[116].mxu1 %vm764_vm12, %v2091_v38 }
 0x262   : > { %5581 = vmatprep.mubr.msk.f32.mxu1 %vm764_vm12, %v2092_v23 }
 0x265   : > { %5582 = vmatmul.mubr.msk.f32.gmra.mrb[118].mxu1 %vm764_vm12, %v2093_v33 }
 0x266   : > { %5584 = vmatprep.mubr.msk.f32.mxu1 %vm764_vm12, %v2094_v31 }
 0x269   : > { %5585 = vmatmul.mubr.msk.f32.gmra.mrb[120].mxu1 %vm764_vm12, %v2095_v59 }
 0x26a   : > { %5587 = vmatprep.mubr.msk.f32.mxu1 %vm764_vm12, %v2096_v37 }
 0x26d   : > { %5588 = vmatmul.mubr.msk.f32.gmra.mrb[122].mxu1 %vm764_vm12, %v2097_v43 }
 0x26e   : > { %5590 = vmatprep.mubr.msk.f32.mxu1 %vm764_vm12, %v2098_v53 }
 0x271   : > { %5591 = vmatmul.mubr.msk.f32.gmra.mrb[124].mxu1 %vm764_vm12, %v2099_v60 }
 0x272   : > { %5593 = vmatprep.mubr.msk.f32.mxu1 %vm764_vm12, %v2100_v24 }
 0x275   : > { %5594 = vmatmul.mubr.msk.f32.gmra.mrb[126].mxu1 %vm764_vm12, %v2101_v35 }
 0x276   : > { %5596 = vmatprep.mubr.msk.f32.mxu1 %vm764_vm12, %v2102_v12  ;;  %v9258_v12 = vld [vmem:[#allocation21_spill] sm:$0xff] }
 0x279   : > { %5597 = vmatmul.mubr.msk.f32.gmra.mrb[128].mxu1 %vm764_vm12, %v2103_v61  ;;  %v513_v61 = vmul.u32 8, %v9258_v12 }
 0x27a   : > { %5599 = vmatprep.mubr.msk.f32.mxu1 %vm764_vm12, %v2104_v30  ;;  %v9259_v30 = vld [vmem:[#allocation28_spill] sm:$0xff] }
 0x27b   : > { %v516_v40 = vmul.u32 8, %v9259_v30 }
 0x27d   : > { %5600 = vmatmul.mubr.msk.f32.gmra.mrb[130].mxu1 %vm764_vm12, %v2105_v32 }
 0x27e   : > { %5610 = vmatprep.mubr.msk.f32.mxu1 %vm6221_vm13, %v9239_v51 }
 0x281   : > { %5611 = vmatmul.mubr.msk.f32.vlgmr.msra.gmra.mrb[132].mxu1 %vm764_vm12, %v9257_v47 }
 0x282   : > { %5713 = vmatprep.mubr.msk.f32.mxu1 %vm6221_vm13, %v9239_v51 }
 0x2d4   : > { %v7780_v52 = vpop.f32.mrb[68].mxu1 }
 0x2d5   : > { %v2759_v34 = vsel %vm2757_vm2, %v7780_v52, -inf  ;;  %v7784_v3 = vpop.f32.mrb[69].mxu1 }
 0x2d6   : > { %v2758_v17 = vsel %vm2757_vm2, %v7784_v3, -inf }
 0x2d7   : > { %v2760_v41 = vmax.f32 %v2758_v17, %v2759_v34  ;;  %v9260_v17 = vld [vmem:[#allocation23_spill] sm:$0xff] }
 0x2d8   : > { %v7788_v11 = vpop.f32.mrb[70].mxu1  ;;  %vm514_vm3 = vcmp.ge.s32.totalorder %v9260_v17, %v513_v61  ;;  %vm517_vm6 = vcmp.lt.s32.totalorder %v9260_v17, %v516_v40 }
 0x2d9   : > { %v7790_v2 = vpop.f32.mrb[71].mxu1  ;;  %v2763_v50 = vsel %vm2757_vm2, %v7788_v11, -inf  ;;  %vm518_vm8 = vmand %vm514_vm3, %vm517_vm6  ;;  %vm2974_vm3 = vcmask 1046534   ;;  %vm2977_vm6 = vcmask 1047559  }
 0x2da   : > { %v2761_v15 = vsel %vm2757_vm2, %v7790_v2, -inf }
 0x2db   : > { %v2762_v21 = vmax.f32 %v2760_v41, %v2761_v15 }
 0x2dc   : > { %v7796_v0 = vpop.f32.mrb[72].mxu1 }
 0x2dd   : > { %v7798_v1 = vpop.f32.mrb[73].mxu1  ;;  %v2764_v55 = vmax.f32 %v2762_v21, %v2763_v50  ;;  %v2767_v56 = vsel %vm2757_vm2, %v7796_v0, -inf  ;;  %v7879_v50 = vsel %vm518_vm8, 1.0, %v9239_v51 }
 0x2de   : > { %v2765_v35 = vsel %vm2757_vm2, %v7798_v1, -inf  ;;  %9261 = vst [vmem:[#allocation83_spill] sm:$0xff] %v7879_v50  ;;  %5712 = vmatpush3.msk.msra.mxu1 %vm3541_vm7, %v7879_v50 }
 0x2df   : > { %v2766_v4 = vmax.f32 %v2764_v55, %v2765_v35 }
 0x2e0   : > { %v7804_v36 = vpop.f32.mrb[74].mxu1 }
 0x2e1   : > { %v7806_v27 = vpop.f32.mrb[75].mxu1  ;;  %v2768_v16 = vmax.f32 %v2766_v4, %v2767_v56  ;;  %v2771_v45 = vsel %vm2757_vm2, %v7804_v36, -inf }
 0x2e2   : > { %v2769_v46 = vsel %vm2757_vm2, %v7806_v27, -inf }
 0x2e3   : > { %v2770_v7 = vmax.f32 %v2768_v16, %v2769_v46 }
 0x2e4   : > { %v7812_v63 = vpop.f32.mrb[76].mxu1 }
 0x2e5   : > { %v7814_v5 = vmax.f32 %v2770_v7, %v2771_v45  ;;  %v2780_v22 = vsel %vm2757_vm2, %v7812_v63, -inf  ;;  %v7818_v20 = vpop.f32.mrb[77].mxu1 }
 0x2e6   : > { %v2779_v48 = vsel %vm2757_vm2, %v7818_v20, -inf }
 0x2e7   : > { %v2781_v8 = vmax.f32 %v2779_v48, %v2780_v22 }
 0x2e8   : > { %v7822_v9 = vpop.f32.mrb[78].mxu1 }
 0x2e9   : > { %v7824_v10 = vpop.f32.mrb[79].mxu1  ;;  %v2784_v26 = vsel %vm2757_vm2, %v7822_v9, -inf }
 0x2ea   : > { %v2782_v44 = vsel %vm2757_vm2, %v7824_v10, -inf }
 0x2eb   : > { %v2783_v54 = vmax.f32 %v2781_v8, %v2782_v44 }
 0x2ec   : > { %v7830_v58 = vpop.f32.mrb[80].mxu1 }
 0x2ed   : > { %v7832_v14 = vpop.f32.mrb[81].mxu1  ;;  %v2785_v42 = vmax.f32 %v2783_v54, %v2784_v26  ;;  %v2788_v29 = vsel %vm2757_vm2, %v7830_v58, -inf }
 0x2ee   : > { %v2786_v62 = vsel %vm2757_vm2, %v7832_v14, -inf }
 0x2ef   : > { %v2787_v25 = vmax.f32 %v2785_v42, %v2786_v62 }
 0x2f0   : > { %v7838_v49 = vpop.f32.mrb[82].mxu1 }
 0x2f1   : > { %v7840_v6 = vpop.f32.mrb[83].mxu1  ;;  %v2789_v19 = vmax.f32 %v2787_v25, %v2788_v29  ;;  %v2792_v38 = vsel %vm2757_vm2, %v7838_v49, -inf }
 0x2f2   : > { %v2790_v13 = vsel %vm2757_vm2, %v7840_v6, -inf }
 0x2f3   : > { %v2791_v39 = vmax.f32 %v2789_v19, %v2790_v13 }
 0x2f4   : > { %v7846_v23 = vpop.f32.mrb[84].mxu1 }
 0x2f5   : > { %v7848_v33 = vmax.f32 %v2791_v39, %v2792_v38  ;;  %v2801_v31 = vsel %vm2757_vm2, %v7846_v23, -inf  ;;  %v7852_v59 = vpop.f32.mrb[85].mxu1 }
 0x2f6   : > { %v2800_v37 = vsel %vm2757_vm2, %v7852_v59, -inf }
 0x2f7   : > { %v2802_v43 = vmax.f32 %v2800_v37, %v2801_v31 }
 0x2f8   : > { %v7856_v53 = vpop.f32.mrb[86].mxu1 }
 0x2f9   : > { %v7858_v60 = vpop.f32.mrb[87].mxu1  ;;  %v2805_v28 = vsel %vm2757_vm2, %v7856_v53, -inf }
 0x2fa   : > { %v2803_v57 = vsel %vm2757_vm2, %v7858_v60, -inf }
 0x2fb   : > { %v2804_v24 = vmax.f32 %v2802_v43, %v2803_v57 }
 0x2fc   : > { %v7864_v18 = vpop.f32.mrb[88].mxu1 }
 0x2fd   : > { %v7868_v32 = vpop.f32.mrb[89].mxu1  ;;  %v2806_v47 = vmax.f32 %v2804_v24, %v2805_v28  ;;  %v2809_v15 = vsel %vm2757_vm2, %v7864_v18, -inf }
 0x2fe   : > { %v2807_v34 = vsel %vm2757_vm2, %v7868_v32, -inf }
 0x2ff   : > { %v2808_v41 = vmax.f32 %v2806_v47, %v2807_v34 }
 0x300   : > { %v7876_v21 = vpop.f32.mrb[90].mxu1 }
 0x301   : > { %v7881_v55 = vpop.f32.mrb[91].mxu1  ;;  %v2810_v35 = vmax.f32 %v2808_v41, %v2809_v15  ;;  %v2813_v16 = vsel %vm2757_vm2, %v7876_v21, -inf }
 0x302   : > { %v2811_v4 = vsel %vm2757_vm2, %v7881_v55, -inf }
 0x303   : > { %v2812_v56 = vmax.f32 %v2810_v35, %v2811_v4 }
 0x304   : > { %v7889_v46 = vpop.f32.mrb[92].mxu1 }
 0x305   : > { %v7891_v7 = vmax.f32 %v2812_v56, %v2813_v16  ;;  %v2822_v45 = vsel %vm2757_vm2, %v7889_v46, -inf  ;;  %v7895_v22 = vpop.f32.mrb[93].mxu1 }
 0x306   : > { %v2821_v48 = vsel %vm2757_vm2, %v7895_v22, -inf }
 0x307   : > { %v2823_v8 = vmax.f32 %v2821_v48, %v2822_v45 }
 0x308   : > { %v7899_v44 = vpop.f32.mrb[94].mxu1 }
 0x309   : > { %v7901_v54 = vpop.f32.mrb[95].mxu1  ;;  %v2826_v62 = vsel %vm2757_vm2, %v7899_v44, -inf }
 0x30a   : > { %v2824_v26 = vsel %vm2757_vm2, %v7901_v54, -inf }
 0x30b   : > { %v2825_v42 = vmax.f32 %v2823_v8, %v2824_v26 }
 0x30c   : > { %v7907_v25 = vpop.f32.mrb[96].mxu1 }
 0x30d   : > { %v7909_v29 = vpop.f32.mrb[97].mxu1  ;;  %v2827_v19 = vmax.f32 %v2825_v42, %v2826_v62  ;;  %v2830_v38 = vsel %vm2757_vm2, %v7907_v25, -inf }
 0x30e   : > { %v2828_v13 = vsel %vm2757_vm2, %v7909_v29, -inf }
 0x30f   : > { %v2829_v39 = vmax.f32 %v2827_v19, %v2828_v13 }
 0x310   : > { %v7915_v31 = vpop.f32.mrb[98].mxu1 }
 0x311   : > { %v7917_v37 = vpop.f32.mrb[99].mxu1  ;;  %v2831_v43 = vmax.f32 %v2829_v39, %v2830_v38  ;;  %v2834_v28 = vsel %vm2757_vm2, %v7915_v31, -inf }
 0x312   : > { %v2832_v57 = vsel %vm2757_vm2, %v7917_v37, -inf }
 0x313   : > { %v2833_v24 = vmax.f32 %v2831_v43, %v2832_v57 }
 0x314   : > { %v7923_v12 = vpop.f32.mrb[100].mxu1 }
 0x315   : > { %9262 = vst [vmem:[#allocation87_spill] sm:$0xff] %v7923_v12  ;;  %v7925_v61 = vmax.f32 %v2833_v24, %v2834_v28  ;;  %v2843_v30 = vsel %vm2757_vm2, %v7923_v12, -inf  ;;  %v7929_v40 = vpop.f32.mrb[101].mxu1 }
 0x316   : > { %9263 = vst [vmem:[#allocation88_spill] sm:$0xff] %v7929_v40  ;;  %v2842_v47 = vsel %vm2757_vm2, %v7929_v40, -inf }
 0x317   : > { %v2844_v34 = vmax.f32 %v2842_v47, %v2843_v30 }
 0x318   : > { %v7933_v17 = vpop.f32.mrb[102].mxu1 }
 0x319   : > { %9264 = vst [vmem:[#allocation58_spill] sm:$0xff] %v7933_v17  ;;  %v7935_v41 = vpop.f32.mrb[103].mxu1  ;;  %v2847_v4 = vsel %vm2757_vm2, %v7933_v17, -inf }
 0x31a   : > { %9265 = vst [vmem:[#allocation61_spill] sm:$0xff] %v7935_v41  ;;  %v2845_v15 = vsel %vm2757_vm2, %v7935_v41, -inf }
 0x31b   : > { %v2846_v35 = vmax.f32 %v2844_v34, %v2845_v15 }
 0x31c   : > { %v7941_v56 = vpop.f32.mrb[104].mxu1 }
 0x31d   : > { %9266 = vst [vmem:[#allocation89_spill] sm:$0xff] %v7941_v56  ;;  %v7943_v16 = vpop.f32.mrb[105].mxu1  ;;  %v2848_v45 = vmax.f32 %v2846_v35, %v2847_v4  ;;  %v2851_v26 = vsel %vm2757_vm2, %v7941_v56, -inf }
 0x31e   : > { %9267 = vst [vmem:[#allocation90_spill] sm:$0xff] %v7943_v16  ;;  %v2849_v48 = vsel %vm2757_vm2, %v7943_v16, -inf }
 0x31f   : > { %v2850_v8 = vmax.f32 %v2848_v45, %v2849_v48 }
 0x320   : > { %v7949_v42 = vpop.f32.mrb[106].mxu1 }
 0x321   : > { %9268 = vst [vmem:[#allocation91_spill] sm:$0xff] %v7949_v42  ;;  %v7951_v62 = vpop.f32.mrb[107].mxu1  ;;  %v2852_v19 = vmax.f32 %v2850_v8, %v2851_v26  ;;  %v2855_v38 = vsel %vm2757_vm2, %v7949_v42, -inf }
 0x322   : > { %9269 = vst [vmem:[#allocation92_spill] sm:$0xff] %v7951_v62  ;;  %v2853_v13 = vsel %vm2757_vm2, %v7951_v62, -inf }
 0x323   : > { %v2854_v39 = vmax.f32 %v2852_v19, %v2853_v13 }
 0x324   : > { %v7957_v43 = vpop.f32.mrb[108].mxu1 }
 0x325   : > { %9270 = vst [vmem:[#allocation94_spill] sm:$0xff] %v7957_v43  ;;  %v2856_v57 = vmax.f32 %v2854_v39, %v2855_v38  ;;  %v2864_v24 = vsel %vm2757_vm2, %v7957_v43, -inf  ;;  %v7961_v28 = vpop.f32.mrb[109].mxu1 }
 0x326   : > { %9271 = vst [vmem:[#allocation93_spill] sm:$0xff] %v7961_v28  ;;  %v2863_v30 = vsel %vm2757_vm2, %v7961_v28, -inf }
 0x327   : > { %v2865_v47 = vmax.f32 %v2863_v30, %v2864_v24 }
 0x328   : > { %v7965_v34 = vpop.f32.mrb[110].mxu1 }
 0x329   : > { %9272 = vst [vmem:[#allocation97_spill] sm:$0xff] %v7965_v34  ;;  %v7967_v15 = vpop.f32.mrb[111].mxu1  ;;  %v2868_v45 = vsel %vm2757_vm2, %v7965_v34, -inf  ;;  %v2815_v34 = vrot.slane %v7891_v7, 4 }
 0x32a   : > { %9273 = vst [vmem:[#allocation95_spill] sm:$0xff] %v7967_v15  ;;  %v2866_v35 = vsel %vm2757_vm2, %v7967_v15, -inf }
 0x32b   : > { %v2867_v4 = vmax.f32 %v2865_v47, %v2866_v35 }
 0x32c   : > { %v7973_v48 = vpop.f32.mrb[112].mxu1 }
 0x32d   : > { %9274 = vst [vmem:[#allocation67_spill] sm:$0xff] %v7973_v48  ;;  %v7975_v8 = vpop.f32.mrb[113].mxu1  ;;  %v2869_v26 = vmax.f32 %v2867_v4, %v2868_v45  ;;  %v2872_v39 = vsel %vm2757_vm2, %v7973_v48, -inf }
 0x32e   : > { %9275 = vst [vmem:[#allocation66_spill] sm:$0xff] %v7975_v8  ;;  %v2870_v19 = vsel %vm2757_vm2, %v7975_v8, -inf  ;;  %v2773_v8 = vrot.slane %v7814_v5, 4 }
 0x32f   : > { %v2871_v13 = vmax.f32 %v2869_v26, %v2870_v19 }
 0x330   : > { %v7981_v38 = vpop.f32.mrb[114].mxu1  ;;  %v2774_v62 = vmax.f32 %v7814_v5, %v2773_v8 }
 0x331   : > { %9276 = vst [vmem:[#allocation70_spill] sm:$0xff] %v7981_v38  ;;  %v7983_v24 = vpop.f32.mrb[115].mxu1  ;;  %v2873_v30 = vmax.f32 %v2871_v13, %v2872_v39  ;;  %v2876_v51 = vsel %vm2757_vm2, %v7981_v38, -inf }
 0x332   : > { %9277 = vst [vmem:[#allocation74_spill] sm:$0xff] %v7983_v24  ;;  %v2874_v47 = vsel %vm2757_vm2, %v7983_v24, -inf  ;;  %v2775_v8 = vrot.slane %v2774_v62, 2 }
 0x333   : > { %v2875_v35 = vmax.f32 %v2873_v30, %v2874_v47 }
 0x334   : > { %v7989_v4 = vpop.f32.mrb[116].mxu1 }
 0x335   : > { %9278 = vst [vmem:[#allocation71_spill] sm:$0xff] %v7989_v4  ;;  %v2877_v45 = vmax.f32 %v2875_v35, %v2876_v51  ;;  %v2885_v26 = vsel %vm2757_vm2, %v7989_v4, -inf  ;;  %v7993_v19 = vpop.f32.mrb[117].mxu1 }
 0x336   : > { %v2884_v50 = vsel %vm2757_vm2, %v7993_v19, -inf }
 0x337   : > { %v2886_v48 = vmax.f32 %v2884_v50, %v2885_v26  ;;  %v2794_v26 = vrot.slane %v7848_v33, 4  ;;  %v2878_v43 = vrot.slane %v2877_v45, 4 }
 0x338   : > { %v7997_v13 = vpop.f32.mrb[118].mxu1 }
 0x339   : > { %9279 = vst [vmem:[#allocation78_spill] sm:$0xff] %v7997_v13  ;;  %v7999_v39 = vpop.f32.mrb[119].mxu1  ;;  %v2889_v51 = vsel %vm2757_vm2, %v7997_v13, -inf  ;;  %v2795_v16 = vmax.f32 %v7848_v33, %v2794_v26  ;;  %v2879_v41 = vmax.f32 %v2877_v45, %v2878_v43 }
 0x33a   : > { %9280 = vst [vmem:[#allocation75_spill] sm:$0xff] %v7999_v39  ;;  %v2887_v30 = vsel %vm2757_vm2, %v7999_v39, -inf }
 0x33b   : > { %v2888_v47 = vmax.f32 %v2886_v48, %v2887_v30  ;;  %v2836_v48 = vrot.slane %v7925_v61, 4  ;;  %v2857_v30 = vrot.slane %v2856_v57, 4  ;;  %v2880_v45 = vrot.slane %v2879_v41, 2 }
 0x33c   : > { %v8005_v35 = vpop.f32.mrb[120].mxu1 }
 0x33d   : > { %9281 = vst [vmem:[#allocation99_spill] sm:$0xff] %v8005_v35  ;;  %v8007_v38 = vpop.f32.mrb[121].mxu1  ;;  %v2890_v24 = vmax.f32 %v2888_v47, %v2889_v51  ;;  %v2893_v28 = vsel %vm2757_vm2, %v8005_v35, -inf  ;;  %v2858_v17 = vmax.f32 %v2856_v57, %v2857_v30  ;;  %v2776_v30 = vmax.f32 %v2774_v62, %v2775_v8 }
 0x33e   : > { %9282 = vst [vmem:[#allocation98_spill] sm:$0xff] %v8007_v38  ;;  %v2891_v50 = vsel %vm2757_vm2, %v8007_v38, -inf  ;;  %v2837_v38 = vmax.f32 %v7925_v61, %v2836_v48  ;;  %v2881_v12 = vmax.f32 %v2879_v41, %v2880_v45 }
 0x33f   : > { %v2892_v15 = vmax.f32 %v2890_v24, %v2891_v50  ;;  %v2816_v24 = vmax.f32 %v7891_v7, %v2815_v34  ;;  %v2796_v7 = vrot.slane %v2795_v16, 2  ;;  %v2859_v34 = vrot.slane %v2858_v17, 2 }
 0x340   : > { %v8017_v42 = vpop.f32.mrb[122].mxu1  ;;  %v2838_v43 = vrot.slane %v2837_v38, 2  ;;  %v2777_v8 = vrot.slane %v2776_v30, 1 }
 0x341   : > { %9283 = vst [vmem:[#allocation100_spill] sm:$0xff] %v8017_v42  ;;  %v8019_v47 = vpop.f32.mrb[123].mxu1  ;;  %v2894_v51 = vmax.f32 %v2892_v15, %v2893_v28  ;;  %v2897_v35 = vsel %vm2757_vm2, %v8017_v42, -inf  ;;  %v2860_v39 = vmax.f32 %v2858_v17, %v2859_v34  ;;  %v2882_v17 = vrot.slane %v2881_v12, 1 }
 0x342   : > { %9284 = vst [vmem:[#allocation96_spill] sm:$0xff] %v8019_v47  ;;  %v2895_v56 = vsel %vm2757_vm2, %v8019_v47, -inf  ;;  %v2839_v47 = vmax.f32 %v2837_v38, %v2838_v43  ;;  %v2778_v45 = vmax.f32 %v2776_v30, %v2777_v8 }
 0x343   : > { %v2896_v50 = vmax.f32 %v2894_v51, %v2895_v56  ;;  %v2817_v56 = vrot.slane %v2816_v24, 2  ;;  %v2861_v38 = vrot.slane %v2860_v39, 1 }
 0x344   : > { %v8029_v13 = vpop.f32.mrb[124].mxu1 }
 0x345   : > { %9285 = vst [vmem:[#allocation21_spill] sm:$0xff] %v8029_v13  ;;  %v2898_v28 = vmax.f32 %v2896_v50, %v2897_v35  ;;  %v2906_v5 = vsel %vm2757_vm2, %v8029_v13, -inf  ;;  %v8033_v15 = vpop.f32.mrb[125].mxu1  ;;  %v2797_v50 = vmax.f32 %v2795_v16, %v2796_v7  ;;  %v2818_v13 = vmax.f32 %v2816_v24, %v2817_v56 }
 0x346   : > { %9286 = vst [vmem:[#allocation28_spill] sm:$0xff] %v8033_v15  ;;  %v2905_v33 = vsel %vm2757_vm2, %v8033_v15, -inf  ;;  %v2840_v56 = vrot.slane %v2839_v47, 1 }
 0x347   : > { %v2899_v61 = vrot.slane %v2898_v28, 4  ;;  %v2907_v57 = vmax.f32 %v2905_v33, %v2906_v5  ;;  %v2798_v16 = vrot.slane %v2797_v50, 1  ;;  %v2819_v24 = vrot.slane %v2818_v13, 1 }
 0x348   : > { %v8037_v26 = vpop.f32.mrb[126].mxu1 }
 0x349   : > { %9287 = vst [vmem:[#allocation23_spill] sm:$0xff] %v8037_v26  ;;  %v2900_v48 = vmax.f32 %v2898_v28, %v2899_v61  ;;  %v8039_v35 = vpop.f32.mrb[127].mxu1  ;;  %v2910_v5 = vsel %vm2757_vm2, %v8037_v26, -inf }
 0x34a   : > { %9288 = vst [vmem:[#allocation102_spill] sm:$0xff] %v8039_v35  ;;  %v2908_v51 = vsel %vm2757_vm2, %v8039_v35, -inf }
 0x34b   : > { %v2901_v42 = vrot.slane %v2900_v48, 2  ;;  %v2909_v15 = vmax.f32 %v2907_v57, %v2908_v51  ;;  %v2820_v51 = vmax.f32 %v2818_v13, %v2819_v24 }
 0x34c   : > { %v8045_v33 = vpop.f32.mrb[128].mxu1 }
 0x34d   : > { %9289 = vst [vmem:[#allocation103_spill] sm:$0xff] %v8045_v33  ;;  %v8047_v40 = vpop.f32.mrb[129].mxu1  ;;  %v2911_v28 = vmax.f32 %v2909_v15, %v2910_v5  ;;  %v2902_v61 = vmax.f32 %v2900_v48, %v2901_v42  ;;  %v2914_v41 = vsel %vm2757_vm2, %v8045_v33, -inf  ;;  %v2799_v48 = vmax.f32 %v2797_v50, %v2798_v16 }
 0x34e   : > { %9290 = vst [vmem:[#allocation104_spill] sm:$0xff] %v8047_v40  ;;  %v2912_v62 = vsel %vm2757_vm2, %v8047_v40, -inf  ;;  %v2883_v40 = vmax.f32 %v2881_v12, %v2882_v17 }
 0x34f   : > { %v2913_v7 = vmax.f32 %v2911_v28, %v2912_v62  ;;  %v2903_v42 = vrot.slane %v2902_v61, 1  ;;  %v2841_v28 = vmax.f32 %v2839_v47, %v2840_v56  ;;  %v2862_v62 = vmax.f32 %v2860_v39, %v2861_v38 }
 0x350   : > { %v8053_v57 = vpop.f32.mrb[130].mxu1 }
 0x351   : > { %v8055_v43 = vpop.f32.mrb[131].mxu1  ;;  %v2915_v34 = vmax.f32 %v2913_v7, %v2914_v41  ;;  %v2918_v33 = vsel %vm2757_vm2, %v8053_v57, -inf  ;;  %v2904_v30 = vmax.f32 %v2902_v61, %v2903_v42  ;;  %v9292_v42 = vld [vmem:[#allocation86_spill] sm:$0xff] }
 0x352   : > { %9291 = vst [vmem:[#allocation105_spill] sm:$0xff] %v8055_v43  ;;  %v2916_v15 = vsel %vm2757_vm2, %v8055_v43, -inf }
 0x353   : > { %v2917_v5 = vmax.f32 %v2915_v34, %v2916_v15 }
 0x354   : > { %v8061_v26 = vpop.f32.mrb[132].mxu1 }
 0x355   : > { %v2919_v7 = vmax.f32 %v2917_v5, %v2918_v33  ;;  %v2927_v41 = vrot.slane %v8061_v26, 1  ;;  %v2928_v35 = vrot.slane %v8061_v26, 2  ;;  %v2929_v43 = vrot.slane %v8061_v26, 3  ;;  %v5612_v4 = vpop.f32.mrb[133].mxu1 }
 0x356   : > { %v2930_v13 = vrot.slane %v8061_v26, 4  ;;  %v2931_v47 = vrot.slane %v8061_v26, 5  ;;  %v2932_v12 = vrot.slane %v8061_v26, 6  ;;  %v2942_v50 = vmax.f32 %v2778_v45, %v8061_v26 }
 0x357   : > { %v2920_v39 = vrot.slane %v2919_v7, 4  ;;  %v2943_v8 = vmax.f32 %v2799_v48, %v2927_v41  ;;  %v2944_v16 = vmax.f32 %v2820_v51, %v2928_v35  ;;  %v2945_v33 = vmax.f32 %v2841_v28, %v2929_v43 }
 0x358   : > { %v8070_v24 = vmax.f32 %v2862_v62, %v2930_v13  ;;  %v8072_v56 = vmax.f32 %v2883_v40, %v2931_v47  ;;  %v8074_v38 = vmax.f32 %v2904_v30, %v2932_v12  ;;  %v2933_v34 = vrot.slane %v8061_v26, 7 }
 0x359   : > { %v2921_v4 = vmax.f32 %v2919_v7, %v2920_v39  ;;  %v2958_v61 = vrot.slane %v2943_v8, 7  ;;  %v2961_v17 = vrot.slane %v2944_v16, 6  ;;  %v8078_v15 = vrot.slane %v2942_v50, %v9292_v42 }
 0x35a   : > { %v2964_v43 = vrot.slane %v2945_v33, 5  ;;  %v2994_v40 = vrot.slane %v2944_v16, %v9292_v42  ;;  %v2967_v51 = vrot.slane %v8070_v24, 4  ;;  %v2970_v5 = vrot.slane %v8072_v56, 3 }
 0x35b   : > { %v2922_v45 = vrot.slane %v2921_v4, 2  ;;  %v2960_v35 = vsel %vm2959_vm9, %v2958_v61, %v2942_v50  ;;  %v2973_v28 = vrot.slane %v8074_v38, 2  ;;  %v8088_v41 = vrot.slane %v2943_v8, %v9292_v42 }
 0x35c   : > { %v2963_v48 = vsel %vm2962_vm14, %v2961_v17, %v2960_v35  ;;  %v3031_v30 = vsub.f32 %v7852_v59, %v2994_v40  ;;  %v3032_v47 = vsub.f32 %v7846_v23, %v2994_v40  ;;  %v3015_v12 = vsub.f32 %v7784_v3, %v8078_v15 }
 0x35d   : > { %v2923_v62 = vmax.f32 %v2921_v4, %v2922_v45  ;;  %v2966_v7 = vsel %vm2965_vm15, %v2964_v43, %v2963_v48  ;;  %v3016_v39 = vsub.f32 %v7780_v52, %v8078_v15  ;;  %v3033_v61 = vsub.f32 %v7858_v60, %v2994_v40 }
 0x35e   : > { %v2969_v13 = vsel %vm2968_vm0, %v2967_v51, %v2966_v7  ;;  %v3111_v4 = vmul.f32 1.442695, %v3031_v30  ;;  %v3113_v17 = vmul.f32 1.442695, %v3032_v47  ;;  %v3079_v59 = vmul.f32 1.442695, %v3015_v12 }
 0x35f   : > { %v2924_v50 = vrot.slane %v2923_v62, 1  ;;  %v2972_v16 = vsel %vm2971_vm1, %v2970_v5, %v2969_v13  ;;  %v3081_v45 = vmul.f32 1.442695, %v3016_v39  ;;  %v3034_v23 = vsub.f32 %v7856_v53, %v2994_v40 }
 0x360   : > { %v2975_v8 = vsel %vm2974_vm3, %v2973_v28, %v2972_v16  ;;  %6023 = vpow2.f32 %v3111_v4  ;;  %v3115_v43 = vmul.f32 1.442695, %v3033_v61  ;;  %v3017_v52 = vsub.f32 %v7790_v2, %v8078_v15 }
 0x361   : > { %v2925_v35 = vmax.f32 %v2923_v62, %v2924_v50  ;;  %6025 = vpow2.f32 %v3113_v17  ;;  %v3018_v3 = vsub.f32 %v7788_v11, %v8078_v15  ;;  %v3035_v48 = vsub.f32 %v7868_v32, %v2994_v40 }
 0x362   : > { %6027 = vpow2.f32 %v3079_v59  ;;  %v3117_v51 = vmul.f32 1.442695, %v3034_v23  ;;  %v3036_v5 = vsub.f32 %v7864_v18, %v2994_v40  ;;  %v8110_v28 = vrot.slane %v2945_v33, %v9292_v42 }
 0x363   : > { %v8106_v60 = vmax.f32 %v2925_v35, %v2933_v34  ;;  %6029 = vpow2.f32 %v3081_v45  ;;  %v3083_v53 = vmul.f32 1.442695, %v3017_v52  ;;  %v3085_v62 = vmul.f32 1.442695, %v3018_v3 }
 0x364   : > { %6031 = vpow2.f32 %v3115_v43  ;;  %v3119_v2 = vmul.f32 1.442695, %v3035_v48  ;;  %v3121_v30 = vmul.f32 1.442695, %v3036_v5  ;;  %v3019_v11 = vsub.f32 %v7798_v1, %v8078_v15 }
 0x365   : > { %v2976_v7 = vrot.slane %v8106_v60, 1  ;;  %6033 = vpow2.f32 %v3117_v51  ;;  %v3020_v32 = vsub.f32 %v7796_v0, %v8078_v15  ;;  %v3037_v18 = vsub.f32 %v7881_v55, %v2994_v40 }
 0x366   : > { %6035 = vpow2.f32 %v3083_v53  ;;  %v3038_v34 = vsub.f32 %v7876_v21, %v2994_v40  ;;  %v3021_v13 = vsub.f32 %v7806_v27, %v8078_v15  ;;  %v3087_v12 = vmul.f32 1.442695, %v3019_v11 }
 0x367   : > { %v2978_v33 = vsel %vm2977_vm6, %v2976_v7, %v2975_v8  ;;  %6037 = vpow2.f32 %v3085_v62  ;;  %v3089_v39 = vmul.f32 1.442695, %v3020_v32  ;;  %v3022_v1 = vsub.f32 %v7804_v36, %v8078_v15 }
 0x368   : > { %v2980_v47 = vsub.f32 %v8061_v26, %v2978_v33  ;;  %6039 = vpow2.f32 %v3119_v2  ;;  %v3123_v55 = vmul.f32 1.442695, %v3037_v18  ;;  %v3039_v50 = vsub.f32 %v7895_v22, %v8110_v28 }
 0x369   : > { %6041 = vpow2.f32 %v3121_v30  ;;  %v3125_v21 = vmul.f32 1.442695, %v3038_v34  ;;  %v3040_v27 = vsub.f32 %v7889_v46, %v8110_v28  ;;  %v3023_v26 = vsub.f32 %v7818_v20, %v8088_v41 }
 0x36a   : > { %v2981_v0 = vmul.f32 1.442695, %v2980_v47  ;;  %v8127_v16 = vpop.eup %6023  ;;  %6043 = vpow2.f32 %v3087_v12  ;;  %v3091_v36 = vmul.f32 1.442695, %v3021_v13  ;;  %v3024_v15 = vsub.f32 %v7812_v63, %v8088_v41  ;;  %v9295_v12 = vld [vmem:[#allocation88_spill] sm:$0xff] }
 0x36b   : > { %v8133_v40 = vpop.eup %6025  ;;  %v3041_v22 = vsub.f32 %v7901_v54, %v8110_v28  ;;  %v8143_v61 = vrot.slane %v8070_v24, %v9292_v42  ;;  %v3093_v20 = vmul.f32 1.442695, %v3022_v1  ;;  %v3127_v17 = vmul.f32 1.442695, %v3039_v50 }
 0x36c   : > { %6045 = vpow2.f32 %v2981_v0  ;;  %v8139_v4 = vpop.eup %6027  ;;  %v5844_v46 = vpack.c.bf16 %v8133_v40, %v8127_v16  ;;  %v3129_v59 = vmul.f32 1.442695, %v3040_v27  ;;  %v3042_v63 = vsub.f32 %v7899_v44, %v8110_v28  ;;  %v9296_v0 = vld [vmem:[#allocation87_spill] sm:$0xff] }
 0x36d   : > { %6047 = vpow2.f32 %v3089_v39  ;;  %v8147_v8 = vpop.eup %6029  ;;  %v3025_v45 = vsub.f32 %v7824_v10, %v8088_v41  ;;  %v3026_v35 = vsub.f32 %v7822_v9, %v8088_v41  ;;  %v3095_v43 = vmul.f32 1.442695, %v3023_v26 }
 0x36e   : > { %6049 = vpow2.f32 %v3123_v55  ;;  %v8151_v54 = vpop.eup %6031  ;;  %5845 = vmatprep.subr.bf16.mxu0 %v5844_v46  ;;  %v5846_v24 = vpack.c.bf16 %v8147_v8, %v8139_v4  ;;  %v3043_v44 = vsub.f32 %v7909_v29, %v8110_v28  ;;  %v3044_v52 = vsub.f32 %v7907_v25, %v8110_v28 }
 0x36f   : > { %6051 = vpow2.f32 %v3125_v21  ;;  %v8159_v23 = vpop.eup %6033  ;;  %v8169_v48 = vrot.slane %v8074_v38, %v9292_v42  ;;  %v3097_v10 = vmul.f32 1.442695, %v3024_v15  ;;  %v3131_v5 = vmul.f32 1.442695, %v3041_v22 }
 0x370   : > { %6053 = vpow2.f32 %v3091_v36  ;;  %v8165_v3 = vpop.eup %6035  ;;  %5847 = vmatpush3.bf16.msra.mxu0 %v5846_v24  ;;  %v5848_v9 = vpack.c.bf16 %v8159_v23, %v8151_v54  ;;  %v3133_v29 = vmul.f32 1.442695, %v3042_v63  ;;  %v3027_v25 = vsub.f32 %v7832_v14, %v8088_v41  ;;  %v9301_v24 = vld [vmem:[#allocation61_spill] sm:$0xff] }
 0x371   : > { %6055 = vpow2.f32 %v3093_v20  ;;  %v8173_v51 = vpop.eup %6037  ;;  %v3028_v62 = vsub.f32 %v7830_v58, %v8088_v41  ;;  %v3045_v7 = vsub.f32 %v7917_v37, %v8110_v28  ;;  %v3099_v30 = vmul.f32 1.442695, %v3025_v45  ;;  %v9299_v20 = vld [vmem:[#allocation75_spill] sm:$0xff] }
 0x372   : > { %6057 = vpow2.f32 %v3127_v17  ;;  %v8177_v53 = vpop.eup %6039  ;;  %5849 = vmatprep.subr.bf16.mxu0 %v5848_v9  ;;  %v5850_v38 = vpack.c.bf16 %v8173_v51, %v8165_v3  ;;  %v3046_v14 = vsub.f32 %v7915_v31, %v8110_v28  ;;  %v3029_v11 = vsub.f32 %v7840_v6, %v8088_v41  ;;  %v9294_v28 = vld [vmem:[#allocation71_spill] sm:$0xff] }
 0x373   : > { %6059 = vpow2.f32 %v3129_v59  ;;  %v8185_v2 = vpop.eup %6041  ;;  %v3101_v58 = vmul.f32 1.442695, %v3026_v35  ;;  %v3135_v37 = vmul.f32 1.442695, %v3043_v44  ;;  %v3137_v34 = vmul.f32 1.442695, %v3044_v52 }
 0x374   : > { %6061 = vpow2.f32 %v3095_v43  ;;  %v8191_v32 = vpop.eup %6043  ;;  %5851 = vmatpush3.bf16.msra.mxu0 %v5850_v38  ;;  %v5852_v18 = vpack.c.bf16 %v8185_v2, %v8177_v53  ;;  %v3030_v13 = vsub.f32 %v7838_v49, %v8088_v41  ;;  %v3063_v6 = vsub.f32 %v7993_v19, %v8169_v48  ;;  %v9302_v35 = vld [vmem:[#allocation58_spill] sm:$0xff] }
 0x375   : > { %6063 = vpow2.f32 %v3097_v10  ;;  %v3064_v47 = vsub.f32 %v9294_v28, %v8169_v48  ;;  %v3047_v39 = vsub.f32 %v9295_v12, %v8143_v61  ;;  %v3103_v41 = vmul.f32 1.442695, %v3027_v25  ;;  %v9303_v10 = vld [vmem:[#allocation98_spill] sm:$0xff] }
 0x376   : > { %v8195_v33 = vpop.eup %6045  ;;  %6065 = vpow2.f32 %v3131_v5  ;;  %5853 = vmatprep.subr.bf16.mxu0 %v5852_v18  ;;  %v3048_v55 = vsub.f32 %v9296_v0, %v8143_v61  ;;  %v9297_v50 = vmov 1.0   ;;  %v8222_v27 = vrot.slane %v8072_v56, %v9292_v42  ;;  %v9300_v56 = vld [vmem:[#allocation78_spill] sm:$0xff] }
 0x377   : > { %9293 = vst [vmem:[#allocation86_spill] sm:$0xff] %v8195_v33  ;;  %v8199_v31 = vpop.eup %6047  ;;  %5714 = vmatmul.mubr.msk.f32.vlgmr.msra.gmra.mrb[134].mxu1 %vm2757_vm2, %v8195_v33  ;;  %6067 = vpow2.f32 %v3133_v29  ;;  %v3105_v26 = vmul.f32 1.442695, %v3028_v62  ;;  %v3139_v36 = vmul.f32 1.442695, %v3045_v7  ;;  %v3065_v17 = vsub.f32 %v9299_v20, %v8169_v48  ;;  %v9309_v20 = vld [vmem:[#allocation92_spill] sm:$0xff] }
 0x378   : > { %v8209_v1 = vpop.eup %6049  ;;  %v5854_v49 = vpack.c.bf16 %v8199_v31, %v8191_v32  ;;  %6069 = vpow2.f32 %v3099_v30  ;;  %4736 = vmatprep.mubr.msk.f32.mxu1 %vm6658_vm4, %v9297_v50  ;;  %v3141_v46 = vmul.f32 1.442695, %v3046_v14  ;;  %v3066_v63 = vsub.f32 %v9300_v56, %v8169_v48 }
 0x379   : > { %v8218_v19 = vpop.eup %6051  ;;  %6071 = vpow2.f32 %v3101_v58  ;;  %v3049_v45 = vsub.f32 %v9301_v24, %v8143_v61  ;;  %v3050_v43 = vsub.f32 %v9302_v35, %v8143_v61  ;;  %v3107_v9 = vmul.f32 1.442695, %v3029_v11  ;;  %v9304_v11 = vld [vmem:[#allocation99_spill] sm:$0xff]  ;;  %v9312_v35 = vld [vmem:[#allocation21_spill] sm:$0xff] }
 0x37a   : > { %v8224_v15 = vpop.eup %6053  ;;  %5855 = vmatpush3.bf16.msra.mxu0 %v5854_v49  ;;  %v5856_v22 = vpack.c.bf16 %v8218_v19, %v8209_v1  ;;  %6073 = vpow2.f32 %v3135_v37  ;;  %v3067_v5 = vsub.f32 %v9303_v10, %v8169_v48  ;;  %v8248_v25 = vrot.slane %v8106_v60, %v9292_v42  ;;  %v9305_v42 = vld [vmem:[#allocation90_spill] sm:$0xff]  ;;  %v9306_v37 = vld [vmem:[#allocation89_spill] sm:$0xff]  ;;  %v9308_v49 = vld [vmem:[#allocation100_spill] sm:$0xff] }
 0x37b   : > { %v8230_v59 = vpop.eup %6055  ;;  %6075 = vpow2.f32 %v3137_v34  ;;  %v3109_v38 = vmul.f32 1.442695, %v3030_v13  ;;  %v3175_v62 = vmul.f32 1.442695, %v3063_v6  ;;  %v3177_v14 = vmul.f32 1.442695, %v3064_v47 }
 0x37c   : > { %v8238_v44 = vpop.eup %6057  ;;  %5857 = vmatprep.subr.bf16.mxu0 %v5856_v22  ;;  %v5858_v52 = vpack.c.bf16 %v8230_v59, %v8224_v15  ;;  %6077 = vpow2.f32 %v3103_v41  ;;  %v3068_v18 = vsub.f32 %v9304_v11, %v8169_v48  ;;  %v3051_v60 = vsub.f32 %v9305_v42, %v8143_v61  ;;  %v9307_v13 = vld [vmem:[#allocation96_spill] sm:$0xff] }
 0x37d   : > { %v8244_v29 = vpop.eup %6059  ;;  %6079 = vpow2.f32 %v3105_v26  ;;  %v3052_v34 = vsub.f32 %v9306_v37, %v8143_v61  ;;  %v3069_v6 = vsub.f32 %v9307_v13, %v8169_v48  ;;  %v3143_v12 = vmul.f32 1.442695, %v3047_v39  ;;  %v9315_v13 = vld [vmem:[#allocation94_spill] sm:$0xff] }
 0x37e   : > { %v8250_v7 = vpop.eup %6061  ;;  %5859 = vmatpush3.bf16.msra.mxu0 %v5858_v52  ;;  %v5860_v30 = vpack.c.bf16 %v8244_v29, %v8238_v44  ;;  %6081 = vpow2.f32 %v3139_v36  ;;  %v3070_v41 = vsub.f32 %v9308_v49, %v8169_v48  ;;  %v3145_v21 = vmul.f32 1.442695, %v3048_v55  ;;  %v9310_v48 = vld [vmem:[#allocation91_spill] sm:$0xff]  ;;  %v9311_v55 = vld [vmem:[#allocation28_spill] sm:$0xff] }
 0x37f   : > { %v8256_v58 = vpop.eup %6063  ;;  %6083 = vpow2.f32 %v3141_v46  ;;  %v3179_v26 = vmul.f32 1.442695, %v3065_v17  ;;  %v3181_v46 = vmul.f32 1.442695, %v3066_v63  ;;  %v3053_v56 = vsub.f32 %v9309_v20, %v8143_v61 }
 0x380   : > { %v8264_v28 = vpop.eup %6065  ;;  %5861 = vmatprep.subr.bf16.mxu0 %v5860_v30  ;;  %v5862_v47 = vpack.c.bf16 %v8256_v58, %v8250_v7  ;;  %6085 = vpow2.f32 %v3107_v9  ;;  %v3054_v24 = vsub.f32 %v9310_v48, %v8143_v61  ;;  %v3071_v17 = vsub.f32 %v9311_v55, %v8248_v25  ;;  %v9320_v48 = vld [vmem:[#allocation97_spill] sm:$0xff] }
 0x381   : > { %v8270_v0 = vpop.eup %6067  ;;  %6087 = vpow2.f32 %v3109_v38  ;;  %v3072_v52 = vsub.f32 %v9312_v35, %v8248_v25  ;;  %v3147_v10 = vmul.f32 1.442695, %v3049_v45  ;;  %v9313_v38 = vld [vmem:[#allocation93_spill] sm:$0xff]  ;;  %v3149_v61 = vmul.f32 1.442695, %v3050_v43  ;;  %v9317_v43 = vld [vmem:[#allocation23_spill] sm:$0xff] }
 0x382   : > { %v8272_v36 = vpop.eup %6069  ;;  %5863 = vmatpush3.bf16.msra.mxu0 %v5862_v47  ;;  %v5864_v22 = vpack.c.bf16 %v8270_v0, %v8264_v28  ;;  %6089 = vpow2.f32 %v3175_v62  ;;  %v3055_v62 = vsub.f32 %v9313_v38, %v8222_v27  ;;  %v3185_v37 = vmul.f32 1.442695, %v3068_v18 }
 0x383   : > { %v8278_v39 = vpop.eup %6071  ;;  %6091 = vpow2.f32 %v3177_v14  ;;  %v3183_v14 = vmul.f32 1.442695, %v3067_v5  ;;  %v3056_v47 = vsub.f32 %v9315_v13, %v8222_v27  ;;  %v3074_v5 = vsub.f32 %v9317_v43, %v8248_v25  ;;  %v9323_v43 = vld [vmem:[#allocation103_spill] sm:$0xff] }
 0x384   : > { %v8286_v9 = vpop.eup %6073  ;;  %5865 = vmatprep.subr.bf16.mxu0 %v5864_v22  ;;  %v5866_v63 = vpack.c.bf16 %v8278_v39, %v8272_v36  ;;  %6093 = vpow2.f32 %v3143_v12  ;;  %v9316_v12 = vld [vmem:[#allocation102_spill] sm:$0xff]  ;;  %v3153_v35 = vmul.f32 1.442695, %v3052_v34  ;;  %vm4361_vm4 = vcmask 130048  }
 0x385   : > { %v8292_v30 = vpop.eup %6075  ;;  %6095 = vpow2.f32 %v3145_v21  ;;  %v3073_v49 = vsub.f32 %v9316_v12, %v8248_v25  ;;  %v9318_v21 = vld [vmem:[#allocation95_spill] sm:$0xff]  ;;  %v9322_v12 = vld [vmem:[#allocation104_spill] sm:$0xff]  ;;  %v9324_v34 = vld [vmem:[#allocation66_spill] sm:$0xff] }
 0x386   : > { %9314 = vst [vmem:[#allocation71_spill] sm:$0xff] %v8292_v30  ;;  %v8294_v11 = vpop.eup %6077  ;;  %5867 = vmatpush3.bf16.msra.mxu0 %v5866_v63  ;;  %v5868_v42 = vpack.c.bf16 %v8292_v30, %v8286_v9  ;;  %6097 = vpow2.f32 %v3179_v26  ;;  %v3151_v26 = vmul.f32 1.442695, %v3051_v60  ;;  %v3187_v63 = vmul.f32 1.442695, %v3069_v6 }
 0x387   : > { %v8300_v45 = vpop.eup %6079  ;;  %6099 = vpow2.f32 %v3181_v46  ;;  %v3058_v46 = vsub.f32 %v9320_v48, %v8222_v27  ;;  %v3076_v48 = vsub.f32 %v9323_v43, %v8248_v25  ;;  %v3059_v6 = vsub.f32 %v9324_v34, %v8222_v27 }
 0x388   : > { %v8308_v20 = vpop.eup %6081  ;;  %5869 = vmatprep.subr.bf16.mxu0 %v5868_v42  ;;  %v5870_v18 = vpack.c.bf16 %v8300_v45, %v8294_v11  ;;  %6101 = vpow2.f32 %v3147_v10  ;;  %v3189_v42 = vmul.f32 1.442695, %v3070_v41  ;;  %v3075_v10 = vsub.f32 %v9322_v12, %v8248_v25  ;;  %v9326_v12 = vld [vmem:[#allocation105_spill] sm:$0xff] }
 0x389   : > { %9319 = vst [vmem:[#allocation88_spill] sm:$0xff] %v8308_v20  ;;  %v8314_v55 = vpop.eup %6083  ;;  %6103 = vpow2.f32 %v3149_v61  ;;  %v9325_v61 = vld [vmem:[#allocation67_spill] sm:$0xff]  ;;  %v3157_v43 = vmul.f32 1.442695, %v3054_v24  ;;  %v9328_v24 = vld [vmem:[#allocation70_spill] sm:$0xff] }
 0x38a   : > { %9321 = vst [vmem:[#allocation87_spill] sm:$0xff] %v8314_v55  ;;  %v8316_v38 = vpop.eup %6085  ;;  %5871 = vmatpush3.bf16.msra.mxu0 %v5870_v18  ;;  %v5872_v13 = vpack.c.bf16 %v8314_v55, %v8308_v20  ;;  %6105 = vpow2.f32 %v3183_v14  ;;  %v3060_v18 = vsub.f32 %v9325_v61, %v8222_v27  ;;  %v3155_v14 = vmul.f32 1.442695, %v3053_v56 }
 0x38b   : > { %v8322_v60 = vpop.eup %6087  ;;  %6107 = vpow2.f32 %v3185_v37  ;;  %v3077_v37 = vsub.f32 %v9326_v12, %v8248_v25  ;;  %v3078_v61 = vsub.f32 %v8053_v57, %v8248_v25  ;;  %v3193_v56 = vmul.f32 1.442695, %v3072_v52  ;;  %v9327_v12 = vld [vmem:[#allocation74_spill] sm:$0xff] }
 0x38c   : > { %v8330_v22 = vpop.eup %6089  ;;  %5873 = vmatprep.subr.bf16.mxu0 %v5872_v13  ;;  %v5874_v41 = vpack.c.bf16 %v8322_v60, %v8316_v38  ;;  %6109 = vpow2.f32 %v3151_v26  ;;  %v3191_v13 = vmul.f32 1.442695, %v3071_v17  ;;  %v3061_v20 = vsub.f32 %v9327_v12, %v8222_v27 }
 0x38d   : > { %v8336_v33 = vpop.eup %6091  ;;  %6111 = vpow2.f32 %v3153_v35  ;;  %v3062_v35 = vsub.f32 %v9328_v24, %v8222_v27  ;;  %v3159_v17 = vmul.f32 1.442695, %v3055_v62  ;;  %v3161_v25 = vmul.f32 1.442695, %v3056_v47 }
 0x38e   : > { %v8338_v55 = vpop.eup %6093  ;;  %5875 = vmatpush3.bf16.msra.mxu0 %v5874_v41  ;;  %v5876_v34 = vpack.c.bf16 %v8336_v33, %v8330_v22  ;;  %6113 = vpow2.f32 %v3187_v63 }
 0x38f   : > { %v8344_v26 = vpop.eup %6095  ;;  %6115 = vpow2.f32 %v3189_v42 }
 0x390   : > { %v8350_v30 = vpop.eup %6097  ;;  %5877 = vmatprep.subr.bf16.mxu0 %v5876_v34  ;;  %v5878_v63 = vpack.c.bf16 %v8344_v26, %v8338_v55  ;;  %6117 = vpow2.f32 %v3155_v14  ;;  %v3195_v34 = vmul.f32 1.442695, %v3073_v49  ;;  %v3197_v14 = vmul.f32 1.442695, %v3074_v5 }
 0x391   : > { %v8354_v41 = vpop.eup %6099  ;;  %4666 = vmatmul.mubr.msk.f32.vlgmr.msra.gmra.mrb[70].mxu0 %vm6700_vm10, %v9297_v50  ;;  %6119 = vpow2.f32 %v3157_v43  ;;  %v9331_v43 = vsub.f32 %v9318_v21, %v8222_v27  ;;  %v3167_v21 = vmul.f32 1.442695, %v3059_v6 }
 0x392   : > { %v8359_v52 = vpop.eup %6101  ;;  %5879 = vmatpush3.bf16.msra.mxu0 %v5878_v63  ;;  %v5880_v42 = vpack.c.bf16 %v8354_v41, %v8350_v30  ;;  %6121 = vpow2.f32 %v3191_v13  ;;  %4667 = vmatprep.mubr.msk.f32.mxu0 %vm6675_vm5, %v9297_v50  ;;  %v3165_v63 = vmul.f32 1.442695, %v3058_v46 }
 0x393   : > { %v8366_v62 = vpop.eup %6103  ;;  %6123 = vpow2.f32 %v3193_v56  ;;  %v3163_v13 = vmul.f32 1.442695, %v9331_v43  ;;  %v3199_v56 = vmul.f32 1.442695, %v3075_v10 }
 0x394   : > { %v8368_v24 = vpop.eup %6105  ;;  %5881 = vmatprep.subr.bf16.mxu0 %v5880_v42  ;;  %v5882_v47 = vpack.c.bf16 %v8366_v62, %v8359_v52  ;;  %6125 = vpow2.f32 %v3159_v17  ;;  %v3201_v17 = vmul.f32 1.442695, %v3076_v48  ;;  %v3203_v48 = vmul.f32 1.442695, %v3077_v37 }
 0x395   : > { %v8375_v49 = vpop.eup %6107  ;;  %6127 = vpow2.f32 %v3161_v25  ;;  %v3169_v25 = vmul.f32 1.442695, %v3060_v18  ;;  %v3171_v18 = vmul.f32 1.442695, %v3061_v20 }
 0x396   : > { %v8377_v12 = vpop.eup %6109  ;;  %5883 = vmatpush3.bf16.msra.mxu0 %v5882_v47  ;;  %v5884_v5 = vpack.c.bf16 %v8375_v49, %v8368_v24  ;;  %6129 = vpow2.f32 %v3195_v34 }
 0x397   : > { %v8381_v42 = vpop.eup %6111  ;;  %6131 = vpow2.f32 %v3197_v14  ;;  %v3205_v14 = vmul.f32 1.442695, %v3078_v61 }
 0x398   : > { %v8383_v57 = vpop.eup %6113  ;;  %5885 = vmatprep.subr.bf16.mxu0 %v5884_v5  ;;  %v5886_v27 = vpack.c.bf16 %v8381_v42, %v8377_v12  ;;  %6133 = vpow2.f32 %v3163_v13 }
 0x399   : > { %v8387_v46 = vpop.eup %6115  ;;  %6135 = vpow2.f32 %v3165_v63  ;;  %v3173_v63 = vmul.f32 1.442695, %v3062_v35 }
 0x39a   : > { %v8389_v47 = vpop.eup %6117  ;;  %5887 = vmatpush3.bf16.msra.mxu0 %v5886_v27  ;;  %v5888_v10 = vpack.c.bf16 %v8387_v46, %v8383_v57  ;;  %6137 = vpow2.f32 %v3199_v56 }
 0x39b   : > { %v8393_v34 = vpop.eup %6119  ;;  %6139 = vpow2.f32 %v3201_v17 }
 0x39c   : > { %v8395_v43 = vpop.eup %6121  ;;  %5889 = vmatprep.subr.bf16.mxu0 %v5888_v10  ;;  %v5890_v6 = vpack.c.bf16 %v8393_v34, %v8389_v47  ;;  %6141 = vpow2.f32 %v3167_v21 }
 0x39d   : > { %v8399_v13 = vpop.eup %6123  ;;  %6143 = vpow2.f32 %v3169_v25 }
 0x39e   : > { %9332 = vst [vmem:[#allocation37_spill] sm:$0xff] %v8399_v13  ;;  %v8401_v5 = vpop.eup %6125  ;;  %5891 = vmatpush3.bf16.msra.mxu0 %v5890_v6  ;;  %v5892_v37 = vpack.c.bf16 %v8399_v13, %v8395_v43  ;;  %6145 = vpow2.f32 %v3203_v48 }
 0x39f   : > { %v8405_v61 = vpop.eup %6127  ;;  %6147 = vpow2.f32 %v3205_v14 }
 0x3a0   : > { %v8407_v56 = vpop.eup %6129  ;;  %5893 = vmatprep.subr.bf16.mxu0 %v5892_v37  ;;  %v5894_v20 = vpack.c.bf16 %v8405_v61, %v8401_v5  ;;  %6149 = vpow2.f32 %v3171_v18 }
 0x3a1   : > { %9333 = vst [vmem:[#allocation75_spill] sm:$0xff] %v8407_v56  ;;  %v8411_v17 = vpop.eup %6131  ;;  %6151 = vpow2.f32 %v3173_v63 }
 0x3a2   : > { %9334 = vst [vmem:[#allocation78_spill] sm:$0xff] %v8411_v17  ;;  %v8413_v35 = vpop.eup %6133  ;;  %5895 = vmatpush3.bf16.msra.mxu0 %v5894_v20  ;;  %v5896_v27 = vpack.c.bf16 %v8411_v17, %v8407_v56 }
 0x3a3   : > { %v8417_v21 = vpop.eup %6135 }
 0x3a4   : > { %v8419_v25 = vpop.eup %6137  ;;  %5897 = vmatprep.subr.bf16.mxu0 %v5896_v27  ;;  %v5898_v10 = vpack.c.bf16 %v8417_v21, %v8413_v35 }
 0x3a5   : > { %v8423_v48 = vpop.eup %6139 }
 0x3a6   : > { %9335 = vst [vmem:[#allocation61_spill] sm:$0xff] %v8423_v48  ;;  %v8425_v14 = vpop.eup %6141  ;;  %5899 = vmatpush3.bf16.msra.mxu0 %v5898_v10  ;;  %v5900_v6 = vpack.c.bf16 %v8423_v48, %v8419_v25  ;;  %v9336_v10 = vld [vmem:[#allocation83_spill] sm:$0xff] }
 0x3a7   : > { %v6144_v18 = vpop.eup %6143 }
 0x3a8   : > { %v8429_v63 = vpop.eup %6145  ;;  %5901 = vmatprep.subr.bf16.mxu0 %v5900_v6  ;;  %v5902_v37 = vpack.c.bf16 %v6144_v18, %v8425_v14  ;;  %v9338_v6 = vmov 0.0|0.0  }
 0x3a9   : > { %v8432_v20 = vpop.eup %6147 }
 0x3aa   : > { %v6150_v27 = vpop.eup %6149  ;;  %5903 = vmatpush3.bf16.msra.mxu0 %v5902_v37  ;;  %v5904_v17 = vpack.c.bf16 %v8432_v20, %v8429_v63 }
 0x3ab   : > { %v6152_v56 = vpop.eup %6151 }
 0x3ac   : > { %5905 = vmatprep.subr.bf16.mxu0 %v5904_v17  ;;  %v5906_v13 = vpack.c.bf16 %v6152_v56, %v6150_v27 }
 0x3ae   : > { %5907 = vmatpush3.bf16.msra.mxu0 %v5906_v13 }
 0x3af   : > { %5613 = vmatprep.subr.msk.mxu0 %vm3541_vm7, %v9336_v10 }
 0x3b1   : > { %4668 = vmatmul.mubr.msk.f32.vlgmr.msra.gmra.mrb[72].mxu0 %vm6704_vm11, %v9297_v50 }
 0x3b2   : > { %5614 = vmatpush3.msk.msra.mxu0 %vm3541_vm7, %v9336_v10  ;;  %5615 = vmatprep.mubr.msk.f32.mxu0 %vm2757_vm2, %v8139_v4  ;;  %v9341_v4 = vld [vmem:[#allocation87_spill] sm:$0xff] }
 0x3b3   : > { %5972 = vmatprep.subr.bf16.mxu0 %v9338_v6 }
 0x3b5   : > { %5616 = vmatmul.mubr.msk.f32.vlgmr.msra.gmra.mrb[74].mxu0 %vm2757_vm2, %v8147_v8  ;;  %v9342_v8 = vld [vmem:[#allocation37_spill] sm:$0xff] }
 0x3b6   : > { %5618 = vmatprep.mubr.msk.f32.mxu0 %vm2757_vm2, %v8165_v3  ;;  %v9345_v3 = vld [vmem:[#allocation61_spill] sm:$0xff] }
 0x3b9   : > { %5619 = vmatmul.mubr.msk.f32.gmra.mrb[76].mxu0 %vm2757_vm2, %v8173_v51  ;;  %v9346_v51 = vmov 0.0  }
 0x3ba   : > { %5621 = vmatprep.mubr.msk.f32.mxu0 %vm2757_vm2, %v8191_v32 }
 0x3bd   : > { %5622 = vmatmul.mubr.msk.f32.gmra.mrb[78].mxu0 %vm2757_vm2, %v8199_v31 }
 0x3be   : > { %5624 = vmatprep.mubr.msk.f32.mxu0 %vm2757_vm2, %v8224_v15 }
 0x3c1   : > { %5625 = vmatmul.mubr.msk.f32.gmra.mrb[80].mxu0 %vm2757_vm2, %v8230_v59 }
 0x3c2   : > { %5627 = vmatprep.mubr.msk.f32.mxu0 %vm2757_vm2, %v8250_v7 }
 0x3c5   : > { %5628 = vmatmul.mubr.msk.f32.gmra.mrb[82].mxu0 %vm2757_vm2, %v8256_v58  ;;  %v9348_v58 = vld [vmem:[#allocation7_spill] sm:$0xff] }
 0x3c6   : > { %5630 = vmatprep.mubr.msk.f32.mxu0 %vm2757_vm2, %v8272_v36 }
 0x3c9   : > { %5631 = vmatmul.mubr.msk.f32.gmra.mrb[84].mxu0 %vm2757_vm2, %v8278_v39 }
 0x3ca   : > { %5633 = vmatprep.mubr.msk.f32.mxu0 %vm2757_vm2, %v8294_v11 }
 0x3cd   : > { %5634 = vmatmul.mubr.msk.f32.gmra.mrb[86].mxu0 %vm2757_vm2, %v8300_v45 }
 0x3ce   : > { %5636 = vmatprep.mubr.msk.f32.mxu0 %vm2757_vm2, %v8316_v38  ;;  %v9351_v38 = vld [vmem:[#allocation14_spill] sm:$0xff] }
 0x3d1   : > { %5637 = vmatmul.mubr.msk.f32.gmra.mrb[88].mxu0 %vm2757_vm2, %v8322_v60 }
 0x3d2   : > { %5639 = vmatprep.mubr.msk.f32.mxu0 %vm2757_vm2, %v8127_v16  ;;  %v9339_v16 = vld [vmem:[#allocation71_spill] sm:$0xff] }
 0x3d5   : > { %5640 = vmatmul.mubr.msk.f32.gmra.mrb[90].mxu0 %vm2757_vm2, %v8133_v40  ;;  %v9340_v40 = vld [vmem:[#allocation88_spill] sm:$0xff] }
 0x3d6   : > { %5642 = vmatprep.mubr.msk.f32.mxu0 %vm2757_vm2, %v8151_v54  ;;  %v9343_v54 = vld [vmem:[#allocation75_spill] sm:$0xff] }
 0x3d9   : > { %5643 = vmatmul.mubr.msk.f32.gmra.mrb[92].mxu0 %vm2757_vm2, %v8159_v23  ;;  %v9344_v23 = vld [vmem:[#allocation78_spill] sm:$0xff] }
 0x3da   : > { %5645 = vmatprep.mubr.msk.f32.mxu0 %vm2757_vm2, %v8177_v53  ;;  %v8574_v53 = vld [vmem:[%s8944_s8] ss:$0 sm:$0xff] }
 0x3db   : > { %v1425_v60 = vadd.f32 %v8574_v53, %v9351_v38  ;;  %v9362_v38 = vld [vmem:[#allocation6_spill] sm:$0xff] }
 0x3dd   : > { %5646 = vmatmul.mubr.msk.f32.gmra.mrb[94].mxu0 %vm2757_vm2, %v8185_v2  ;;  %v9347_v2 = vld [vmem:[#allocation101_spill] sm:$0xff] }
 0x3de   : > { %5648 = vmatprep.mubr.msk.f32.mxu0 %vm2757_vm2, %v8209_v1  ;;  %v1949_v32 = vadd.f32 %v8574_v53, %v9347_v2 }
 0x3e1   : > { %5649 = vmatmul.mubr.msk.f32.gmra.mrb[96].mxu0 %vm2757_vm2, %v8218_v19 }
 0x3e2   : > { %5651 = vmatprep.mubr.msk.f32.mxu0 %vm2757_vm2, %v8238_v44 }
 0x3e5   : > { %5652 = vmatmul.mubr.msk.f32.gmra.mrb[98].mxu0 %vm2757_vm2, %v8244_v29 }
 0x3e6   : > { %5654 = vmatprep.mubr.msk.f32.mxu0 %vm2757_vm2, %v8264_v28  ;;  %v1420_v28 = vadd.f32 %v9348_v58, %v8574_v53 }
 0x3e9   : > { %5655 = vmatmul.mubr.msk.f32.gmra.mrb[100].mxu0 %vm2757_vm2, %v8270_v0  ;;  %v9349_v0 = vld [vmem:[#allocation8_spill] sm:$0xff] }
 0x3ea   : > { %5657 = vmatprep.mubr.msk.f32.mxu0 %vm2757_vm2, %v8286_v9  ;;  %v1415_v36 = vadd.f32 %v8574_v53, %v9349_v0 }
 0x3ed   : > { %5658 = vmatmul.mubr.msk.f32.gmra.mrb[102].mxu0 %vm2757_vm2, %v9339_v16 }
 0x3ee   : > { %5660 = vmatprep.mubr.msk.f32.mxu0 %vm2757_vm2, %v9340_v40  ;;  %v9357_v40 = vld [vmem:[#allocation29_spill] sm:$0xff] }
 0x3f1   : > { %5661 = vmatmul.mubr.msk.f32.gmra.mrb[104].mxu0 %vm2757_vm2, %v9341_v4  ;;  %v1455_v4 = vadd.f32 %v8574_v53, %v9357_v40 }
 0x3f2   : > { %5663 = vmatprep.mubr.msk.f32.mxu0 %vm2757_vm2, %v8338_v55 }
 0x3f5   : > { %5664 = vmatmul.mubr.msk.f32.gmra.mrb[106].mxu0 %vm2757_vm2, %v8344_v26 }
 0x3f6   : > { %5666 = vmatprep.mubr.msk.f32.mxu0 %vm2757_vm2, %v8359_v52 }
 0x3f9   : > { %5667 = vmatmul.mubr.msk.f32.gmra.mrb[108].mxu0 %vm2757_vm2, %v8366_v62  ;;  %v9352_v62 = vld [vmem:[#allocation15_spill] sm:$0xff] }
 0x3fa   : > { %5669 = vmatprep.mubr.msk.f32.mxu0 %vm2757_vm2, %v8377_v12 }
 0x3fd   : > { %5670 = vmatmul.mubr.msk.f32.gmra.mrb[110].mxu0 %vm2757_vm2, %v8381_v42 }
 0x3fe   : > { %5672 = vmatprep.mubr.msk.f32.mxu0 %vm2757_vm2, %v8389_v47 }
 0x401   : > { %5673 = vmatmul.mubr.msk.f32.gmra.mrb[112].mxu0 %vm2757_vm2, %v8393_v34 }
 0x402   : > { %5675 = vmatprep.mubr.msk.f32.mxu0 %vm2757_vm2, %v8401_v5  ;;  %v475_v5 = vld [vmem:[%s8945_s9] sm:$0xff] }
 0x405   : > { %5676 = vmatmul.mubr.msk.f32.gmra.mrb[114].mxu0 %vm2757_vm2, %v8405_v61  ;;  %v476_v61 = vld [vmem:[%s8945_s9 + $0x8] sm:$0xff] }
 0x406   : > { %5678 = vmatprep.mubr.msk.f32.mxu0 %vm2757_vm2, %v8413_v35  ;;  %v5973_v35 = vpack.c.bf16 %v476_v61, %v475_v5  ;;  %v9365_v61 = vld [vmem:[#allocation12_spill] sm:$0xff] }
 0x408   : > { %5974 = vmatpush3.bf16.msra.mxu0 %v5973_v35 }
 0x409   : > { %5679 = vmatmul.mubr.msk.f32.gmra.mrb[116].mxu0 %vm2757_vm2, %v8417_v21  ;;  %v9355_v21 = vld [vmem:[#allocation24_spill] sm:$0xff]  ;;  %5975 = vmatprep.subr.bf16.mxu0 %v9338_v6 }
 0x40a   : > { %5681 = vmatprep.mubr.msk.f32.mxu0 %vm2757_vm2, %v8425_v14 }
 0x40d   : > { %5682 = vmatmul.mubr.msk.f32.gmra.mrb[118].mxu0 %vm2757_vm2, %v6144_v18 }
 0x40e   : > { %5684 = vmatprep.mubr.msk.f32.mxu0 %vm2757_vm2, %v6150_v27  ;;  %v9356_v27 = vld [vmem:[#allocation25_spill] sm:$0xff] }
 0x40f   : > { %v1460_v16 = vadd.f32 %v9356_v27, %v8574_v53 }
 0x411   : > { %5685 = vmatmul.mubr.msk.f32.gmra.mrb[120].mxu0 %vm2757_vm2, %v6152_v56  ;;  %v9354_v56 = vld [vmem:[#allocation19_spill] sm:$0xff] }
 0x412   : > { %5687 = vmatprep.mubr.msk.f32.mxu0 %vm2757_vm2, %v8330_v22  ;;  %v9350_v22 = vld [vmem:[#allocation11_spill] sm:$0xff]  ;;  %v1450_v17 = vadd.f32 %v9354_v56, %v8574_v53  ;;  %v1495_v56 = vadd.f32 %v8574_v53, %v9365_v61 }
 0x413   : > { %v1430_v55 = vadd.f32 %v9350_v22, %v8574_v53 }
 0x415   : > { %5688 = vmatmul.mubr.msk.f32.gmra.mrb[122].mxu0 %vm2757_vm2, %v8336_v33 }
 0x416   : > { %5690 = vmatprep.mubr.msk.f32.mxu0 %vm2757_vm2, %v8350_v30 }
 0x419   : > { %5691 = vmatmul.mubr.msk.f32.gmra.mrb[124].mxu0 %vm2757_vm2, %v8354_v41 }
 0x41a   : > { %5693 = vmatprep.mubr.msk.f32.mxu0 %vm2757_vm2, %v8368_v24  ;;  %v1440_v24 = vadd.f32 %v9352_v62, %v8574_v53 }
 0x41d   : > { %5694 = vmatmul.mubr.msk.f32.gmra.mrb[126].mxu0 %vm2757_vm2, %v8375_v49  ;;  %v9353_v49 = vld [vmem:[#allocation18_spill] sm:$0xff] }
 0x41e   : > { %5696 = vmatprep.mubr.msk.f32.mxu0 %vm2757_vm2, %v8383_v57  ;;  %v1435_v42 = vadd.f32 %v8574_v53, %v9353_v49 }
 0x421   : > { %5697 = vmatmul.mubr.msk.f32.gmra.mrb[128].mxu0 %vm2757_vm2, %v8387_v46 }
 0x422   : > { %5699 = vmatprep.mubr.msk.f32.mxu0 %vm2757_vm2, %v8395_v43 }
 0x425   : > { %5700 = vmatmul.mubr.msk.f32.gmra.mrb[130].mxu0 %vm2757_vm2, %v9342_v8 }
 0x426   : > { %5702 = vmatprep.mubr.msk.f32.mxu0 %vm2757_vm2, %v9343_v54 }
 0x429   : > { %5703 = vmatmul.mubr.msk.f32.gmra.mrb[132].mxu0 %vm2757_vm2, %v9344_v23 }
 0x42a   : > { %5705 = vmatprep.mubr.msk.f32.mxu0 %vm2757_vm2, %v8419_v25  ;;  %v1445_v25 = vadd.f32 %v8574_v53, %v9355_v21 }
 0x42d   : > { %5706 = vmatmul.mubr.msk.f32.gmra.mrb[134].mxu0 %vm2757_vm2, %v9345_v3 }
 0x42e   : > { %5708 = vmatprep.mubr.msk.f32.mxu0 %vm2757_vm2, %v8429_v63 }
 0x431   : > { %5709 = vmatmul.mubr.msk.f32.gmra.mrb[136].mxu0 %vm2757_vm2, %v8432_v20 }
 0x432   : > { %5729 = vmatprep.mubr.msk.f32.mxu0 %vm6221_vm13, %v9346_v51 }
 0x44a   : > { %v4063_v33 = vpop.f32.mrb[134].mxu1 }
 0x44b   : > { %v8578_v31 = vmul.f32 %v4063_v33, %v1949_v32  ;;  %v5715_v1 = vpop.f32.mrb[135].mxu1  ;;  %v9358_v32 = vld [vmem:[#allocation30_spill] sm:$0xff] }
 0x44c   : > { %v1470_v33 = vadd.f32 %v9358_v32, %v8574_v53  ;;  %v9359_v1 = vld [vmem:[#allocation33_spill] sm:$0xff] }
 0x44d   : > { %v1465_v6 = vadd.f32 %v8574_v53, %v9359_v1  ;;  %v9368_v1 = vld [vmem:[#allocation17_spill] sm:$0xff] }
 0x464   : > { %v5075_v19 = vpop.f32.mrb[70].mxu0 }
 0x465   : > { %v5076_v15 = vpop.f32.mrb[71].mxu0 }
 0x466   : > { %v5077_v59 = vadd.f32 %v5076_v15, %v5075_v19 }
 0x484   : > { %v5110_v44 = vpop.f32.mrb[72].mxu0 }
 0x485   : > { %v5111_v29 = vpop.f32.mrb[73].mxu0 }
 0x486   : > { %v5112_v7 = vadd.f32 %v5111_v29, %v5110_v44 }
 0x488   : > { %v8584_v39 = vadd.f32 %v5112_v7, %v5077_v59  ;;  %v5617_v9 = vpop.f32.mrb[74].mxu0  ;;  %v9360_v7 = vld [vmem:[#allocation34_spill] sm:$0xff] }
 0x489   : > { %v8586_v30 = vmul.f32 %v5617_v9, %v1420_v28  ;;  %v3611_v11 = vpop.f32.mrb[75].mxu0  ;;  %v1480_v58 = vadd.f32 %v9360_v7, %v8574_v53  ;;  %v9361_v28 = vld [vmem:[#allocation5_spill] sm:$0xff] }
 0x48a   : > { %v8588_v45 = vmul.f32 %v3611_v11, %v1415_v36  ;;  %v1475_v0 = vadd.f32 %v8574_v53, %v9361_v28 }
 0x48c   : > { %v5910_v26 = vpack.c.bf16 %v8586_v30, %v8588_v45  ;;  %v5620_v41 = vpop.f32.mrb[76].mxu0 }
 0x48d   : > { %v8596_v57 = vmul.f32 %v5620_v41, %v1430_v55  ;;  %v3621_v52 = vpop.f32.mrb[77].mxu0  ;;  %v9363_v41 = vld [vmem:[#allocation9_spill] sm:$0xff] }
 0x48e   : > { %v8598_v12 = vmul.f32 %v3621_v52, %v1425_v60  ;;  %v1490_v60 = vadd.f32 %v9362_v38, %v8574_v53  ;;  %v1485_v52 = vadd.f32 %v8574_v53, %v9363_v41 }
 0x490   : > { %v5914_v46 = vpack.c.bf16 %v8596_v57, %v8598_v12  ;;  %v5623_v47 = vpop.f32.mrb[78].mxu0 }
 0x491   : > { %v8606_v34 = vmul.f32 %v5623_v47, %v1440_v24  ;;  %v3631_v43 = vpop.f32.mrb[79].mxu0 }
 0x492   : > { %v8608_v13 = vmul.f32 %v3631_v43, %v1435_v42  ;;  %v9364_v43 = vld [vmem:[#allocation10_spill] sm:$0xff] }
 0x493   : > { %v1500_v5 = vadd.f32 %v9364_v43, %v8574_v53 }
 0x494   : > { %v5918_v14 = vpack.c.bf16 %v8606_v34, %v8608_v13  ;;  %v5626_v18 = vpop.f32.mrb[80].mxu0 }
 0x495   : > { %v8622_v63 = vmul.f32 %v5626_v18, %v1450_v17  ;;  %v3641_v37 = vpop.f32.mrb[81].mxu0 }
 0x496   : > { %v8624_v20 = vmul.f32 %v3641_v37, %v1445_v25  ;;  %v9366_v37 = vld [vmem:[#allocation13_spill] sm:$0xff] }
 0x497   : > { %v1510_v27 = vadd.f32 %v9366_v37, %v8574_v53 }
 0x498   : > { %v5922_v8 = vpack.c.bf16 %v8622_v63, %v8624_v20  ;;  %v5629_v54 = vpop.f32.mrb[82].mxu0 }
 0x499   : > { %v8633_v23 = vmul.f32 %v5629_v54, %v1460_v16  ;;  %v3651_v3 = vpop.f32.mrb[83].mxu0  ;;  %v9367_v16 = vld [vmem:[#allocation16_spill] sm:$0xff] }
 0x49a   : > { %v8635_v2 = vmul.f32 %v3651_v3, %v1455_v4  ;;  %v1505_v40 = vadd.f32 %v8574_v53, %v9367_v16 }
 0x49c   : > { %v5926_v19 = vpack.c.bf16 %v8633_v23, %v8635_v2  ;;  %v5632_v15 = vpop.f32.mrb[84].mxu0 }
 0x49d   : > { %v8643_v59 = vmul.f32 %v5632_v15, %v1470_v33  ;;  %v3661_v44 = vpop.f32.mrb[85].mxu0  ;;  %v9369_v15 = vld [vmem:[#allocation20_spill] sm:$0xff] }
 0x49e   : > { %v8645_v29 = vmul.f32 %v3661_v44, %v1465_v6  ;;  %v1520_v6 = vadd.f32 %v9368_v1, %v8574_v53  ;;  %v1515_v44 = vadd.f32 %v8574_v53, %v9369_v15  ;;  %v9378_v1 = vld [vmem:[#allocation42_spill] sm:$0xff]  ;;  %v9379_v15 = vld [vmem:[#allocation43_spill] sm:$0xff] }
 0x49f   : > { %v1565_v23 = vadd.f32 %v8574_v53, %v9379_v15 }
 0x4a0   : > { %v5930_v36 = vpack.c.bf16 %v8643_v59, %v8645_v29  ;;  %v5635_v9 = vpop.f32.mrb[86].mxu0 }
 0x4a1   : > { %v8653_v11 = vmul.f32 %v5635_v9, %v1480_v58  ;;  %v3671_v22 = vpop.f32.mrb[87].mxu0 }
 0x4a2   : > { %v8655_v55 = vmul.f32 %v3671_v22, %v1475_v0  ;;  %v9370_v22 = vld [vmem:[#allocation22_spill] sm:$0xff] }
 0x4a3   : > { %v1530_v38 = vadd.f32 %v9370_v22, %v8574_v53 }
 0x4a4   : > { %v5934_v62 = vpack.c.bf16 %v8653_v11, %v8655_v55  ;;  %v5638_v24 = vpop.f32.mrb[88].mxu0  ;;  %v9383_v11 = vld [vmem:[#allocation47_spill] sm:$0xff] }
 0x4a5   : > { %v8663_v49 = vmul.f32 %v5638_v24, %v1490_v60  ;;  %v3681_v42 = vpop.f32.mrb[89].mxu0  ;;  %v9371_v60 = vld [vmem:[#allocation26_spill] sm:$0xff]  ;;  %v1585_v55 = vadd.f32 %v8574_v53, %v9383_v11 }
 0x4a6   : > { %v8665_v47 = vmul.f32 %v3681_v42, %v1485_v52  ;;  %v1525_v30 = vadd.f32 %v8574_v53, %v9371_v60  ;;  %v9372_v42 = vld [vmem:[#allocation27_spill] sm:$0xff] }
 0x4a7   : > { %v1540_v43 = vadd.f32 %v9372_v42, %v8574_v53 }
 0x4a8   : > { %v5938_v17 = vpack.c.bf16 %v8663_v49, %v8665_v47  ;;  %v5641_v35 = vpop.f32.mrb[90].mxu0 }
 0x4a9   : > { %v3947_v21 = vmul.f32 %v5641_v35, %v1500_v5  ;;  %v3691_v25 = vpop.f32.mrb[91].mxu0  ;;  %v9373_v5 = vld [vmem:[#allocation31_spill] sm:$0xff] }
 0x4aa   : > { %v3946_v18 = vmul.f32 %v3691_v25, %v1495_v56  ;;  %v1535_v57 = vadd.f32 %v8574_v53, %v9373_v5 }
 0x4ac   : > { %v5908_v4 = vpack.c.bf16 %v3947_v21, %v3946_v18  ;;  %v5644_v54 = vpop.f32.mrb[92].mxu0  ;;  %v9374_v21 = vld [vmem:[#allocation32_spill] sm:$0xff]  ;;  %v9375_v18 = vld [vmem:[#allocation35_spill] sm:$0xff] }
 0x4ad   : > { %v3949_v3 = vmul.f32 %v5644_v54, %v1510_v27  ;;  %v3701_v32 = vpop.f32.mrb[93].mxu0  ;;  %v1550_v25 = vadd.f32 %v9374_v21, %v8574_v53  ;;  %v1545_v34 = vadd.f32 %v8574_v53, %v9375_v18  ;;  %v9377_v54 = vld [vmem:[#allocation41_spill] sm:$0xff] }
 0x4ae   : > { %v3948_v33 = vmul.f32 %v3701_v32, %v1505_v40  ;;  %5909 = vmatprep.subr.bf16.mxu1 %v5908_v4  ;;  %v9376_v40 = vld [vmem:[#allocation36_spill] sm:$0xff]  ;;  %v1555_v63 = vadd.f32 %v8574_v53, %v9377_v54 }
 0x4af   : > { %5911 = vmatpush3.bf16.msra.mxu1 %v5910_v26  ;;  %v1560_v4 = vadd.f32 %v9376_v40, %v8574_v53 }
 0x4b0   : > { %v5912_v7 = vpack.c.bf16 %v3949_v3, %v3948_v33  ;;  %v5647_v58 = vpop.f32.mrb[94].mxu0 }
 0x4b1   : > { %v3951_v28 = vmul.f32 %v5647_v58, %v1520_v6  ;;  %v3711_v0 = vpop.f32.mrb[95].mxu0  ;;  %v1570_v6 = vadd.f32 %v9378_v1, %v8574_v53 }
 0x4b2   : > { %v3950_v9 = vmul.f32 %v3711_v0, %v1515_v44  ;;  %5913 = vmatprep.subr.bf16.mxu1 %v5912_v7 }
 0x4b3   : > { %5915 = vmatpush3.bf16.msra.mxu1 %v5914_v46 }
 0x4b4   : > { %v5916_v45 = vpack.c.bf16 %v3951_v28, %v3950_v9  ;;  %v5650_v26 = vpop.f32.mrb[96].mxu0  ;;  %v9380_v28 = vld [vmem:[#allocation44_spill] sm:$0xff]  ;;  %v9381_v9 = vld [vmem:[#allocation45_spill] sm:$0xff] }
 0x4b5   : > { %v3953_v41 = vmul.f32 %v5650_v26, %v1530_v38  ;;  %v3721_v52 = vpop.f32.mrb[97].mxu0  ;;  %v1580_v0 = vadd.f32 %v9380_v28, %v8574_v53  ;;  %v1575_v59 = vadd.f32 %v8574_v53, %v9381_v9 }
 0x4b6   : > { %v3952_v24 = vmul.f32 %v3721_v52, %v1525_v30  ;;  %5917 = vmatprep.subr.bf16.mxu1 %v5916_v45  ;;  %v9382_v30 = vld [vmem:[#allocation46_spill] sm:$0xff] }
 0x4b7   : > { %5919 = vmatpush3.bf16.msra.mxu1 %v5918_v14  ;;  %v1590_v45 = vadd.f32 %v9382_v30, %v8574_v53 }
 0x4b8   : > { %v5920_v12 = vpack.c.bf16 %v3953_v41, %v3952_v24  ;;  %v5653_v46 = vpop.f32.mrb[98].mxu0 }
 0x4b9   : > { %v3955_v61 = vmul.f32 %v5653_v46, %v1540_v43  ;;  %v3731_v56 = vpop.f32.mrb[99].mxu0  ;;  %v9385_v43 = vld [vmem:[#allocation48_spill] sm:$0xff] }
 0x4ba   : > { %v3954_v35 = vmul.f32 %v3731_v56, %v1535_v57  ;;  %5921 = vmatprep.subr.bf16.mxu1 %v5920_v12  ;;  %v1600_v49 = vadd.f32 %v9385_v43, %v8574_v53 }
 0x4bb   : > { %5923 = vmatpush3.bf16.msra.mxu1 %v5922_v8 }
 0x4bc   : > { %v5924_v13 = vpack.c.bf16 %v3955_v61, %v3954_v35  ;;  %v5656_v14 = vpop.f32.mrb[100].mxu0  ;;  %v9388_v35 = vld [vmem:[#allocation50_spill] sm:$0xff] }
 0x4bd   : > { %v3957_v37 = vmul.f32 %v5656_v14, %v1550_v25  ;;  %v3741_v27 = vpop.f32.mrb[101].mxu0  ;;  %v1610_v21 = vadd.f32 %v9388_v35, %v8574_v53  ;;  %v9389_v25 = vld [vmem:[#allocation51_spill] sm:$0xff] }
 0x4be   : > { %v3956_v16 = vmul.f32 %v3741_v27, %v1545_v34  ;;  %5925 = vmatprep.subr.bf16.mxu1 %v5924_v13  ;;  %v1605_v18 = vadd.f32 %v8574_v53, %v9389_v25 }
 0x4bf   : > { %5927 = vmatpush3.bf16.msra.mxu1 %v5926_v19 }
 0x4c0   : > { %v5928_v20 = vpack.c.bf16 %v3957_v37, %v3956_v16  ;;  %v5659_v8 = vpop.f32.mrb[102].mxu0  ;;  %v9390_v16 = vld [vmem:[#allocation52_spill] sm:$0xff] }
 0x4c1   : > { %v3959_v3 = vmul.f32 %v5659_v8, %v1560_v4  ;;  %v3751_v32 = vpop.f32.mrb[103].mxu0  ;;  %v1620_v40 = vadd.f32 %v9390_v16, %v8574_v53  ;;  %v9391_v4 = vld [vmem:[#allocation53_spill] sm:$0xff] }
 0x4c2   : > { %v3958_v33 = vmul.f32 %v3751_v32, %v1555_v63  ;;  %5929 = vmatprep.subr.bf16.mxu1 %v5928_v20  ;;  %v1615_v54 = vadd.f32 %v8574_v53, %v9391_v4 }
 0x4c3   : > { %5931 = vmatpush3.bf16.msra.mxu1 %v5930_v36 }
 0x4c4   : > { %v5932_v2 = vpack.c.bf16 %v3959_v3, %v3958_v33  ;;  %v5662_v19 = vpop.f32.mrb[104].mxu0  ;;  %v9392_v33 = vld [vmem:[#allocation54_spill] sm:$0xff] }
 0x4c5   : > { %v3961_v44 = vmul.f32 %v5662_v19, %v1570_v6  ;;  %v3761_v7 = vpop.f32.mrb[105].mxu0  ;;  %v1630_v1 = vadd.f32 %v9392_v33, %v8574_v53  ;;  %v9393_v6 = vld [vmem:[#allocation55_spill] sm:$0xff] }
 0x4c6   : > { %v3960_v58 = vmul.f32 %v3761_v7, %v1565_v23  ;;  %5933 = vmatprep.subr.bf16.mxu1 %v5932_v2  ;;  %v1625_v15 = vadd.f32 %v8574_v53, %v9393_v6  ;;  %v9402_v6 = vld [vmem:[#allocation68_spill] sm:$0xff] }
 0x4c7   : > { %5935 = vmatpush3.bf16.msra.mxu1 %v5934_v62 }
 0x4c8   : > { %v5936_v29 = vpack.c.bf16 %v3961_v44, %v3960_v58  ;;  %v5665_v36 = vpop.f32.mrb[106].mxu0  ;;  %v9394_v58 = vld [vmem:[#allocation56_spill] sm:$0xff] }
 0x4c9   : > { %v8726_v22 = vmul.f32 %v5665_v36, %v1580_v0  ;;  %v3771_v38 = vpop.f32.mrb[107].mxu0  ;;  %v1640_v28 = vadd.f32 %v9394_v58, %v8574_v53  ;;  %v9395_v0 = vld [vmem:[#allocation57_spill] sm:$0xff] }
 0x4ca   : > { %v8728_v60 = vmul.f32 %v3771_v38, %v1575_v59  ;;  %5937 = vmatprep.subr.bf16.mxu1 %v5936_v29  ;;  %v1635_v9 = vadd.f32 %v8574_v53, %v9395_v0 }
 0x4cb   : > { %5939 = vmatpush3.bf16.msra.mxu1 %v5938_v17  ;;  %v9387_v17 = vld [vmem:[#allocation49_spill] sm:$0xff] }
 0x4cc   : > { %v5942_v62 = vpack.c.bf16 %v8726_v22, %v8728_v60  ;;  %v5668_v26 = vpop.f32.mrb[108].mxu0  ;;  %v1595_v5 = vadd.f32 %v8574_v53, %v9387_v17  ;;  %v9398_v17 = vld [vmem:[#allocation62_spill] sm:$0xff] }
 0x4cd   : > { %v8739_v41 = vmul.f32 %v5668_v26, %v1590_v45  ;;  %v3781_v52 = vpop.f32.mrb[109].mxu0  ;;  %v9396_v45 = vld [vmem:[#allocation59_spill] sm:$0xff] }
 0x4ce   : > { %v8741_v24 = vmul.f32 %v3781_v52, %v1585_v55  ;;  %4737 = vmatmul.mubr.msk.f32.vlgmr.msra.gmra.mrb[136].mxu1 %vm6700_vm10, %v9297_v50  ;;  %v1650_v11 = vadd.f32 %v9396_v45, %v8574_v53  ;;  %v9397_v55 = vld [vmem:[#allocation60_spill] sm:$0xff] }
 0x4cf   : > { %4738 = vmatprep.mubr.msk.f32.mxu1 %vm6675_vm5, %v9297_v50  ;;  %v1645_v26 = vadd.f32 %v8574_v53, %v9397_v55 }
 0x4d0   : > { %v5946_v57 = vpack.c.bf16 %v8739_v41, %v8741_v24  ;;  %v5671_v12 = vpop.f32.mrb[110].mxu0 }
 0x4d1   : > { %v8755_v46 = vmul.f32 %v5671_v12, %v1600_v49  ;;  %v3791_v61 = vpop.f32.mrb[111].mxu0  ;;  %v9399_v12 = vld [vmem:[#allocation63_spill] sm:$0xff] }
 0x4d2   : > { %v8757_v56 = vmul.f32 %v3791_v61, %v1595_v5  ;;  %v1660_v5 = vadd.f32 %v9398_v17, %v8574_v53  ;;  %v1655_v61 = vadd.f32 %v8574_v53, %v9399_v12 }
 0x4d4   : > { %v5950_v34 = vpack.c.bf16 %v8755_v46, %v8757_v56  ;;  %v5674_v13 = vpop.f32.mrb[112].mxu0 }
 0x4d5   : > { %v8765_v14 = vmul.f32 %v5674_v13, %v1610_v21  ;;  %v3801_v37 = vpop.f32.mrb[113].mxu0 }
 0x4d6   : > { %v8767_v27 = vmul.f32 %v3801_v37, %v1605_v18  ;;  %v9400_v37 = vld [vmem:[#allocation64_spill] sm:$0xff] }
 0x4d7   : > { %v1670_v16 = vadd.f32 %v9400_v37, %v8574_v53 }
 0x4d8   : > { %v5954_v63 = vpack.c.bf16 %v8765_v14, %v8767_v27  ;;  %v5677_v20 = vpop.f32.mrb[114].mxu0 }
 0x4d9   : > { %v8775_v8 = vmul.f32 %v5677_v20, %v1620_v40  ;;  %v3811_v3 = vpop.f32.mrb[115].mxu0  ;;  %v9401_v40 = vld [vmem:[#allocation65_spill] sm:$0xff] }
 0x4da   : > { %v8777_v32 = vmul.f32 %v3811_v3, %v1615_v54  ;;  %v1665_v4 = vadd.f32 %v8574_v53, %v9401_v40 }
 0x4dc   : > { %v5958_v23 = vpack.c.bf16 %v8775_v8, %v8777_v32  ;;  %v5680_v2 = vpop.f32.mrb[116].mxu0  ;;  %v9414_v8 = vld [vmem:[#allocation85_spill] sm:$0xff] }
 0x4dd   : > { %v8785_v19 = vmul.f32 %v5680_v2, %v1630_v1  ;;  %v3821_v44 = vpop.f32.mrb[117].mxu0  ;;  %v9403_v2 = vld [vmem:[#allocation69_spill] sm:$0xff]  ;;  %v1725_v32 = vadd.f32 %v8574_v53, %v9414_v8 }
 0x4de   : > { %v8787_v7 = vmul.f32 %v3821_v44, %v1625_v15  ;;  %v1680_v15 = vadd.f32 %v9402_v6, %v8574_v53  ;;  %v1675_v44 = vadd.f32 %v8574_v53, %v9403_v2  ;;  %v9412_v6 = vld [vmem:[#allocation84_spill] sm:$0xff]  ;;  %v9413_v2 = vld [vmem:[#allocation86_spill] sm:$0xff] }
 0x4e0   : > { %v5962_v59 = vpack.c.bf16 %v8785_v19, %v8787_v7  ;;  %v5683_v29 = vpop.f32.mrb[118].mxu0  ;;  %v478_v19 = vld [vmem:[%s8945_s9 + $0x18] sm:$0xff] }
 0x4e1   : > { %v8795_v36 = vmul.f32 %v5683_v29, %v1640_v28  ;;  %v3831_v38 = vpop.f32.mrb[119].mxu0 }
 0x4e2   : > { %v8797_v30 = vmul.f32 %v3831_v38, %v1635_v9  ;;  %v9404_v38 = vld [vmem:[#allocation72_spill] sm:$0xff] }
 0x4e3   : > { %v1690_v45 = vadd.f32 %v9404_v38, %v8574_v53  ;;  %v4742_v38 = vld [vmem:[%s8946_s10] ss:$0 sm:$0xff] }
 0x4e4   : > { %v5966_v52 = vpack.c.bf16 %v8795_v36, %v8797_v30  ;;  %v5686_v42 = vpop.f32.mrb[120].mxu0 }
 0x4e5   : > { %v8805_v43 = vmul.f32 %v5686_v42, %v1650_v11  ;;  %v3841_v49 = vpop.f32.mrb[121].mxu0  ;;  %v9405_v11 = vld [vmem:[#allocation73_spill] sm:$0xff] }
 0x4e6   : > { %v8807_v47 = vmul.f32 %v3841_v49, %v1645_v26  ;;  %v1685_v22 = vadd.f32 %v8574_v53, %v9405_v11  ;;  %v9406_v49 = vld [vmem:[#allocation76_spill] sm:$0xff] }
 0x4e7   : > { %v1700_v17 = vadd.f32 %v9406_v49, %v8574_v53 }
 0x4e8   : > { %v5970_v35 = vpack.c.bf16 %v8805_v43, %v8807_v47  ;;  %v5689_v21 = vpop.f32.mrb[122].mxu0 }
 0x4e9   : > { %v3979_v25 = vmul.f32 %v5689_v21, %v1660_v5  ;;  %v3851_v18 = vpop.f32.mrb[123].mxu0  ;;  %v9407_v5 = vld [vmem:[#allocation77_spill] sm:$0xff] }
 0x4ea   : > { %v3978_v13 = vmul.f32 %v3851_v18, %v1655_v61  ;;  %v1695_v41 = vadd.f32 %v8574_v53, %v9407_v5 }
 0x4ec   : > { %v5940_v54 = vpack.c.bf16 %v3979_v25, %v3978_v13  ;;  %v5692_v20 = vpop.f32.mrb[124].mxu0  ;;  %v9408_v25 = vld [vmem:[#allocation79_spill] sm:$0xff]  ;;  %v9409_v13 = vld [vmem:[#allocation80_spill] sm:$0xff] }
 0x4ed   : > { %v3981_v3 = vmul.f32 %v5692_v20, %v1670_v16  ;;  %v3861_v33 = vpop.f32.mrb[125].mxu0  ;;  %v1710_v18 = vadd.f32 %v9408_v25, %v8574_v53  ;;  %v1705_v46 = vadd.f32 %v8574_v53, %v9409_v13  ;;  %v9411_v20 = vld [vmem:[#allocation82_spill] sm:$0xff] }
 0x4ee   : > { %v3980_v1 = vmul.f32 %v3861_v33, %v1665_v4  ;;  %5941 = vmatprep.subr.bf16.mxu1 %v5940_v54  ;;  %v9410_v4 = vld [vmem:[#allocation81_spill] sm:$0xff]  ;;  %v1715_v14 = vadd.f32 %v8574_v53, %v9411_v20 }
 0x4ef   : > { %5943 = vmatpush3.bf16.msra.mxu1 %v5942_v62  ;;  %v1720_v54 = vadd.f32 %v9410_v4, %v8574_v53 }
 0x4f0   : > { %v5944_v58 = vpack.c.bf16 %v3981_v3, %v3980_v1  ;;  %v5695_v28 = vpop.f32.mrb[126].mxu0 }
 0x4f1   : > { %v3983_v0 = vmul.f32 %v5695_v28, %v1680_v15  ;;  %v3871_v9 = vpop.f32.mrb[127].mxu0  ;;  %v1730_v15 = vadd.f32 %v9412_v6, %v8574_v53 }
 0x4f2   : > { %v3982_v29 = vmul.f32 %v3871_v9, %v1675_v44  ;;  %5945 = vmatprep.subr.bf16.mxu1 %v5944_v58  ;;  %v3347_v44 = vadd.f32 %v9413_v2, %v8584_v39  ;;  %v477_v39 = vld [vmem:[%s8945_s9 + $0x10] sm:$0xff] }
 0x4f3   : > { %5947 = vmatpush3.bf16.msra.mxu1 %v5946_v57  ;;  %v5976_v48 = vpack.c.bf16 %v478_v19, %v477_v39 }
 0x4f4   : > { %v5948_v60 = vpack.c.bf16 %v3983_v0, %v3982_v29  ;;  %v5698_v62 = vpop.f32.mrb[128].mxu0  ;;  %6153 = vrcp.f32 %v3347_v44 }
 0x4f5   : > { %v3985_v55 = vmul.f32 %v5698_v62, %v1690_v45  ;;  %v3881_v26 = vpop.f32.mrb[129].mxu0  ;;  %5977 = vmatpush3.bf16.msra.mxu0 %v5976_v48 }
 0x4f6   : > { %v3984_v42 = vmul.f32 %v3881_v26, %v1685_v22  ;;  %5949 = vmatprep.subr.bf16.mxu1 %v5948_v60 }
 0x4f7   : > { %5951 = vmatpush3.bf16.msra.mxu1 %v5950_v34 }
 0x4f8   : > { %v5952_v24 = vpack.c.bf16 %v3985_v55, %v3984_v42  ;;  %v5701_v57 = vpop.f32.mrb[130].mxu0 }
 0x4f9   : > { %v3987_v12 = vmul.f32 %v5701_v57, %v1700_v17  ;;  %v3891_v61 = vpop.f32.mrb[131].mxu0 }
 0x4fa   : > { %v3986_v21 = vmul.f32 %v3891_v61, %v1695_v41  ;;  %5953 = vmatprep.subr.bf16.mxu1 %v5952_v24 }
 0x4fb   : > { %5955 = vmatpush3.bf16.msra.mxu1 %v5954_v63 }
 0x4fc   : > { %v5956_v56 = vpack.c.bf16 %v3987_v12, %v3986_v21  ;;  %v5704_v34 = vpop.f32.mrb[132].mxu0 }
 0x4fd   : > { %v3989_v37 = vmul.f32 %v5704_v34, %v1710_v18  ;;  %v3901_v16 = vpop.f32.mrb[133].mxu0 }
 0x4fe   : > { %v3988_v40 = vmul.f32 %v3901_v16, %v1705_v46  ;;  %5957 = vmatprep.subr.bf16.mxu1 %v5956_v56  ;;  %v6154_v53 = vpop.eup %6153 }
 0x4ff   : > { %5959 = vmatpush3.bf16.msra.mxu1 %v5958_v23 }
 0x500   : > { %v5960_v27 = vpack.c.bf16 %v3989_v37, %v3988_v40  ;;  %v5707_v63 = vpop.f32.mrb[134].mxu0 }
 0x501   : > { %v3991_v3 = vmul.f32 %v5707_v63, %v1720_v54  ;;  %v3911_v33 = vpop.f32.mrb[135].mxu0 }
 0x502   : > { %v3990_v1 = vmul.f32 %v3911_v33, %v1715_v14  ;;  %5961 = vmatprep.subr.bf16.mxu1 %v5960_v27 }
 0x503   : > { %5963 = vmatpush3.bf16.msra.mxu1 %v5962_v59 }
 0x504   : > { %v5964_v23 = vpack.c.bf16 %v3991_v3, %v3990_v1  ;;  %v5710_v58 = vpop.f32.mrb[136].mxu0 }
 0x505   : > { %v3993_v28 = vmul.f32 %v5710_v58, %v1730_v15  ;;  %v3921_v0 = vpop.f32.mrb[137].mxu0 }
 0x506   : > { %v3992_v9 = vmul.f32 %v3921_v0, %v1725_v32  ;;  %5965 = vmatprep.subr.bf16.mxu1 %v5964_v23 }
 0x507   : > { %5967 = vmatpush3.bf16.msra.mxu1 %v5966_v52 }
 0x508   : > { %v5968_v29 = vpack.c.bf16 %v3993_v28, %v3992_v9 }
 0x50a   : > { %5969 = vmatprep.subr.bf16.mxu1 %v5968_v29 }
 0x50b   : > { %5971 = vmatpush3.bf16.msra.mxu1 %v5970_v35 }
 0x50c   : > { %5716 = vmatprep.subr.mxu1 %v9346_v51 }
 0x50e   : > { %4739 = vmatmul.mubr.msk.f32.vlgmr.msra.gmra.mrb[138].mxu1 %vm6704_vm11, %v9297_v50 }
 0x50f   : > { %5717 = vmatpush3.msk.msra.mxu1 %vm3541_vm7, %v9336_v10  ;;  %5718 = vmatprep.mubr.msk.f32.mxu1 %vm6221_vm13, %v9346_v51 }
 0x512   : > { %5719 = vmatmul.mubr.msk.f32.vlgmr.msra.gmra.mrb[140].mxu1 %vm2757_vm2, %v6154_v53 }
 0x5a1   : > { %v5212_v50 = vpop.f32.mrb[136].mxu1 }
 0x5a2   : > { %v5213_v10 = vpop.f32.mrb[137].mxu1 }
 0x5a3   : > { %v5214_v7 = vadd.f32 %v5213_v10, %v5212_v50 }
 0x5a5   : > { %v4135_v51 = vadd.f32 %v5214_v7, %v8578_v31 }
 0x5e1   : > { %v5247_v59 = vpop.f32.mrb[138].mxu1 }
 0x5e2   : > { %v5248_v36 = vpop.f32.mrb[139].mxu1 }
 0x5e3   : > { %v5249_v30 = vadd.f32 %v5248_v36, %v5247_v59 }
 0x5e5   : > { %v4205_v52 = vadd.f32 %v5249_v30, %v4135_v51  ;;  %v4277_v43 = vpop.f32.mrb[140].mxu1 }
 0x5e6   : > { %v5720_v47 = vpop.f32.mrb[141].mxu1 }
 0x5e7   : > { %v4281_v35 = vmul.f32 %v4277_v43, %v4205_v52 }
 0x5e9   : > { %5730 = vmatmul.mubr.msk.f32.vlgmr.msra.gmra.mrb[138].mxu0 %vm764_vm12, %v4281_v35 }
 0x6bc   : > { %v4357_v31 = vpop.f32.mrb[138].mxu0 }
 0x6bd   : > { %v4358_v45 = vadd.f32 %v4742_v38, %v4357_v31  ;;  %v5731_v11 = vpop.f32.mrb[139].mxu0 }
 0x6bf   : > { %4362 = vst.msk [vmem:[%s382_s24] sm:$0xff] %vm4361_vm4, %v4358_v45 }
 0x6c0   : > { %6168 = shalt.err (!%p6165_p3)
}
 0x6c1   : > { %s6169_s12 = scalar_lea.hbm %s8894_s30, 128  ;;  %s6173_s25 = scalar_lea.hbm %s8947_s11, 256 }
 0x6c2   : > { %p6170_p4 = scmp.ne.s32.totalorder %s8894_s30, %s6169_s12  ;;  %p6174_p9 = scmp.lt.u32.totalorder %s8894_s30, %s8947_s11 }
 0x6c3   : > { %p6175_p10 = scmp.lt.u32.totalorder %s6173_s25, %s6169_s12  ;;  %p6177_p12 = scmp.lt.u32.totalorder %s6169_s12, %s8894_s30 }
 0x6c4   : > { %p6171_p7 = pnand %p6170_p4, %p6324_p5 }
 0x6c5   : > { %p6176_p11 = por %p6175_p10, %p6174_p9 }
 0x6c6   : > { %p6172_p8 = pneg %p6171_p7 }
 0x6c7   : > { %p6178_p13 = por %p6177_p12, %p6176_p11 }
 0x6c9   : > { %p6179_p0 = pnand %p6178_p13, %p6172_p8 }
 0x6cb   : > { %6182 = shalt.err (!%p6179_p0)
}
 0x6cc   : > { %5978 = dma.vmem_to_hbm [thread:$0]  (%p6324_p5), %s8896_s14, 128, %s8894_s30, %s4364_s15  }
 0x6cd PF: > { %p5984_p1 = scmp.ge.s32.totalorder %s6217_s20, 2  ;;  %s4389_s0 = sand.u32 1, %s6205_s17  }
 0x6ce   : > { %s4390_s16 = scalar_lea.sflag [#allocation3], %s4389_s0 }
 0x6cf   : > { %p5981_p2 = pnand %p5984_p1, %p6328_p6 }
 0x6d1   : > { %6200 = dma.done.wait (!%p5981_p2), %s4390_s16, 128  }
 0x6d2   : > { %6202 = vsyncadd (!%p5981_p2), %s4390_s16, 4294967168  ;;  %p21_p3 = scmp.ge.s32.totalorder %s6311_s23, 4   ;;  %s9415_s17 = smov %s6209_s18 }
 0x6d3   : > { %s9416_s18 = smov %s6213_s19  ;;  %s9417_s19 = smov %s6322_s26 }
 0x6d4   : > { %s9418_s20 = smov %s6311_s23  ;;  %23 = sbr.rel (!%p21_p3) target bundleno = 5 (0x5), region = 99 }
 0x6db   :  { %4395 = vsyncpa [#allocation3], 1 }
 0x6dc   :  { %4397 = vsyncpa [#allocation3 + $0x1], 1 }

// kernel: tpu_custom_call.1
= control target key start
LH: loop header
LB: loop body
LE: loop exit
PB: predicated region body
PF: predicated region fallthrough
CT: control target
= control target key end

     0   :  { %s8936_s0 = inlined_call_operand.vmem [shape: f32[16,64,32], index: 0, kind: input, shape index: {}]   ;;  %s8937_s1 = inlined_call_operand.vmem [shape: f32[1,32], index: 1, kind: input, shape index: {}]   ;;  %s8938_s2 = inlined_call_operand.vmem [shape: f32[64,32], index: 2, kind: input, shape index: {}]   ;;  %s8939_s3 = inlined_call_operand.vmem [shape: f32[32,32], index: 3, kind: input, shape index: {}]   ;;  %s8940_s4 = inlined_call_operand.vmem [shape: f32[1,32], index: 4, kind: input, shape index: {}]   ;;  %s8941_s5 = inlined_call_operand.vmem [shape: f32[32,32], index: 5, kind: input, shape index: {}]   ;;  %s8942_s6 = inlined_call_operand.vmem [shape: f32[1,32], index: 6, kind: input, shape index: {}]   ;;  %s8943_s7 = inlined_call_operand.vmem [shape: f32[32,32], index: 7, kind: input, shape index: {}]   ;;  %s8944_s8 = inlined_call_operand.vmem [shape: f32[1,32], index: 8, kind: input, shape index: {}]   ;;  %s8945_s9 = inlined_call_operand.vmem [shape: f32[32,16], index: 9, kind: input, shape index: {}]   ;;  %s8946_s10 = inlined_call_operand.vmem [shape: f32[1,16], index: 10, kind: input, shape index: {}]   ;;  %s8947_s11 = inlined_call_operand.hbm [shape: f32[16,16], index: 11, kind: output, shape index: {}]  }
   0x1   :  { %9044 = sst [smem:[#allocation106_spill]] %s8936_s0 }
   0x2   :  { %16 = vsyncpa [#allocation3], 0 }
   0x3   :  { %18 = vsyncpa [#allocation3 + $0x1], 0  ;;  %s6286_s17 = smov 0   ;;  %s6288_s18 = smov 0  }
   0x4   :  { %s6290_s19 = smov 0   ;;  %s6292_s20 = smov 0  }
   0x5 LB: > { %s6307_s21 = sadd.s32 4294967295, %s6217_s20   ;;  %s4436_s22 = sadd.s32 4294967294, %s6217_s20   ;;  %s6217_s20 = sphi %s6292_s20, %s9418_s20   ;;  %s6213_s19 = sphi %s6290_s19, %s9417_s19   ;;  %s6209_s18 = sphi %s6288_s18, %s9416_s18   ;;  %s6205_s17 = sphi %s6286_s17, %s9415_s17  }
   0x6   : > { %s6311_s23 = sadd.s32 1, %s6217_s20   ;;  %s267_s24 = sadd.s32 1, %s6213_s19 }
   0x7   : > { %s264_s25 = ssub.s32 %s6217_s20, %s6311_s23  ;;  %p277_p0 = scmp.ne.s32.totalorder %s6213_s19, %s6209_s18 }
   0x8   : > { %p265_p1 = scmp.eq.s32.totalorder %s264_s25, 0  ;;  %p278_p2 = scmp.eq.s32.totalorder %s6307_s21, 1 }
   0x9   : > { %p283_p3 = scmp.ne.s32.totalorder %s6209_s18, %s6205_s17  ;;  %p284_p4 = scmp.eq.s32.totalorder %s4436_s22, 1 }
   0xa   : > { %s6322_s26 = scalar_select %p265_p1, %s6213_s19, %s267_s24  }
   0xb   : > { %p6324_p5 = por %p278_p2, %p277_p0  ;;  %p6328_p6 = por %p284_p4, %p283_p3 }
   0xc   : > { %p4439_p7 = scmp.ge.s32.totalorder %s6217_s20, 1  ;;  %p342_p8 = scmp.lt.s32.totalorder %s6217_s20, 3 }
   0xe   : > { %p343_p9 = pnand %p4439_p7, %p342_p8 }
  0x10   : > { %346 = sbr.rel (%p343_p9) target bundleno = 1741 (0x6cd), region = 64 }
  0x17   : > { %s4441_s29 = sshll.u32 %s6307_s21, 3  ;;  %s9047_s0 = sld [smem:[#allocation106_spill]]  ;;  %v6343_v0 = vld [vmem:[%s8938_s2] sm:$0xff]  ;;  %v6348_v1 = vld [vmem:[%s8938_s2 + $0x8] sm:$0xff]  ;;  %v6382_v16 = vld [vmem:[%s8938_s2 + $0x10] sm:$0xff]  ;;  %vm764_vm12 = vcmask 261120  }
  0x18   : > { %p384_p10 = scmp.lt.s32.totalorder %s4441_s29, 15  ;;  %v6387_v17 = vld [vmem:[%s8938_s2 + $0x18] sm:$0xff]  ;;  %v6429_v35 = vld [vmem:[%s8938_s2 + $0x20] sm:$0xff]  ;;  %v6434_v36 = vld [vmem:[%s8938_s2 + $0x28] sm:$0xff]  ;;  %vm6221_vm13 = vmmov 0   ;;  %s380_s12 = sand.u32 1, %s6209_s18  }
  0x19   : > { %v6469_v52 = vld [vmem:[%s8938_s2 + $0x30] sm:$0xff]  ;;  %v6474_v53 = vld [vmem:[%s8938_s2 + $0x38] sm:$0xff]  ;;  %s4440_s13 = sshll.u32 %s380_s12, 3  ;;  %s4745_s22 = sshll.u32 %s6307_s21, 7 }
  0x1a   : > { %s9420_s29 = smov (!%p384_p10, %s4441_s29), 15  ;;  %s382_s24 = scalar_lea.vmem [#allocation2], %s4440_s13 }
  0x1b   : > { %s4748_s30 = sshll.u32 %s9420_s29, 6  ;;  %s4364_s15 = scalar_lea.sflag [#allocation3], %s380_s12 }
  0x1c   : > { %s6225_s21 = smov [#allocation2]  }
  0x1d   : > { %s6338_s14 = scalar_lea.vmem %s9047_s0, %s4748_s30  ;;  %s8894_s30 = scalar_lea.hbm %s8947_s11, %s4745_s22 }
  0x1e   : > { %v6351_v2 = vld [vmem:[%s6338_s14 + $0x80] sm:$0xff]  ;;  %v6354_v3 = vld [vmem:[%s6338_s14 + $0x88] sm:$0xff]  ;;  %v6377_v15 = vld [vmem:[%s6338_s14 + $0x90] sm:$0xff]  ;;  %s6159_s13 = sshll.u32 %s6225_s21, 4  ;;  %s6160_s13 = int_to_ptr.vmem [resolvable:$false] %s6159_s13 }
  0x1f   : > { %v438_v4 = vld [vmem:[%s6338_s14 + $0x180] sm:$0xff]  ;;  %v5732_v5 = vpack.c.bf16 %v6354_v3, %v6351_v2  ;;  %v439_v6 = vld [vmem:[%s6338_s14 + $0x188] sm:$0xff]  ;;  %v6396_v21 = vld [vmem:[%s6338_s14 + $0x98] sm:$0xff]  ;;  %s6161_s0 = scalar_lea.vmem %s6160_s13, 256 }
  0x20   : > { %v6361_v7 = vadd.f32 %v6343_v0, %v438_v4  ;;  %v6364_v8 = vld [vmem:[%s6338_s14] sm:$0xff]  ;;  %v6367_v9 = vld [vmem:[%s6338_s14 + $0x8] sm:$0xff]  ;;  %v5764_v10 = vpack.c.bf16 %v439_v6, %v438_v4  ;;  %v6370_v11 = vadd.f32 %v6348_v1, %v439_v6  ;;  %v440_v22 = vld [vmem:[%s6338_s14 + $0x190] sm:$0xff]  ;;  %v5736_v24 = vpack.c.bf16 %v6396_v21, %v6377_v15 }
  0x21   : > { %v5734_v12 = vpack.c.bf16 %v6367_v9, %v6364_v8  ;;  %v422_v13 = vld [vmem:[%s6338_s14 + $0x100] sm:$0xff]  ;;  %v423_v14 = vld [vmem:[%s6338_s14 + $0x108] sm:$0xff]  ;;  %5733 = vmatprep.subr.bf16.mxu0 %v5732_v5  ;;  %v441_v23 = vld [vmem:[%s6338_s14 + $0x198] sm:$0xff]  ;;  %v6412_v29 = vadd.f32 %v6382_v16, %v440_v22  ;;  %v483_v5 = vlaneseq }
  0x22   : > { %9048 = vst [vmem:[#allocation5_spill] sm:$0xff] %v6361_v7  ;;  %9049 = vst [vmem:[#allocation6_spill] sm:$0xff] %v6370_v11  ;;  %v5766_v18 = vpack.c.bf16 %v423_v14, %v422_v13  ;;  %v6390_v19 = vadd.f32 %v6343_v0, %v422_v13  ;;  %v6393_v20 = vadd.f32 %v6348_v1, %v423_v14  ;;  %5765 = vmatprep.subr.bf16.mxu1 %v5764_v10  ;;  %v6403_v25 = vld [vmem:[%s6338_s14 + $0x10] sm:$0xff]  ;;  %v6406_v26 = vld [vmem:[%s6338_s14 + $0x18] sm:$0xff] }
  0x23   : > { %5735 = vmatpush3.bf16.msra.mxu0 %v5734_v12  ;;  %v6409_v27 = vld [vmem:[%s6338_s14 + $0x110] sm:$0xff]  ;;  %v5768_v28 = vpack.c.bf16 %v441_v23, %v440_v22  ;;  %9052 = vst [vmem:[#allocation9_spill] sm:$0xff] %v6412_v29  ;;  %v6415_v30 = vadd.f32 %v6387_v17, %v441_v23  ;;  %v5738_v31 = vpack.c.bf16 %v6406_v26, %v6403_v25  ;;  %v425_v32 = vld [vmem:[%s6338_s14 + $0x118] sm:$0xff]  ;;  %v6421_v33 = vld [vmem:[%s6338_s14 + $0xa0] sm:$0xff] }
  0x24   : > { %9050 = vst [vmem:[#allocation7_spill] sm:$0xff] %v6390_v19  ;;  %9051 = vst [vmem:[#allocation8_spill] sm:$0xff] %v6393_v20  ;;  %5767 = vmatpush3.bf16.msra.mxu1 %v5766_v18  ;;  %v6424_v34 = vld [vmem:[%s6338_s14 + $0xa8] sm:$0xff]  ;;  %5737 = vmatprep.subr.bf16.mxu0 %v5736_v24  ;;  %v5770_v37 = vpack.c.bf16 %v425_v32, %v6409_v27  ;;  %v442_v38 = vld [vmem:[%s6338_s14 + $0x1a0] sm:$0xff]  ;;  %v6443_v41 = vadd.f32 %v6387_v17, %v425_v32 }
  0x25   : > { %9053 = vst [vmem:[#allocation10_spill] sm:$0xff] %v6415_v30  ;;  %v443_v39 = vld [vmem:[%s6338_s14 + $0x1a8] sm:$0xff]  ;;  %v6440_v40 = vld [vmem:[%s6338_s14 + $0x20] sm:$0xff]  ;;  %5769 = vmatprep.subr.bf16.mxu1 %v5768_v28  ;;  %v5740_v42 = vpack.c.bf16 %v6424_v34, %v6421_v33  ;;  %v6453_v47 = vadd.f32 %v6429_v35, %v442_v38  ;;  %v6461_v50 = vld [vmem:[%s6338_s14 + $0xb0] sm:$0xff] }
  0x26   : > { %9054 = vst [vmem:[#allocation11_spill] sm:$0xff] %v6443_v41  ;;  %v6448_v43 = vld [vmem:[%s6338_s14 + $0x28] sm:$0xff]  ;;  %v426_v44 = vld [vmem:[%s6338_s14 + $0x120] sm:$0xff]  ;;  %v5772_v46 = vpack.c.bf16 %v443_v39, %v442_v38  ;;  %v6456_v48 = vadd.f32 %v6434_v36, %v443_v39  ;;  %v6464_v51 = vld [vmem:[%s6338_s14 + $0xb8] sm:$0xff] }
  0x27   : > { %v427_v45 = vld [vmem:[%s6338_s14 + $0x128] sm:$0xff]  ;;  %5739 = vmatpush3.bf16.msra.mxu0 %v5738_v31  ;;  %9055 = vst [vmem:[#allocation12_spill] sm:$0xff] %v6453_v47  ;;  %v5742_v49 = vpack.c.bf16 %v6448_v43, %v6440_v40  ;;  %v444_v54 = vld [vmem:[%s6338_s14 + $0x1b0] sm:$0xff]  ;;  %v445_v56 = vld [vmem:[%s6338_s14 + $0x1b8] sm:$0xff]  ;;  %v6485_v59 = vadd.f32 %v6429_v35, %v426_v44  ;;  %v5744_v61 = vpack.c.bf16 %v6464_v51, %v6461_v50 }
  0x28   : > { %9056 = vst [vmem:[#allocation13_spill] sm:$0xff] %v6456_v48  ;;  %5771 = vmatpush3.bf16.msra.mxu1 %v5770_v37  ;;  %5741 = vmatprep.subr.bf16.mxu0 %v5740_v42  ;;  %v5774_v55 = vpack.c.bf16 %v427_v45, %v426_v44  ;;  %v6479_v57 = vld [vmem:[%s6338_s14 + $0x30] sm:$0xff]  ;;  %v6482_v58 = vld [vmem:[%s6338_s14 + $0x38] sm:$0xff]  ;;  %v6488_v60 = vadd.f32 %v6434_v36, %v427_v45  ;;  %v6495_v4 = vld [vmem:[%s6338_s14 + $0xc0] sm:$0xff] }
  0x29   : > { %5773 = vmatprep.subr.bf16.mxu1 %v5772_v46  ;;  %9057 = vst [vmem:[#allocation14_spill] sm:$0xff] %v6485_v59  ;;  %v428_v62 = vld [vmem:[%s6338_s14 + $0x130] sm:$0xff]  ;;  %v429_v63 = vld [vmem:[%s6338_s14 + $0x138] sm:$0xff]  ;;  %v5776_v6 = vpack.c.bf16 %v445_v56, %v444_v54  ;;  %v6498_v10 = vadd.f32 %v6469_v52, %v444_v54  ;;  %v6501_v12 = vadd.f32 %v6474_v53, %v445_v56  ;;  %v6504_v13 = vld [vmem:[%s6338_s14 + $0xc8] sm:$0xff] }
  0x2a   : > { %9058 = vst [vmem:[#allocation15_spill] sm:$0xff] %v6488_v60  ;;  %v446_v14 = vld [vmem:[%s6338_s14 + $0x1c0] sm:$0xff]  ;;  %v447_v18 = vld [vmem:[%s6338_s14 + $0x1c8] sm:$0xff]  ;;  %v5746_v22 = vpack.c.bf16 %v6482_v58, %v6479_v57  ;;  %v5778_v23 = vpack.c.bf16 %v429_v63, %v428_v62  ;;  %v6511_v24 = vadd.f32 %v6469_v52, %v428_v62  ;;  %v6514_v28 = vadd.f32 %v6474_v53, %v429_v63  ;;  %v6530_v45 = vld [vmem:[%s6338_s14 + $0xd0] sm:$0xff] }
  0x2b   : > { %9059 = vst [vmem:[#allocation16_spill] sm:$0xff] %v6498_v10  ;;  %9060 = vst [vmem:[#allocation17_spill] sm:$0xff] %v6501_v12  ;;  %5743 = vmatpush3.bf16.msra.mxu0 %v5742_v49  ;;  %v5748_v31 = vpack.c.bf16 %v6504_v13, %v6495_v4  ;;  %v6519_v32 = vld [vmem:[%s6338_s14 + $0x40] sm:$0xff]  ;;  %v6522_v37 = vld [vmem:[%s6338_s14 + $0x48] sm:$0xff]  ;;  %v5780_v39 = vpack.c.bf16 %v447_v18, %v446_v14  ;;  %v6526_v42 = vadd.f32 %v6343_v0, %v446_v14 }
  0x2c   : > { %5775 = vmatpush3.bf16.msra.mxu1 %v5774_v55  ;;  %5745 = vmatprep.subr.bf16.mxu0 %v5744_v61  ;;  %9061 = vst [vmem:[#allocation18_spill] sm:$0xff] %v6511_v24  ;;  %9062 = vst [vmem:[#allocation19_spill] sm:$0xff] %v6514_v28  ;;  %v430_v38 = vld [vmem:[%s6338_s14 + $0x140] sm:$0xff]  ;;  %v431_v44 = vld [vmem:[%s6338_s14 + $0x148] sm:$0xff]  ;;  %v6535_v49 = vshrl.u32 %v483_v5, 7  ;;  %v6538_v54 = vadd.f32 %v6348_v1, %v447_v18  ;;  %v6542_v61 = vand.u32 127, %v483_v5 }
  0x2d   : > { %5777 = vmatprep.subr.bf16.mxu1 %v5776_v6  ;;  %9063 = vst [vmem:[#allocation20_spill] sm:$0xff] %v6526_v42  ;;  %v6533_v46 = vld [vmem:[%s6338_s14 + $0xd8] sm:$0xff]  ;;  %v448_v55 = vld [vmem:[%s6338_s14 + $0x1d0] sm:$0xff]  ;;  %v5750_v62 = vpack.c.bf16 %v6522_v37, %v6519_v32  ;;  %v6547_v63 = vadd.f32 %v6343_v0, %v430_v38  ;;  %v6550_v6 = vadd.f32 %v6348_v1, %v431_v44  ;;  %v450_v47 = vld [vmem:[%s6338_s14 + $0x1e0] sm:$0xff] }
  0x2e   : > { %9064 = vst [vmem:[#allocation21_spill] sm:$0xff] %v6535_v49  ;;  %9065 = vst [vmem:[#allocation22_spill] sm:$0xff] %v6538_v54  ;;  %v449_v56 = vld [vmem:[%s6338_s14 + $0x1d8] sm:$0xff]  ;;  %v6553_v14 = vld [vmem:[%s6338_s14 + $0x50] sm:$0xff]  ;;  %v5782_v5 = vpack.c.bf16 %v431_v44, %v430_v38  ;;  %v5752_v18 = vpack.c.bf16 %v6533_v46, %v6530_v45  ;;  %v6563_v10 = vadd.f32 %v6382_v16, %v448_v55  ;;  %v6575_v44 = vadd.s32 1, %v6535_v49 }
  0x2f   : > { %9066 = vst [vmem:[#allocation23_spill] sm:$0xff] %v6542_v61  ;;  %5747 = vmatpush3.bf16.msra.mxu0 %v5746_v22  ;;  %9067 = vst [vmem:[#allocation24_spill] sm:$0xff] %v6547_v63  ;;  %v6558_v22 = vld [vmem:[%s6338_s14 + $0x58] sm:$0xff]  ;;  %v432_v54 = vld [vmem:[%s6338_s14 + $0x150] sm:$0xff]  ;;  %v5784_v12 = vpack.c.bf16 %v449_v56, %v448_v55  ;;  %v523_v7 = vadd.s32 384, %v6542_v61  ;;  %v522_v41 = vadd.s32 256, %v6542_v61 }
  0x30   : > { %9068 = vst [vmem:[#allocation25_spill] sm:$0xff] %v6550_v6  ;;  %5779 = vmatpush3.bf16.msra.mxu1 %v5778_v23  ;;  %5749 = vmatprep.subr.bf16.mxu0 %v5748_v31  ;;  %v433_v42 = vld [vmem:[%s6338_s14 + $0x158] sm:$0xff]  ;;  %9069 = vst [vmem:[#allocation26_spill] sm:$0xff] %v6563_v10  ;;  %v6566_v23 = vadd.f32 %v6387_v17, %v449_v56  ;;  %v6569_v31 = vld [vmem:[%s6338_s14 + $0xe0] sm:$0xff]  ;;  %v6578_v48 = vadd.f32 %v6382_v16, %v432_v54  ;;  %v521_v56 = vadd.s32 128, %v6542_v61 }
  0x31   : > { %5781 = vmatprep.subr.bf16.mxu1 %v5780_v39  ;;  %v6572_v38 = vld [vmem:[%s6338_s14 + $0xe8] sm:$0xff]  ;;  %9071 = vst [vmem:[#allocation28_spill] sm:$0xff] %v6575_v44  ;;  %v6581_v39 = vadd.f32 %v6387_v17, %v433_v42  ;;  %v5754_v10 = vpack.c.bf16 %v6558_v22, %v6553_v14  ;;  %v5786_v30 = vpack.c.bf16 %v433_v42, %v432_v54  ;;  %v6592_v29 = vld [vmem:[%s6338_s14 + $0x60] sm:$0xff]  ;;  %v453_v28 = vld [vmem:[%s6338_s14 + $0x1f8] sm:$0xff]  ;;  %v529_v24 = vmul.u32 64, %v6575_v44 }
  0x32   : > { %9070 = vst [vmem:[#allocation27_spill] sm:$0xff] %v6566_v23  ;;  %9072 = vst [vmem:[#allocation29_spill] sm:$0xff] %v6578_v48  ;;  %v451_v55 = vld [vmem:[%s6338_s14 + $0x1e8] sm:$0xff]  ;;  %v6587_v23 = vmul.u32 64, %v6535_v49  ;;  %v5756_v49 = vpack.c.bf16 %v6572_v38, %v6569_v31  ;;  %v434_v42 = vld [vmem:[%s6338_s14 + $0x160] sm:$0xff] }
  0x33   : > { %9073 = vst [vmem:[#allocation30_spill] sm:$0xff] %v6581_v39  ;;  %5751 = vmatpush3.bf16.msra.mxu0 %v5750_v62  ;;  %v6595_v11 = vld [vmem:[%s6338_s14 + $0x68] sm:$0xff]  ;;  %v6601_v62 = vadd.f32 %v6429_v35, %v450_v47  ;;  %v6604_v39 = vadd.f32 %v6434_v36, %v451_v55  ;;  %v6609_v48 = vld [vmem:[%s6338_s14 + $0xf0] sm:$0xff]  ;;  %v5788_v6 = vpack.c.bf16 %v451_v55, %v450_v47  ;;  %v467_v44 = vld [vmem:[%s8941_s5] sm:$0xff] }
  0x34   : > { %5783 = vmatpush3.bf16.msra.mxu1 %v5782_v5  ;;  %5753 = vmatprep.subr.bf16.mxu0 %v5752_v18  ;;  %v435_v54 = vld [vmem:[%s6338_s14 + $0x168] sm:$0xff]  ;;  %v6612_v63 = vadd.f32 %v6429_v35, %v434_v42  ;;  %v6615_v5 = vld [vmem:[%s6338_s14 + $0xf8] sm:$0xff]  ;;  %v452_v18 = vld [vmem:[%s6338_s14 + $0x1f0] sm:$0xff]  ;;  %vm526_vm0 = vcmp.ge.s32.totalorder %v521_v56, %v6587_v23  ;;  %v5758_v47 = vpack.c.bf16 %v6595_v11, %v6592_v29 }
  0x35   : > { %9074 = vst [vmem:[#allocation31_spill] sm:$0xff] %v6601_v62  ;;  %9075 = vst [vmem:[#allocation32_spill] sm:$0xff] %v6604_v39  ;;  %5785 = vmatprep.subr.bf16.mxu1 %v5784_v12  ;;  %v6621_v62 = vadd.f32 %v6434_v36, %v435_v54  ;;  %v6627_v12 = vadd.f32 %v6469_v52, %v452_v18  ;;  %v6630_v55 = vadd.f32 %v6474_v53, %v453_v28  ;;  %v6633_v39 = vld [vmem:[%s6338_s14 + $0x70] sm:$0xff]  ;;  %v437_v59 = vld [vmem:[%s6338_s14 + $0x178] sm:$0xff] }
  0x36   : > { %9076 = vst [vmem:[#allocation33_spill] sm:$0xff] %v6612_v63  ;;  %vm528_vm1 = vcmp.ge.s32.totalorder %v523_v7, %v6587_v23  ;;  %v5792_v63 = vpack.c.bf16 %v453_v28, %v452_v18  ;;  %v436_v60 = vld [vmem:[%s6338_s14 + $0x170] sm:$0xff]  ;;  %v6654_v19 = vadd.f32 %v6474_v53, %v437_v59  ;;  %vm531_vm2 = vcmp.lt.s32.totalorder %v521_v56, %v529_v24  ;;  %v471_v28 = vld [vmem:[%s8943_s7] sm:$0xff] }
  0x37   : > { %9077 = vst [vmem:[#allocation34_spill] sm:$0xff] %v6621_v62  ;;  %5755 = vmatpush3.bf16.msra.mxu0 %v5754_v10  ;;  %9078 = vst [vmem:[#allocation35_spill] sm:$0xff] %v6627_v12  ;;  %v468_v10 = vld [vmem:[%s8941_s5 + $0x8] sm:$0xff]  ;;  %v5790_v62 = vpack.c.bf16 %v435_v54, %v434_v42  ;;  %v5760_v12 = vpack.c.bf16 %v6615_v5, %v6609_v48  ;;  %v6651_v20 = vadd.f32 %v6469_v52, %v436_v60  ;;  %v8980_v42 = vmov 1.0  }
  0x38   : > { %9079 = vst [vmem:[#allocation36_spill] sm:$0xff] %v6630_v55  ;;  %5787 = vmatpush3.bf16.msra.mxu1 %v5786_v30  ;;  %5757 = vmatprep.subr.bf16.mxu0 %v5756_v49  ;;  %v6645_v55 = vld [vmem:[%s6338_s14 + $0x78] sm:$0xff]  ;;  %vm533_vm3 = vcmp.lt.s32.totalorder %v523_v7, %v529_v24  ;;  %vm6658_vm4 = vmand %vm526_vm0, %vm531_vm2  ;;  %v9080_v30 = vmov 0  ;;  %v472_v49 = vld [vmem:[%s8943_s7 + $0x8] sm:$0xff]  ;;  %v9083_v56 = vmov 0  ;;  %v5796_v54 = vpack.c.bf16 %v468_v10, %v467_v44  ;;  %s4377_s14 = sshll.u32 %s382_s24, 4  ;;  %s8896_s14 = int_to_ptr.vmem [resolvable:$true] %s4377_s14 }
  0x39   : > { %5789 = vmatprep.subr.bf16.mxu1 %v5788_v6  ;;  %v9081_v30 = vsel %vm6658_vm4, 4294967295, %v9080_v30  ;;  %v5762_v6 = vpack.c.bf16 %v6645_v55, %v6633_v39  ;;  %4453 = vmatprep.mubr.msk.f32.mxu0 %vm6658_vm4, %v8980_v42  ;;  %vm6675_vm5 = vmand %vm528_vm1, %vm533_vm3  ;;  %v5794_v18 = vpack.c.bf16 %v437_v59, %v436_v60  ;;  %vm525_vm6 = vcmp.ge.s32.totalorder %v6542_v61, %v6587_v23  ;;  %v469_v44 = vld [vmem:[%s8941_s5 + $0x10] sm:$0xff]  ;;  %v470_v59 = vld [vmem:[%s8941_s5 + $0x18] sm:$0xff]  ;;  %s6155_s16 = scalar_lea.vmem %s8896_s14, 128  ;;  %p6162_p0 = scmp.lt.s32.totalorder %s8896_s14, %s6160_s13 }
  0x3a   : > { %9082 = vst [vmem:[#allocation37_spill] sm:$0xff] %v9081_v30  ;;  %v9084_v56 = vsel %vm6675_vm5, 4294967295, %v9083_v56  ;;  %vm530_vm7 = vcmp.lt.s32.totalorder %v6542_v61, %v529_v24  ;;  %4455 = vmatprep.mubr.msk.f32.mxu1 %vm6675_vm5, %v8980_v42  ;;  %vm527_vm8 = vcmp.ge.s32.totalorder %v522_v41, %v6587_v23  ;;  %vm532_vm9 = vcmp.lt.s32.totalorder %v522_v41, %v529_v24  ;;  %v473_v60 = vld [vmem:[%s8943_s7 + $0x10] sm:$0xff]  ;;  %p6156_p11 = scmp.ne.s32.totalorder %s8896_s14, %s6155_s16  ;;  %p6163_p1 = scmp.lt.s32.totalorder %s6161_s0, %s6155_s16 }
  0x3b   : > { %5759 = vmatpush3.bf16.msra.mxu0 %v5758_v47  ;;  %9085 = vst [vmem:[#allocation38_spill] sm:$0xff] %v9084_v56  ;;  %v6686_v7 = vpack.c.bf16 %v472_v49, %v471_v28  ;;  %vm6700_vm10 = vmand %vm525_vm6, %vm530_vm7  ;;  %v9086_v41 = vmov 0  ;;  %v9089_v24 = vmov 0  ;;  %v5800_v23 = vpack.c.bf16 %v470_v59, %v469_v44 }
  0x3c   : > { %5791 = vmatpush3.bf16.msra.mxu1 %v5790_v62  ;;  %5761 = vmatprep.subr.bf16.mxu0 %v5760_v12  ;;  %v9087_v41 = vsel %vm6700_vm10, 4294967295, %v9086_v41  ;;  %vm6704_vm11 = vmand %vm527_vm8, %vm532_vm9  ;;  %v694_v62 = vadd.f32 %v6343_v0, %v6364_v8  ;;  %v463_v8 = vld [vmem:[%s8939_s3] sm:$0xff]  ;;  %v464_v12 = vld [vmem:[%s8939_s3 + $0x8] sm:$0xff]  ;;  %v695_v10 = vadd.f32 %v6348_v1, %v6367_v9  ;;  %v696_v49 = vadd.f32 %v6382_v16, %v6403_v25  ;;  %p6157_p12 = pnand %p6156_p11, %p6324_p5  ;;  %p6164_p2 = por %p6163_p1, %p6162_p0 }
  0x3d   : > { %5793 = vmatprep.subr.bf16.mxu1 %v5792_v63  ;;  %v474_v63 = vld [vmem:[%s8943_s7 + $0x18] sm:$0xff]  ;;  %9088 = vst [vmem:[#allocation39_spill] sm:$0xff] %v9087_v41  ;;  %v9090_v24 = vsel %vm6704_vm11, 4294967295, %v9089_v24  ;;  %v5813_v28 = vpack.c.bf16 %v464_v12, %v463_v8  ;;  %v697_v44 = vadd.f32 %v6387_v17, %v6406_v26  ;;  %v698_v25 = vadd.f32 %v6429_v35, %v6440_v40  ;;  %v9107_v8 = vld [vmem:[#allocation9_spill] sm:$0xff] }
  0x3e   : > { %9091 = vst [vmem:[#allocation40_spill] sm:$0xff] %v9090_v24  ;;  %v6711_v47 = vpack.c.bf16 %v474_v63, %v473_v60  ;;  %v466_v9 = vld [vmem:[%s8939_s3 + $0x18] sm:$0xff]  ;;  %v699_v60 = vadd.f32 %v6434_v36, %v6448_v43  ;;  %v700_v26 = vadd.f32 %v6469_v52, %v6479_v57  ;;  %v701_v40 = vadd.f32 %v6474_v53, %v6482_v58  ;;  %v9110_v12 = vld [vmem:[#allocation13_spill] sm:$0xff]  ;;  %p6158_p13 = pneg %p6157_p12 }
  0x3f   : > { %5763 = vmatpush3.bf16.msra.mxu0 %v5762_v6  ;;  %v8984_v6 = vmov 0.0|0.0   ;;  %v702_v43 = vadd.f32 %v6343_v0, %v6519_v32  ;;  %v703_v57 = vadd.f32 %v6348_v1, %v6522_v37  ;;  %v705_v58 = vadd.f32 %v6387_v17, %v6558_v22  ;;  %v9104_v63 = vld [vmem:[#allocation34_spill] sm:$0xff] }
  0x40   : > { %5795 = vmatpush3.bf16.msra.mxu1 %v5794_v18  ;;  %5797 = vmatprep.subr.bf16.mxu0 %v5796_v54  ;;  %v465_v18 = vld [vmem:[%s8939_s3 + $0x10] sm:$0xff]  ;;  %v706_v32 = vadd.f32 %v6429_v35, %v6592_v29  ;;  %v707_v37 = vadd.f32 %v6434_v36, %v6595_v11  ;;  %v709_v29 = vadd.f32 %v6474_v53, %v6645_v55  ;;  %p6165_p3 = pnand %p6164_p2, %p6158_p13 }
  0x41   : > { %5805 = vmatprep.subr.bf16.mxu1 %v6686_v7  ;;  %v5816_v59 = vpack.c.bf16 %v466_v9, %v465_v18  ;;  %v710_v22 = vadd.f32 %v6343_v0, %v6351_v2  ;;  %v711_v11 = vadd.f32 %v6348_v1, %v6354_v3  ;;  %v713_v2 = vadd.f32 %v6387_v17, %v6396_v21  ;;  %v9114_v18 = vld [vmem:[#allocation22_spill] sm:$0xff] }
  0x42   : > { %4454 = vmatmul.mubr.msk.f32.vlgmr.msra.gmra.mrb[0].mxu0 %vm6700_vm10, %v8980_v42  ;;  %v714_v55 = vadd.f32 %v6429_v35, %v6421_v33  ;;  %v715_v3 = vadd.f32 %v6434_v36, %v6424_v34  ;;  %v717_v21 = vadd.f32 %v6474_v53, %v6464_v51  ;;  %v718_v33 = vadd.f32 %v6343_v0, %v6495_v4  ;;  %v9115_v9 = vld [vmem:[#allocation26_spill] sm:$0xff] }
  0x43   : > { %4456 = vmatmul.mubr.msk.f32.vlgmr.msra.gmra.mrb[0].mxu1 %vm6704_vm11, %v8980_v42  ;;  %5799 = vmatpush3.bf16.msra.mxu0 %v5796_v54  ;;  %v719_v34 = vadd.f32 %v6348_v1, %v6504_v13  ;;  %v721_v0 = vadd.f32 %v6387_v17, %v6533_v46  ;;  %v722_v51 = vadd.f32 %v6429_v35, %v6569_v31  ;;  %v9098_v13 = vld [vmem:[#allocation19_spill] sm:$0xff]  ;;  %v9100_v46 = vld [vmem:[#allocation25_spill] sm:$0xff] }
  0x44   : > { %5807 = vmatpush3.bf16.msra.mxu1 %v6686_v7  ;;  %5801 = vmatprep.subr.bf16.mxu0 %v5800_v23  ;;  %v723_v1 = vadd.f32 %v6434_v36, %v6572_v38  ;;  %v724_v4 = vadd.f32 %v6469_v52, %v6609_v48  ;;  %v725_v17 = vadd.f32 %v6474_v53, %v6615_v5  ;;  %v9092_v36 = vld [vmem:[#allocation7_spill] sm:$0xff]  ;;  %v9093_v48 = vld [vmem:[#allocation8_spill] sm:$0xff]  ;;  %v9097_v53 = vld [vmem:[#allocation18_spill] sm:$0xff] }
  0x45   : > { %5809 = vmatprep.subr.bf16.mxu1 %v6711_v47  ;;  %5265 = vmatprep.mubr.msk.f32.mxu0 %vm764_vm12, %v694_v62  ;;  %v728_v35 = vadd.f32 %v6382_v16, %v6409_v27  ;;  %v9096_v27 = vld [vmem:[#allocation15_spill] sm:$0xff]  ;;  %v9101_v31 = vld [vmem:[#allocation29_spill] sm:$0xff]  ;;  %v9102_v38 = vld [vmem:[#allocation30_spill] sm:$0xff] }
  0x46   : > { %5369 = vmatprep.mubr.msk.f32.mxu1 %vm764_vm12, %v694_v62  ;;  %v9103_v5 = vld [vmem:[#allocation33_spill] sm:$0xff]  ;;  %v9106_v62 = vld [vmem:[#allocation6_spill] sm:$0xff] }
  0x47   : > { %5803 = vmatpush3.bf16.msra.mxu0 %v5800_v23 }
  0x48   : > { %5811 = vmatpush3.bf16.msra.mxu1 %v6711_v47  ;;  %5812 = vmatprep.subr.bf16.mxu0 %v8984_v6 }
  0x49   : > { %5818 = vmatprep.subr.bf16.mxu1 %v8984_v6 }
  0x4a   : > { %5266 = vmatmul.mubr.msk.f32.vlgmr.msra.gmra.mrb[2].mxu0 %vm764_vm12, %v695_v10 }
  0x4b   : > { %5370 = vmatmul.mubr.msk.f32.vlgmr.msra.gmra.mrb[2].mxu1 %vm764_vm12, %v695_v10  ;;  %5814 = vmatpush3.bf16.msra.mxu0 %v5813_v28  ;;  %v9111_v10 = vld [vmem:[#allocation16_spill] sm:$0xff]  ;;  %v9112_v28 = vld [vmem:[#allocation17_spill] sm:$0xff] }
  0x4c   : > { %5268 = vmatprep.mubr.msk.f32.mxu0 %vm764_vm12, %v696_v49  ;;  %5372 = vmatprep.mubr.msk.f32.mxu1 %vm764_vm12, %v696_v49  ;;  %v9113_v49 = vld [vmem:[#allocation20_spill] sm:$0xff] }
  0x4d   : > { %5815 = vmatprep.subr.bf16.mxu0 %v8984_v6  ;;  %5820 = vmatpush3.bf16.msra.mxu1 %v5796_v54  ;;  %v704_v54 = vadd.f32 %v6382_v16, %v6553_v14  ;;  %v708_v14 = vadd.f32 %v6469_v52, %v6633_v39  ;;  %v712_v39 = vadd.f32 %v6382_v16, %v6377_v15 }
  0x4e   : > { %5269 = vmatmul.mubr.msk.f32.gmra.mrb[4].mxu0 %vm764_vm12, %v697_v44  ;;  %5821 = vmatprep.subr.bf16.mxu1 %v8984_v6  ;;  %v716_v15 = vadd.f32 %v6469_v52, %v6461_v50  ;;  %v720_v50 = vadd.f32 %v6382_v16, %v6530_v45  ;;  %v9094_v52 = vld [vmem:[#allocation11_spill] sm:$0xff]  ;;  %v9095_v16 = vld [vmem:[#allocation14_spill] sm:$0xff]  ;;  %v9099_v45 = vld [vmem:[#allocation24_spill] sm:$0xff] }
  0x4f   : > { %5373 = vmatmul.mubr.msk.f32.gmra.mrb[4].mxu1 %vm764_vm12, %v697_v44  ;;  %5271 = vmatprep.mubr.msk.f32.mxu0 %vm764_vm12, %v698_v25  ;;  %v9116_v44 = vld [vmem:[#allocation27_spill] sm:$0xff] }
  0x50   : > { %5375 = vmatprep.mubr.msk.f32.mxu1 %vm764_vm12, %v698_v25  ;;  %5817 = vmatpush3.bf16.msra.mxu0 %v5816_v59  ;;  %v9117_v25 = vld [vmem:[#allocation31_spill] sm:$0xff]  ;;  %v9118_v59 = vld [vmem:[#allocation32_spill] sm:$0xff] }
  0x51   : > { %5823 = vmatpush3.bf16.msra.mxu1 %v5800_v23  ;;  %5824 = vmatprep.subr.bf16.mxu0 %v8984_v6  ;;  %v9105_v23 = vld [vmem:[#allocation5_spill] sm:$0xff] }
  0x52   : > { %5272 = vmatmul.mubr.msk.f32.gmra.mrb[6].mxu0 %vm764_vm12, %v699_v60 }
  0x53   : > { %5376 = vmatmul.mubr.msk.f32.gmra.mrb[6].mxu1 %vm764_vm12, %v699_v60  ;;  %5274 = vmatprep.mubr.msk.f32.mxu0 %vm764_vm12, %v700_v26  ;;  %v9119_v60 = vld [vmem:[#allocation35_spill] sm:$0xff] }
  0x54   : > { %5378 = vmatprep.mubr.msk.f32.mxu1 %vm764_vm12, %v700_v26  ;;  %v9120_v26 = vld [vmem:[#allocation36_spill] sm:$0xff] }
  0x56   : > { %5275 = vmatmul.mubr.msk.f32.gmra.mrb[8].mxu0 %vm764_vm12, %v701_v40 }
  0x57   : > { %5379 = vmatmul.mubr.msk.f32.gmra.mrb[8].mxu1 %vm764_vm12, %v701_v40  ;;  %5277 = vmatprep.mubr.msk.f32.mxu0 %vm764_vm12, %v702_v43  ;;  %v8982_v40 = vmov 0.0  }
  0x58   : > { %5381 = vmatprep.mubr.msk.f32.mxu1 %vm764_vm12, %v702_v43 }
  0x5a   : > { %5278 = vmatmul.mubr.msk.f32.gmra.mrb[10].mxu0 %vm764_vm12, %v703_v57 }
  0x5b   : > { %5382 = vmatmul.mubr.msk.f32.gmra.mrb[10].mxu1 %vm764_vm12, %v703_v57  ;;  %5280 = vmatprep.mubr.msk.f32.mxu0 %vm764_vm12, %v704_v54 }
  0x5c   : > { %5384 = vmatprep.mubr.msk.f32.mxu1 %vm764_vm12, %v704_v54 }
  0x5e   : > { %5281 = vmatmul.mubr.msk.f32.gmra.mrb[12].mxu0 %vm764_vm12, %v705_v58 }
  0x5f   : > { %5385 = vmatmul.mubr.msk.f32.gmra.mrb[12].mxu1 %vm764_vm12, %v705_v58  ;;  %5283 = vmatprep.mubr.msk.f32.mxu0 %vm764_vm12, %v706_v32 }
  0x60   : > { %5387 = vmatprep.mubr.msk.f32.mxu1 %vm764_vm12, %v706_v32 }
  0x62   : > { %5284 = vmatmul.mubr.msk.f32.gmra.mrb[14].mxu0 %vm764_vm12, %v707_v37 }
  0x63   : > { %5388 = vmatmul.mubr.msk.f32.gmra.mrb[14].mxu1 %vm764_vm12, %v707_v37  ;;  %5286 = vmatprep.mubr.msk.f32.mxu0 %vm764_vm12, %v708_v14 }
  0x64   : > { %5390 = vmatprep.mubr.msk.f32.mxu1 %vm764_vm12, %v708_v14 }
  0x66   : > { %5287 = vmatmul.mubr.msk.f32.gmra.mrb[16].mxu0 %vm764_vm12, %v709_v29 }
  0x67   : > { %5391 = vmatmul.mubr.msk.f32.gmra.mrb[16].mxu1 %vm764_vm12, %v709_v29  ;;  %5289 = vmatprep.mubr.msk.f32.mxu0 %vm764_vm12, %v710_v22  ;;  %v4457_v29 = vld [vmem:[%s8937_s1] ss:$0 sm:$0xff] }
  0x68   : > { %5393 = vmatprep.mubr.msk.f32.mxu1 %vm764_vm12, %v710_v22 }
  0x6a   : > { %5290 = vmatmul.mubr.msk.f32.gmra.mrb[18].mxu0 %vm764_vm12, %v711_v11 }
  0x6b   : > { %5394 = vmatmul.mubr.msk.f32.gmra.mrb[18].mxu1 %vm764_vm12, %v711_v11  ;;  %5292 = vmatprep.mubr.msk.f32.mxu0 %vm764_vm12, %v712_v39 }
  0x6c   : > { %5396 = vmatprep.mubr.msk.f32.mxu1 %vm764_vm12, %v712_v39 }
  0x6e   : > { %5293 = vmatmul.mubr.msk.f32.gmra.mrb[20].mxu0 %vm764_vm12, %v713_v2 }
  0x6f   : > { %5397 = vmatmul.mubr.msk.f32.gmra.mrb[20].mxu1 %vm764_vm12, %v713_v2  ;;  %5295 = vmatprep.mubr.msk.f32.mxu0 %vm764_vm12, %v714_v55 }
  0x70   : > { %5399 = vmatprep.mubr.msk.f32.mxu1 %vm764_vm12, %v714_v55 }
  0x72   : > { %5296 = vmatmul.mubr.msk.f32.gmra.mrb[22].mxu0 %vm764_vm12, %v715_v3 }
  0x73   : > { %5400 = vmatmul.mubr.msk.f32.gmra.mrb[22].mxu1 %vm764_vm12, %v715_v3  ;;  %5298 = vmatprep.mubr.msk.f32.mxu0 %vm764_vm12, %v716_v15 }
  0x74   : > { %5402 = vmatprep.mubr.msk.f32.mxu1 %vm764_vm12, %v716_v15 }
  0x76   : > { %5299 = vmatmul.mubr.msk.f32.gmra.mrb[24].mxu0 %vm764_vm12, %v717_v21 }
  0x77   : > { %5403 = vmatmul.mubr.msk.f32.gmra.mrb[24].mxu1 %vm764_vm12, %v717_v21  ;;  %5301 = vmatprep.mubr.msk.f32.mxu0 %vm764_vm12, %v718_v33 }
  0x78   : > { %5405 = vmatprep.mubr.msk.f32.mxu1 %vm764_vm12, %v718_v33 }
  0x7a   : > { %5302 = vmatmul.mubr.msk.f32.gmra.mrb[26].mxu0 %vm764_vm12, %v719_v34 }
  0x7b   : > { %5406 = vmatmul.mubr.msk.f32.gmra.mrb[26].mxu1 %vm764_vm12, %v719_v34  ;;  %5304 = vmatprep.mubr.msk.f32.mxu0 %vm764_vm12, %v720_v50 }
  0x7c   : > { %5408 = vmatprep.mubr.msk.f32.mxu1 %vm764_vm12, %v720_v50 }
  0x7e   : > { %5305 = vmatmul.mubr.msk.f32.gmra.mrb[28].mxu0 %vm764_vm12, %v721_v0 }
  0x7f   : > { %5409 = vmatmul.mubr.msk.f32.gmra.mrb[28].mxu1 %vm764_vm12, %v721_v0  ;;  %5307 = vmatprep.mubr.msk.f32.mxu0 %vm764_vm12, %v722_v51 }
  0x80   : > { %5411 = vmatprep.mubr.msk.f32.mxu1 %vm764_vm12, %v722_v51 }
  0x82   : > { %5308 = vmatmul.mubr.msk.f32.gmra.mrb[30].mxu0 %vm764_vm12, %v723_v1 }
  0x83   : > { %5412 = vmatmul.mubr.msk.f32.gmra.mrb[30].mxu1 %vm764_vm12, %v723_v1  ;;  %5310 = vmatprep.mubr.msk.f32.mxu0 %vm764_vm12, %v724_v4 }
  0x84   : > { %5414 = vmatprep.mubr.msk.f32.mxu1 %vm764_vm12, %v724_v4 }
  0x86   : > { %5311 = vmatmul.mubr.msk.f32.gmra.mrb[32].mxu0 %vm764_vm12, %v725_v17 }
  0x87   : > { %5415 = vmatmul.mubr.msk.f32.gmra.mrb[32].mxu1 %vm764_vm12, %v725_v17  ;;  %5313 = vmatprep.mubr.msk.f32.mxu0 %vm764_vm12, %v9092_v36 }
  0x88   : > { %5417 = vmatprep.mubr.msk.f32.mxu1 %vm764_vm12, %v9092_v36 }
  0x8a   : > { %5314 = vmatmul.mubr.msk.f32.gmra.mrb[34].mxu0 %vm764_vm12, %v9093_v48 }
  0x8b   : > { %5418 = vmatmul.mubr.msk.f32.gmra.mrb[34].mxu1 %vm764_vm12, %v9093_v48  ;;  %5316 = vmatprep.mubr.msk.f32.mxu0 %vm764_vm12, %v728_v35 }
  0x8c   : > { %5420 = vmatprep.mubr.msk.f32.mxu1 %vm764_vm12, %v728_v35 }
  0x8e   : > { %5317 = vmatmul.mubr.msk.f32.gmra.mrb[36].mxu0 %vm764_vm12, %v9094_v52 }
  0x8f   : > { %5421 = vmatmul.mubr.msk.f32.gmra.mrb[36].mxu1 %vm764_vm12, %v9094_v52  ;;  %5319 = vmatprep.mubr.msk.f32.mxu0 %vm764_vm12, %v9095_v16 }
  0x90   : > { %5423 = vmatprep.mubr.msk.f32.mxu1 %vm764_vm12, %v9095_v16 }
  0x92   : > { %5320 = vmatmul.mubr.msk.f32.gmra.mrb[38].mxu0 %vm764_vm12, %v9096_v27 }
  0x93   : > { %5424 = vmatmul.mubr.msk.f32.gmra.mrb[38].mxu1 %vm764_vm12, %v9096_v27  ;;  %5322 = vmatprep.mubr.msk.f32.mxu0 %vm764_vm12, %v9097_v53 }
  0x94   : > { %5426 = vmatprep.mubr.msk.f32.mxu1 %vm764_vm12, %v9097_v53 }
  0x96   : > { %5323 = vmatmul.mubr.msk.f32.gmra.mrb[40].mxu0 %vm764_vm12, %v9098_v13 }
  0x97   : > { %5427 = vmatmul.mubr.msk.f32.gmra.mrb[40].mxu1 %vm764_vm12, %v9098_v13  ;;  %5325 = vmatprep.mubr.msk.f32.mxu0 %vm764_vm12, %v9099_v45 }
  0x98   : > { %5429 = vmatprep.mubr.msk.f32.mxu1 %vm764_vm12, %v9099_v45 }
  0x9a   : > { %5326 = vmatmul.mubr.msk.f32.gmra.mrb[42].mxu0 %vm764_vm12, %v9100_v46 }
  0x9b   : > { %5430 = vmatmul.mubr.msk.f32.gmra.mrb[42].mxu1 %vm764_vm12, %v9100_v46  ;;  %5328 = vmatprep.mubr.msk.f32.mxu0 %vm764_vm12, %v9101_v31 }
  0x9c   : > { %5432 = vmatprep.mubr.msk.f32.mxu1 %vm764_vm12, %v9101_v31 }
  0x9e   : > { %5329 = vmatmul.mubr.msk.f32.gmra.mrb[44].mxu0 %vm764_vm12, %v9102_v38 }
  0x9f   : > { %5433 = vmatmul.mubr.msk.f32.gmra.mrb[44].mxu1 %vm764_vm12, %v9102_v38  ;;  %5331 = vmatprep.mubr.msk.f32.mxu0 %vm764_vm12, %v9103_v5 }
  0xa0   : > { %5435 = vmatprep.mubr.msk.f32.mxu1 %vm764_vm12, %v9103_v5 }
  0xa2   : > { %5332 = vmatmul.mubr.msk.f32.gmra.mrb[46].mxu0 %vm764_vm12, %v9104_v63 }
  0xa3   : > { %5436 = vmatmul.mubr.msk.f32.gmra.mrb[46].mxu1 %vm764_vm12, %v9104_v63  ;;  %5334 = vmatprep.mubr.msk.f32.mxu0 %vm764_vm12, %v6651_v20 }
  0xa4   : > { %5438 = vmatprep.mubr.msk.f32.mxu1 %vm764_vm12, %v6651_v20  ;;  %v9108_v20 = vld [vmem:[#allocation10_spill] sm:$0xff] }
  0xa6   : > { %5335 = vmatmul.mubr.msk.f32.gmra.mrb[48].mxu0 %vm764_vm12, %v6654_v19 }
  0xa7   : > { %5439 = vmatmul.mubr.msk.f32.gmra.mrb[48].mxu1 %vm764_vm12, %v6654_v19  ;;  %5337 = vmatprep.mubr.msk.f32.mxu0 %vm764_vm12, %v9105_v23  ;;  %v9109_v19 = vld [vmem:[#allocation12_spill] sm:$0xff] }
  0xa8   : > { %5441 = vmatprep.mubr.msk.f32.mxu1 %vm764_vm12, %v9105_v23 }
  0xaa   : > { %5338 = vmatmul.mubr.msk.f32.gmra.mrb[50].mxu0 %vm764_vm12, %v9106_v62 }
  0xab   : > { %5442 = vmatmul.mubr.msk.f32.gmra.mrb[50].mxu1 %vm764_vm12, %v9106_v62  ;;  %5340 = vmatprep.mubr.msk.f32.mxu0 %vm764_vm12, %v9107_v8 }
  0xac   : > { %5444 = vmatprep.mubr.msk.f32.mxu1 %vm764_vm12, %v9107_v8 }
  0xae   : > { %5341 = vmatmul.mubr.msk.f32.gmra.mrb[52].mxu0 %vm764_vm12, %v9108_v20 }
  0xaf   : > { %5445 = vmatmul.mubr.msk.f32.gmra.mrb[52].mxu1 %vm764_vm12, %v9108_v20  ;;  %5343 = vmatprep.mubr.msk.f32.mxu0 %vm764_vm12, %v9109_v19 }
  0xb0   : > { %5447 = vmatprep.mubr.msk.f32.mxu1 %vm764_vm12, %v9109_v19 }
  0xb2   : > { %5344 = vmatmul.mubr.msk.f32.gmra.mrb[54].mxu0 %vm764_vm12, %v9110_v12 }
  0xb3   : > { %5448 = vmatmul.mubr.msk.f32.gmra.mrb[54].mxu1 %vm764_vm12, %v9110_v12  ;;  %5346 = vmatprep.mubr.msk.f32.mxu0 %vm764_vm12, %v9111_v10 }
  0xb4   : > { %5450 = vmatprep.mubr.msk.f32.mxu1 %vm764_vm12, %v9111_v10 }
  0xb6   : > { %5347 = vmatmul.mubr.msk.f32.gmra.mrb[56].mxu0 %vm764_vm12, %v9112_v28 }
  0xb7   : > { %5451 = vmatmul.mubr.msk.f32.gmra.mrb[56].mxu1 %vm764_vm12, %v9112_v28  ;;  %5349 = vmatprep.mubr.msk.f32.mxu0 %vm764_vm12, %v9113_v49 }
  0xb8   : > { %5453 = vmatprep.mubr.msk.f32.mxu1 %vm764_vm12, %v9113_v49 }
  0xba   : > { %5350 = vmatmul.mubr.msk.f32.gmra.mrb[58].mxu0 %vm764_vm12, %v9114_v18 }
  0xbb   : > { %5454 = vmatmul.mubr.msk.f32.gmra.mrb[58].mxu1 %vm764_vm12, %v9114_v18  ;;  %5352 = vmatprep.mubr.msk.f32.mxu0 %vm764_vm12, %v9115_v9 }
  0xbc   : > { %5456 = vmatprep.mubr.msk.f32.mxu1 %vm764_vm12, %v9115_v9 }
  0xbe   : > { %5353 = vmatmul.mubr.msk.f32.gmra.mrb[60].mxu0 %vm764_vm12, %v9116_v44 }
  0xbf   : > { %5457 = vmatmul.mubr.msk.f32.gmra.mrb[60].mxu1 %vm764_vm12, %v9116_v44  ;;  %5355 = vmatprep.mubr.msk.f32.mxu0 %vm764_vm12, %v9117_v25 }
  0xc0   : > { %5459 = vmatprep.mubr.msk.f32.mxu1 %vm764_vm12, %v9117_v25 }
  0xc2   : > { %5356 = vmatmul.mubr.msk.f32.gmra.mrb[62].mxu0 %vm764_vm12, %v9118_v59 }
  0xc3   : > { %5460 = vmatmul.mubr.msk.f32.gmra.mrb[62].mxu1 %vm764_vm12, %v9118_v59  ;;  %5358 = vmatprep.mubr.msk.f32.mxu0 %vm764_vm12, %v9119_v60 }
  0xc4   : > { %5462 = vmatprep.mubr.msk.f32.mxu1 %vm764_vm12, %v9119_v60 }
  0xc6   : > { %5359 = vmatmul.mubr.msk.f32.gmra.mrb[64].mxu0 %vm764_vm12, %v9120_v26 }
  0xc7   : > { %5463 = vmatmul.mubr.msk.f32.gmra.mrb[64].mxu1 %vm764_vm12, %v9120_v26  ;;  %5473 = vmatprep.mubr.msk.f32.mxu0 %vm6221_vm13, %v8982_v40 }
  0xc8   : > { %5484 = vmatprep.mubr.msk.f32.mxu1 %vm6221_vm13, %v8982_v40 }
 0x115   : > { %v4781_v43 = vpop.f32.mrb[0].mxu0 }
 0x116   : > { %v4816_v57 = vpop.f32.mrb[0].mxu1  ;;  %v4782_v54 = vpop.f32.mrb[1].mxu0 }
 0x117   : > { %v4783_v58 = vadd.f32 %v4782_v54, %v4781_v43  ;;  %v4817_v32 = vpop.f32.mrb[1].mxu1 }
 0x118   : > { %v4818_v37 = vadd.f32 %v4817_v32, %v4816_v57 }
 0x11a   : > { %v683_v14 = vadd.f32 %v4818_v37, %v4783_v58 }
 0x11c   : > { %v686_v22 = vmul.f32 0.015625, %v683_v14 }
 0x11d   : > { %v7000_v11 = vpop.f32.mrb[2].mxu0 }
 0x11e   : > { %v693_v39 = vadd.f32 %v4457_v29, %v686_v22  ;;  %v7002_v2 = vpop.f32.mrb[3].mxu0  ;;  %v7004_v55 = vpop.f32.mrb[2].mxu1 }
 0x11f   : > { %9121 = vst [vmem:[#allocation7_spill] sm:$0xff] %v7004_v55  ;;  %v7006_v3 = vpop.f32.mrb[3].mxu1 }
 0x120   : > { %9122 = vst [vmem:[#allocation8_spill] sm:$0xff] %v7006_v3  ;;  %5474 = vmatmul.mubr.msk.f32.vlgmr.msra.gmra.mrb[66].mxu0 %vm764_vm12, %v693_v39  ;;  %5485 = vmatmul.mubr.msk.f32.vlgmr.msra.gmra.mrb[66].mxu1 %vm764_vm12, %v693_v39  ;;  %v8995_v3 = vmov 1.0|1.0  }
 0x121   : > { %5826 = vmatpush3.bf16.msra.mxu0 %v6686_v7  ;;  %5495 = vmatprep.mubr.msk.f32.mxu0 %vm6221_vm13, %v8982_v40  ;;  %v7013_v15 = vpop.f32.mrb[4].mxu0 }
 0x122   : > { %5827 = vmatprep.subr.bf16.mxu0 %v8984_v6  ;;  %v7016_v21 = vpop.f32.mrb[5].mxu0  ;;  %v7018_v33 = vpop.f32.mrb[4].mxu1 }
 0x123   : > { %9123 = vst [vmem:[#allocation11_spill] sm:$0xff] %v7018_v33  ;;  %v7020_v34 = vpop.f32.mrb[5].mxu1 }
 0x124   : > { %9124 = vst [vmem:[#allocation14_spill] sm:$0xff] %v7020_v34  ;;  %v9168_v34 = vmov 0 }
 0x125   : > { %5829 = vmatpush3.bf16.msra.mxu0 %v6711_v47  ;;  %v7023_v50 = vpop.f32.mrb[6].mxu0 }
 0x126   : > { %v7025_v0 = vpop.f32.mrb[7].mxu0  ;;  %v7027_v7 = vpop.f32.mrb[6].mxu1 }
 0x127   : > { %9125 = vst [vmem:[#allocation15_spill] sm:$0xff] %v7027_v7  ;;  %v7029_v51 = vpop.f32.mrb[7].mxu1 }
 0x128   : > { %9126 = vst [vmem:[#allocation18_spill] sm:$0xff] %v7029_v51  ;;  %5496 = vmatmul.mubr.msk.f32.vlgmr.msra.gmra.mrb[68].mxu0 %vm764_vm12, %v693_v39 }
 0x129   : > { %v7032_v1 = vpop.f32.mrb[8].mxu0  ;;  %4665 = vmatprep.mubr.msk.f32.mxu0 %vm6658_vm4, %v8980_v42 }
 0x12a   : > { %v7037_v4 = vpop.f32.mrb[9].mxu0  ;;  %v7039_v17 = vpop.f32.mrb[8].mxu1 }
 0x12b   : > { %9127 = vst [vmem:[#allocation19_spill] sm:$0xff] %v7039_v17  ;;  %v7041_v47 = vpop.f32.mrb[9].mxu1 }
 0x12c   : > { %9128 = vst [vmem:[#allocation24_spill] sm:$0xff] %v7041_v47  ;;  %v490_v47 = vmul.u32 8, %v6542_v61 }
 0x12d   : > { %v7043_v35 = vpop.f32.mrb[10].mxu0 }
 0x12e   : > { %v7045_v36 = vpop.f32.mrb[11].mxu0  ;;  %v7047_v48 = vpop.f32.mrb[10].mxu1 }
 0x12f   : > { %9129 = vst [vmem:[#allocation25_spill] sm:$0xff] %v7047_v48  ;;  %v7049_v52 = vpop.f32.mrb[11].mxu1 }
 0x130   : > { %9130 = vst [vmem:[#allocation29_spill] sm:$0xff] %v7049_v52 }
 0x131   : > { %v7051_v16 = vpop.f32.mrb[12].mxu0 }
 0x132   : > { %v7053_v27 = vpop.f32.mrb[13].mxu0  ;;  %v7055_v53 = vpop.f32.mrb[12].mxu1 }
 0x133   : > { %9131 = vst [vmem:[#allocation30_spill] sm:$0xff] %v7055_v53  ;;  %v7057_v13 = vpop.f32.mrb[13].mxu1 }
 0x134   : > { %9132 = vst [vmem:[#allocation33_spill] sm:$0xff] %v7057_v13 }
 0x135   : > { %v7059_v45 = vpop.f32.mrb[14].mxu0 }
 0x136   : > { %v7061_v46 = vpop.f32.mrb[15].mxu0  ;;  %v7063_v31 = vpop.f32.mrb[14].mxu1 }
 0x137   : > { %9133 = vst [vmem:[#allocation34_spill] sm:$0xff] %v7063_v31  ;;  %v7065_v38 = vpop.f32.mrb[15].mxu1 }
 0x138   : > { %9134 = vst [vmem:[#allocation5_spill] sm:$0xff] %v7065_v38 }
 0x139   : > { %v7067_v5 = vpop.f32.mrb[16].mxu0 }
 0x13a   : > { %v7069_v63 = vpop.f32.mrb[17].mxu0  ;;  %v7071_v23 = vpop.f32.mrb[16].mxu1 }
 0x13b   : > { %9135 = vst [vmem:[#allocation6_spill] sm:$0xff] %v7071_v23  ;;  %v7073_v62 = vpop.f32.mrb[17].mxu1 }
 0x13c   : > { %9136 = vst [vmem:[#allocation9_spill] sm:$0xff] %v7073_v62 }
 0x13d   : > { %v7075_v8 = vpop.f32.mrb[18].mxu0 }
 0x13e   : > { %v7077_v20 = vpop.f32.mrb[19].mxu0  ;;  %v7079_v19 = vpop.f32.mrb[18].mxu1 }
 0x13f   : > { %9137 = vst [vmem:[#allocation10_spill] sm:$0xff] %v7079_v19  ;;  %v7081_v12 = vpop.f32.mrb[19].mxu1 }
 0x140   : > { %9138 = vst [vmem:[#allocation12_spill] sm:$0xff] %v7081_v12 }
 0x141   : > { %v7083_v10 = vpop.f32.mrb[20].mxu0 }
 0x142   : > { %v7085_v28 = vpop.f32.mrb[21].mxu0  ;;  %v7087_v49 = vpop.f32.mrb[20].mxu1 }
 0x143   : > { %9139 = vst [vmem:[#allocation13_spill] sm:$0xff] %v7087_v49  ;;  %v7089_v18 = vpop.f32.mrb[21].mxu1 }
 0x144   : > { %9140 = vst [vmem:[#allocation16_spill] sm:$0xff] %v7089_v18 }
 0x145   : > { %v7091_v9 = vpop.f32.mrb[22].mxu0 }
 0x146   : > { %v7093_v44 = vpop.f32.mrb[23].mxu0  ;;  %v7095_v25 = vpop.f32.mrb[22].mxu1 }
 0x147   : > { %9141 = vst [vmem:[#allocation17_spill] sm:$0xff] %v7095_v25  ;;  %v7097_v59 = vpop.f32.mrb[23].mxu1 }
 0x148   : > { %9142 = vst [vmem:[#allocation20_spill] sm:$0xff] %v7097_v59 }
 0x149   : > { %v7099_v60 = vpop.f32.mrb[24].mxu0 }
 0x14a   : > { %v7101_v26 = vpop.f32.mrb[25].mxu0  ;;  %v7103_v43 = vpop.f32.mrb[24].mxu1 }
 0x14b   : > { %9143 = vst [vmem:[#allocation22_spill] sm:$0xff] %v7103_v43  ;;  %v7105_v57 = vpop.f32.mrb[25].mxu1 }
 0x14c   : > { %9144 = vst [vmem:[#allocation26_spill] sm:$0xff] %v7105_v57 }
 0x14d   : > { %v7107_v54 = vpop.f32.mrb[26].mxu0 }
 0x14e   : > { %v7109_v58 = vpop.f32.mrb[27].mxu0  ;;  %v7111_v32 = vpop.f32.mrb[26].mxu1 }
 0x14f   : > { %9145 = vst [vmem:[#allocation27_spill] sm:$0xff] %v7111_v32  ;;  %v7113_v37 = vpop.f32.mrb[27].mxu1 }
 0x150   : > { %9146 = vst [vmem:[#allocation31_spill] sm:$0xff] %v7113_v37 }
 0x151   : > { %v7115_v14 = vpop.f32.mrb[28].mxu0 }
 0x152   : > { %v7117_v29 = vpop.f32.mrb[29].mxu0  ;;  %v7119_v22 = vpop.f32.mrb[28].mxu1 }
 0x153   : > { %9147 = vst [vmem:[#allocation32_spill] sm:$0xff] %v7119_v22  ;;  %v7121_v39 = vpop.f32.mrb[29].mxu1 }
 0x154   : > { %9148 = vst [vmem:[#allocation35_spill] sm:$0xff] %v7121_v39 }
 0x155   : > { %v7123_v42 = vpop.f32.mrb[30].mxu0 }
 0x156   : > { %v7125_v40 = vpop.f32.mrb[31].mxu0  ;;  %v7127_v6 = vpop.f32.mrb[30].mxu1 }
 0x157   : > { %9149 = vst [vmem:[#allocation36_spill] sm:$0xff] %v7127_v6  ;;  %v7129_v57 = vpop.f32.mrb[31].mxu1 }
 0x158   : > { %9150 = vst [vmem:[#allocation41_spill] sm:$0xff] %v7129_v57 }
 0x159   : > { %v7131_v43 = vpop.f32.mrb[32].mxu0 }
 0x15a   : > { %v7133_v32 = vpop.f32.mrb[33].mxu0  ;;  %v7135_v37 = vpop.f32.mrb[32].mxu1 }
 0x15b   : > { %9151 = vst [vmem:[#allocation42_spill] sm:$0xff] %v7135_v37  ;;  %v7137_v59 = vpop.f32.mrb[33].mxu1 }
 0x15c   : > { %9152 = vst [vmem:[#allocation43_spill] sm:$0xff] %v7137_v59 }
 0x15d   : > { %v7139_v25 = vpop.f32.mrb[34].mxu0 }
 0x15e   : > { %v7141_v22 = vpop.f32.mrb[35].mxu0  ;;  %v7143_v39 = vpop.f32.mrb[34].mxu1 }
 0x15f   : > { %9153 = vst [vmem:[#allocation44_spill] sm:$0xff] %v7143_v39  ;;  %v7145_v18 = vpop.f32.mrb[35].mxu1 }
 0x160   : > { %9154 = vst [vmem:[#allocation45_spill] sm:$0xff] %v7145_v18 }
 0x161   : > { %v7147_v49 = vpop.f32.mrb[36].mxu0 }
 0x162   : > { %v7149_v6 = vpop.f32.mrb[37].mxu0  ;;  %v7151_v57 = vpop.f32.mrb[36].mxu1 }
 0x163   : > { %9155 = vst [vmem:[#allocation46_spill] sm:$0xff] %v7151_v57  ;;  %v7153_v12 = vpop.f32.mrb[37].mxu1 }
 0x164   : > { %9156 = vst [vmem:[#allocation47_spill] sm:$0xff] %v7153_v12 }
 0x165   : > { %v7155_v19 = vpop.f32.mrb[38].mxu0 }
 0x166   : > { %v7157_v37 = vpop.f32.mrb[39].mxu0  ;;  %v7159_v59 = vpop.f32.mrb[38].mxu1 }
 0x167   : > { %9157 = vst [vmem:[#allocation48_spill] sm:$0xff] %v7159_v59  ;;  %v7161_v62 = vpop.f32.mrb[39].mxu1 }
 0x168   : > { %9158 = vst [vmem:[#allocation49_spill] sm:$0xff] %v7161_v62  ;;  %v495_v62 = vadd.s32 1, %v6542_v61 }
 0x169   : > { %v7163_v23 = vpop.f32.mrb[40].mxu0 }
 0x16a   : > { %v7165_v39 = vpop.f32.mrb[41].mxu0  ;;  %v7167_v18 = vpop.f32.mrb[40].mxu1  ;;  %v496_v17 = vmul.u32 8, %v495_v62 }
 0x16b   : > { %9159 = vst [vmem:[#allocation50_spill] sm:$0xff] %v7167_v18  ;;  %v7169_v38 = vpop.f32.mrb[41].mxu1  ;;  %v9165_v18 = vld [vmem:[#allocation21_spill] sm:$0xff] }
 0x16c   : > { %9160 = vst [vmem:[#allocation51_spill] sm:$0xff] %v7169_v38  ;;  %v485_v38 = vadd.s32 8, %v9165_v18  ;;  %vm491_vm14 = vcmp.ge.s32.totalorder %v9165_v18, %v490_v47  ;;  %vm497_vm0 = vcmp.lt.s32.totalorder %v9165_v18, %v496_v17  ;;  %v487_v62 = vadd.s32 24, %v9165_v18 }
 0x16d   : > { %v7171_v31 = vpop.f32.mrb[42].mxu0  ;;  %vm501_vm2 = vmand %vm491_vm14, %vm497_vm0 }
 0x16e   : > { %v7173_v57 = vpop.f32.mrb[43].mxu0  ;;  %v7175_v12 = vpop.f32.mrb[42].mxu1  ;;  %vm492_vm15 = vcmp.ge.s32.totalorder %v485_v38, %v490_v47  ;;  %vm498_vm1 = vcmp.lt.s32.totalorder %v485_v38, %v496_v17  ;;  %vm494_vm8 = vcmp.ge.s32.totalorder %v487_v62, %v490_v47  ;;  %vm500_vm14 = vcmp.lt.s32.totalorder %v487_v62, %v496_v17 }
 0x16f   : > { %9161 = vst [vmem:[#allocation52_spill] sm:$0xff] %v7175_v12  ;;  %v7177_v13 = vpop.f32.mrb[43].mxu1  ;;  %vm502_vm3 = vmand %vm492_vm15, %vm498_vm1 }
 0x170   : > { %9162 = vst [vmem:[#allocation53_spill] sm:$0xff] %v7177_v13  ;;  %vm7204_vm6 = vmpackc.low %vm502_vm3, %vm501_vm2  ;;  %vm2757_vm2 = vcmask 31744  }
 0x171   : > { %v7179_v53 = vpop.f32.mrb[44].mxu0  ;;  %v9169_v34 = vsel %vm7204_vm6, 4294967295, %v9168_v34  ;;  %5831 = vmatprep.subr.msk.bf16.mxu1 %vm7204_vm6, %v8995_v3  ;;  %vm504_vm0 = vmand %vm494_vm8, %vm500_vm14  ;;  %vm2962_vm14 = vcmask 1042434  }
 0x172   : > { %v7182_v59 = vpop.f32.mrb[45].mxu0  ;;  %v7184_v52 = vpop.f32.mrb[44].mxu1  ;;  %9170 = vst [vmem:[#allocation58_spill] sm:$0xff] %v9169_v34  ;;  %5833 = vmatpush3.bf16.msk.msra.mxu1 %vm7204_vm6, %v8995_v3 }
 0x173   : > { %9163 = vst [vmem:[#allocation54_spill] sm:$0xff] %v7184_v52  ;;  %v7186_v48 = vpop.f32.mrb[45].mxu1 }
 0x174   : > { %9164 = vst [vmem:[#allocation55_spill] sm:$0xff] %v7186_v48  ;;  %v486_v48 = vadd.s32 16, %v9165_v18 }
 0x175   : > { %v7190_v51 = vpop.f32.mrb[46].mxu0 }
 0x176   : > { %v7192_v12 = vpop.f32.mrb[47].mxu0  ;;  %v7194_v13 = vpop.f32.mrb[46].mxu1  ;;  %vm493_vm7 = vcmp.ge.s32.totalorder %v486_v48, %v490_v47  ;;  %vm499_vm9 = vcmp.lt.s32.totalorder %v486_v48, %v496_v17  ;;  %v9178_v17 = vmov 0.0|0.0  }
 0x177   : > { %9166 = vst [vmem:[#allocation56_spill] sm:$0xff] %v7194_v13  ;;  %v7198_v7 = vpop.f32.mrb[47].mxu1  ;;  %vm503_vm15 = vmand %vm493_vm7, %vm499_vm9  ;;  %vm3541_vm7 = vcmask 1043456   ;;  %vm2959_vm9 = vcmask 1041409  }
 0x178   : > { %9167 = vst [vmem:[#allocation57_spill] sm:$0xff] %v7198_v7  ;;  %vm7222_vm1 = vmpackc.low %vm504_vm0, %vm503_vm15  ;;  %vm2965_vm15 = vcmask 1043459   ;;  %vm2968_vm0 = vcmask 1044484  }
 0x179   : > { %v7202_v52 = vpop.f32.mrb[48].mxu0  ;;  %5835 = vmatprep.subr.msk.bf16.mxu1 %vm7222_vm1, %v8995_v3 }
 0x17a   : > { %v7208_v13 = vpop.f32.mrb[49].mxu0  ;;  %v7210_v33 = vpop.f32.mrb[48].mxu1  ;;  %5837 = vmatpush3.bf16.msk.msra.mxu1 %vm7222_vm1, %v8995_v3 }
 0x17b   : > { %9171 = vst [vmem:[#allocation59_spill] sm:$0xff] %v7210_v33  ;;  %v7215_v38 = vpop.f32.mrb[49].mxu1  ;;  %v9173_v33 = vmov 0  ;;  %5838 = vmatprep.subr.bf16.mxu1 %v9178_v17 }
 0x17c   : > { %9172 = vst [vmem:[#allocation60_spill] sm:$0xff] %v7215_v38  ;;  %v9174_v33 = vsel %vm7222_vm1, 4294967295, %v9173_v33 }
 0x17d   : > { %v7220_v7 = vpop.f32.mrb[50].mxu0  ;;  %9175 = vst [vmem:[#allocation61_spill] sm:$0xff] %v9174_v33 }
 0x17e   : > { %v7226_v55 = vpop.f32.mrb[51].mxu0  ;;  %v7228_v24 = vpop.f32.mrb[50].mxu1 }
 0x17f   : > { %9176 = vst [vmem:[#allocation62_spill] sm:$0xff] %v7228_v24  ;;  %v7233_v47 = vpop.f32.mrb[51].mxu1 }
 0x180   : > { %9177 = vst [vmem:[#allocation63_spill] sm:$0xff] %v7233_v47 }
 0x181   : > { %v7239_v48 = vpop.f32.mrb[52].mxu0 }
 0x182   : > { %v7241_v62 = vpop.f32.mrb[53].mxu0  ;;  %v7243_v38 = vpop.f32.mrb[52].mxu1 }
 0x183   : > { %9179 = vst [vmem:[#allocation64_spill] sm:$0xff] %v7243_v38  ;;  %v7245_v56 = vpop.f32.mrb[53].mxu1 }
 0x184   : > { %9180 = vst [vmem:[#allocation65_spill] sm:$0xff] %v7245_v56 }
 0x185   : > { %v7247_v24 = vpop.f32.mrb[54].mxu0 }
 0x186   : > { %9181 = vst [vmem:[#allocation66_spill] sm:$0xff] %v7247_v24  ;;  %v7249_v41 = vpop.f32.mrb[55].mxu0  ;;  %v7251_v30 = vpop.f32.mrb[54].mxu1 }
 0x187   : > { %9182 = vst [vmem:[#allocation67_spill] sm:$0xff] %v7249_v41  ;;  %9183 = vst [vmem:[#allocation68_spill] sm:$0xff] %v7251_v30  ;;  %v7253_v47 = vpop.f32.mrb[55].mxu1 }
 0x188   : > { %9184 = vst [vmem:[#allocation69_spill] sm:$0xff] %v7253_v47 }
 0x189   : > { %v7255_v61 = vpop.f32.mrb[56].mxu0 }
 0x18a   : > { %9185 = vst [vmem:[#allocation70_spill] sm:$0xff] %v7255_v61  ;;  %v7257_v3 = vpop.f32.mrb[57].mxu0  ;;  %v7259_v33 = vpop.f32.mrb[56].mxu1 }
 0x18b   : > { %9186 = vst [vmem:[#allocation71_spill] sm:$0xff] %v7257_v3  ;;  %9187 = vst [vmem:[#allocation72_spill] sm:$0xff] %v7259_v33  ;;  %v7261_v17 = vpop.f32.mrb[57].mxu1 }
 0x18c   : > { %9188 = vst [vmem:[#allocation73_spill] sm:$0xff] %v7261_v17 }
 0x18d   : > { %v7263_v34 = vpop.f32.mrb[58].mxu0 }
 0x18e   : > { %9189 = vst [vmem:[#allocation74_spill] sm:$0xff] %v7263_v34  ;;  %v7265_v38 = vpop.f32.mrb[59].mxu0  ;;  %v7267_v56 = vpop.f32.mrb[58].mxu1 }
 0x18f   : > { %9190 = vst [vmem:[#allocation75_spill] sm:$0xff] %v7265_v38  ;;  %9191 = vst [vmem:[#allocation76_spill] sm:$0xff] %v7267_v56  ;;  %v7269_v24 = vpop.f32.mrb[59].mxu1 }
 0x190   : > { %9192 = vst [vmem:[#allocation77_spill] sm:$0xff] %v7269_v24 }
 0x191   : > { %v7271_v41 = vpop.f32.mrb[60].mxu0 }
 0x192   : > { %9193 = vst [vmem:[#allocation78_spill] sm:$0xff] %v7271_v41  ;;  %v7273_v30 = vpop.f32.mrb[61].mxu0  ;;  %v7275_v47 = vpop.f32.mrb[60].mxu1 }
 0x193   : > { %9194 = vst [vmem:[#allocation79_spill] sm:$0xff] %v7275_v47  ;;  %v7277_v61 = vpop.f32.mrb[61].mxu1  ;;  %v7301_v47 = vsub.s32 0, %v9165_v18 }
 0x194   : > { %9195 = vst [vmem:[#allocation80_spill] sm:$0xff] %v7277_v61  ;;  %v7298_v61 = vld [vmem:[%s8942_s6] ss:$0 sm:$0xff] }
 0x195   : > { %v7279_v3 = vpop.f32.mrb[62].mxu0  ;;  %9201 = vst [vmem:[#allocation86_spill] sm:$0xff] %v7301_v47 }
 0x196   : > { %v7281_v33 = vpop.f32.mrb[63].mxu0  ;;  %v7283_v17 = vpop.f32.mrb[62].mxu1 }
 0x197   : > { %9196 = vst [vmem:[#allocation81_spill] sm:$0xff] %v7283_v17  ;;  %v7285_v34 = vpop.f32.mrb[63].mxu1  ;;  %v7305_v17 = vadd.f32 %v7000_v11, %v7298_v61  ;;  %v7325_v11 = vadd.f32 %v7298_v61, %v7025_v0  ;;  %v7345_v0 = vadd.f32 %v7051_v16, %v7298_v61  ;;  %v7369_v16 = vadd.f32 %v7075_v8, %v7298_v61 }
 0x198   : > { %9197 = vst [vmem:[#allocation82_spill] sm:$0xff] %v7285_v34  ;;  %v7309_v34 = vadd.f32 %v7298_v61, %v7002_v2  ;;  %v7329_v2 = vadd.f32 %v7032_v1, %v7298_v61  ;;  %v7349_v1 = vadd.f32 %v7298_v61, %v7053_v27  ;;  %v7373_v27 = vadd.f32 %v7298_v61, %v7077_v20 }
 0x199   : > { %v7287_v38 = vpop.f32.mrb[64].mxu0  ;;  %v7393_v8 = vadd.f32 %v7099_v60, %v7298_v61  ;;  %v7397_v20 = vadd.f32 %v7298_v61, %v7101_v26  ;;  %v7413_v60 = vadd.f32 %v7298_v61, %v7117_v29  ;;  %v7417_v26 = vadd.f32 %v7123_v42, %v7298_v61 }
 0x19a   : > { %v7289_v56 = vpop.f32.mrb[65].mxu0  ;;  %v7291_v24 = vpop.f32.mrb[64].mxu1  ;;  %v7437_v42 = vadd.f32 %v7298_v61, %v7141_v22  ;;  %v7456_v29 = vadd.f32 %v7298_v61, %v7157_v37  ;;  %v7477_v37 = vadd.f32 %v7179_v53, %v7298_v61 }
 0x19b   : > { %9198 = vst [vmem:[#allocation83_spill] sm:$0xff] %v7289_v56  ;;  %9199 = vst [vmem:[#allocation84_spill] sm:$0xff] %v7291_v24  ;;  %v7293_v41 = vpop.f32.mrb[65].mxu1  ;;  %v7313_v24 = vadd.f32 %v7013_v15, %v7298_v61  ;;  %v7321_v56 = vadd.f32 %v7023_v50, %v7298_v61  ;;  %v7333_v15 = vadd.f32 %v7298_v61, %v7037_v4 }
 0x19c   : > { %9200 = vst [vmem:[#allocation85_spill] sm:$0xff] %v7293_v41  ;;  %v7317_v41 = vadd.f32 %v7298_v61, %v7016_v21  ;;  %v7337_v21 = vadd.f32 %v7043_v35, %v7298_v61  ;;  %v7341_v50 = vadd.f32 %v7298_v61, %v7045_v36  ;;  %v7353_v4 = vadd.f32 %v7059_v45, %v7298_v61 }
 0x19d   : > { %9202 = vst [vmem:[#allocation87_spill] sm:$0xff] %v7313_v24  ;;  %9203 = vst [vmem:[#allocation88_spill] sm:$0xff] %v7321_v56  ;;  %v6224_v56 = vmov 1966171168   ;;  %v7357_v35 = vadd.f32 %v7298_v61, %v7061_v46  ;;  %v7361_v36 = vadd.f32 %v7067_v5, %v7298_v61  ;;  %v7377_v45 = vadd.f32 %v7083_v10, %v7298_v61 }
 0x19e   : > { %v1955_v24 = vunpack.c.l.s4 %v6224_v56  ;;  %v7365_v56 = vadd.f32 %v7298_v61, %v7069_v63  ;;  %v7381_v46 = vadd.f32 %v7298_v61, %v7085_v28  ;;  %v7385_v5 = vadd.f32 %v7091_v9, %v7298_v61  ;;  %9207 = vst [vmem:[#allocation92_spill] sm:$0xff] %v7477_v37 }
 0x19f   : > { %v7389_v63 = vadd.f32 %v7298_v61, %v7093_v44  ;;  %v7401_v10 = vadd.f32 %v7107_v54, %v7298_v61  ;;  %v7405_v9 = vadd.f32 %v7298_v61, %v7109_v58  ;;  %v7409_v44 = vadd.f32 %v7115_v14, %v7298_v61 }
 0x1a0   : > { %v1956_v28 = vunpack.c.0.s8 %v1955_v24  ;;  %v7421_v54 = vadd.f32 %v7298_v61, %v7125_v40  ;;  %v7425_v24 = vadd.f32 %v7131_v43, %v7298_v61  ;;  %v7429_v58 = vadd.f32 %v7298_v61, %v7133_v32 }
 0x1a1   : > { %v7433_v14 = vadd.f32 %v7139_v25, %v7298_v61  ;;  %v7441_v40 = vadd.f32 %v7147_v49, %v7298_v61  ;;  %v7445_v43 = vadd.f32 %v7298_v61, %v7149_v6  ;;  %v7449_v32 = vadd.f32 %v7155_v19, %v7298_v61  ;;  %v4588_v25 = vld [vmem:[%s8940_s4] ss:$0 sm:$0xff] }
 0x1a2   : > { %v7460_v49 = vadd.f32 %v7163_v23, %v7298_v61  ;;  %v7464_v6 = vadd.f32 %v7298_v61, %v7165_v39  ;;  %v1959_v22 = vsub.s32 %v1956_v28, %v9165_v18  ;;  %v7469_v19 = vadd.f32 %v7171_v31, %v7298_v61 }
 0x1a3   : > { %9204 = vst [vmem:[#allocation89_spill] sm:$0xff] %v7449_v32  ;;  %v7473_v32 = vadd.f32 %v7298_v61, %v7173_v57  ;;  %v7481_v23 = vadd.f32 %v7298_v61, %v7182_v59  ;;  %v7485_v28 = vadd.f32 %v7190_v51, %v7298_v61  ;;  %v7489_v31 = vadd.f32 %v7298_v61, %v7192_v12 }
 0x1a4   : > { %9205 = vst [vmem:[#allocation90_spill] sm:$0xff] %v7460_v49  ;;  %9206 = vst [vmem:[#allocation91_spill] sm:$0xff] %v7469_v19  ;;  %v7494_v37 = vadd.f32 %v7202_v52, %v7298_v61  ;;  %v7498_v59 = vadd.f32 %v7298_v61, %v7208_v13  ;;  %v7502_v51 = vadd.f32 %v7220_v7, %v7298_v61 }
 0x1a5   : > { %v7506_v12 = vadd.f32 %v7298_v61, %v7226_v55  ;;  %v7516_v13 = vadd.f32 %v7298_v61, %v7241_v62 }
 0x1a6   : > { %9208 = vst [vmem:[#allocation93_spill] sm:$0xff] %v7502_v51  ;;  %v9217_v51 = vld [vmem:[#allocation70_spill] sm:$0xff] }
 0x1a7   : > { %9209 = vst [vmem:[#allocation94_spill] sm:$0xff] %v7506_v12  ;;  %9212 = vst [vmem:[#allocation97_spill] sm:$0xff] %v7516_v13  ;;  %v9220_v13 = vld [vmem:[#allocation74_spill] sm:$0xff] }
 0x1a8   : > { %v7536_v12 = vadd.f32 %v9220_v13, %v7298_v61  ;;  %v7552_v13 = vadd.f32 %v7279_v3, %v7298_v61 }
 0x1aa   : > { %9227 = vst [vmem:[#allocation98_spill] sm:$0xff] %v7552_v13 }
 0x1f3   : > { %v1808_v39 = vpop.f32.mrb[66].mxu0  ;;  %v1878_v49 = vpop.f32.mrb[66].mxu1 }
 0x1f4   : > { %v1809_v57 = vadd.f32 %v4588_v25, %v1808_v39  ;;  %v1879_v18 = vadd.f32 %v7298_v61, %v1878_v49  ;;  %v5475_v19 = vpop.f32.mrb[67].mxu0  ;;  %v5486_v53 = vpop.f32.mrb[67].mxu1  ;;  %v7510_v25 = vadd.f32 %v7239_v48, %v7298_v61  ;;  %v9213_v39 = vld [vmem:[#allocation66_spill] sm:$0xff]  ;;  %v7528_v48 = vadd.f32 %v9217_v51, %v7298_v61 }
 0x1f5   : > { %v7520_v7 = vadd.f32 %v9213_v39, %v7298_v61  ;;  %v9215_v53 = vld [vmem:[#allocation67_spill] sm:$0xff]  ;;  %v7548_v51 = vadd.f32 %v7298_v61, %v7273_v30 }
 0x1f6   : > { %9210 = vst [vmem:[#allocation95_spill] sm:$0xff] %v7510_v25  ;;  %v1953_v49 = vcombine.high %v1809_v57, %v1809_v57  ;;  %v1960_v19 = vrot.slane %v1809_v57, %v1959_v22  ;;  %v7512_v52 = vmul.f32 %v1879_v18, %v1809_v57  ;;  %v7524_v55 = vadd.f32 %v7298_v61, %v9215_v53  ;;  %v9219_v25 = vld [vmem:[#allocation71_spill] sm:$0xff]  ;;  %v9224_v53 = vld [vmem:[#allocation78_spill] sm:$0xff] }
 0x1f7   : > { %9214 = vst [vmem:[#allocation66_spill] sm:$0xff] %v7520_v7  ;;  %9218 = vst [vmem:[#allocation70_spill] sm:$0xff] %v7528_v48  ;;  %v7532_v18 = vadd.f32 %v7298_v61, %v9219_v25  ;;  %v9222_v39 = vld [vmem:[#allocation75_spill] sm:$0xff] }
 0x1f8   : > { %9211 = vst [vmem:[#allocation96_spill] sm:$0xff] %v7512_v52  ;;  %9216 = vst [vmem:[#allocation67_spill] sm:$0xff] %v7524_v55  ;;  %v1967_v57 = vrot.slane %v1953_v49, %v1959_v22  ;;  %v1968_v52 = vcombine.high %v1960_v19, %v1960_v19  ;;  %v1976_v62 = vrot.slane %v1960_v19, %v1959_v22 }
 0x1f9   : > { %9221 = vst [vmem:[#allocation71_spill] sm:$0xff] %v7536_v12  ;;  %v7540_v7 = vadd.f32 %v7298_v61, %v9222_v39  ;;  %v7544_v55 = vadd.f32 %v9224_v53, %v7298_v61  ;;  %9226 = vst [vmem:[#allocation78_spill] sm:$0xff] %v7548_v51  ;;  %v7556_v39 = vadd.f32 %v7298_v61, %v7281_v33  ;;  %v9231_v51 = vld [vmem:[#allocation83_spill] sm:$0xff] }
 0x1fa   : > { %v1969_v25 = vcombine.high %v1967_v57, %v1967_v57  ;;  %v1983_v49 = vrot.slane %v1967_v57, %v1959_v22  ;;  %v1990_v48 = vrot.slane %v1968_v52, %v1959_v22  ;;  %v1998_v19 = vcombine.high %v1976_v62, %v1976_v62 }
 0x1fb   : > { %9223 = vst [vmem:[#allocation74_spill] sm:$0xff] %v7540_v7  ;;  %9225 = vst [vmem:[#allocation75_spill] sm:$0xff] %v7544_v55  ;;  %v7560_v53 = vadd.f32 %v7287_v38, %v7298_v61  ;;  %v2005_v55 = vrot.slane %v1976_v62, %v7301_v47  ;;  %v7563_v30 = vpop.f32.mrb[68].mxu0  ;;  %v7567_v52 = vadd.f32 %v7298_v61, %v9231_v51  ;;  %v9232_v51 = vld [vmem:[#allocation87_spill] sm:$0xff] }
 0x1fc   : > { %9228 = vst [vmem:[#allocation99_spill] sm:$0xff] %v7556_v39  ;;  %9230 = vst [vmem:[#allocation101_spill] sm:$0xff] %v7563_v30  ;;  %v1997_v57 = vrot.slane %v1969_v25, %v1959_v22  ;;  %v1999_v12 = vcombine.high %v1983_v49, %v1983_v49  ;;  %v2000_v3 = vcombine.high %v1990_v48, %v1990_v48  ;;  %v5497_v13 = vpop.f32.mrb[69].mxu0 }
 0x1fd   : > { %9229 = vst [vmem:[#allocation100_spill] sm:$0xff] %v7560_v53  ;;  %v2009_v7 = vrot.slane %v1990_v48, %v7301_v47  ;;  %v2013_v33 = vrot.slane %v1998_v19, %v7301_v47  ;;  %v2021_v39 = vrot.slane %v1983_v49, %v7301_v47  ;;  %v2042_v38 = vmul.f32 %v2005_v55, %v7309_v34  ;;  %v9233_v19 = vld [vmem:[#allocation88_spill] sm:$0xff] }
 0x1fe   : > { %v2001_v53 = vcombine.high %v1997_v57, %v1997_v57  ;;  %v2017_v62 = vrot.slane %v2000_v3, %v7301_v47  ;;  %v2025_v30 = vrot.slane %v1997_v57, %v7301_v47  ;;  %v7576_v61 = vrot.slane %v1999_v12, %v7301_v47 }
 0x1ff   : > { %5506 = vmatprep.mubr.msk.f32.mxu1 %vm764_vm12, %v2042_v38  ;;  %v2043_v22 = vmul.f32 %v2005_v55, %v7305_v17  ;;  %v2044_v48 = vmul.f32 %v2005_v55, %v7317_v41  ;;  %v2045_v25 = vmul.f32 %v2005_v55, %v9232_v51  ;;  %v2046_v49 = vmul.f32 %v2005_v55, %v7325_v11 }
 0x200   : > { %v7584_v34 = vrot.slane %v2001_v53, %v7301_v47  ;;  %v2047_v13 = vmul.f32 %v2005_v55, %v9233_v19  ;;  %v2048_v57 = vmul.f32 %v2005_v55, %v7333_v15  ;;  %v2049_v12 = vmul.f32 %v2005_v55, %v7329_v2  ;;  %v9255_v47 = vld [vmem:[#allocation98_spill] sm:$0xff] }
 0x201   : > { %5507 = vmatmul.mubr.msk.f32.vlgmr.msra.gmra.mrb[68].mxu1 %vm764_vm12, %v2043_v22  ;;  %v2050_v3 = vmul.f32 %v2009_v7, %v7341_v50  ;;  %v7592_v17 = vmul.f32 %v2009_v7, %v7337_v21  ;;  %v7595_v41 = vmul.f32 %v2009_v7, %v7349_v1  ;;  %v7598_v11 = vmul.f32 %v2009_v7, %v7345_v0 }
 0x202   : > { %5509 = vmatprep.mubr.msk.f32.mxu1 %vm764_vm12, %v2044_v48  ;;  %v9234_v53 = vmov 1.0|1.0   ;;  %v7605_v2 = vmul.f32 %v2009_v7, %v7357_v35  ;;  %v7608_v15 = vmul.f32 %v2009_v7, %v7353_v4  ;;  %v7611_v21 = vmul.f32 %v2009_v7, %v7365_v56 }
 0x203   : > { %5840 = vmatpush3.bf16.msk.msra.mxu1 %vm7204_vm6, %v9234_v53  ;;  %v7614_v50 = vmul.f32 %v2009_v7, %v7361_v36  ;;  %v7617_v0 = vmul.f32 %v2013_v33, %v7373_v27  ;;  %v7620_v1 = vmul.f32 %v2013_v33, %v7369_v16  ;;  %v7623_v55 = vmul.f32 %v2013_v33, %v7381_v46 }
 0x204   : > { %v9236_v35 = vmov 0.0|0.0   ;;  %v7627_v4 = vmul.f32 %v2013_v33, %v7377_v45  ;;  %v7630_v56 = vmul.f32 %v2013_v33, %v7389_v63  ;;  %v7633_v36 = vmul.f32 %v2013_v33, %v7385_v5 }
 0x205   : > { %5841 = vmatprep.subr.bf16.mxu1 %v9236_v35  ;;  %v7636_v27 = vmul.f32 %v2013_v33, %v7397_v20  ;;  %5510 = vmatmul.mubr.msk.f32.gmra.mrb[70].mxu1 %vm764_vm12, %v2045_v25  ;;  %v2065_v16 = vmul.f32 %v2013_v33, %v7393_v8  ;;  %v2066_v46 = vmul.f32 %v2017_v62, %v7405_v9  ;;  %v9238_v33 = vld [vmem:[#allocation89_spill] sm:$0xff]  ;;  %v9239_v51 = vmov 0.0  }
 0x206   : > { %v2067_v7 = vmul.f32 %v2017_v62, %v7401_v10  ;;  %v2068_v45 = vmul.f32 %v2017_v62, %v7413_v60  ;;  %5512 = vmatprep.mubr.msk.f32.mxu1 %vm764_vm12, %v2046_v49  ;;  %v2069_v63 = vmul.f32 %v2017_v62, %v7409_v44  ;;  %v2070_v5 = vmul.f32 %v2017_v62, %v7421_v54  ;;  %v9245_v60 = vld [vmem:[#allocation97_spill] sm:$0xff] }
 0x207   : > { %v2071_v22 = vmul.f32 %v2017_v62, %v7417_v26  ;;  %v2072_v20 = vmul.f32 %v2017_v62, %v7429_v58  ;;  %v2073_v48 = vmul.f32 %v2017_v62, %v7425_v24  ;;  %v2074_v8 = vmul.f32 %v2021_v39, %v7437_v42  ;;  %5843 = vmatpush3.bf16.msk.msra.mxu1 %vm7222_vm1, %v9234_v53  ;;  %v9240_v24 = vld [vmem:[#allocation90_spill] sm:$0xff] }
 0x208   : > { %v2075_v9 = vmul.f32 %v2021_v39, %v7433_v14  ;;  %v2076_v10 = vmul.f32 %v2021_v39, %v7445_v43  ;;  %v2077_v44 = vmul.f32 %v2021_v39, %v7441_v40  ;;  %v2078_v54 = vmul.f32 %v2021_v39, %v7456_v29  ;;  %5711 = vmatprep.subr.mxu1 %v9239_v51  ;;  %v9241_v43 = vld [vmem:[#allocation91_spill] sm:$0xff]  ;;  %v9242_v40 = vld [vmem:[#allocation92_spill] sm:$0xff]  ;;  %v9243_v53 = vld [vmem:[#allocation94_spill] sm:$0xff] }
 0x209   : > { %v2079_v26 = vmul.f32 %v2021_v39, %v9238_v33  ;;  %v2080_v58 = vmul.f32 %v2021_v39, %v7464_v6  ;;  %5513 = vmatmul.mubr.msk.f32.gmra.mrb[72].mxu1 %vm764_vm12, %v2047_v13  ;;  %v2081_v14 = vmul.f32 %v2021_v39, %v9240_v24  ;;  %v2082_v42 = vmul.f32 %v2025_v30, %v7473_v32  ;;  %v9244_v32 = vld [vmem:[#allocation93_spill] sm:$0xff]  ;;  %v9247_v24 = vld [vmem:[#allocation67_spill] sm:$0xff] }
 0x20a   : > { %v2083_v62 = vmul.f32 %v2025_v30, %v9241_v43  ;;  %v2084_v25 = vmul.f32 %v2025_v30, %v7481_v23  ;;  %5515 = vmatprep.mubr.msk.f32.mxu1 %vm764_vm12, %v2048_v57  ;;  %v2085_v29 = vmul.f32 %v2025_v30, %v9242_v40  ;;  %v2086_v49 = vmul.f32 %v2025_v30, %v7489_v31  ;;  %v9246_v57 = vld [vmem:[#allocation95_spill] sm:$0xff]  ;;  %v9250_v40 = vld [vmem:[#allocation74_spill] sm:$0xff] }
 0x20b   : > { %v2087_v6 = vmul.f32 %v2025_v30, %v7485_v28  ;;  %v2088_v19 = vmul.f32 %v2025_v30, %v7498_v59  ;;  %v2089_v13 = vmul.f32 %v2025_v30, %v7494_v37  ;;  %v2090_v39 = vmul.f32 %v7576_v61, %v9243_v53  ;;  %v9248_v28 = vld [vmem:[#allocation66_spill] sm:$0xff] }
 0x20c   : > { %v2091_v38 = vmul.f32 %v7576_v61, %v9244_v32  ;;  %v2092_v23 = vmul.f32 %v7576_v61, %v9245_v60  ;;  %v2093_v33 = vmul.f32 %v7576_v61, %v9246_v57  ;;  %v2094_v31 = vmul.f32 %v7576_v61, %v9247_v24  ;;  %v9249_v30 = vld [vmem:[#allocation70_spill] sm:$0xff]  ;;  %v9251_v32 = vld [vmem:[#allocation71_spill] sm:$0xff] }
 0x20d   : > { %v2095_v59 = vmul.f32 %v7576_v61, %v9248_v28  ;;  %v2096_v37 = vmul.f32 %v7576_v61, %v7532_v18  ;;  %5516 = vmatmul.mubr.msk.f32.gmra.mrb[74].mxu1 %vm764_vm12, %v2049_v12  ;;  %v2097_v43 = vmul.f32 %v7576_v61, %v9249_v30  ;;  %v2098_v53 = vmul.f32 %v7584_v34, %v9250_v40  ;;  %v9252_v57 = vld [vmem:[#allocation78_spill] sm:$0xff]  ;;  %v9253_v28 = vld [vmem:[#allocation75_spill] sm:$0xff]  ;;  %v9256_v40 = vld [vmem:[#allocation100_spill] sm:$0xff] }
 0x20e   : > { %v2099_v60 = vmul.f32 %v7584_v34, %v9251_v32  ;;  %v2100_v24 = vmul.f32 %v7584_v34, %v9252_v57  ;;  %5518 = vmatprep.mubr.msk.f32.mxu1 %vm764_vm12, %v2050_v3  ;;  %v2101_v35 = vmul.f32 %v7584_v34, %v9253_v28  ;;  %v9254_v18 = vld [vmem:[#allocation99_spill] sm:$0xff]  ;;  %v2103_v61 = vmul.f32 %v7584_v34, %v9255_v47  ;;  %v9257_v47 = vld [vmem:[#allocation96_spill] sm:$0xff] }
 0x20f   : > { %v2102_v12 = vmul.f32 %v7584_v34, %v9254_v18  ;;  %v2104_v30 = vmul.f32 %v7584_v34, %v7567_v52  ;;  %v2105_v32 = vmul.f32 %v7584_v34, %v9256_v40  ;;  %vm2971_vm1 = vcmask 1045509  }
 0x211   : > { %5519 = vmatmul.mubr.msk.f32.gmra.mrb[76].mxu1 %vm764_vm12, %v7592_v17 }
 0x212   : > { %5521 = vmatprep.mubr.msk.f32.mxu1 %vm764_vm12, %v7595_v41 }
 0x215   : > { %5522 = vmatmul.mubr.msk.f32.gmra.mrb[78].mxu1 %vm764_vm12, %v7598_v11 }
 0x216   : > { %5524 = vmatprep.mubr.msk.f32.mxu1 %vm764_vm12, %v7605_v2 }
 0x219   : > { %5525 = vmatmul.mubr.msk.f32.gmra.mrb[80].mxu1 %vm764_vm12, %v7608_v15 }
 0x21a   : > { %5527 = vmatprep.mubr.msk.f32.mxu1 %vm764_vm12, %v7611_v21 }
 0x21d   : > { %5528 = vmatmul.mubr.msk.f32.gmra.mrb[82].mxu1 %vm764_vm12, %v7614_v50 }
 0x21e   : > { %5530 = vmatprep.mubr.msk.f32.mxu1 %vm764_vm12, %v7617_v0 }
 0x221   : > { %5531 = vmatmul.mubr.msk.f32.gmra.mrb[84].mxu1 %vm764_vm12, %v7620_v1 }
 0x222   : > { %5533 = vmatprep.mubr.msk.f32.mxu1 %vm764_vm12, %v7623_v55 }
 0x225   : > { %5534 = vmatmul.mubr.msk.f32.gmra.mrb[86].mxu1 %vm764_vm12, %v7627_v4 }
 0x226   : > { %5536 = vmatprep.mubr.msk.f32.mxu1 %vm764_vm12, %v7630_v56 }
 0x229   : > { %5537 = vmatmul.mubr.msk.f32.gmra.mrb[88].mxu1 %vm764_vm12, %v7633_v36 }
 0x22a   : > { %5539 = vmatprep.mubr.msk.f32.mxu1 %vm764_vm12, %v7636_v27 }
 0x22d   : > { %5540 = vmatmul.mubr.msk.f32.gmra.mrb[90].mxu1 %vm764_vm12, %v2065_v16 }
 0x22e   : > { %5542 = vmatprep.mubr.msk.f32.mxu1 %vm764_vm12, %v2066_v46 }
 0x231   : > { %5543 = vmatmul.mubr.msk.f32.gmra.mrb[92].mxu1 %vm764_vm12, %v2067_v7 }
 0x232   : > { %5545 = vmatprep.mubr.msk.f32.mxu1 %vm764_vm12, %v2068_v45 }
 0x235   : > { %5546 = vmatmul.mubr.msk.f32.gmra.mrb[94].mxu1 %vm764_vm12, %v2069_v63 }
 0x236   : > { %5548 = vmatprep.mubr.msk.f32.mxu1 %vm764_vm12, %v2070_v5 }
 0x239   : > { %5549 = vmatmul.mubr.msk.f32.gmra.mrb[96].mxu1 %vm764_vm12, %v2071_v22 }
 0x23a   : > { %5551 = vmatprep.mubr.msk.f32.mxu1 %vm764_vm12, %v2072_v20 }
 0x23d   : > { %5552 = vmatmul.mubr.msk.f32.gmra.mrb[98].mxu1 %vm764_vm12, %v2073_v48 }
 0x23e   : > { %5554 = vmatprep.mubr.msk.f32.mxu1 %vm764_vm12, %v2074_v8 }
 0x241   : > { %5555 = vmatmul.mubr.msk.f32.gmra.mrb[100].mxu1 %vm764_vm12, %v2075_v9 }
 0x242   : > { %5557 = vmatprep.mubr.msk.f32.mxu1 %vm764_vm12, %v2076_v10 }
 0x245   : > { %5558 = vmatmul.mubr.msk.f32.gmra.mrb[102].mxu1 %vm764_vm12, %v2077_v44 }
 0x246   : > { %5560 = vmatprep.mubr.msk.f32.mxu1 %vm764_vm12, %v2078_v54 }
 0x249   : > { %5561 = vmatmul.mubr.msk.f32.gmra.mrb[104].mxu1 %vm764_vm12, %v2079_v26 }
 0x24a   : > { %5563 = vmatprep.mubr.msk.f32.mxu1 %vm764_vm12, %v2080_v58 }
 0x24d   : > { %5564 = vmatmul.mubr.msk.f32.gmra.mrb[106].mxu1 %vm764_vm12, %v2081_v14 }
 0x24e   : > { %5566 = vmatprep.mubr.msk.f32.mxu1 %vm764_vm12, %v2082_v42 }
 0x251   : > { %5567 = vmatmul.mubr.msk.f32.gmra.mrb[108].mxu1 %vm764_vm12, %v2083_v62 }
 0x252   : > { %5569 = vmatprep.mubr.msk.f32.mxu1 %vm764_vm12, %v2084_v25 }
 0x255   : > { %5570 = vmatmul.mubr.msk.f32.gmra.mrb[110].mxu1 %vm764_vm12, %v2085_v29 }
 0x256   : > { %5572 = vmatprep.mubr.msk.f32.mxu1 %vm764_vm12, %v2086_v49 }
 0x259   : > { %5573 = vmatmul.mubr.msk.f32.gmra.mrb[112].mxu1 %vm764_vm12, %v2087_v6 }
 0x25a   : > { %5575 = vmatprep.mubr.msk.f32.mxu1 %vm764_vm12, %v2088_v19 }
 0x25d   : > { %5576 = vmatmul.mubr.msk.f32.gmra.mrb[114].mxu1 %vm764_vm12, %v2089_v13 }
 0x25e   : > { %5578 = vmatprep.mubr.msk.f32.mxu1 %vm764_vm12, %v2090_v39 }
 0x261   : > { %5579 = vmatmul.mubr.msk.f32.gmra.mrb[116].mxu1 %vm764_vm12, %v2091_v38 }
 0x262   : > { %5581 = vmatprep.mubr.msk.f32.mxu1 %vm764_vm12, %v2092_v23 }
 0x265   : > { %5582 = vmatmul.mubr.msk.f32.gmra.mrb[118].mxu1 %vm764_vm12, %v2093_v33 }
 0x266   : > { %5584 = vmatprep.mubr.msk.f32.mxu1 %vm764_vm12, %v2094_v31 }
 0x269   : > { %5585 = vmatmul.mubr.msk.f32.gmra.mrb[120].mxu1 %vm764_vm12, %v2095_v59 }
 0x26a   : > { %5587 = vmatprep.mubr.msk.f32.mxu1 %vm764_vm12, %v2096_v37 }
 0x26d   : > { %5588 = vmatmul.mubr.msk.f32.gmra.mrb[122].mxu1 %vm764_vm12, %v2097_v43 }
 0x26e   : > { %5590 = vmatprep.mubr.msk.f32.mxu1 %vm764_vm12, %v2098_v53 }
 0x271   : > { %5591 = vmatmul.mubr.msk.f32.gmra.mrb[124].mxu1 %vm764_vm12, %v2099_v60 }
 0x272   : > { %5593 = vmatprep.mubr.msk.f32.mxu1 %vm764_vm12, %v2100_v24 }
 0x275   : > { %5594 = vmatmul.mubr.msk.f32.gmra.mrb[126].mxu1 %vm764_vm12, %v2101_v35 }
 0x276   : > { %5596 = vmatprep.mubr.msk.f32.mxu1 %vm764_vm12, %v2102_v12  ;;  %v9258_v12 = vld [vmem:[#allocation21_spill] sm:$0xff] }
 0x279   : > { %5597 = vmatmul.mubr.msk.f32.gmra.mrb[128].mxu1 %vm764_vm12, %v2103_v61  ;;  %v513_v61 = vmul.u32 8, %v9258_v12 }
 0x27a   : > { %5599 = vmatprep.mubr.msk.f32.mxu1 %vm764_vm12, %v2104_v30  ;;  %v9259_v30 = vld [vmem:[#allocation28_spill] sm:$0xff] }
 0x27b   : > { %v516_v40 = vmul.u32 8, %v9259_v30 }
 0x27d   : > { %5600 = vmatmul.mubr.msk.f32.gmra.mrb[130].mxu1 %vm764_vm12, %v2105_v32 }
 0x27e   : > { %5610 = vmatprep.mubr.msk.f32.mxu1 %vm6221_vm13, %v9239_v51 }
 0x281   : > { %5611 = vmatmul.mubr.msk.f32.vlgmr.msra.gmra.mrb[132].mxu1 %vm764_vm12, %v9257_v47 }
 0x282   : > { %5713 = vmatprep.mubr.msk.f32.mxu1 %vm6221_vm13, %v9239_v51 }
 0x2d4   : > { %v7780_v52 = vpop.f32.mrb[68].mxu1 }
 0x2d5   : > { %v2759_v34 = vsel %vm2757_vm2, %v7780_v52, -inf  ;;  %v7784_v3 = vpop.f32.mrb[69].mxu1 }
 0x2d6   : > { %v2758_v17 = vsel %vm2757_vm2, %v7784_v3, -inf }
 0x2d7   : > { %v2760_v41 = vmax.f32 %v2758_v17, %v2759_v34  ;;  %v9260_v17 = vld [vmem:[#allocation23_spill] sm:$0xff] }
 0x2d8   : > { %v7788_v11 = vpop.f32.mrb[70].mxu1  ;;  %vm514_vm3 = vcmp.ge.s32.totalorder %v9260_v17, %v513_v61  ;;  %vm517_vm6 = vcmp.lt.s32.totalorder %v9260_v17, %v516_v40 }
 0x2d9   : > { %v7790_v2 = vpop.f32.mrb[71].mxu1  ;;  %v2763_v50 = vsel %vm2757_vm2, %v7788_v11, -inf  ;;  %vm518_vm8 = vmand %vm514_vm3, %vm517_vm6  ;;  %vm2974_vm3 = vcmask 1046534   ;;  %vm2977_vm6 = vcmask 1047559  }
 0x2da   : > { %v2761_v15 = vsel %vm2757_vm2, %v7790_v2, -inf }
 0x2db   : > { %v2762_v21 = vmax.f32 %v2760_v41, %v2761_v15 }
 0x2dc   : > { %v7796_v0 = vpop.f32.mrb[72].mxu1 }
 0x2dd   : > { %v7798_v1 = vpop.f32.mrb[73].mxu1  ;;  %v2764_v55 = vmax.f32 %v2762_v21, %v2763_v50  ;;  %v2767_v56 = vsel %vm2757_vm2, %v7796_v0, -inf  ;;  %v7879_v50 = vsel %vm518_vm8, 1.0, %v9239_v51 }
 0x2de   : > { %v2765_v35 = vsel %vm2757_vm2, %v7798_v1, -inf  ;;  %9261 = vst [vmem:[#allocation83_spill] sm:$0xff] %v7879_v50  ;;  %5712 = vmatpush3.msk.msra.mxu1 %vm3541_vm7, %v7879_v50 }
 0x2df   : > { %v2766_v4 = vmax.f32 %v2764_v55, %v2765_v35 }
 0x2e0   : > { %v7804_v36 = vpop.f32.mrb[74].mxu1 }
 0x2e1   : > { %v7806_v27 = vpop.f32.mrb[75].mxu1  ;;  %v2768_v16 = vmax.f32 %v2766_v4, %v2767_v56  ;;  %v2771_v45 = vsel %vm2757_vm2, %v7804_v36, -inf }
 0x2e2   : > { %v2769_v46 = vsel %vm2757_vm2, %v7806_v27, -inf }
 0x2e3   : > { %v2770_v7 = vmax.f32 %v2768_v16, %v2769_v46 }
 0x2e4   : > { %v7812_v63 = vpop.f32.mrb[76].mxu1 }
 0x2e5   : > { %v7814_v5 = vmax.f32 %v2770_v7, %v2771_v45  ;;  %v2780_v22 = vsel %vm2757_vm2, %v7812_v63, -inf  ;;  %v7818_v20 = vpop.f32.mrb[77].mxu1 }
 0x2e6   : > { %v2779_v48 = vsel %vm2757_vm2, %v7818_v20, -inf }
 0x2e7   : > { %v2781_v8 = vmax.f32 %v2779_v48, %v2780_v22 }
 0x2e8   : > { %v7822_v9 = vpop.f32.mrb[78].mxu1 }
 0x2e9   : > { %v7824_v10 = vpop.f32.mrb[79].mxu1  ;;  %v2784_v26 = vsel %vm2757_vm2, %v7822_v9, -inf }
 0x2ea   : > { %v2782_v44 = vsel %vm2757_vm2, %v7824_v10, -inf }
 0x2eb   : > { %v2783_v54 = vmax.f32 %v2781_v8, %v2782_v44 }
 0x2ec   : > { %v7830_v58 = vpop.f32.mrb[80].mxu1 }
 0x2ed   : > { %v7832_v14 = vpop.f32.mrb[81].mxu1  ;;  %v2785_v42 = vmax.f32 %v2783_v54, %v2784_v26  ;;  %v2788_v29 = vsel %vm2757_vm2, %v7830_v58, -inf }
 0x2ee   : > { %v2786_v62 = vsel %vm2757_vm2, %v7832_v14, -inf }
 0x2ef   : > { %v2787_v25 = vmax.f32 %v2785_v42, %v2786_v62 }
 0x2f0   : > { %v7838_v49 = vpop.f32.mrb[82].mxu1 }
 0x2f1   : > { %v7840_v6 = vpop.f32.mrb[83].mxu1  ;;  %v2789_v19 = vmax.f32 %v2787_v25, %v2788_v29  ;;  %v2792_v38 = vsel %vm2757_vm2, %v7838_v49, -inf }
 0x2f2   : > { %v2790_v13 = vsel %vm2757_vm2, %v7840_v6, -inf }
 0x2f3   : > { %v2791_v39 = vmax.f32 %v2789_v19, %v2790_v13 }
 0x2f4   : > { %v7846_v23 = vpop.f32.mrb[84].mxu1 }
 0x2f5   : > { %v7848_v33 = vmax.f32 %v2791_v39, %v2792_v38  ;;  %v2801_v31 = vsel %vm2757_vm2, %v7846_v23, -inf  ;;  %v7852_v59 = vpop.f32.mrb[85].mxu1 }
 0x2f6   : > { %v2800_v37 = vsel %vm2757_vm2, %v7852_v59, -inf }
 0x2f7   : > { %v2802_v43 = vmax.f32 %v2800_v37, %v2801_v31 }
 0x2f8   : > { %v7856_v53 = vpop.f32.mrb[86].mxu1 }
 0x2f9   : > { %v7858_v60 = vpop.f32.mrb[87].mxu1  ;;  %v2805_v28 = vsel %vm2757_vm2, %v7856_v53, -inf }
 0x2fa   : > { %v2803_v57 = vsel %vm2757_vm2, %v7858_v60, -inf }
 0x2fb   : > { %v2804_v24 = vmax.f32 %v2802_v43, %v2803_v57 }
 0x2fc   : > { %v7864_v18 = vpop.f32.mrb[88].mxu1 }
 0x2fd   : > { %v7868_v32 = vpop.f32.mrb[89].mxu1  ;;  %v2806_v47 = vmax.f32 %v2804_v24, %v2805_v28  ;;  %v2809_v15 = vsel %vm2757_vm2, %v7864_v18, -inf }
 0x2fe   : > { %v2807_v34 = vsel %vm2757_vm2, %v7868_v32, -inf }
 0x2ff   : > { %v2808_v41 = vmax.f32 %v2806_v47, %v2807_v34 }
 0x300   : > { %v7876_v21 = vpop.f32.mrb[90].mxu1 }
 0x301   : > { %v7881_v55 = vpop.f32.mrb[91].mxu1  ;;  %v2810_v35 = vmax.f32 %v2808_v41, %v2809_v15  ;;  %v2813_v16 = vsel %vm2757_vm2, %v7876_v21, -inf }
 0x302   : > { %v2811_v4 = vsel %vm2757_vm2, %v7881_v55, -inf }
 0x303   : > { %v2812_v56 = vmax.f32 %v2810_v35, %v2811_v4 }
 0x304   : > { %v7889_v46 = vpop.f32.mrb[92].mxu1 }
 0x305   : > { %v7891_v7 = vmax.f32 %v2812_v56, %v2813_v16  ;;  %v2822_v45 = vsel %vm2757_vm2, %v7889_v46, -inf  ;;  %v7895_v22 = vpop.f32.mrb[93].mxu1 }
 0x306   : > { %v2821_v48 = vsel %vm2757_vm2, %v7895_v22, -inf }
 0x307   : > { %v2823_v8 = vmax.f32 %v2821_v48, %v2822_v45 }
 0x308   : > { %v7899_v44 = vpop.f32.mrb[94].mxu1 }
 0x309   : > { %v7901_v54 = vpop.f32.mrb[95].mxu1  ;;  %v2826_v62 = vsel %vm2757_vm2, %v7899_v44, -inf }
 0x30a   : > { %v2824_v26 = vsel %vm2757_vm2, %v7901_v54, -inf }
 0x30b   : > { %v2825_v42 = vmax.f32 %v2823_v8, %v2824_v26 }
 0x30c   : > { %v7907_v25 = vpop.f32.mrb[96].mxu1 }
 0x30d   : > { %v7909_v29 = vpop.f32.mrb[97].mxu1  ;;  %v2827_v19 = vmax.f32 %v2825_v42, %v2826_v62  ;;  %v2830_v38 = vsel %vm2757_vm2, %v7907_v25, -inf }
 0x30e   : > { %v2828_v13 = vsel %vm2757_vm2, %v7909_v29, -inf }
 0x30f   : > { %v2829_v39 = vmax.f32 %v2827_v19, %v2828_v13 }
 0x310   : > { %v7915_v31 = vpop.f32.mrb[98].mxu1 }
 0x311   : > { %v7917_v37 = vpop.f32.mrb[99].mxu1  ;;  %v2831_v43 = vmax.f32 %v2829_v39, %v2830_v38  ;;  %v2834_v28 = vsel %vm2757_vm2, %v7915_v31, -inf }
 0x312   : > { %v2832_v57 = vsel %vm2757_vm2, %v7917_v37, -inf }
 0x313   : > { %v2833_v24 = vmax.f32 %v2831_v43, %v2832_v57 }
 0x314   : > { %v7923_v12 = vpop.f32.mrb[100].mxu1 }
 0x315   : > { %9262 = vst [vmem:[#allocation87_spill] sm:$0xff] %v7923_v12  ;;  %v7925_v61 = vmax.f32 %v2833_v24, %v2834_v28  ;;  %v2843_v30 = vsel %vm2757_vm2, %v7923_v12, -inf  ;;  %v7929_v40 = vpop.f32.mrb[101].mxu1 }
 0x316   : > { %9263 = vst [vmem:[#allocation88_spill] sm:$0xff] %v7929_v40  ;;  %v2842_v47 = vsel %vm2757_vm2, %v7929_v40, -inf }
 0x317   : > { %v2844_v34 = vmax.f32 %v2842_v47, %v2843_v30 }
 0x318   : > { %v7933_v17 = vpop.f32.mrb[102].mxu1 }
 0x319   : > { %9264 = vst [vmem:[#allocation58_spill] sm:$0xff] %v7933_v17  ;;  %v7935_v41 = vpop.f32.mrb[103].mxu1  ;;  %v2847_v4 = vsel %vm2757_vm2, %v7933_v17, -inf }
 0x31a   : > { %9265 = vst [vmem:[#allocation61_spill] sm:$0xff] %v7935_v41  ;;  %v2845_v15 = vsel %vm2757_vm2, %v7935_v41, -inf }
 0x31b   : > { %v2846_v35 = vmax.f32 %v2844_v34, %v2845_v15 }
 0x31c   : > { %v7941_v56 = vpop.f32.mrb[104].mxu1 }
 0x31d   : > { %9266 = vst [vmem:[#allocation89_spill] sm:$0xff] %v7941_v56  ;;  %v7943_v16 = vpop.f32.mrb[105].mxu1  ;;  %v2848_v45 = vmax.f32 %v2846_v35, %v2847_v4  ;;  %v2851_v26 = vsel %vm2757_vm2, %v7941_v56, -inf }
 0x31e   : > { %9267 = vst [vmem:[#allocation90_spill] sm:$0xff] %v7943_v16  ;;  %v2849_v48 = vsel %vm2757_vm2, %v7943_v16, -inf }
 0x31f   : > { %v2850_v8 = vmax.f32 %v2848_v45, %v2849_v48 }
 0x320   : > { %v7949_v42 = vpop.f32.mrb[106].mxu1 }
 0x321   : > { %9268 = vst [vmem:[#allocation91_spill] sm:$0xff] %v7949_v42  ;;  %v7951_v62 = vpop.f32.mrb[107].mxu1  ;;  %v2852_v19 = vmax.f32 %v2850_v8, %v2851_v26  ;;  %v2855_v38 = vsel %vm2757_vm2, %v7949_v42, -inf }
 0x322   : > { %9269 = vst [vmem:[#allocation92_spill] sm:$0xff] %v7951_v62  ;;  %v2853_v13 = vsel %vm2757_vm2, %v7951_v62, -inf }
 0x323   : > { %v2854_v39 = vmax.f32 %v2852_v19, %v2853_v13 }
 0x324   : > { %v7957_v43 = vpop.f32.mrb[108].mxu1 }
 0x325   : > { %9270 = vst [vmem:[#allocation94_spill] sm:$0xff] %v7957_v43  ;;  %v2856_v57 = vmax.f32 %v2854_v39, %v2855_v38  ;;  %v2864_v24 = vsel %vm2757_vm2, %v7957_v43, -inf  ;;  %v7961_v28 = vpop.f32.mrb[109].mxu1 }
 0x326   : > { %9271 = vst [vmem:[#allocation93_spill] sm:$0xff] %v7961_v28  ;;  %v2863_v30 = vsel %vm2757_vm2, %v7961_v28, -inf }
 0x327   : > { %v2865_v47 = vmax.f32 %v2863_v30, %v2864_v24 }
 0x328   : > { %v7965_v34 = vpop.f32.mrb[110].mxu1 }
 0x329   : > { %9272 = vst [vmem:[#allocation97_spill] sm:$0xff] %v7965_v34  ;;  %v7967_v15 = vpop.f32.mrb[111].mxu1  ;;  %v2868_v45 = vsel %vm2757_vm2, %v7965_v34, -inf  ;;  %v2815_v34 = vrot.slane %v7891_v7, 4 }
 0x32a   : > { %9273 = vst [vmem:[#allocation95_spill] sm:$0xff] %v7967_v15  ;;  %v2866_v35 = vsel %vm2757_vm2, %v7967_v15, -inf }
 0x32b   : > { %v2867_v4 = vmax.f32 %v2865_v47, %v2866_v35 }
 0x32c   : > { %v7973_v48 = vpop.f32.mrb[112].mxu1 }
 0x32d   : > { %9274 = vst [vmem:[#allocation67_spill] sm:$0xff] %v7973_v48  ;;  %v7975_v8 = vpop.f32.mrb[113].mxu1  ;;  %v2869_v26 = vmax.f32 %v2867_v4, %v2868_v45  ;;  %v2872_v39 = vsel %vm2757_vm2, %v7973_v48, -inf }
 0x32e   : > { %9275 = vst [vmem:[#allocation66_spill] sm:$0xff] %v7975_v8  ;;  %v2870_v19 = vsel %vm2757_vm2, %v7975_v8, -inf  ;;  %v2773_v8 = vrot.slane %v7814_v5, 4 }
 0x32f   : > { %v2871_v13 = vmax.f32 %v2869_v26, %v2870_v19 }
 0x330   : > { %v7981_v38 = vpop.f32.mrb[114].mxu1  ;;  %v2774_v62 = vmax.f32 %v7814_v5, %v2773_v8 }
 0x331   : > { %9276 = vst [vmem:[#allocation70_spill] sm:$0xff] %v7981_v38  ;;  %v7983_v24 = vpop.f32.mrb[115].mxu1  ;;  %v2873_v30 = vmax.f32 %v2871_v13, %v2872_v39  ;;  %v2876_v51 = vsel %vm2757_vm2, %v7981_v38, -inf }
 0x332   : > { %9277 = vst [vmem:[#allocation74_spill] sm:$0xff] %v7983_v24  ;;  %v2874_v47 = vsel %vm2757_vm2, %v7983_v24, -inf  ;;  %v2775_v8 = vrot.slane %v2774_v62, 2 }
 0x333   : > { %v2875_v35 = vmax.f32 %v2873_v30, %v2874_v47 }
 0x334   : > { %v7989_v4 = vpop.f32.mrb[116].mxu1 }
 0x335   : > { %9278 = vst [vmem:[#allocation71_spill] sm:$0xff] %v7989_v4  ;;  %v2877_v45 = vmax.f32 %v2875_v35, %v2876_v51  ;;  %v2885_v26 = vsel %vm2757_vm2, %v7989_v4, -inf  ;;  %v7993_v19 = vpop.f32.mrb[117].mxu1 }
 0x336   : > { %v2884_v50 = vsel %vm2757_vm2, %v7993_v19, -inf }
 0x337   : > { %v2886_v48 = vmax.f32 %v2884_v50, %v2885_v26  ;;  %v2794_v26 = vrot.slane %v7848_v33, 4  ;;  %v2878_v43 = vrot.slane %v2877_v45, 4 }
 0x338   : > { %v7997_v13 = vpop.f32.mrb[118].mxu1 }
 0x339   : > { %9279 = vst [vmem:[#allocation78_spill] sm:$0xff] %v7997_v13  ;;  %v7999_v39 = vpop.f32.mrb[119].mxu1  ;;  %v2889_v51 = vsel %vm2757_vm2, %v7997_v13, -inf  ;;  %v2795_v16 = vmax.f32 %v7848_v33, %v2794_v26  ;;  %v2879_v41 = vmax.f32 %v2877_v45, %v2878_v43 }
 0x33a   : > { %9280 = vst [vmem:[#allocation75_spill] sm:$0xff] %v7999_v39  ;;  %v2887_v30 = vsel %vm2757_vm2, %v7999_v39, -inf }
 0x33b   : > { %v2888_v47 = vmax.f32 %v2886_v48, %v2887_v30  ;;  %v2836_v48 = vrot.slane %v7925_v61, 4  ;;  %v2857_v30 = vrot.slane %v2856_v57, 4  ;;  %v2880_v45 = vrot.slane %v2879_v41, 2 }
 0x33c   : > { %v8005_v35 = vpop.f32.mrb[120].mxu1 }
 0x33d   : > { %9281 = vst [vmem:[#allocation99_spill] sm:$0xff] %v8005_v35  ;;  %v8007_v38 = vpop.f32.mrb[121].mxu1  ;;  %v2890_v24 = vmax.f32 %v2888_v47, %v2889_v51  ;;  %v2893_v28 = vsel %vm2757_vm2, %v8005_v35, -inf  ;;  %v2858_v17 = vmax.f32 %v2856_v57, %v2857_v30  ;;  %v2776_v30 = vmax.f32 %v2774_v62, %v2775_v8 }
 0x33e   : > { %9282 = vst [vmem:[#allocation98_spill] sm:$0xff] %v8007_v38  ;;  %v2891_v50 = vsel %vm2757_vm2, %v8007_v38, -inf  ;;  %v2837_v38 = vmax.f32 %v7925_v61, %v2836_v48  ;;  %v2881_v12 = vmax.f32 %v2879_v41, %v2880_v45 }
 0x33f   : > { %v2892_v15 = vmax.f32 %v2890_v24, %v2891_v50  ;;  %v2816_v24 = vmax.f32 %v7891_v7, %v2815_v34  ;;  %v2796_v7 = vrot.slane %v2795_v16, 2  ;;  %v2859_v34 = vrot.slane %v2858_v17, 2 }
 0x340   : > { %v8017_v42 = vpop.f32.mrb[122].mxu1  ;;  %v2838_v43 = vrot.slane %v2837_v38, 2  ;;  %v2777_v8 = vrot.slane %v2776_v30, 1 }
 0x341   : > { %9283 = vst [vmem:[#allocation100_spill] sm:$0xff] %v8017_v42  ;;  %v8019_v47 = vpop.f32.mrb[123].mxu1  ;;  %v2894_v51 = vmax.f32 %v2892_v15, %v2893_v28  ;;  %v2897_v35 = vsel %vm2757_vm2, %v8017_v42, -inf  ;;  %v2860_v39 = vmax.f32 %v2858_v17, %v2859_v34  ;;  %v2882_v17 = vrot.slane %v2881_v12, 1 }
 0x342   : > { %9284 = vst [vmem:[#allocation96_spill] sm:$0xff] %v8019_v47  ;;  %v2895_v56 = vsel %vm2757_vm2, %v8019_v47, -inf  ;;  %v2839_v47 = vmax.f32 %v2837_v38, %v2838_v43  ;;  %v2778_v45 = vmax.f32 %v2776_v30, %v2777_v8 }
 0x343   : > { %v2896_v50 = vmax.f32 %v2894_v51, %v2895_v56  ;;  %v2817_v56 = vrot.slane %v2816_v24, 2  ;;  %v2861_v38 = vrot.slane %v2860_v39, 1 }
 0x344   : > { %v8029_v13 = vpop.f32.mrb[124].mxu1 }
 0x345   : > { %9285 = vst [vmem:[#allocation21_spill] sm:$0xff] %v8029_v13  ;;  %v2898_v28 = vmax.f32 %v2896_v50, %v2897_v35  ;;  %v2906_v5 = vsel %vm2757_vm2, %v8029_v13, -inf  ;;  %v8033_v15 = vpop.f32.mrb[125].mxu1  ;;  %v2797_v50 = vmax.f32 %v2795_v16, %v2796_v7  ;;  %v2818_v13 = vmax.f32 %v2816_v24, %v2817_v56 }
 0x346   : > { %9286 = vst [vmem:[#allocation28_spill] sm:$0xff] %v8033_v15  ;;  %v2905_v33 = vsel %vm2757_vm2, %v8033_v15, -inf  ;;  %v2840_v56 = vrot.slane %v2839_v47, 1 }
 0x347   : > { %v2899_v61 = vrot.slane %v2898_v28, 4  ;;  %v2907_v57 = vmax.f32 %v2905_v33, %v2906_v5  ;;  %v2798_v16 = vrot.slane %v2797_v50, 1  ;;  %v2819_v24 = vrot.slane %v2818_v13, 1 }
 0x348   : > { %v8037_v26 = vpop.f32.mrb[126].mxu1 }
 0x349   : > { %9287 = vst [vmem:[#allocation23_spill] sm:$0xff] %v8037_v26  ;;  %v2900_v48 = vmax.f32 %v2898_v28, %v2899_v61  ;;  %v8039_v35 = vpop.f32.mrb[127].mxu1  ;;  %v2910_v5 = vsel %vm2757_vm2, %v8037_v26, -inf }
 0x34a   : > { %9288 = vst [vmem:[#allocation102_spill] sm:$0xff] %v8039_v35  ;;  %v2908_v51 = vsel %vm2757_vm2, %v8039_v35, -inf }
 0x34b   : > { %v2901_v42 = vrot.slane %v2900_v48, 2  ;;  %v2909_v15 = vmax.f32 %v2907_v57, %v2908_v51  ;;  %v2820_v51 = vmax.f32 %v2818_v13, %v2819_v24 }
 0x34c   : > { %v8045_v33 = vpop.f32.mrb[128].mxu1 }
 0x34d   : > { %9289 = vst [vmem:[#allocation103_spill] sm:$0xff] %v8045_v33  ;;  %v8047_v40 = vpop.f32.mrb[129].mxu1  ;;  %v2911_v28 = vmax.f32 %v2909_v15, %v2910_v5  ;;  %v2902_v61 = vmax.f32 %v2900_v48, %v2901_v42  ;;  %v2914_v41 = vsel %vm2757_vm2, %v8045_v33, -inf  ;;  %v2799_v48 = vmax.f32 %v2797_v50, %v2798_v16 }
 0x34e   : > { %9290 = vst [vmem:[#allocation104_spill] sm:$0xff] %v8047_v40  ;;  %v2912_v62 = vsel %vm2757_vm2, %v8047_v40, -inf  ;;  %v2883_v40 = vmax.f32 %v2881_v12, %v2882_v17 }
 0x34f   : > { %v2913_v7 = vmax.f32 %v2911_v28, %v2912_v62  ;;  %v2903_v42 = vrot.slane %v2902_v61, 1  ;;  %v2841_v28 = vmax.f32 %v2839_v47, %v2840_v56  ;;  %v2862_v62 = vmax.f32 %v2860_v39, %v2861_v38 }
 0x350   : > { %v8053_v57 = vpop.f32.mrb[130].mxu1 }
 0x351   : > { %v8055_v43 = vpop.f32.mrb[131].mxu1  ;;  %v2915_v34 = vmax.f32 %v2913_v7, %v2914_v41  ;;  %v2918_v33 = vsel %vm2757_vm2, %v8053_v57, -inf  ;;  %v2904_v30 = vmax.f32 %v2902_v61, %v2903_v42  ;;  %v9292_v42 = vld [vmem:[#allocation86_spill] sm:$0xff] }
 0x352   : > { %9291 = vst [vmem:[#allocation105_spill] sm:$0xff] %v8055_v43  ;;  %v2916_v15 = vsel %vm2757_vm2, %v8055_v43, -inf }
 0x353   : > { %v2917_v5 = vmax.f32 %v2915_v34, %v2916_v15 }
 0x354   : > { %v8061_v26 = vpop.f32.mrb[132].mxu1 }
 0x355   : > { %v2919_v7 = vmax.f32 %v2917_v5, %v2918_v33  ;;  %v2927_v41 = vrot.slane %v8061_v26, 1  ;;  %v2928_v35 = vrot.slane %v8061_v26, 2  ;;  %v2929_v43 = vrot.slane %v8061_v26, 3  ;;  %v5612_v4 = vpop.f32.mrb[133].mxu1 }
 0x356   : > { %v2930_v13 = vrot.slane %v8061_v26, 4  ;;  %v2931_v47 = vrot.slane %v8061_v26, 5  ;;  %v2932_v12 = vrot.slane %v8061_v26, 6  ;;  %v2942_v50 = vmax.f32 %v2778_v45, %v8061_v26 }
 0x357   : > { %v2920_v39 = vrot.slane %v2919_v7, 4  ;;  %v2943_v8 = vmax.f32 %v2799_v48, %v2927_v41  ;;  %v2944_v16 = vmax.f32 %v2820_v51, %v2928_v35  ;;  %v2945_v33 = vmax.f32 %v2841_v28, %v2929_v43 }
 0x358   : > { %v8070_v24 = vmax.f32 %v2862_v62, %v2930_v13  ;;  %v8072_v56 = vmax.f32 %v2883_v40, %v2931_v47  ;;  %v8074_v38 = vmax.f32 %v2904_v30, %v2932_v12  ;;  %v2933_v34 = vrot.slane %v8061_v26, 7 }
 0x359   : > { %v2921_v4 = vmax.f32 %v2919_v7, %v2920_v39  ;;  %v2958_v61 = vrot.slane %v2943_v8, 7  ;;  %v2961_v17 = vrot.slane %v2944_v16, 6  ;;  %v8078_v15 = vrot.slane %v2942_v50, %v9292_v42 }
 0x35a   : > { %v2964_v43 = vrot.slane %v2945_v33, 5  ;;  %v2994_v40 = vrot.slane %v2944_v16, %v9292_v42  ;;  %v2967_v51 = vrot.slane %v8070_v24, 4  ;;  %v2970_v5 = vrot.slane %v8072_v56, 3 }
 0x35b   : > { %v2922_v45 = vrot.slane %v2921_v4, 2  ;;  %v2960_v35 = vsel %vm2959_vm9, %v2958_v61, %v2942_v50  ;;  %v2973_v28 = vrot.slane %v8074_v38, 2  ;;  %v8088_v41 = vrot.slane %v2943_v8, %v9292_v42 }
 0x35c   : > { %v2963_v48 = vsel %vm2962_vm14, %v2961_v17, %v2960_v35  ;;  %v3031_v30 = vsub.f32 %v7852_v59, %v2994_v40  ;;  %v3032_v47 = vsub.f32 %v7846_v23, %v2994_v40  ;;  %v3015_v12 = vsub.f32 %v7784_v3, %v8078_v15 }
 0x35d   : > { %v2923_v62 = vmax.f32 %v2921_v4, %v2922_v45  ;;  %v2966_v7 = vsel %vm2965_vm15, %v2964_v43, %v2963_v48  ;;  %v3016_v39 = vsub.f32 %v7780_v52, %v8078_v15  ;;  %v3033_v61 = vsub.f32 %v7858_v60, %v2994_v40 }
 0x35e   : > { %v2969_v13 = vsel %vm2968_vm0, %v2967_v51, %v2966_v7  ;;  %v3111_v4 = vmul.f32 1.442695, %v3031_v30  ;;  %v3113_v17 = vmul.f32 1.442695, %v3032_v47  ;;  %v3079_v59 = vmul.f32 1.442695, %v3015_v12 }
 0x35f   : > { %v2924_v50 = vrot.slane %v2923_v62, 1  ;;  %v2972_v16 = vsel %vm2971_vm1, %v2970_v5, %v2969_v13  ;;  %v3081_v45 = vmul.f32 1.442695, %v3016_v39  ;;  %v3034_v23 = vsub.f32 %v7856_v53, %v2994_v40 }
 0x360   : > { %v2975_v8 = vsel %vm2974_vm3, %v2973_v28, %v2972_v16  ;;  %6023 = vpow2.f32 %v3111_v4  ;;  %v3115_v43 = vmul.f32 1.442695, %v3033_v61  ;;  %v3017_v52 = vsub.f32 %v7790_v2, %v8078_v15 }
 0x361   : > { %v2925_v35 = vmax.f32 %v2923_v62, %v2924_v50  ;;  %6025 = vpow2.f32 %v3113_v17  ;;  %v3018_v3 = vsub.f32 %v7788_v11, %v8078_v15  ;;  %v3035_v48 = vsub.f32 %v7868_v32, %v2994_v40 }
 0x362   : > { %6027 = vpow2.f32 %v3079_v59  ;;  %v3117_v51 = vmul.f32 1.442695, %v3034_v23  ;;  %v3036_v5 = vsub.f32 %v7864_v18, %v2994_v40  ;;  %v8110_v28 = vrot.slane %v2945_v33, %v9292_v42 }
 0x363   : > { %v8106_v60 = vmax.f32 %v2925_v35, %v2933_v34  ;;  %6029 = vpow2.f32 %v3081_v45  ;;  %v3083_v53 = vmul.f32 1.442695, %v3017_v52  ;;  %v3085_v62 = vmul.f32 1.442695, %v3018_v3 }
 0x364   : > { %6031 = vpow2.f32 %v3115_v43  ;;  %v3119_v2 = vmul.f32 1.442695, %v3035_v48  ;;  %v3121_v30 = vmul.f32 1.442695, %v3036_v5  ;;  %v3019_v11 = vsub.f32 %v7798_v1, %v8078_v15 }
 0x365   : > { %v2976_v7 = vrot.slane %v8106_v60, 1  ;;  %6033 = vpow2.f32 %v3117_v51  ;;  %v3020_v32 = vsub.f32 %v7796_v0, %v8078_v15  ;;  %v3037_v18 = vsub.f32 %v7881_v55, %v2994_v40 }
 0x366   : > { %6035 = vpow2.f32 %v3083_v53  ;;  %v3038_v34 = vsub.f32 %v7876_v21, %v2994_v40  ;;  %v3021_v13 = vsub.f32 %v7806_v27, %v8078_v15  ;;  %v3087_v12 = vmul.f32 1.442695, %v3019_v11 }
 0x367   : > { %v2978_v33 = vsel %vm2977_vm6, %v2976_v7, %v2975_v8  ;;  %6037 = vpow2.f32 %v3085_v62  ;;  %v3089_v39 = vmul.f32 1.442695, %v3020_v32  ;;  %v3022_v1 = vsub.f32 %v7804_v36, %v8078_v15 }
 0x368   : > { %v2980_v47 = vsub.f32 %v8061_v26, %v2978_v33  ;;  %6039 = vpow2.f32 %v3119_v2  ;;  %v3123_v55 = vmul.f32 1.442695, %v3037_v18  ;;  %v3039_v50 = vsub.f32 %v7895_v22, %v8110_v28 }
 0x369   : > { %6041 = vpow2.f32 %v3121_v30  ;;  %v3125_v21 = vmul.f32 1.442695, %v3038_v34  ;;  %v3040_v27 = vsub.f32 %v7889_v46, %v8110_v28  ;;  %v3023_v26 = vsub.f32 %v7818_v20, %v8088_v41 }
 0x36a   : > { %v2981_v0 = vmul.f32 1.442695, %v2980_v47  ;;  %v8127_v16 = vpop.eup %6023  ;;  %6043 = vpow2.f32 %v3087_v12  ;;  %v3091_v36 = vmul.f32 1.442695, %v3021_v13  ;;  %v3024_v15 = vsub.f32 %v7812_v63, %v8088_v41  ;;  %v9295_v12 = vld [vmem:[#allocation88_spill] sm:$0xff] }
 0x36b   : > { %v8133_v40 = vpop.eup %6025  ;;  %v3041_v22 = vsub.f32 %v7901_v54, %v8110_v28  ;;  %v8143_v61 = vrot.slane %v8070_v24, %v9292_v42  ;;  %v3093_v20 = vmul.f32 1.442695, %v3022_v1  ;;  %v3127_v17 = vmul.f32 1.442695, %v3039_v50 }
 0x36c   : > { %6045 = vpow2.f32 %v2981_v0  ;;  %v8139_v4 = vpop.eup %6027  ;;  %v5844_v46 = vpack.c.bf16 %v8133_v40, %v8127_v16  ;;  %v3129_v59 = vmul.f32 1.442695, %v3040_v27  ;;  %v3042_v63 = vsub.f32 %v7899_v44, %v8110_v28  ;;  %v9296_v0 = vld [vmem:[#allocation87_spill] sm:$0xff] }
 0x36d   : > { %6047 = vpow2.f32 %v3089_v39  ;;  %v8147_v8 = vpop.eup %6029  ;;  %v3025_v45 = vsub.f32 %v7824_v10, %v8088_v41  ;;  %v3026_v35 = vsub.f32 %v7822_v9, %v8088_v41  ;;  %v3095_v43 = vmul.f32 1.442695, %v3023_v26 }
 0x36e   : > { %6049 = vpow2.f32 %v3123_v55  ;;  %v8151_v54 = vpop.eup %6031  ;;  %5845 = vmatprep.subr.bf16.mxu0 %v5844_v46  ;;  %v5846_v24 = vpack.c.bf16 %v8147_v8, %v8139_v4  ;;  %v3043_v44 = vsub.f32 %v7909_v29, %v8110_v28  ;;  %v3044_v52 = vsub.f32 %v7907_v25, %v8110_v28 }
 0x36f   : > { %6051 = vpow2.f32 %v3125_v21  ;;  %v8159_v23 = vpop.eup %6033  ;;  %v8169_v48 = vrot.slane %v8074_v38, %v9292_v42  ;;  %v3097_v10 = vmul.f32 1.442695, %v3024_v15  ;;  %v3131_v5 = vmul.f32 1.442695, %v3041_v22 }
 0x370   : > { %6053 = vpow2.f32 %v3091_v36  ;;  %v8165_v3 = vpop.eup %6035  ;;  %5847 = vmatpush3.bf16.msra.mxu0 %v5846_v24  ;;  %v5848_v9 = vpack.c.bf16 %v8159_v23, %v8151_v54  ;;  %v3133_v29 = vmul.f32 1.442695, %v3042_v63  ;;  %v3027_v25 = vsub.f32 %v7832_v14, %v8088_v41  ;;  %v9301_v24 = vld [vmem:[#allocation61_spill] sm:$0xff] }
 0x371   : > { %6055 = vpow2.f32 %v3093_v20  ;;  %v8173_v51 = vpop.eup %6037  ;;  %v3028_v62 = vsub.f32 %v7830_v58, %v8088_v41  ;;  %v3045_v7 = vsub.f32 %v7917_v37, %v8110_v28  ;;  %v3099_v30 = vmul.f32 1.442695, %v3025_v45  ;;  %v9299_v20 = vld [vmem:[#allocation75_spill] sm:$0xff] }
 0x372   : > { %6057 = vpow2.f32 %v3127_v17  ;;  %v8177_v53 = vpop.eup %6039  ;;  %5849 = vmatprep.subr.bf16.mxu0 %v5848_v9  ;;  %v5850_v38 = vpack.c.bf16 %v8173_v51, %v8165_v3  ;;  %v3046_v14 = vsub.f32 %v7915_v31, %v8110_v28  ;;  %v3029_v11 = vsub.f32 %v7840_v6, %v8088_v41  ;;  %v9294_v28 = vld [vmem:[#allocation71_spill] sm:$0xff] }
 0x373   : > { %6059 = vpow2.f32 %v3129_v59  ;;  %v8185_v2 = vpop.eup %6041  ;;  %v3101_v58 = vmul.f32 1.442695, %v3026_v35  ;;  %v3135_v37 = vmul.f32 1.442695, %v3043_v44  ;;  %v3137_v34 = vmul.f32 1.442695, %v3044_v52 }
 0x374   : > { %6061 = vpow2.f32 %v3095_v43  ;;  %v8191_v32 = vpop.eup %6043  ;;  %5851 = vmatpush3.bf16.msra.mxu0 %v5850_v38  ;;  %v5852_v18 = vpack.c.bf16 %v8185_v2, %v8177_v53  ;;  %v3030_v13 = vsub.f32 %v7838_v49, %v8088_v41  ;;  %v3063_v6 = vsub.f32 %v7993_v19, %v8169_v48  ;;  %v9302_v35 = vld [vmem:[#allocation58_spill] sm:$0xff] }
 0x375   : > { %6063 = vpow2.f32 %v3097_v10  ;;  %v3064_v47 = vsub.f32 %v9294_v28, %v8169_v48  ;;  %v3047_v39 = vsub.f32 %v9295_v12, %v8143_v61  ;;  %v3103_v41 = vmul.f32 1.442695, %v3027_v25  ;;  %v9303_v10 = vld [vmem:[#allocation98_spill] sm:$0xff] }
 0x376   : > { %v8195_v33 = vpop.eup %6045  ;;  %6065 = vpow2.f32 %v3131_v5  ;;  %5853 = vmatprep.subr.bf16.mxu0 %v5852_v18  ;;  %v3048_v55 = vsub.f32 %v9296_v0, %v8143_v61  ;;  %v9297_v50 = vmov 1.0   ;;  %v8222_v27 = vrot.slane %v8072_v56, %v9292_v42  ;;  %v9300_v56 = vld [vmem:[#allocation78_spill] sm:$0xff] }
 0x377   : > { %9293 = vst [vmem:[#allocation86_spill] sm:$0xff] %v8195_v33  ;;  %v8199_v31 = vpop.eup %6047  ;;  %5714 = vmatmul.mubr.msk.f32.vlgmr.msra.gmra.mrb[134].mxu1 %vm2757_vm2, %v8195_v33  ;;  %6067 = vpow2.f32 %v3133_v29  ;;  %v3105_v26 = vmul.f32 1.442695, %v3028_v62  ;;  %v3139_v36 = vmul.f32 1.442695, %v3045_v7  ;;  %v3065_v17 = vsub.f32 %v9299_v20, %v8169_v48  ;;  %v9309_v20 = vld [vmem:[#allocation92_spill] sm:$0xff] }
 0x378   : > { %v8209_v1 = vpop.eup %6049  ;;  %v5854_v49 = vpack.c.bf16 %v8199_v31, %v8191_v32  ;;  %6069 = vpow2.f32 %v3099_v30  ;;  %4736 = vmatprep.mubr.msk.f32.mxu1 %vm6658_vm4, %v9297_v50  ;;  %v3141_v46 = vmul.f32 1.442695, %v3046_v14  ;;  %v3066_v63 = vsub.f32 %v9300_v56, %v8169_v48 }
 0x379   : > { %v8218_v19 = vpop.eup %6051  ;;  %6071 = vpow2.f32 %v3101_v58  ;;  %v3049_v45 = vsub.f32 %v9301_v24, %v8143_v61  ;;  %v3050_v43 = vsub.f32 %v9302_v35, %v8143_v61  ;;  %v3107_v9 = vmul.f32 1.442695, %v3029_v11  ;;  %v9304_v11 = vld [vmem:[#allocation99_spill] sm:$0xff]  ;;  %v9312_v35 = vld [vmem:[#allocation21_spill] sm:$0xff] }
 0x37a   : > { %v8224_v15 = vpop.eup %6053  ;;  %5855 = vmatpush3.bf16.msra.mxu0 %v5854_v49  ;;  %v5856_v22 = vpack.c.bf16 %v8218_v19, %v8209_v1  ;;  %6073 = vpow2.f32 %v3135_v37  ;;  %v3067_v5 = vsub.f32 %v9303_v10, %v8169_v48  ;;  %v8248_v25 = vrot.slane %v8106_v60, %v9292_v42  ;;  %v9305_v42 = vld [vmem:[#allocation90_spill] sm:$0xff]  ;;  %v9306_v37 = vld [vmem:[#allocation89_spill] sm:$0xff]  ;;  %v9308_v49 = vld [vmem:[#allocation100_spill] sm:$0xff] }
 0x37b   : > { %v8230_v59 = vpop.eup %6055  ;;  %6075 = vpow2.f32 %v3137_v34  ;;  %v3109_v38 = vmul.f32 1.442695, %v3030_v13  ;;  %v3175_v62 = vmul.f32 1.442695, %v3063_v6  ;;  %v3177_v14 = vmul.f32 1.442695, %v3064_v47 }
 0x37c   : > { %v8238_v44 = vpop.eup %6057  ;;  %5857 = vmatprep.subr.bf16.mxu0 %v5856_v22  ;;  %v5858_v52 = vpack.c.bf16 %v8230_v59, %v8224_v15  ;;  %6077 = vpow2.f32 %v3103_v41  ;;  %v3068_v18 = vsub.f32 %v9304_v11, %v8169_v48  ;;  %v3051_v60 = vsub.f32 %v9305_v42, %v8143_v61  ;;  %v9307_v13 = vld [vmem:[#allocation96_spill] sm:$0xff] }
 0x37d   : > { %v8244_v29 = vpop.eup %6059  ;;  %6079 = vpow2.f32 %v3105_v26  ;;  %v3052_v34 = vsub.f32 %v9306_v37, %v8143_v61  ;;  %v3069_v6 = vsub.f32 %v9307_v13, %v8169_v48  ;;  %v3143_v12 = vmul.f32 1.442695, %v3047_v39  ;;  %v9315_v13 = vld [vmem:[#allocation94_spill] sm:$0xff] }
 0x37e   : > { %v8250_v7 = vpop.eup %6061  ;;  %5859 = vmatpush3.bf16.msra.mxu0 %v5858_v52  ;;  %v5860_v30 = vpack.c.bf16 %v8244_v29, %v8238_v44  ;;  %6081 = vpow2.f32 %v3139_v36  ;;  %v3070_v41 = vsub.f32 %v9308_v49, %v8169_v48  ;;  %v3145_v21 = vmul.f32 1.442695, %v3048_v55  ;;  %v9310_v48 = vld [vmem:[#allocation91_spill] sm:$0xff]  ;;  %v9311_v55 = vld [vmem:[#allocation28_spill] sm:$0xff] }
 0x37f   : > { %v8256_v58 = vpop.eup %6063  ;;  %6083 = vpow2.f32 %v3141_v46  ;;  %v3179_v26 = vmul.f32 1.442695, %v3065_v17  ;;  %v3181_v46 = vmul.f32 1.442695, %v3066_v63  ;;  %v3053_v56 = vsub.f32 %v9309_v20, %v8143_v61 }
 0x380   : > { %v8264_v28 = vpop.eup %6065  ;;  %5861 = vmatprep.subr.bf16.mxu0 %v5860_v30  ;;  %v5862_v47 = vpack.c.bf16 %v8256_v58, %v8250_v7  ;;  %6085 = vpow2.f32 %v3107_v9  ;;  %v3054_v24 = vsub.f32 %v9310_v48, %v8143_v61  ;;  %v3071_v17 = vsub.f32 %v9311_v55, %v8248_v25  ;;  %v9320_v48 = vld [vmem:[#allocation97_spill] sm:$0xff] }
 0x381   : > { %v8270_v0 = vpop.eup %6067  ;;  %6087 = vpow2.f32 %v3109_v38  ;;  %v3072_v52 = vsub.f32 %v9312_v35, %v8248_v25  ;;  %v3147_v10 = vmul.f32 1.442695, %v3049_v45  ;;  %v9313_v38 = vld [vmem:[#allocation93_spill] sm:$0xff]  ;;  %v3149_v61 = vmul.f32 1.442695, %v3050_v43  ;;  %v9317_v43 = vld [vmem:[#allocation23_spill] sm:$0xff] }
 0x382   : > { %v8272_v36 = vpop.eup %6069  ;;  %5863 = vmatpush3.bf16.msra.mxu0 %v5862_v47  ;;  %v5864_v22 = vpack.c.bf16 %v8270_v0, %v8264_v28  ;;  %6089 = vpow2.f32 %v3175_v62  ;;  %v3055_v62 = vsub.f32 %v9313_v38, %v8222_v27  ;;  %v3185_v37 = vmul.f32 1.442695, %v3068_v18 }
 0x383   : > { %v8278_v39 = vpop.eup %6071  ;;  %6091 = vpow2.f32 %v3177_v14  ;;  %v3183_v14 = vmul.f32 1.442695, %v3067_v5  ;;  %v3056_v47 = vsub.f32 %v9315_v13, %v8222_v27  ;;  %v3074_v5 = vsub.f32 %v9317_v43, %v8248_v25  ;;  %v9323_v43 = vld [vmem:[#allocation103_spill] sm:$0xff] }
 0x384   : > { %v8286_v9 = vpop.eup %6073  ;;  %5865 = vmatprep.subr.bf16.mxu0 %v5864_v22  ;;  %v5866_v63 = vpack.c.bf16 %v8278_v39, %v8272_v36  ;;  %6093 = vpow2.f32 %v3143_v12  ;;  %v9316_v12 = vld [vmem:[#allocation102_spill] sm:$0xff]  ;;  %v3153_v35 = vmul.f32 1.442695, %v3052_v34  ;;  %vm4361_vm4 = vcmask 130048  }
 0x385   : > { %v8292_v30 = vpop.eup %6075  ;;  %6095 = vpow2.f32 %v3145_v21  ;;  %v3073_v49 = vsub.f32 %v9316_v12, %v8248_v25  ;;  %v9318_v21 = vld [vmem:[#allocation95_spill] sm:$0xff]  ;;  %v9322_v12 = vld [vmem:[#allocation104_spill] sm:$0xff]  ;;  %v9324_v34 = vld [vmem:[#allocation66_spill] sm:$0xff] }
 0x386   : > { %9314 = vst [vmem:[#allocation71_spill] sm:$0xff] %v8292_v30  ;;  %v8294_v11 = vpop.eup %6077  ;;  %5867 = vmatpush3.bf16.msra.mxu0 %v5866_v63  ;;  %v5868_v42 = vpack.c.bf16 %v8292_v30, %v8286_v9  ;;  %6097 = vpow2.f32 %v3179_v26  ;;  %v3151_v26 = vmul.f32 1.442695, %v3051_v60  ;;  %v3187_v63 = vmul.f32 1.442695, %v3069_v6 }
 0x387   : > { %v8300_v45 = vpop.eup %6079  ;;  %6099 = vpow2.f32 %v3181_v46  ;;  %v3058_v46 = vsub.f32 %v9320_v48, %v8222_v27  ;;  %v3076_v48 = vsub.f32 %v9323_v43, %v8248_v25  ;;  %v3059_v6 = vsub.f32 %v9324_v34, %v8222_v27 }
 0x388   : > { %v8308_v20 = vpop.eup %6081  ;;  %5869 = vmatprep.subr.bf16.mxu0 %v5868_v42  ;;  %v5870_v18 = vpack.c.bf16 %v8300_v45, %v8294_v11  ;;  %6101 = vpow2.f32 %v3147_v10  ;;  %v3189_v42 = vmul.f32 1.442695, %v3070_v41  ;;  %v3075_v10 = vsub.f32 %v9322_v12, %v8248_v25  ;;  %v9326_v12 = vld [vmem:[#allocation105_spill] sm:$0xff] }
 0x389   : > { %9319 = vst [vmem:[#allocation88_spill] sm:$0xff] %v8308_v20  ;;  %v8314_v55 = vpop.eup %6083  ;;  %6103 = vpow2.f32 %v3149_v61  ;;  %v9325_v61 = vld [vmem:[#allocation67_spill] sm:$0xff]  ;;  %v3157_v43 = vmul.f32 1.442695, %v3054_v24  ;;  %v9328_v24 = vld [vmem:[#allocation70_spill] sm:$0xff] }
 0x38a   : > { %9321 = vst [vmem:[#allocation87_spill] sm:$0xff] %v8314_v55  ;;  %v8316_v38 = vpop.eup %6085  ;;  %5871 = vmatpush3.bf16.msra.mxu0 %v5870_v18  ;;  %v5872_v13 = vpack.c.bf16 %v8314_v55, %v8308_v20  ;;  %6105 = vpow2.f32 %v3183_v14  ;;  %v3060_v18 = vsub.f32 %v9325_v61, %v8222_v27  ;;  %v3155_v14 = vmul.f32 1.442695, %v3053_v56 }
 0x38b   : > { %v8322_v60 = vpop.eup %6087  ;;  %6107 = vpow2.f32 %v3185_v37  ;;  %v3077_v37 = vsub.f32 %v9326_v12, %v8248_v25  ;;  %v3078_v61 = vsub.f32 %v8053_v57, %v8248_v25  ;;  %v3193_v56 = vmul.f32 1.442695, %v3072_v52  ;;  %v9327_v12 = vld [vmem:[#allocation74_spill] sm:$0xff] }
 0x38c   : > { %v8330_v22 = vpop.eup %6089  ;;  %5873 = vmatprep.subr.bf16.mxu0 %v5872_v13  ;;  %v5874_v41 = vpack.c.bf16 %v8322_v60, %v8316_v38  ;;  %6109 = vpow2.f32 %v3151_v26  ;;  %v3191_v13 = vmul.f32 1.442695, %v3071_v17  ;;  %v3061_v20 = vsub.f32 %v9327_v12, %v8222_v27 }
 0x38d   : > { %v8336_v33 = vpop.eup %6091  ;;  %6111 = vpow2.f32 %v3153_v35  ;;  %v3062_v35 = vsub.f32 %v9328_v24, %v8222_v27  ;;  %v3159_v17 = vmul.f32 1.442695, %v3055_v62  ;;  %v3161_v25 = vmul.f32 1.442695, %v3056_v47 }
 0x38e   : > { %v8338_v55 = vpop.eup %6093  ;;  %5875 = vmatpush3.bf16.msra.mxu0 %v5874_v41  ;;  %v5876_v34 = vpack.c.bf16 %v8336_v33, %v8330_v22  ;;  %6113 = vpow2.f32 %v3187_v63 }
 0x38f   : > { %v8344_v26 = vpop.eup %6095  ;;  %6115 = vpow2.f32 %v3189_v42 }
 0x390   : > { %v8350_v30 = vpop.eup %6097  ;;  %5877 = vmatprep.subr.bf16.mxu0 %v5876_v34  ;;  %v5878_v63 = vpack.c.bf16 %v8344_v26, %v8338_v55  ;;  %6117 = vpow2.f32 %v3155_v14  ;;  %v3195_v34 = vmul.f32 1.442695, %v3073_v49  ;;  %v3197_v14 = vmul.f32 1.442695, %v3074_v5 }
 0x391   : > { %v8354_v41 = vpop.eup %6099  ;;  %4666 = vmatmul.mubr.msk.f32.vlgmr.msra.gmra.mrb[70].mxu0 %vm6700_vm10, %v9297_v50  ;;  %6119 = vpow2.f32 %v3157_v43  ;;  %v9331_v43 = vsub.f32 %v9318_v21, %v8222_v27  ;;  %v3167_v21 = vmul.f32 1.442695, %v3059_v6 }
 0x392   : > { %v8359_v52 = vpop.eup %6101  ;;  %5879 = vmatpush3.bf16.msra.mxu0 %v5878_v63  ;;  %v5880_v42 = vpack.c.bf16 %v8354_v41, %v8350_v30  ;;  %6121 = vpow2.f32 %v3191_v13  ;;  %4667 = vmatprep.mubr.msk.f32.mxu0 %vm6675_vm5, %v9297_v50  ;;  %v3165_v63 = vmul.f32 1.442695, %v3058_v46 }
 0x393   : > { %v8366_v62 = vpop.eup %6103  ;;  %6123 = vpow2.f32 %v3193_v56  ;;  %v3163_v13 = vmul.f32 1.442695, %v9331_v43  ;;  %v3199_v56 = vmul.f32 1.442695, %v3075_v10 }
 0x394   : > { %v8368_v24 = vpop.eup %6105  ;;  %5881 = vmatprep.subr.bf16.mxu0 %v5880_v42  ;;  %v5882_v47 = vpack.c.bf16 %v8366_v62, %v8359_v52  ;;  %6125 = vpow2.f32 %v3159_v17  ;;  %v3201_v17 = vmul.f32 1.442695, %v3076_v48  ;;  %v3203_v48 = vmul.f32 1.442695, %v3077_v37 }
 0x395   : > { %v8375_v49 = vpop.eup %6107  ;;  %6127 = vpow2.f32 %v3161_v25  ;;  %v3169_v25 = vmul.f32 1.442695, %v3060_v18  ;;  %v3171_v18 = vmul.f32 1.442695, %v3061_v20 }
 0x396   : > { %v8377_v12 = vpop.eup %6109  ;;  %5883 = vmatpush3.bf16.msra.mxu0 %v5882_v47  ;;  %v5884_v5 = vpack.c.bf16 %v8375_v49, %v8368_v24  ;;  %6129 = vpow2.f32 %v3195_v34 }
 0x397   : > { %v8381_v42 = vpop.eup %6111  ;;  %6131 = vpow2.f32 %v3197_v14  ;;  %v3205_v14 = vmul.f32 1.442695, %v3078_v61 }
 0x398   : > { %v8383_v57 = vpop.eup %6113  ;;  %5885 = vmatprep.subr.bf16.mxu0 %v5884_v5  ;;  %v5886_v27 = vpack.c.bf16 %v8381_v42, %v8377_v12  ;;  %6133 = vpow2.f32 %v3163_v13 }
 0x399   : > { %v8387_v46 = vpop.eup %6115  ;;  %6135 = vpow2.f32 %v3165_v63  ;;  %v3173_v63 = vmul.f32 1.442695, %v3062_v35 }
 0x39a   : > { %v8389_v47 = vpop.eup %6117  ;;  %5887 = vmatpush3.bf16.msra.mxu0 %v5886_v27  ;;  %v5888_v10 = vpack.c.bf16 %v8387_v46, %v8383_v57  ;;  %6137 = vpow2.f32 %v3199_v56 }
 0x39b   : > { %v8393_v34 = vpop.eup %6119  ;;  %6139 = vpow2.f32 %v3201_v17 }
 0x39c   : > { %v8395_v43 = vpop.eup %6121  ;;  %5889 = vmatprep.subr.bf16.mxu0 %v5888_v10  ;;  %v5890_v6 = vpack.c.bf16 %v8393_v34, %v8389_v47  ;;  %6141 = vpow2.f32 %v3167_v21 }
 0x39d   : > { %v8399_v13 = vpop.eup %6123  ;;  %6143 = vpow2.f32 %v3169_v25 }
 0x39e   : > { %9332 = vst [vmem:[#allocation37_spill] sm:$0xff] %v8399_v13  ;;  %v8401_v5 = vpop.eup %6125  ;;  %5891 = vmatpush3.bf16.msra.mxu0 %v5890_v6  ;;  %v5892_v37 = vpack.c.bf16 %v8399_v13, %v8395_v43  ;;  %6145 = vpow2.f32 %v3203_v48 }
 0x39f   : > { %v8405_v61 = vpop.eup %6127  ;;  %6147 = vpow2.f32 %v3205_v14 }
 0x3a0   : > { %v8407_v56 = vpop.eup %6129  ;;  %5893 = vmatprep.subr.bf16.mxu0 %v5892_v37  ;;  %v5894_v20 = vpack.c.bf16 %v8405_v61, %v8401_v5  ;;  %6149 = vpow2.f32 %v3171_v18 }
 0x3a1   : > { %9333 = vst [vmem:[#allocation75_spill] sm:$0xff] %v8407_v56  ;;  %v8411_v17 = vpop.eup %6131  ;;  %6151 = vpow2.f32 %v3173_v63 }
 0x3a2   : > { %9334 = vst [vmem:[#allocation78_spill] sm:$0xff] %v8411_v17  ;;  %v8413_v35 = vpop.eup %6133  ;;  %5895 = vmatpush3.bf16.msra.mxu0 %v5894_v20  ;;  %v5896_v27 = vpack.c.bf16 %v8411_v17, %v8407_v56 }
 0x3a3   : > { %v8417_v21 = vpop.eup %6135 }
 0x3a4   : > { %v8419_v25 = vpop.eup %6137  ;;  %5897 = vmatprep.subr.bf16.mxu0 %v5896_v27  ;;  %v5898_v10 = vpack.c.bf16 %v8417_v21, %v8413_v35 }
 0x3a5   : > { %v8423_v48 = vpop.eup %6139 }
 0x3a6   : > { %9335 = vst [vmem:[#allocation61_spill] sm:$0xff] %v8423_v48  ;;  %v8425_v14 = vpop.eup %6141  ;;  %5899 = vmatpush3.bf16.msra.mxu0 %v5898_v10  ;;  %v5900_v6 = vpack.c.bf16 %v8423_v48, %v8419_v25  ;;  %v9336_v10 = vld [vmem:[#allocation83_spill] sm:$0xff] }
 0x3a7   : > { %v6144_v18 = vpop.eup %6143 }
 0x3a8   : > { %v8429_v63 = vpop.eup %6145  ;;  %5901 = vmatprep.subr.bf16.mxu0 %v5900_v6  ;;  %v5902_v37 = vpack.c.bf16 %v6144_v18, %v8425_v14  ;;  %v9338_v6 = vmov 0.0|0.0  }
 0x3a9   : > { %v8432_v20 = vpop.eup %6147 }
 0x3aa   : > { %v6150_v27 = vpop.eup %6149  ;;  %5903 = vmatpush3.bf16.msra.mxu0 %v5902_v37  ;;  %v5904_v17 = vpack.c.bf16 %v8432_v20, %v8429_v63 }
 0x3ab   : > { %v6152_v56 = vpop.eup %6151 }
 0x3ac   : > { %5905 = vmatprep.subr.bf16.mxu0 %v5904_v17  ;;  %v5906_v13 = vpack.c.bf16 %v6152_v56, %v6150_v27 }
 0x3ae   : > { %5907 = vmatpush3.bf16.msra.mxu0 %v5906_v13 }
 0x3af   : > { %5613 = vmatprep.subr.msk.mxu0 %vm3541_vm7, %v9336_v10 }
 0x3b1   : > { %4668 = vmatmul.mubr.msk.f32.vlgmr.msra.gmra.mrb[72].mxu0 %vm6704_vm11, %v9297_v50 }
 0x3b2   : > { %5614 = vmatpush3.msk.msra.mxu0 %vm3541_vm7, %v9336_v10  ;;  %5615 = vmatprep.mubr.msk.f32.mxu0 %vm2757_vm2, %v8139_v4  ;;  %v9341_v4 = vld [vmem:[#allocation87_spill] sm:$0xff] }
 0x3b3   : > { %5972 = vmatprep.subr.bf16.mxu0 %v9338_v6 }
 0x3b5   : > { %5616 = vmatmul.mubr.msk.f32.vlgmr.msra.gmra.mrb[74].mxu0 %vm2757_vm2, %v8147_v8  ;;  %v9342_v8 = vld [vmem:[#allocation37_spill] sm:$0xff] }
 0x3b6   : > { %5618 = vmatprep.mubr.msk.f32.mxu0 %vm2757_vm2, %v8165_v3  ;;  %v9345_v3 = vld [vmem:[#allocation61_spill] sm:$0xff] }
 0x3b9   : > { %5619 = vmatmul.mubr.msk.f32.gmra.mrb[76].mxu0 %vm2757_vm2, %v8173_v51  ;;  %v9346_v51 = vmov 0.0  }
 0x3ba   : > { %5621 = vmatprep.mubr.msk.f32.mxu0 %vm2757_vm2, %v8191_v32 }
 0x3bd   : > { %5622 = vmatmul.mubr.msk.f32.gmra.mrb[78].mxu0 %vm2757_vm2, %v8199_v31 }
 0x3be   : > { %5624 = vmatprep.mubr.msk.f32.mxu0 %vm2757_vm2, %v8224_v15 }
 0x3c1   : > { %5625 = vmatmul.mubr.msk.f32.gmra.mrb[80].mxu0 %vm2757_vm2, %v8230_v59 }
 0x3c2   : > { %5627 = vmatprep.mubr.msk.f32.mxu0 %vm2757_vm2, %v8250_v7 }
 0x3c5   : > { %5628 = vmatmul.mubr.msk.f32.gmra.mrb[82].mxu0 %vm2757_vm2, %v8256_v58  ;;  %v9348_v58 = vld [vmem:[#allocation7_spill] sm:$0xff] }
 0x3c6   : > { %5630 = vmatprep.mubr.msk.f32.mxu0 %vm2757_vm2, %v8272_v36 }
 0x3c9   : > { %5631 = vmatmul.mubr.msk.f32.gmra.mrb[84].mxu0 %vm2757_vm2, %v8278_v39 }
 0x3ca   : > { %5633 = vmatprep.mubr.msk.f32.mxu0 %vm2757_vm2, %v8294_v11 }
 0x3cd   : > { %5634 = vmatmul.mubr.msk.f32.gmra.mrb[86].mxu0 %vm2757_vm2, %v8300_v45 }
 0x3ce   : > { %5636 = vmatprep.mubr.msk.f32.mxu0 %vm2757_vm2, %v8316_v38  ;;  %v9351_v38 = vld [vmem:[#allocation14_spill] sm:$0xff] }
 0x3d1   : > { %5637 = vmatmul.mubr.msk.f32.gmra.mrb[88].mxu0 %vm2757_vm2, %v8322_v60 }
 0x3d2   : > { %5639 = vmatprep.mubr.msk.f32.mxu0 %vm2757_vm2, %v8127_v16  ;;  %v9339_v16 = vld [vmem:[#allocation71_spill] sm:$0xff] }
 0x3d5   : > { %5640 = vmatmul.mubr.msk.f32.gmra.mrb[90].mxu0 %vm2757_vm2, %v8133_v40  ;;  %v9340_v40 = vld [vmem:[#allocation88_spill] sm:$0xff] }
 0x3d6   : > { %5642 = vmatprep.mubr.msk.f32.mxu0 %vm2757_vm2, %v8151_v54  ;;  %v9343_v54 = vld [vmem:[#allocation75_spill] sm:$0xff] }
 0x3d9   : > { %5643 = vmatmul.mubr.msk.f32.gmra.mrb[92].mxu0 %vm2757_vm2, %v8159_v23  ;;  %v9344_v23 = vld [vmem:[#allocation78_spill] sm:$0xff] }
 0x3da   : > { %5645 = vmatprep.mubr.msk.f32.mxu0 %vm2757_vm2, %v8177_v53  ;;  %v8574_v53 = vld [vmem:[%s8944_s8] ss:$0 sm:$0xff] }
 0x3db   : > { %v1425_v60 = vadd.f32 %v8574_v53, %v9351_v38  ;;  %v9362_v38 = vld [vmem:[#allocation6_spill] sm:$0xff] }
 0x3dd   : > { %5646 = vmatmul.mubr.msk.f32.gmra.mrb[94].mxu0 %vm2757_vm2, %v8185_v2  ;;  %v9347_v2 = vld [vmem:[#allocation101_spill] sm:$0xff] }
 0x3de   : > { %5648 = vmatprep.mubr.msk.f32.mxu0 %vm2757_vm2, %v8209_v1  ;;  %v1949_v32 = vadd.f32 %v8574_v53, %v9347_v2 }
 0x3e1   : > { %5649 = vmatmul.mubr.msk.f32.gmra.mrb[96].mxu0 %vm2757_vm2, %v8218_v19 }
 0x3e2   : > { %5651 = vmatprep.mubr.msk.f32.mxu0 %vm2757_vm2, %v8238_v44 }
 0x3e5   : > { %5652 = vmatmul.mubr.msk.f32.gmra.mrb[98].mxu0 %vm2757_vm2, %v8244_v29 }
 0x3e6   : > { %5654 = vmatprep.mubr.msk.f32.mxu0 %vm2757_vm2, %v8264_v28  ;;  %v1420_v28 = vadd.f32 %v9348_v58, %v8574_v53 }
 0x3e9   : > { %5655 = vmatmul.mubr.msk.f32.gmra.mrb[100].mxu0 %vm2757_vm2, %v8270_v0  ;;  %v9349_v0 = vld [vmem:[#allocation8_spill] sm:$0xff] }
 0x3ea   : > { %5657 = vmatprep.mubr.msk.f32.mxu0 %vm2757_vm2, %v8286_v9  ;;  %v1415_v36 = vadd.f32 %v8574_v53, %v9349_v0 }
 0x3ed   : > { %5658 = vmatmul.mubr.msk.f32.gmra.mrb[102].mxu0 %vm2757_vm2, %v9339_v16 }
 0x3ee   : > { %5660 = vmatprep.mubr.msk.f32.mxu0 %vm2757_vm2, %v9340_v40  ;;  %v9357_v40 = vld [vmem:[#allocation29_spill] sm:$0xff] }
 0x3f1   : > { %5661 = vmatmul.mubr.msk.f32.gmra.mrb[104].mxu0 %vm2757_vm2, %v9341_v4  ;;  %v1455_v4 = vadd.f32 %v8574_v53, %v9357_v40 }
 0x3f2   : > { %5663 = vmatprep.mubr.msk.f32.mxu0 %vm2757_vm2, %v8338_v55 }
 0x3f5   : > { %5664 = vmatmul.mubr.msk.f32.gmra.mrb[106].mxu0 %vm2757_vm2, %v8344_v26 }
 0x3f6   : > { %5666 = vmatprep.mubr.msk.f32.mxu0 %vm2757_vm2, %v8359_v52 }
 0x3f9   : > { %5667 = vmatmul.mubr.msk.f32.gmra.mrb[108].mxu0 %vm2757_vm2, %v8366_v62  ;;  %v9352_v62 = vld [vmem:[#allocation15_spill] sm:$0xff] }
 0x3fa   : > { %5669 = vmatprep.mubr.msk.f32.mxu0 %vm2757_vm2, %v8377_v12 }
 0x3fd   : > { %5670 = vmatmul.mubr.msk.f32.gmra.mrb[110].mxu0 %vm2757_vm2, %v8381_v42 }
 0x3fe   : > { %5672 = vmatprep.mubr.msk.f32.mxu0 %vm2757_vm2, %v8389_v47 }
 0x401   : > { %5673 = vmatmul.mubr.msk.f32.gmra.mrb[112].mxu0 %vm2757_vm2, %v8393_v34 }
 0x402   : > { %5675 = vmatprep.mubr.msk.f32.mxu0 %vm2757_vm2, %v8401_v5  ;;  %v475_v5 = vld [vmem:[%s8945_s9] sm:$0xff] }
 0x405   : > { %5676 = vmatmul.mubr.msk.f32.gmra.mrb[114].mxu0 %vm2757_vm2, %v8405_v61  ;;  %v476_v61 = vld [vmem:[%s8945_s9 + $0x8] sm:$0xff] }
 0x406   : > { %5678 = vmatprep.mubr.msk.f32.mxu0 %vm2757_vm2, %v8413_v35  ;;  %v5973_v35 = vpack.c.bf16 %v476_v61, %v475_v5  ;;  %v9365_v61 = vld [vmem:[#allocation12_spill] sm:$0xff] }
 0x408   : > { %5974 = vmatpush3.bf16.msra.mxu0 %v5973_v35 }
 0x409   : > { %5679 = vmatmul.mubr.msk.f32.gmra.mrb[116].mxu0 %vm2757_vm2, %v8417_v21  ;;  %v9355_v21 = vld [vmem:[#allocation24_spill] sm:$0xff]  ;;  %5975 = vmatprep.subr.bf16.mxu0 %v9338_v6 }
 0x40a   : > { %5681 = vmatprep.mubr.msk.f32.mxu0 %vm2757_vm2, %v8425_v14 }
 0x40d   : > { %5682 = vmatmul.mubr.msk.f32.gmra.mrb[118].mxu0 %vm2757_vm2, %v6144_v18 }
 0x40e   : > { %5684 = vmatprep.mubr.msk.f32.mxu0 %vm2757_vm2, %v6150_v27  ;;  %v9356_v27 = vld [vmem:[#allocation25_spill] sm:$0xff] }
 0x40f   : > { %v1460_v16 = vadd.f32 %v9356_v27, %v8574_v53 }
 0x411   : > { %5685 = vmatmul.mubr.msk.f32.gmra.mrb[120].mxu0 %vm2757_vm2, %v6152_v56  ;;  %v9354_v56 = vld [vmem:[#allocation19_spill] sm:$0xff] }
 0x412   : > { %5687 = vmatprep.mubr.msk.f32.mxu0 %vm2757_vm2, %v8330_v22  ;;  %v9350_v22 = vld [vmem:[#allocation11_spill] sm:$0xff]  ;;  %v1450_v17 = vadd.f32 %v9354_v56, %v8574_v53  ;;  %v1495_v56 = vadd.f32 %v8574_v53, %v9365_v61 }
 0x413   : > { %v1430_v55 = vadd.f32 %v9350_v22, %v8574_v53 }
 0x415   : > { %5688 = vmatmul.mubr.msk.f32.gmra.mrb[122].mxu0 %vm2757_vm2, %v8336_v33 }
 0x416   : > { %5690 = vmatprep.mubr.msk.f32.mxu0 %vm2757_vm2, %v8350_v30 }
 0x419   : > { %5691 = vmatmul.mubr.msk.f32.gmra.mrb[124].mxu0 %vm2757_vm2, %v8354_v41 }
 0x41a   : > { %5693 = vmatprep.mubr.msk.f32.mxu0 %vm2757_vm2, %v8368_v24  ;;  %v1440_v24 = vadd.f32 %v9352_v62, %v8574_v53 }
 0x41d   : > { %5694 = vmatmul.mubr.msk.f32.gmra.mrb[126].mxu0 %vm2757_vm2, %v8375_v49  ;;  %v9353_v49 = vld [vmem:[#allocation18_spill] sm:$0xff] }
 0x41e   : > { %5696 = vmatprep.mubr.msk.f32.mxu0 %vm2757_vm2, %v8383_v57  ;;  %v1435_v42 = vadd.f32 %v8574_v53, %v9353_v49 }
 0x421   : > { %5697 = vmatmul.mubr.msk.f32.gmra.mrb[128].mxu0 %vm2757_vm2, %v8387_v46 }
 0x422   : > { %5699 = vmatprep.mubr.msk.f32.mxu0 %vm2757_vm2, %v8395_v43 }
 0x425   : > { %5700 = vmatmul.mubr.msk.f32.gmra.mrb[130].mxu0 %vm2757_vm2, %v9342_v8 }
 0x426   : > { %5702 = vmatprep.mubr.msk.f32.mxu0 %vm2757_vm2, %v9343_v54 }
 0x429   : > { %5703 = vmatmul.mubr.msk.f32.gmra.mrb[132].mxu0 %vm2757_vm2, %v9344_v23 }
 0x42a   : > { %5705 = vmatprep.mubr.msk.f32.mxu0 %vm2757_vm2, %v8419_v25  ;;  %v1445_v25 = vadd.f32 %v8574_v53, %v9355_v21 }
 0x42d   : > { %5706 = vmatmul.mubr.msk.f32.gmra.mrb[134].mxu0 %vm2757_vm2, %v9345_v3 }
 0x42e   : > { %5708 = vmatprep.mubr.msk.f32.mxu0 %vm2757_vm2, %v8429_v63 }
 0x431   : > { %5709 = vmatmul.mubr.msk.f32.gmra.mrb[136].mxu0 %vm2757_vm2, %v8432_v20 }
 0x432   : > { %5729 = vmatprep.mubr.msk.f32.mxu0 %vm6221_vm13, %v9346_v51 }
 0x44a   : > { %v4063_v33 = vpop.f32.mrb[134].mxu1 }
 0x44b   : > { %v8578_v31 = vmul.f32 %v4063_v33, %v1949_v32  ;;  %v5715_v1 = vpop.f32.mrb[135].mxu1  ;;  %v9358_v32 = vld [vmem:[#allocation30_spill] sm:$0xff] }
 0x44c   : > { %v1470_v33 = vadd.f32 %v9358_v32, %v8574_v53  ;;  %v9359_v1 = vld [vmem:[#allocation33_spill] sm:$0xff] }
 0x44d   : > { %v1465_v6 = vadd.f32 %v8574_v53, %v9359_v1  ;;  %v9368_v1 = vld [vmem:[#allocation17_spill] sm:$0xff] }
 0x464   : > { %v5075_v19 = vpop.f32.mrb[70].mxu0 }
 0x465   : > { %v5076_v15 = vpop.f32.mrb[71].mxu0 }
 0x466   : > { %v5077_v59 = vadd.f32 %v5076_v15, %v5075_v19 }
 0x484   : > { %v5110_v44 = vpop.f32.mrb[72].mxu0 }
 0x485   : > { %v5111_v29 = vpop.f32.mrb[73].mxu0 }
 0x486   : > { %v5112_v7 = vadd.f32 %v5111_v29, %v5110_v44 }
 0x488   : > { %v8584_v39 = vadd.f32 %v5112_v7, %v5077_v59  ;;  %v5617_v9 = vpop.f32.mrb[74].mxu0  ;;  %v9360_v7 = vld [vmem:[#allocation34_spill] sm:$0xff] }
 0x489   : > { %v8586_v30 = vmul.f32 %v5617_v9, %v1420_v28  ;;  %v3611_v11 = vpop.f32.mrb[75].mxu0  ;;  %v1480_v58 = vadd.f32 %v9360_v7, %v8574_v53  ;;  %v9361_v28 = vld [vmem:[#allocation5_spill] sm:$0xff] }
 0x48a   : > { %v8588_v45 = vmul.f32 %v3611_v11, %v1415_v36  ;;  %v1475_v0 = vadd.f32 %v8574_v53, %v9361_v28 }
 0x48c   : > { %v5910_v26 = vpack.c.bf16 %v8586_v30, %v8588_v45  ;;  %v5620_v41 = vpop.f32.mrb[76].mxu0 }
 0x48d   : > { %v8596_v57 = vmul.f32 %v5620_v41, %v1430_v55  ;;  %v3621_v52 = vpop.f32.mrb[77].mxu0  ;;  %v9363_v41 = vld [vmem:[#allocation9_spill] sm:$0xff] }
 0x48e   : > { %v8598_v12 = vmul.f32 %v3621_v52, %v1425_v60  ;;  %v1490_v60 = vadd.f32 %v9362_v38, %v8574_v53  ;;  %v1485_v52 = vadd.f32 %v8574_v53, %v9363_v41 }
 0x490   : > { %v5914_v46 = vpack.c.bf16 %v8596_v57, %v8598_v12  ;;  %v5623_v47 = vpop.f32.mrb[78].mxu0 }
 0x491   : > { %v8606_v34 = vmul.f32 %v5623_v47, %v1440_v24  ;;  %v3631_v43 = vpop.f32.mrb[79].mxu0 }
 0x492   : > { %v8608_v13 = vmul.f32 %v3631_v43, %v1435_v42  ;;  %v9364_v43 = vld [vmem:[#allocation10_spill] sm:$0xff] }
 0x493   : > { %v1500_v5 = vadd.f32 %v9364_v43, %v8574_v53 }
 0x494   : > { %v5918_v14 = vpack.c.bf16 %v8606_v34, %v8608_v13  ;;  %v5626_v18 = vpop.f32.mrb[80].mxu0 }
 0x495   : > { %v8622_v63 = vmul.f32 %v5626_v18, %v1450_v17  ;;  %v3641_v37 = vpop.f32.mrb[81].mxu0 }
 0x496   : > { %v8624_v20 = vmul.f32 %v3641_v37, %v1445_v25  ;;  %v9366_v37 = vld [vmem:[#allocation13_spill] sm:$0xff] }
 0x497   : > { %v1510_v27 = vadd.f32 %v9366_v37, %v8574_v53 }
 0x498   : > { %v5922_v8 = vpack.c.bf16 %v8622_v63, %v8624_v20  ;;  %v5629_v54 = vpop.f32.mrb[82].mxu0 }
 0x499   : > { %v8633_v23 = vmul.f32 %v5629_v54, %v1460_v16  ;;  %v3651_v3 = vpop.f32.mrb[83].mxu0  ;;  %v9367_v16 = vld [vmem:[#allocation16_spill] sm:$0xff] }
 0x49a   : > { %v8635_v2 = vmul.f32 %v3651_v3, %v1455_v4  ;;  %v1505_v40 = vadd.f32 %v8574_v53, %v9367_v16 }
 0x49c   : > { %v5926_v19 = vpack.c.bf16 %v8633_v23, %v8635_v2  ;;  %v5632_v15 = vpop.f32.mrb[84].mxu0 }
 0x49d   : > { %v8643_v59 = vmul.f32 %v5632_v15, %v1470_v33  ;;  %v3661_v44 = vpop.f32.mrb[85].mxu0  ;;  %v9369_v15 = vld [vmem:[#allocation20_spill] sm:$0xff] }
 0x49e   : > { %v8645_v29 = vmul.f32 %v3661_v44, %v1465_v6  ;;  %v1520_v6 = vadd.f32 %v9368_v1, %v8574_v53  ;;  %v1515_v44 = vadd.f32 %v8574_v53, %v9369_v15  ;;  %v9378_v1 = vld [vmem:[#allocation42_spill] sm:$0xff]  ;;  %v9379_v15 = vld [vmem:[#allocation43_spill] sm:$0xff] }
 0x49f   : > { %v1565_v23 = vadd.f32 %v8574_v53, %v9379_v15 }
 0x4a0   : > { %v5930_v36 = vpack.c.bf16 %v8643_v59, %v8645_v29  ;;  %v5635_v9 = vpop.f32.mrb[86].mxu0 }
 0x4a1   : > { %v8653_v11 = vmul.f32 %v5635_v9, %v1480_v58  ;;  %v3671_v22 = vpop.f32.mrb[87].mxu0 }
 0x4a2   : > { %v8655_v55 = vmul.f32 %v3671_v22, %v1475_v0  ;;  %v9370_v22 = vld [vmem:[#allocation22_spill] sm:$0xff] }
 0x4a3   : > { %v1530_v38 = vadd.f32 %v9370_v22, %v8574_v53 }
 0x4a4   : > { %v5934_v62 = vpack.c.bf16 %v8653_v11, %v8655_v55  ;;  %v5638_v24 = vpop.f32.mrb[88].mxu0  ;;  %v9383_v11 = vld [vmem:[#allocation47_spill] sm:$0xff] }
 0x4a5   : > { %v8663_v49 = vmul.f32 %v5638_v24, %v1490_v60  ;;  %v3681_v42 = vpop.f32.mrb[89].mxu0  ;;  %v9371_v60 = vld [vmem:[#allocation26_spill] sm:$0xff]  ;;  %v1585_v55 = vadd.f32 %v8574_v53, %v9383_v11 }
 0x4a6   : > { %v8665_v47 = vmul.f32 %v3681_v42, %v1485_v52  ;;  %v1525_v30 = vadd.f32 %v8574_v53, %v9371_v60  ;;  %v9372_v42 = vld [vmem:[#allocation27_spill] sm:$0xff] }
 0x4a7   : > { %v1540_v43 = vadd.f32 %v9372_v42, %v8574_v53 }
 0x4a8   : > { %v5938_v17 = vpack.c.bf16 %v8663_v49, %v8665_v47  ;;  %v5641_v35 = vpop.f32.mrb[90].mxu0 }
 0x4a9   : > { %v3947_v21 = vmul.f32 %v5641_v35, %v1500_v5  ;;  %v3691_v25 = vpop.f32.mrb[91].mxu0  ;;  %v9373_v5 = vld [vmem:[#allocation31_spill] sm:$0xff] }
 0x4aa   : > { %v3946_v18 = vmul.f32 %v3691_v25, %v1495_v56  ;;  %v1535_v57 = vadd.f32 %v8574_v53, %v9373_v5 }
 0x4ac   : > { %v5908_v4 = vpack.c.bf16 %v3947_v21, %v3946_v18  ;;  %v5644_v54 = vpop.f32.mrb[92].mxu0  ;;  %v9374_v21 = vld [vmem:[#allocation32_spill] sm:$0xff]  ;;  %v9375_v18 = vld [vmem:[#allocation35_spill] sm:$0xff] }
 0x4ad   : > { %v3949_v3 = vmul.f32 %v5644_v54, %v1510_v27  ;;  %v3701_v32 = vpop.f32.mrb[93].mxu0  ;;  %v1550_v25 = vadd.f32 %v9374_v21, %v8574_v53  ;;  %v1545_v34 = vadd.f32 %v8574_v53, %v9375_v18  ;;  %v9377_v54 = vld [vmem:[#allocation41_spill] sm:$0xff] }
 0x4ae   : > { %v3948_v33 = vmul.f32 %v3701_v32, %v1505_v40  ;;  %5909 = vmatprep.subr.bf16.mxu1 %v5908_v4  ;;  %v9376_v40 = vld [vmem:[#allocation36_spill] sm:$0xff]  ;;  %v1555_v63 = vadd.f32 %v8574_v53, %v9377_v54 }
 0x4af   : > { %5911 = vmatpush3.bf16.msra.mxu1 %v5910_v26  ;;  %v1560_v4 = vadd.f32 %v9376_v40, %v8574_v53 }
 0x4b0   : > { %v5912_v7 = vpack.c.bf16 %v3949_v3, %v3948_v33  ;;  %v5647_v58 = vpop.f32.mrb[94].mxu0 }
 0x4b1   : > { %v3951_v28 = vmul.f32 %v5647_v58, %v1520_v6  ;;  %v3711_v0 = vpop.f32.mrb[95].mxu0  ;;  %v1570_v6 = vadd.f32 %v9378_v1, %v8574_v53 }
 0x4b2   : > { %v3950_v9 = vmul.f32 %v3711_v0, %v1515_v44  ;;  %5913 = vmatprep.subr.bf16.mxu1 %v5912_v7 }
 0x4b3   : > { %5915 = vmatpush3.bf16.msra.mxu1 %v5914_v46 }
 0x4b4   : > { %v5916_v45 = vpack.c.bf16 %v3951_v28, %v3950_v9  ;;  %v5650_v26 = vpop.f32.mrb[96].mxu0  ;;  %v9380_v28 = vld [vmem:[#allocation44_spill] sm:$0xff]  ;;  %v9381_v9 = vld [vmem:[#allocation45_spill] sm:$0xff] }
 0x4b5   : > { %v3953_v41 = vmul.f32 %v5650_v26, %v1530_v38  ;;  %v3721_v52 = vpop.f32.mrb[97].mxu0  ;;  %v1580_v0 = vadd.f32 %v9380_v28, %v8574_v53  ;;  %v1575_v59 = vadd.f32 %v8574_v53, %v9381_v9 }
 0x4b6   : > { %v3952_v24 = vmul.f32 %v3721_v52, %v1525_v30  ;;  %5917 = vmatprep.subr.bf16.mxu1 %v5916_v45  ;;  %v9382_v30 = vld [vmem:[#allocation46_spill] sm:$0xff] }
 0x4b7   : > { %5919 = vmatpush3.bf16.msra.mxu1 %v5918_v14  ;;  %v1590_v45 = vadd.f32 %v9382_v30, %v8574_v53 }
 0x4b8   : > { %v5920_v12 = vpack.c.bf16 %v3953_v41, %v3952_v24  ;;  %v5653_v46 = vpop.f32.mrb[98].mxu0 }
 0x4b9   : > { %v3955_v61 = vmul.f32 %v5653_v46, %v1540_v43  ;;  %v3731_v56 = vpop.f32.mrb[99].mxu0  ;;  %v9385_v43 = vld [vmem:[#allocation48_spill] sm:$0xff] }
 0x4ba   : > { %v3954_v35 = vmul.f32 %v3731_v56, %v1535_v57  ;;  %5921 = vmatprep.subr.bf16.mxu1 %v5920_v12  ;;  %v1600_v49 = vadd.f32 %v9385_v43, %v8574_v53 }
 0x4bb   : > { %5923 = vmatpush3.bf16.msra.mxu1 %v5922_v8 }
 0x4bc   : > { %v5924_v13 = vpack.c.bf16 %v3955_v61, %v3954_v35  ;;  %v5656_v14 = vpop.f32.mrb[100].mxu0  ;;  %v9388_v35 = vld [vmem:[#allocation50_spill] sm:$0xff] }
 0x4bd   : > { %v3957_v37 = vmul.f32 %v5656_v14, %v1550_v25  ;;  %v3741_v27 = vpop.f32.mrb[101].mxu0  ;;  %v1610_v21 = vadd.f32 %v9388_v35, %v8574_v53  ;;  %v9389_v25 = vld [vmem:[#allocation51_spill] sm:$0xff] }
 0x4be   : > { %v3956_v16 = vmul.f32 %v3741_v27, %v1545_v34  ;;  %5925 = vmatprep.subr.bf16.mxu1 %v5924_v13  ;;  %v1605_v18 = vadd.f32 %v8574_v53, %v9389_v25 }
 0x4bf   : > { %5927 = vmatpush3.bf16.msra.mxu1 %v5926_v19 }
 0x4c0   : > { %v5928_v20 = vpack.c.bf16 %v3957_v37, %v3956_v16  ;;  %v5659_v8 = vpop.f32.mrb[102].mxu0  ;;  %v9390_v16 = vld [vmem:[#allocation52_spill] sm:$0xff] }
 0x4c1   : > { %v3959_v3 = vmul.f32 %v5659_v8, %v1560_v4  ;;  %v3751_v32 = vpop.f32.mrb[103].mxu0  ;;  %v1620_v40 = vadd.f32 %v9390_v16, %v8574_v53  ;;  %v9391_v4 = vld [vmem:[#allocation53_spill] sm:$0xff] }
 0x4c2   : > { %v3958_v33 = vmul.f32 %v3751_v32, %v1555_v63  ;;  %5929 = vmatprep.subr.bf16.mxu1 %v5928_v20  ;;  %v1615_v54 = vadd.f32 %v8574_v53, %v9391_v4 }
 0x4c3   : > { %5931 = vmatpush3.bf16.msra.mxu1 %v5930_v36 }
 0x4c4   : > { %v5932_v2 = vpack.c.bf16 %v3959_v3, %v3958_v33  ;;  %v5662_v19 = vpop.f32.mrb[104].mxu0  ;;  %v9392_v33 = vld [vmem:[#allocation54_spill] sm:$0xff] }
 0x4c5   : > { %v3961_v44 = vmul.f32 %v5662_v19, %v1570_v6  ;;  %v3761_v7 = vpop.f32.mrb[105].mxu0  ;;  %v1630_v1 = vadd.f32 %v9392_v33, %v8574_v53  ;;  %v9393_v6 = vld [vmem:[#allocation55_spill] sm:$0xff] }
 0x4c6   : > { %v3960_v58 = vmul.f32 %v3761_v7, %v1565_v23  ;;  %5933 = vmatprep.subr.bf16.mxu1 %v5932_v2  ;;  %v1625_v15 = vadd.f32 %v8574_v53, %v9393_v6  ;;  %v9402_v6 = vld [vmem:[#allocation68_spill] sm:$0xff] }
 0x4c7   : > { %5935 = vmatpush3.bf16.msra.mxu1 %v5934_v62 }
 0x4c8   : > { %v5936_v29 = vpack.c.bf16 %v3961_v44, %v3960_v58  ;;  %v5665_v36 = vpop.f32.mrb[106].mxu0  ;;  %v9394_v58 = vld [vmem:[#allocation56_spill] sm:$0xff] }
 0x4c9   : > { %v8726_v22 = vmul.f32 %v5665_v36, %v1580_v0  ;;  %v3771_v38 = vpop.f32.mrb[107].mxu0  ;;  %v1640_v28 = vadd.f32 %v9394_v58, %v8574_v53  ;;  %v9395_v0 = vld [vmem:[#allocation57_spill] sm:$0xff] }
 0x4ca   : > { %v8728_v60 = vmul.f32 %v3771_v38, %v1575_v59  ;;  %5937 = vmatprep.subr.bf16.mxu1 %v5936_v29  ;;  %v1635_v9 = vadd.f32 %v8574_v53, %v9395_v0 }
 0x4cb   : > { %5939 = vmatpush3.bf16.msra.mxu1 %v5938_v17  ;;  %v9387_v17 = vld [vmem:[#allocation49_spill] sm:$0xff] }
 0x4cc   : > { %v5942_v62 = vpack.c.bf16 %v8726_v22, %v8728_v60  ;;  %v5668_v26 = vpop.f32.mrb[108].mxu0  ;;  %v1595_v5 = vadd.f32 %v8574_v53, %v9387_v17  ;;  %v9398_v17 = vld [vmem:[#allocation62_spill] sm:$0xff] }
 0x4cd   : > { %v8739_v41 = vmul.f32 %v5668_v26, %v1590_v45  ;;  %v3781_v52 = vpop.f32.mrb[109].mxu0  ;;  %v9396_v45 = vld [vmem:[#allocation59_spill] sm:$0xff] }
 0x4ce   : > { %v8741_v24 = vmul.f32 %v3781_v52, %v1585_v55  ;;  %4737 = vmatmul.mubr.msk.f32.vlgmr.msra.gmra.mrb[136].mxu1 %vm6700_vm10, %v9297_v50  ;;  %v1650_v11 = vadd.f32 %v9396_v45, %v8574_v53  ;;  %v9397_v55 = vld [vmem:[#allocation60_spill] sm:$0xff] }
 0x4cf   : > { %4738 = vmatprep.mubr.msk.f32.mxu1 %vm6675_vm5, %v9297_v50  ;;  %v1645_v26 = vadd.f32 %v8574_v53, %v9397_v55 }
 0x4d0   : > { %v5946_v57 = vpack.c.bf16 %v8739_v41, %v8741_v24  ;;  %v5671_v12 = vpop.f32.mrb[110].mxu0 }
 0x4d1   : > { %v8755_v46 = vmul.f32 %v5671_v12, %v1600_v49  ;;  %v3791_v61 = vpop.f32.mrb[111].mxu0  ;;  %v9399_v12 = vld [vmem:[#allocation63_spill] sm:$0xff] }
 0x4d2   : > { %v8757_v56 = vmul.f32 %v3791_v61, %v1595_v5  ;;  %v1660_v5 = vadd.f32 %v9398_v17, %v8574_v53  ;;  %v1655_v61 = vadd.f32 %v8574_v53, %v9399_v12 }
 0x4d4   : > { %v5950_v34 = vpack.c.bf16 %v8755_v46, %v8757_v56  ;;  %v5674_v13 = vpop.f32.mrb[112].mxu0 }
 0x4d5   : > { %v8765_v14 = vmul.f32 %v5674_v13, %v1610_v21  ;;  %v3801_v37 = vpop.f32.mrb[113].mxu0 }
 0x4d6   : > { %v8767_v27 = vmul.f32 %v3801_v37, %v1605_v18  ;;  %v9400_v37 = vld [vmem:[#allocation64_spill] sm:$0xff] }
 0x4d7   : > { %v1670_v16 = vadd.f32 %v9400_v37, %v8574_v53 }
 0x4d8   : > { %v5954_v63 = vpack.c.bf16 %v8765_v14, %v8767_v27  ;;  %v5677_v20 = vpop.f32.mrb[114].mxu0 }
 0x4d9   : > { %v8775_v8 = vmul.f32 %v5677_v20, %v1620_v40  ;;  %v3811_v3 = vpop.f32.mrb[115].mxu0  ;;  %v9401_v40 = vld [vmem:[#allocation65_spill] sm:$0xff] }
 0x4da   : > { %v8777_v32 = vmul.f32 %v3811_v3, %v1615_v54  ;;  %v1665_v4 = vadd.f32 %v8574_v53, %v9401_v40 }
 0x4dc   : > { %v5958_v23 = vpack.c.bf16 %v8775_v8, %v8777_v32  ;;  %v5680_v2 = vpop.f32.mrb[116].mxu0  ;;  %v9414_v8 = vld [vmem:[#allocation85_spill] sm:$0xff] }
 0x4dd   : > { %v8785_v19 = vmul.f32 %v5680_v2, %v1630_v1  ;;  %v3821_v44 = vpop.f32.mrb[117].mxu0  ;;  %v9403_v2 = vld [vmem:[#allocation69_spill] sm:$0xff]  ;;  %v1725_v32 = vadd.f32 %v8574_v53, %v9414_v8 }
 0x4de   : > { %v8787_v7 = vmul.f32 %v3821_v44, %v1625_v15  ;;  %v1680_v15 = vadd.f32 %v9402_v6, %v8574_v53  ;;  %v1675_v44 = vadd.f32 %v8574_v53, %v9403_v2  ;;  %v9412_v6 = vld [vmem:[#allocation84_spill] sm:$0xff]  ;;  %v9413_v2 = vld [vmem:[#allocation86_spill] sm:$0xff] }
 0x4e0   : > { %v5962_v59 = vpack.c.bf16 %v8785_v19, %v8787_v7  ;;  %v5683_v29 = vpop.f32.mrb[118].mxu0  ;;  %v478_v19 = vld [vmem:[%s8945_s9 + $0x18] sm:$0xff] }
 0x4e1   : > { %v8795_v36 = vmul.f32 %v5683_v29, %v1640_v28  ;;  %v3831_v38 = vpop.f32.mrb[119].mxu0 }
 0x4e2   : > { %v8797_v30 = vmul.f32 %v3831_v38, %v1635_v9  ;;  %v9404_v38 = vld [vmem:[#allocation72_spill] sm:$0xff] }
 0x4e3   : > { %v1690_v45 = vadd.f32 %v9404_v38, %v8574_v53  ;;  %v4742_v38 = vld [vmem:[%s8946_s10] ss:$0 sm:$0xff] }
 0x4e4   : > { %v5966_v52 = vpack.c.bf16 %v8795_v36, %v8797_v30  ;;  %v5686_v42 = vpop.f32.mrb[120].mxu0 }
 0x4e5   : > { %v8805_v43 = vmul.f32 %v5686_v42, %v1650_v11  ;;  %v3841_v49 = vpop.f32.mrb[121].mxu0  ;;  %v9405_v11 = vld [vmem:[#allocation73_spill] sm:$0xff] }
 0x4e6   : > { %v8807_v47 = vmul.f32 %v3841_v49, %v1645_v26  ;;  %v1685_v22 = vadd.f32 %v8574_v53, %v9405_v11  ;;  %v9406_v49 = vld [vmem:[#allocation76_spill] sm:$0xff] }
 0x4e7   : > { %v1700_v17 = vadd.f32 %v9406_v49, %v8574_v53 }
 0x4e8   : > { %v5970_v35 = vpack.c.bf16 %v8805_v43, %v8807_v47  ;;  %v5689_v21 = vpop.f32.mrb[122].mxu0 }
 0x4e9   : > { %v3979_v25 = vmul.f32 %v5689_v21, %v1660_v5  ;;  %v3851_v18 = vpop.f32.mrb[123].mxu0  ;;  %v9407_v5 = vld [vmem:[#allocation77_spill] sm:$0xff] }
 0x4ea   : > { %v3978_v13 = vmul.f32 %v3851_v18, %v1655_v61  ;;  %v1695_v41 = vadd.f32 %v8574_v53, %v9407_v5 }
 0x4ec   : > { %v5940_v54 = vpack.c.bf16 %v3979_v25, %v3978_v13  ;;  %v5692_v20 = vpop.f32.mrb[124].mxu0  ;;  %v9408_v25 = vld [vmem:[#allocation79_spill] sm:$0xff]  ;;  %v9409_v13 = vld [vmem:[#allocation80_spill] sm:$0xff] }
 0x4ed   : > { %v3981_v3 = vmul.f32 %v5692_v20, %v1670_v16  ;;  %v3861_v33 = vpop.f32.mrb[125].mxu0  ;;  %v1710_v18 = vadd.f32 %v9408_v25, %v8574_v53  ;;  %v1705_v46 = vadd.f32 %v8574_v53, %v9409_v13  ;;  %v9411_v20 = vld [vmem:[#allocation82_spill] sm:$0xff] }
 0x4ee   : > { %v3980_v1 = vmul.f32 %v3861_v33, %v1665_v4  ;;  %5941 = vmatprep.subr.bf16.mxu1 %v5940_v54  ;;  %v9410_v4 = vld [vmem:[#allocation81_spill] sm:$0xff]  ;;  %v1715_v14 = vadd.f32 %v8574_v53, %v9411_v20 }
 0x4ef   : > { %5943 = vmatpush3.bf16.msra.mxu1 %v5942_v62  ;;  %v1720_v54 = vadd.f32 %v9410_v4, %v8574_v53 }
 0x4f0   : > { %v5944_v58 = vpack.c.bf16 %v3981_v3, %v3980_v1  ;;  %v5695_v28 = vpop.f32.mrb[126].mxu0 }
 0x4f1   : > { %v3983_v0 = vmul.f32 %v5695_v28, %v1680_v15  ;;  %v3871_v9 = vpop.f32.mrb[127].mxu0  ;;  %v1730_v15 = vadd.f32 %v9412_v6, %v8574_v53 }
 0x4f2   : > { %v3982_v29 = vmul.f32 %v3871_v9, %v1675_v44  ;;  %5945 = vmatprep.subr.bf16.mxu1 %v5944_v58  ;;  %v3347_v44 = vadd.f32 %v9413_v2, %v8584_v39  ;;  %v477_v39 = vld [vmem:[%s8945_s9 + $0x10] sm:$0xff] }
 0x4f3   : > { %5947 = vmatpush3.bf16.msra.mxu1 %v5946_v57  ;;  %v5976_v48 = vpack.c.bf16 %v478_v19, %v477_v39 }
 0x4f4   : > { %v5948_v60 = vpack.c.bf16 %v3983_v0, %v3982_v29  ;;  %v5698_v62 = vpop.f32.mrb[128].mxu0  ;;  %6153 = vrcp.f32 %v3347_v44 }
 0x4f5   : > { %v3985_v55 = vmul.f32 %v5698_v62, %v1690_v45  ;;  %v3881_v26 = vpop.f32.mrb[129].mxu0  ;;  %5977 = vmatpush3.bf16.msra.mxu0 %v5976_v48 }
 0x4f6   : > { %v3984_v42 = vmul.f32 %v3881_v26, %v1685_v22  ;;  %5949 = vmatprep.subr.bf16.mxu1 %v5948_v60 }
 0x4f7   : > { %5951 = vmatpush3.bf16.msra.mxu1 %v5950_v34 }
 0x4f8   : > { %v5952_v24 = vpack.c.bf16 %v3985_v55, %v3984_v42  ;;  %v5701_v57 = vpop.f32.mrb[130].mxu0 }
 0x4f9   : > { %v3987_v12 = vmul.f32 %v5701_v57, %v1700_v17  ;;  %v3891_v61 = vpop.f32.mrb[131].mxu0 }
 0x4fa   : > { %v3986_v21 = vmul.f32 %v3891_v61, %v1695_v41  ;;  %5953 = vmatprep.subr.bf16.mxu1 %v5952_v24 }
 0x4fb   : > { %5955 = vmatpush3.bf16.msra.mxu1 %v5954_v63 }
 0x4fc   : > { %v5956_v56 = vpack.c.bf16 %v3987_v12, %v3986_v21  ;;  %v5704_v34 = vpop.f32.mrb[132].mxu0 }
 0x4fd   : > { %v3989_v37 = vmul.f32 %v5704_v34, %v1710_v18  ;;  %v3901_v16 = vpop.f32.mrb[133].mxu0 }
 0x4fe   : > { %v3988_v40 = vmul.f32 %v3901_v16, %v1705_v46  ;;  %5957 = vmatprep.subr.bf16.mxu1 %v5956_v56  ;;  %v6154_v53 = vpop.eup %6153 }
 0x4ff   : > { %5959 = vmatpush3.bf16.msra.mxu1 %v5958_v23 }
 0x500   : > { %v5960_v27 = vpack.c.bf16 %v3989_v37, %v3988_v40  ;;  %v5707_v63 = vpop.f32.mrb[134].mxu0 }
 0x501   : > { %v3991_v3 = vmul.f32 %v5707_v63, %v1720_v54  ;;  %v3911_v33 = vpop.f32.mrb[135].mxu0 }
 0x502   : > { %v3990_v1 = vmul.f32 %v3911_v33, %v1715_v14  ;;  %5961 = vmatprep.subr.bf16.mxu1 %v5960_v27 }
 0x503   : > { %5963 = vmatpush3.bf16.msra.mxu1 %v5962_v59 }
 0x504   : > { %v5964_v23 = vpack.c.bf16 %v3991_v3, %v3990_v1  ;;  %v5710_v58 = vpop.f32.mrb[136].mxu0 }
 0x505   : > { %v3993_v28 = vmul.f32 %v5710_v58, %v1730_v15  ;;  %v3921_v0 = vpop.f32.mrb[137].mxu0 }
 0x506   : > { %v3992_v9 = vmul.f32 %v3921_v0, %v1725_v32  ;;  %5965 = vmatprep.subr.bf16.mxu1 %v5964_v23 }
 0x507   : > { %5967 = vmatpush3.bf16.msra.mxu1 %v5966_v52 }
 0x508   : > { %v5968_v29 = vpack.c.bf16 %v3993_v28, %v3992_v9 }
 0x50a   : > { %5969 = vmatprep.subr.bf16.mxu1 %v5968_v29 }
 0x50b   : > { %5971 = vmatpush3.bf16.msra.mxu1 %v5970_v35 }
 0x50c   : > { %5716 = vmatprep.subr.mxu1 %v9346_v51 }
 0x50e   : > { %4739 = vmatmul.mubr.msk.f32.vlgmr.msra.gmra.mrb[138].mxu1 %vm6704_vm11, %v9297_v50 }
 0x50f   : > { %5717 = vmatpush3.msk.msra.mxu1 %vm3541_vm7, %v9336_v10  ;;  %5718 = vmatprep.mubr.msk.f32.mxu1 %vm6221_vm13, %v9346_v51 }
 0x512   : > { %5719 = vmatmul.mubr.msk.f32.vlgmr.msra.gmra.mrb[140].mxu1 %vm2757_vm2, %v6154_v53 }
 0x5a1   : > { %v5212_v50 = vpop.f32.mrb[136].mxu1 }
 0x5a2   : > { %v5213_v10 = vpop.f32.mrb[137].mxu1 }
 0x5a3   : > { %v5214_v7 = vadd.f32 %v5213_v10, %v5212_v50 }
 0x5a5   : > { %v4135_v51 = vadd.f32 %v5214_v7, %v8578_v31 }
 0x5e1   : > { %v5247_v59 = vpop.f32.mrb[138].mxu1 }
 0x5e2   : > { %v5248_v36 = vpop.f32.mrb[139].mxu1 }
 0x5e3   : > { %v5249_v30 = vadd.f32 %v5248_v36, %v5247_v59 }
 0x5e5   : > { %v4205_v52 = vadd.f32 %v5249_v30, %v4135_v51  ;;  %v4277_v43 = vpop.f32.mrb[140].mxu1 }
 0x5e6   : > { %v5720_v47 = vpop.f32.mrb[141].mxu1 }
 0x5e7   : > { %v4281_v35 = vmul.f32 %v4277_v43, %v4205_v52 }
 0x5e9   : > { %5730 = vmatmul.mubr.msk.f32.vlgmr.msra.gmra.mrb[138].mxu0 %vm764_vm12, %v4281_v35 }
 0x6bc   : > { %v4357_v31 = vpop.f32.mrb[138].mxu0 }
 0x6bd   : > { %v4358_v45 = vadd.f32 %v4742_v38, %v4357_v31  ;;  %v5731_v11 = vpop.f32.mrb[139].mxu0 }
 0x6bf   : > { %4362 = vst.msk [vmem:[%s382_s24] sm:$0xff] %vm4361_vm4, %v4358_v45 }
 0x6c0   : > { %6168 = shalt.err (!%p6165_p3)
}
 0x6c1   : > { %s6169_s12 = scalar_lea.hbm %s8894_s30, 128  ;;  %s6173_s25 = scalar_lea.hbm %s8947_s11, 256 }
 0x6c2   : > { %p6170_p4 = scmp.ne.s32.totalorder %s8894_s30, %s6169_s12  ;;  %p6174_p9 = scmp.lt.u32.totalorder %s8894_s30, %s8947_s11 }
 0x6c3   : > { %p6175_p10 = scmp.lt.u32.totalorder %s6173_s25, %s6169_s12  ;;  %p6177_p12 = scmp.lt.u32.totalorder %s6169_s12, %s8894_s30 }
 0x6c4   : > { %p6171_p7 = pnand %p6170_p4, %p6324_p5 }
 0x6c5   : > { %p6176_p11 = por %p6175_p10, %p6174_p9 }
 0x6c6   : > { %p6172_p8 = pneg %p6171_p7 }
 0x6c7   : > { %p6178_p13 = por %p6177_p12, %p6176_p11 }
 0x6c9   : > { %p6179_p0 = pnand %p6178_p13, %p6172_p8 }
 0x6cb   : > { %6182 = shalt.err (!%p6179_p0)
}
 0x6cc   : > { %5978 = dma.vmem_to_hbm [thread:$0]  (%p6324_p5), %s8896_s14, 128, %s8894_s30, %s4364_s15  }
 0x6cd PF: > { %p5984_p1 = scmp.ge.s32.totalorder %s6217_s20, 2  ;;  %s4389_s0 = sand.u32 1, %s6205_s17  }
 0x6ce   : > { %s4390_s16 = scalar_lea.sflag [#allocation3], %s4389_s0 }
 0x6cf   : > { %p5981_p2 = pnand %p5984_p1, %p6328_p6 }
 0x6d1   : > { %6200 = dma.done.wait (!%p5981_p2), %s4390_s16, 128  }
 0x6d2   : > { %6202 = vsyncadd (!%p5981_p2), %s4390_s16, 4294967168  ;;  %p21_p3 = scmp.ge.s32.totalorder %s6311_s23, 4   ;;  %s9415_s17 = smov %s6209_s18 }
 0x6d3   : > { %s9416_s18 = smov %s6213_s19  ;;  %s9417_s19 = smov %s6322_s26 }
 0x6d4   : > { %s9418_s20 = smov %s6311_s23  ;;  %23 = sbr.rel (!%p21_p3) target bundleno = 5 (0x5), region = 99 }
 0x6db   :  { %4395 = vsyncpa [#allocation3], 1 }
 0x6dc   :  { %4397 = vsyncpa [#allocation3 + $0x1], 1 }

</bundles_post_ra>
